<compile_context>
chip_gen: v7x
topology: tpu7x:2x2x1
jax: 0.10.0
libtpu: 0.0.40
codegen_flags: <defaults>
</compile_context>

<pallas_src>
import functools

import jax
import jax.numpy as jnp
from jax import lax
from jax.experimental import pallas as pl
from jax.experimental.pallas import tpu as pltpu

# Module hyper-parameters (PyTorch defaults).
INPUT_SIZE = 256
HIDDEN = 100
OUTPUT_SIZE = 4
FC_HIDDEN = 128

HP = 128            # hidden padded to a full lane group (100 -> 128)
GP = 4 * HP         # padded gate width: [i | f | o | g], 128 lanes each

_VMEM = pl.BlockSpec(memory_space=pltpu.MemorySpace.VMEM)


# ---------------- Pallas kernel ----------------

def _dot(a, b):
    return jnp.dot(a, b, preferred_element_type=jnp.float32)


def _cell(gates, c):
    # Gate lane order is [i | f | o | g]: one contiguous sigmoid over 3*HP
    # lanes + one tanh over HP lanes (fewer EUP/slice issues on the serial chain).
    sig = jax.nn.sigmoid(gates[:, :3 * HP])
    g = jnp.tanh(gates[:, 3 * HP:])
    i = sig[:, 0 * HP:1 * HP]
    f = sig[:, 1 * HP:2 * HP]
    o = sig[:, 2 * HP:3 * HP]
    c_new = f * c + i * g
    h_new = o * jnp.tanh(c_new)
    return h_new, c_new


def bilstm_kernel(seq_len,
                  x_ref,                       # [T*B, I]
                  wih0_ref, b0_ref,            # [I, 2*GP], [1, 2*GP]  (fwd|bwd)
                  whh0f_ref, whh0b_ref,        # [HP, GP] each
                  w1a_ref, w1b_ref, b1_ref,    # [HP, 2*GP] x2, [1, 2*GP] (fwd|bwd)
                  whh1f_ref,                   # [HP, GP]
                  wfc1a_ref, wfc1b_ref, bfc1_ref,
                  wfc2_ref, bfc2_ref,
                  out_ref,                     # [B, HP]
                  xp0_ref, xp1_ref,            # [T*B, 2*GP] scratch
                  seqf_ref, seqb_ref):         # [T*B, HP] scratch
    T = seq_len
    nb = x_ref.shape[0] // T
    zeros = jnp.zeros((nb, HP), jnp.float32)

    # ----- batched layer-0 input projection: ALL timesteps, BOTH directions,
    # biases folded in.  One [T*B, I] @ [I, 2*GP] matmul replaces 2*T tiny
    # M=B matmuls + per-step bias adds. -----
    xp0_ref[...] = _dot(x_ref[...], wih0_ref[...]) + b0_ref[...]

    # ----- layer 0: fwd and bwd recurrences merged into one T-step loop so the
    # two independent chains overlap; per step only h @ W_hh remains. -----
    hf, cf = zeros, zeros
    hb, cb = zeros, zeros
    for s in range(T):
        tb = T - 1 - s
        gf = xp0_ref[pl.ds(s * nb, nb), pl.ds(0, GP)] + _dot(hf, whh0f_ref[...])
        gb = xp0_ref[pl.ds(tb * nb, nb), pl.ds(GP, GP)] + _dot(hb, whh0b_ref[...])
        hf, cf = _cell(gf, cf)
        hb, cb = _cell(gb, cb)
        seqf_ref[pl.ds(s * nb, nb), :] = hf
        seqb_ref[pl.ds(tb * nb, nb), :] = hb

    # ----- batched layer-1 input projection (fwd gates for all t; bwd gates are
    # only consumed at t = T-1), biases folded in. -----
    xp1_ref[...] = (_dot(seqf_ref[...], w1a_ref[...])
                    + _dot(seqb_ref[...], w1b_ref[...]) + b1_ref[...])

    # ----- layer 1, forward recurrence (only the final hidden state is used) -----
    h, c = zeros, zeros
    for t in range(T):
        g = xp1_ref[pl.ds(t * nb, nb), pl.ds(0, GP)] + _dot(h, whh1f_ref[...])
        h, c = _cell(g, c)
    h1f = h

    # ----- layer 1, backward direction at the LAST time index: its output at
    # t = T-1 is its first step from the zero initial state, so a single cell
    # evaluation with no W_hh term suffices. -----
    gb = xp1_ref[pl.ds((T - 1) * nb, nb), pl.ds(GP, GP)]
    h1b, _ = _cell(gb, zeros)

    # ----- classifier: Linear(200->128) + ReLU + Linear(128->4); dropout = identity -----
    z = jnp.maximum(_dot(h1f, wfc1a_ref[...]) + _dot(h1b, wfc1b_ref[...])
                    + bfc1_ref[...], 0.0)
    out_ref[...] = _dot(z, wfc2_ref[...]) + bfc2_ref[...]


# ---------------- Weight preparation (wrapper-side layout plumbing) ----------------

# PyTorch gate order is [i, f, g, o]; kernel uses [i, f, o, g].
_GATE_ORDER = (0, 1, 3, 2)


def _pad_gate_cols(w):
    # w: [in, 4*HIDDEN] -> [in, GP]; reorder gates to [i|f|o|g] and pad each
    # gate block 100 -> 128 lanes.
    blocks = [w[:, g * HIDDEN:(g + 1) * HIDDEN] for g in _GATE_ORDER]
    return jnp.concatenate(
        [jnp.pad(b, ((0, 0), (0, HP - HIDDEN))) for b in blocks], axis=1)


def _pad_rows(w, rows):
    return jnp.pad(w, ((0, rows - w.shape[0]), (0, 0)))


def _prep_dir_l0(w_ih, w_hh, b_ih, b_hh):
    # PyTorch layout: w_ih [4H, I], w_hh [4H, H], biases [4H].
    wih = _pad_gate_cols(w_ih.T)                       # [I,  GP]
    whh = _pad_rows(_pad_gate_cols(w_hh.T), HP)        # [HP, GP]
    b = _pad_gate_cols((b_ih + b_hh)[None, :])         # [1,  GP]
    return wih, whh, b


def _prep_dir_l1(w_ih, w_hh, b_ih, b_hh):
    # Layer-1 input is concat(fwd, bwd); split the input dim so the kernel can
    # consume the two VMEM sequence buffers directly (no in-kernel concat).
    wih_t = _pad_gate_cols(w_ih.T)                     # [2H, GP]
    wih_a = _pad_rows(wih_t[:HIDDEN], HP)              # [HP, GP] (fwd features)
    wih_b = _pad_rows(wih_t[HIDDEN:], HP)              # [HP, GP] (bwd features)
    whh = _pad_rows(_pad_gate_cols(w_hh.T), HP)        # [HP, GP]
    b = _pad_gate_cols((b_ih + b_hh)[None, :])         # [1,  GP]
    return wih_a, wih_b, whh, b


def bi_lstm_forward(x, params):
    """x: [B, T, INPUT_SIZE] (batch_first).  Returns [B, OUTPUT_SIZE]."""
    B, T, _ = x.shape
    # Flattened time-major layout: row index = t*B + b (dense (8,128) slabs).
    x_flat = jnp.transpose(x, (1, 0, 2)).reshape(T * B, INPUT_SIZE).astype(jnp.float32)

    wih0f, whh0f, b0f = _prep_dir_l0(params['w_ih_l0'], params['w_hh_l0'],
                                     params['b_ih_l0'], params['b_hh_l0'])
    wih0b, whh0b, b0b = _prep_dir_l0(params['w_ih_l0r'], params['w_hh_l0r'],
                                     params['b_ih_l0r'], params['b_hh_l0r'])
    # Combine the two layer-0 directions along lanes -> one batched projection.
    wih0 = jnp.concatenate([wih0f, wih0b], axis=1)                  # [I, 2*GP]
    b0 = jnp.concatenate([b0f, b0b], axis=1)                        # [1, 2*GP]

    wih1fa, wih1fb, whh1f, b1f = _prep_dir_l1(params['w_ih_l1'], params['w_hh_l1'],
                                              params['b_ih_l1'], params['b_hh_l1'])
    wih1ba, wih1bb, _whh1b_unused, b1b = _prep_dir_l1(
        params['w_ih_l1r'], params['w_hh_l1r'], params['b_ih_l1r'], params['b_hh_l1r'])
    # Combine layer-1 fwd and bwd gate blocks along lanes as well.
    w1a = jnp.concatenate([wih1fa, wih1ba], axis=1)                 # [HP, 2*GP]
    w1b = jnp.concatenate([wih1fb, wih1bb], axis=1)                 # [HP, 2*GP]
    b1 = jnp.concatenate([b1f, b1b], axis=1)                        # [1, 2*GP]

    # Classifier: split fc1's input dim into fwd/bwd halves; pad fc2 to 128 lanes.
    wfc1_t = params['w_fc1'].T                                      # [2H, 128]
    wfc1a = _pad_rows(wfc1_t[:HIDDEN], HP)                          # [HP, 128]
    wfc1b = _pad_rows(wfc1_t[HIDDEN:], HP)                          # [HP, 128]
    bfc1 = params['b_fc1'][None, :]                                 # [1, 128]
    wfc2 = jnp.pad(params['w_fc2'].T, ((0, 0), (0, HP - OUTPUT_SIZE)))   # [128, HP]
    bfc2 = jnp.pad(params['b_fc2'][None, :], ((0, 0), (0, HP - OUTPUT_SIZE)))

    out = pl.pallas_call(
        functools.partial(bilstm_kernel, T),
        out_shape=jax.ShapeDtypeStruct((B, HP), jnp.float32),
        in_specs=[_VMEM] * 14,
        out_specs=_VMEM,
        scratch_shapes=[
            pltpu.VMEM((T * B, 2 * GP), jnp.float32),   # layer-0 batched gate proj
            pltpu.VMEM((T * B, 2 * GP), jnp.float32),   # layer-1 batched gate proj
            pltpu.VMEM((T * B, HP), jnp.float32),       # layer-0 fwd hidden sequence
            pltpu.VMEM((T * B, HP), jnp.float32),       # layer-0 bwd hidden sequence
        ],
    )(x_flat,
      wih0, b0, whh0f, whh0b,
      w1a, w1b, b1, whh1f,
      wfc1a, wfc1b, bfc1, wfc2, bfc2)
    return out[:, :OUTPUT_SIZE]


# ---------------- Pure-JAX reference (eval-mode forward) ----------------

def _ref_forward(x, params):
    B, T, _ = x.shape

    def run_dir(xs_tm, w_ih, w_hh, b_ih, b_hh, reverse):
        def cell(carry, x_t):
            h, c = carry
            gates = x_t @ w_ih.T + h @ w_hh.T + b_ih + b_hh
            i, f, g, o = jnp.split(gates, 4, axis=-1)
            c = jax.nn.sigmoid(f) * c + jax.nn.sigmoid(i) * jnp.tanh(g)
            h = jax.nn.sigmoid(o) * jnp.tanh(c)
            return (h, c), h
        seq = xs_tm[::-1] if reverse else xs_tm
        h0 = jnp.zeros((B, HIDDEN), jnp.float32)
        _, hs = lax.scan(cell, (h0, h0), seq)
        return hs[::-1] if reverse else hs          # [T, B, H]

    xs = jnp.transpose(x, (1, 0, 2))
    hf0 = run_dir(xs, params['w_ih_l0'], params['w_hh_l0'],
                  params['b_ih_l0'], params['b_hh_l0'], False)
    hb0 = run_dir(xs, params['w_ih_l0r'], params['w_hh_l0r'],
                  params['b_ih_l0r'], params['b_hh_l0r'], True)
    xs1 = jnp.concatenate([hf0, hb0], axis=-1)
    hf1 = run_dir(xs1, params['w_ih_l1'], params['w_hh_l1'],
                  params['b_ih_l1'], params['b_hh_l1'], False)
    hb1 = run_dir(xs1, params['w_ih_l1r'], params['w_hh_l1r'],
                  params['b_ih_l1r'], params['b_hh_l1r'], True)
    last = jnp.concatenate([hf1[-1], hb1[-1]], axis=-1)           # lstm_out[:, -1, :]
    z = jax.nn.relu(last @ params['w_fc1'].T + params['b_fc1'])
    return z @ params['w_fc2'].T + params['b_fc2']


# ---------------- Main ----------------

if __name__ == "__main__":
    key = jax.random.PRNGKey(0)
    keys = jax.random.split(key, 32)
    kit = iter(keys)

    B, T = 2, 8
    scale = 0.1

    def rnd(shape):
        return scale * jax.random.normal(next(kit), shape, dtype=jnp.float32)

    x = jax.random.normal(next(kit), (B, T, INPUT_SIZE), dtype=jnp.float32)

    params = dict(
        # LSTM layer 0, forward / reverse (PyTorch layouts)
        w_ih_l0=rnd((4 * HIDDEN, INPUT_SIZE)), w_hh_l0=rnd((4 * HIDDEN, HIDDEN)),
        b_ih_l0=rnd((4 * HIDDEN,)), b_hh_l0=rnd((4 * HIDDEN,)),
        w_ih_l0r=rnd((4 * HIDDEN, INPUT_SIZE)), w_hh_l0r=rnd((4 * HIDDEN, HIDDEN)),
        b_ih_l0r=rnd((4 * HIDDEN,)), b_hh_l0r=rnd((4 * HIDDEN,)),
        # LSTM layer 1 (input = 2*HIDDEN), forward / reverse
        w_ih_l1=rnd((4 * HIDDEN, 2 * HIDDEN)), w_hh_l1=rnd((4 * HIDDEN, HIDDEN)),
        b_ih_l1=rnd((4 * HIDDEN,)), b_hh_l1=rnd((4 * HIDDEN,)),
        w_ih_l1r=rnd((4 * HIDDEN, 2 * HIDDEN)), w_hh_l1r=rnd((4 * HIDDEN, HIDDEN)),
        b_ih_l1r=rnd((4 * HIDDEN,)), b_hh_l1r=rnd((4 * HIDDEN,)),
        # classifier
        w_fc1=rnd((FC_HIDDEN, 2 * HIDDEN)), b_fc1=rnd((FC_HIDDEN,)),
        w_fc2=rnd((OUTPUT_SIZE, FC_HIDDEN)), b_fc2=rnd((OUTPUT_SIZE,)),
    )

    # TODO(synk): nn.Dropout (LSTM inter-layer 0.1 and classifier 0.3) is
    # training-only / stochastic; this kernel implements the eval-mode forward.
    out = jax.jit(bi_lstm_forward)(x, params)
    out = jax.block_until_ready(out)
    assert out.shape == (B, OUTPUT_SIZE), out.shape

    ref = _ref_forward(x, params)
    err = float(jnp.max(jnp.abs(out - ref)))
    assert jnp.allclose(out, ref, atol=1e-3, rtol=1e-3), f"mismatch vs reference: {err}"

    print("KERNEL_OK")
</pallas_src>

<mosaic_0001>
module attributes {stable_mosaic.version = 11 : i64} {
  func.func @bilstm_kernel(%arg0: memref<16x256xf32, #tpu.memory_space<vmem>>, %arg1: memref<256x1024xf32, #tpu.memory_space<vmem>>, %arg2: memref<1x1024xf32, #tpu.memory_space<vmem>>, %arg3: memref<128x512xf32, #tpu.memory_space<vmem>>, %arg4: memref<128x512xf32, #tpu.memory_space<vmem>>, %arg5: memref<128x1024xf32, #tpu.memory_space<vmem>>, %arg6: memref<128x1024xf32, #tpu.memory_space<vmem>>, %arg7: memref<1x1024xf32, #tpu.memory_space<vmem>>, %arg8: memref<128x512xf32, #tpu.memory_space<vmem>>, %arg9: memref<128x128xf32, #tpu.memory_space<vmem>>, %arg10: memref<128x128xf32, #tpu.memory_space<vmem>>, %arg11: memref<1x128xf32, #tpu.memory_space<vmem>>, %arg12: memref<128x128xf32, #tpu.memory_space<vmem>>, %arg13: memref<1x128xf32, #tpu.memory_space<vmem>>, %arg14: memref<2x128xf32, #tpu.memory_space<vmem>>, %arg15: memref<16x1024xf32, #tpu.memory_space<vmem>>, %arg16: memref<16x1024xf32, #tpu.memory_space<vmem>>, %arg17: memref<16x128xf32, #tpu.memory_space<vmem>>, %arg18: memref<16x128xf32, #tpu.memory_space<vmem>>) attributes {dimension_semantics = [], scalar_prefetch = 0 : i64, scratch_operands = 4 : i64, tpu.core_type = #tpu.core_type<tc>} {
    %cst = arith.constant 0.000000e+00 : f32
    %0 = vector.broadcast %cst : f32 to vector<2x128xf32>
    %c0 = arith.constant 0 : index
    %c0_0 = arith.constant 0 : index
    %1 = vector.load %arg0[%c0, %c0_0] : memref<16x256xf32, #tpu.memory_space<vmem>>, vector<16x256xf32>
    %c0_1 = arith.constant 0 : index
    %c0_2 = arith.constant 0 : index
    %2 = vector.load %arg1[%c0_1, %c0_2] : memref<256x1024xf32, #tpu.memory_space<vmem>>, vector<256x1024xf32>
    %cst_3 = arith.constant dense<0.000000e+00> : vector<16x1024xf32>
    %3 = tpu.matmul %1, %2, %cst_3 {dimension_numbers = #tpu.dot_dimension_numbers<[1], [0], [0], [1], [0, 0, 1, 1], [], []>} : vector<16x256xf32>, vector<256x1024xf32>, vector<16x1024xf32> -> vector<16x1024xf32>
    %c0_4 = arith.constant 0 : index
    %c0_5 = arith.constant 0 : index
    %4 = vector.load %arg2[%c0_4, %c0_5] : memref<1x1024xf32, #tpu.memory_space<vmem>>, vector<1x1024xf32>
    %5 = vector.broadcast %4 : vector<1x1024xf32> to vector<16x1024xf32>
    %6 = arith.addf %3, %5 : vector<16x1024xf32>
    %c0_6 = arith.constant 0 : index
    %c0_7 = arith.constant 0 : index
    %7 = vector.load %arg15[%c0_6, %c0_7] : memref<16x1024xf32, #tpu.memory_space<vmem>>, vector<16x1024xf32>
    tpu.vector_store %arg15[%c0_6, %c0_7], %6 {strides = array<i32>} : memref<16x1024xf32, #tpu.memory_space<vmem>>, vector<16x1024xf32>,
    %c0_8 = arith.constant 0 : index
    %c0_9 = arith.constant 0 : index
    %8 = vector.load %arg15[%c0_8, %c0_9] : memref<16x1024xf32, #tpu.memory_space<vmem>>, vector<2x512xf32>
    %c0_10 = arith.constant 0 : index
    %c0_11 = arith.constant 0 : index
    %9 = vector.load %arg3[%c0_10, %c0_11] : memref<128x512xf32, #tpu.memory_space<vmem>>, vector<128x512xf32>
    %cst_12 = arith.constant dense<0.000000e+00> : vector<2x512xf32>
    %10 = tpu.matmul %0, %9, %cst_12 {dimension_numbers = #tpu.dot_dimension_numbers<[1], [0], [0], [1], [0, 0, 1, 1], [], []>} : vector<2x128xf32>, vector<128x512xf32>, vector<2x512xf32> -> vector<2x512xf32>
    %11 = arith.addf %8, %10 : vector<2x512xf32>
    %c14 = arith.constant 14 : index
    %c512 = arith.constant 512 : index
    %12 = vector.load %arg15[%c14, %c512] : memref<16x1024xf32, #tpu.memory_space<vmem>>, vector<2x512xf32>
    %c0_13 = arith.constant 0 : index
    %c0_14 = arith.constant 0 : index
    %13 = vector.load %arg4[%c0_13, %c0_14] : memref<128x512xf32, #tpu.memory_space<vmem>>, vector<128x512xf32>
    %cst_15 = arith.constant dense<0.000000e+00> : vector<2x512xf32>
    %14 = tpu.matmul %0, %13, %cst_15 {dimension_numbers = #tpu.dot_dimension_numbers<[1], [0], [0], [1], [0, 0, 1, 1], [], []>} : vector<2x128xf32>, vector<128x512xf32>, vector<2x512xf32> -> vector<2x512xf32>
    %15 = arith.addf %12, %14 : vector<2x512xf32>
    %16 = vector.extract_strided_slice %11 {offsets = [0, 0], sizes = [2, 384], strides = [1, 1]} : vector<2x512xf32> to vector<2x384xf32>
    %17 = arith.negf %16 : vector<2x384xf32>
    %18 = math.exp %17 : vector<2x384xf32>
    %cst_16 = arith.constant 1.000000e+00 : f32
    %19 = vector.broadcast %cst_16 : f32 to vector<2x384xf32>
    %20 = arith.addf %19, %18 : vector<2x384xf32>
    %21 = arith.divf %19, %20 : vector<2x384xf32>
    %22 = vector.extract_strided_slice %11 {offsets = [0, 384], sizes = [2, 128], strides = [1, 1]} : vector<2x512xf32> to vector<2x128xf32>
    %23 = math.tanh %22 : vector<2x128xf32>
    %24 = vector.extract_strided_slice %21 {offsets = [0, 0], sizes = [2, 128], strides = [1, 1]} : vector<2x384xf32> to vector<2x128xf32>
    %25 = vector.extract_strided_slice %21 {offsets = [0, 128], sizes = [2, 128], strides = [1, 1]} : vector<2x384xf32> to vector<2x128xf32>
    %26 = vector.extract_strided_slice %21 {offsets = [0, 256], sizes = [2, 128], strides = [1, 1]} : vector<2x384xf32> to vector<2x128xf32>
    %27 = arith.mulf %25, %0 : vector<2x128xf32>
    %28 = arith.mulf %24, %23 : vector<2x128xf32>
    %29 = arith.addf %27, %28 : vector<2x128xf32>
    %30 = math.tanh %29 : vector<2x128xf32>
    %31 = arith.mulf %26, %30 : vector<2x128xf32>
    %32 = vector.extract_strided_slice %15 {offsets = [0, 0], sizes = [2, 384], strides = [1, 1]} : vector<2x512xf32> to vector<2x384xf32>
    %33 = arith.negf %32 : vector<2x384xf32>
    %34 = math.exp %33 : vector<2x384xf32>
    %cst_17 = arith.constant 1.000000e+00 : f32
    %35 = vector.broadcast %cst_17 : f32 to vector<2x384xf32>
    %36 = arith.addf %35, %34 : vector<2x384xf32>
    %37 = arith.divf %35, %36 : vector<2x384xf32>
    %38 = vector.extract_strided_slice %15 {offsets = [0, 384], sizes = [2, 128], strides = [1, 1]} : vector<2x512xf32> to vector<2x128xf32>
    %39 = math.tanh %38 : vector<2x128xf32>
    %40 = vector.extract_strided_slice %37 {offsets = [0, 0], sizes = [2, 128], strides = [1, 1]} : vector<2x384xf32> to vector<2x128xf32>
    %41 = vector.extract_strided_slice %37 {offsets = [0, 128], sizes = [2, 128], strides = [1, 1]} : vector<2x384xf32> to vector<2x128xf32>
    %42 = vector.extract_strided_slice %37 {offsets = [0, 256], sizes = [2, 128], strides = [1, 1]} : vector<2x384xf32> to vector<2x128xf32>
    %43 = arith.mulf %41, %0 : vector<2x128xf32>
    %44 = arith.mulf %40, %39 : vector<2x128xf32>
    %45 = arith.addf %43, %44 : vector<2x128xf32>
    %46 = math.tanh %45 : vector<2x128xf32>
    %47 = arith.mulf %42, %46 : vector<2x128xf32>
    %c0_18 = arith.constant 0 : index
    %c0_19 = arith.constant 0 : index
    %48 = vector.load %arg17[%c0_18, %c0_19] : memref<16x128xf32, #tpu.memory_space<vmem>>, vector<2x128xf32>
    tpu.vector_store %arg17[%c0_18, %c0_19], %31 {strides = array<i32>} : memref<16x128xf32, #tpu.memory_space<vmem>>, vector<2x128xf32>,
    %c14_20 = arith.constant 14 : index
    %c0_21 = arith.constant 0 : index
    %49 = vector.load %arg18[%c14_20, %c0_21] : memref<16x128xf32, #tpu.memory_space<vmem>>, vector<2x128xf32>
    tpu.vector_store %arg18[%c14_20, %c0_21], %47 {strides = array<i32>} : memref<16x128xf32, #tpu.memory_space<vmem>>, vector<2x128xf32>,
    %c2 = arith.constant 2 : index
    %c0_22 = arith.constant 0 : index
    %50 = vector.load %arg15[%c2, %c0_22] : memref<16x1024xf32, #tpu.memory_space<vmem>>, vector<2x512xf32>
    %c0_23 = arith.constant 0 : index
    %c0_24 = arith.constant 0 : index
    %51 = vector.load %arg3[%c0_23, %c0_24] : memref<128x512xf32, #tpu.memory_space<vmem>>, vector<128x512xf32>
    %cst_25 = arith.constant dense<0.000000e+00> : vector<2x512xf32>
    %52 = tpu.matmul %31, %51, %cst_25 {dimension_numbers = #tpu.dot_dimension_numbers<[1], [0], [0], [1], [0, 0, 1, 1], [], []>} : vector<2x128xf32>, vector<128x512xf32>, vector<2x512xf32> -> vector<2x512xf32>
    %53 = arith.addf %50, %52 : vector<2x512xf32>
    %c12 = arith.constant 12 : index
    %c512_26 = arith.constant 512 : index
    %54 = vector.load %arg15[%c12, %c512_26] : memref<16x1024xf32, #tpu.memory_space<vmem>>, vector<2x512xf32>
    %c0_27 = arith.constant 0 : index
    %c0_28 = arith.constant 0 : index
    %55 = vector.load %arg4[%c0_27, %c0_28] : memref<128x512xf32, #tpu.memory_space<vmem>>, vector<128x512xf32>
    %cst_29 = arith.constant dense<0.000000e+00> : vector<2x512xf32>
    %56 = tpu.matmul %47, %55, %cst_29 {dimension_numbers = #tpu.dot_dimension_numbers<[1], [0], [0], [1], [0, 0, 1, 1], [], []>} : vector<2x128xf32>, vector<128x512xf32>, vector<2x512xf32> -> vector<2x512xf32>
    %57 = arith.addf %54, %56 : vector<2x512xf32>
    %58 = vector.extract_strided_slice %53 {offsets = [0, 0], sizes = [2, 384], strides = [1, 1]} : vector<2x512xf32> to vector<2x384xf32>
    %59 = arith.negf %58 : vector<2x384xf32>
    %60 = math.exp %59 : vector<2x384xf32>
    %cst_30 = arith.constant 1.000000e+00 : f32
    %61 = vector.broadcast %cst_30 : f32 to vector<2x384xf32>
    %62 = arith.addf %61, %60 : vector<2x384xf32>
    %63 = arith.divf %61, %62 : vector<2x384xf32>
    %64 = vector.extract_strided_slice %53 {offsets = [0, 384], sizes = [2, 128], strides = [1, 1]} : vector<2x512xf32> to vector<2x128xf32>
    %65 = math.tanh %64 : vector<2x128xf32>
    %66 = vector.extract_strided_slice %63 {offsets = [0, 0], sizes = [2, 128], strides = [1, 1]} : vector<2x384xf32> to vector<2x128xf32>
    %67 = vector.extract_strided_slice %63 {offsets = [0, 128], sizes = [2, 128], strides = [1, 1]} : vector<2x384xf32> to vector<2x128xf32>
    %68 = vector.extract_strided_slice %63 {offsets = [0, 256], sizes = [2, 128], strides = [1, 1]} : vector<2x384xf32> to vector<2x128xf32>
    %69 = arith.mulf %67, %29 : vector<2x128xf32>
    %70 = arith.mulf %66, %65 : vector<2x128xf32>
    %71 = arith.addf %69, %70 : vector<2x128xf32>
    %72 = math.tanh %71 : vector<2x128xf32>
    %73 = arith.mulf %68, %72 : vector<2x128xf32>
    %74 = vector.extract_strided_slice %57 {offsets = [0, 0], sizes = [2, 384], strides = [1, 1]} : vector<2x512xf32> to vector<2x384xf32>
    %75 = arith.negf %74 : vector<2x384xf32>
    %76 = math.exp %75 : vector<2x384xf32>
    %cst_31 = arith.constant 1.000000e+00 : f32
    %77 = vector.broadcast %cst_31 : f32 to vector<2x384xf32>
    %78 = arith.addf %77, %76 : vector<2x384xf32>
    %79 = arith.divf %77, %78 : vector<2x384xf32>
    %80 = vector.extract_strided_slice %57 {offsets = [0, 384], sizes = [2, 128], strides = [1, 1]} : vector<2x512xf32> to vector<2x128xf32>
    %81 = math.tanh %80 : vector<2x128xf32>
    %82 = vector.extract_strided_slice %79 {offsets = [0, 0], sizes = [2, 128], strides = [1, 1]} : vector<2x384xf32> to vector<2x128xf32>
    %83 = vector.extract_strided_slice %79 {offsets = [0, 128], sizes = [2, 128], strides = [1, 1]} : vector<2x384xf32> to vector<2x128xf32>
    %84 = vector.extract_strided_slice %79 {offsets = [0, 256], sizes = [2, 128], strides = [1, 1]} : vector<2x384xf32> to vector<2x128xf32>
    %85 = arith.mulf %83, %45 : vector<2x128xf32>
    %86 = arith.mulf %82, %81 : vector<2x128xf32>
    %87 = arith.addf %85, %86 : vector<2x128xf32>
    %88 = math.tanh %87 : vector<2x128xf32>
    %89 = arith.mulf %84, %88 : vector<2x128xf32>
    %c2_32 = arith.constant 2 : index
    %c0_33 = arith.constant 0 : index
    %90 = vector.load %arg17[%c2_32, %c0_33] : memref<16x128xf32, #tpu.memory_space<vmem>>, vector<2x128xf32>
    tpu.vector_store %arg17[%c2_32, %c0_33], %73 {strides = array<i32>} : memref<16x128xf32, #tpu.memory_space<vmem>>, vector<2x128xf32>,
    %c12_34 = arith.constant 12 : index
    %c0_35 = arith.constant 0 : index
    %91 = vector.load %arg18[%c12_34, %c0_35] : memref<16x128xf32, #tpu.memory_space<vmem>>, vector<2x128xf32>
    tpu.vector_store %arg18[%c12_34, %c0_35], %89 {strides = array<i32>} : memref<16x128xf32, #tpu.memory_space<vmem>>, vector<2x128xf32>,
    %c4 = arith.constant 4 : index
    %c0_36 = arith.constant 0 : index
    %92 = vector.load %arg15[%c4, %c0_36] : memref<16x1024xf32, #tpu.memory_space<vmem>>, vector<2x512xf32>
    %c0_37 = arith.constant 0 : index
    %c0_38 = arith.constant 0 : index
    %93 = vector.load %arg3[%c0_37, %c0_38] : memref<128x512xf32, #tpu.memory_space<vmem>>, vector<128x512xf32>
    %cst_39 = arith.constant dense<0.000000e+00> : vector<2x512xf32>
    %94 = tpu.matmul %73, %93, %cst_39 {dimension_numbers = #tpu.dot_dimension_numbers<[1], [0], [0], [1], [0, 0, 1, 1], [], []>} : vector<2x128xf32>, vector<128x512xf32>, vector<2x512xf32> -> vector<2x512xf32>
    %95 = arith.addf %92, %94 : vector<2x512xf32>
    %c10 = arith.constant 10 : index
    %c512_40 = arith.constant 512 : index
    %96 = vector.load %arg15[%c10, %c512_40] : memref<16x1024xf32, #tpu.memory_space<vmem>>, vector<2x512xf32>
    %c0_41 = arith.constant 0 : index
    %c0_42 = arith.constant 0 : index
    %97 = vector.load %arg4[%c0_41, %c0_42] : memref<128x512xf32, #tpu.memory_space<vmem>>, vector<128x512xf32>
    %cst_43 = arith.constant dense<0.000000e+00> : vector<2x512xf32>
    %98 = tpu.matmul %89, %97, %cst_43 {dimension_numbers = #tpu.dot_dimension_numbers<[1], [0], [0], [1], [0, 0, 1, 1], [], []>} : vector<2x128xf32>, vector<128x512xf32>, vector<2x512xf32> -> vector<2x512xf32>
    %99 = arith.addf %96, %98 : vector<2x512xf32>
    %100 = vector.extract_strided_slice %95 {offsets = [0, 0], sizes = [2, 384], strides = [1, 1]} : vector<2x512xf32> to vector<2x384xf32>
    %101 = arith.negf %100 : vector<2x384xf32>
    %102 = math.exp %101 : vector<2x384xf32>
    %cst_44 = arith.constant 1.000000e+00 : f32
    %103 = vector.broadcast %cst_44 : f32 to vector<2x384xf32>
    %104 = arith.addf %103, %102 : vector<2x384xf32>
    %105 = arith.divf %103, %104 : vector<2x384xf32>
    %106 = vector.extract_strided_slice %95 {offsets = [0, 384], sizes = [2, 128], strides = [1, 1]} : vector<2x512xf32> to vector<2x128xf32>
    %107 = math.tanh %106 : vector<2x128xf32>
    %108 = vector.extract_strided_slice %105 {offsets = [0, 0], sizes = [2, 128], strides = [1, 1]} : vector<2x384xf32> to vector<2x128xf32>
    %109 = vector.extract_strided_slice %105 {offsets = [0, 128], sizes = [2, 128], strides = [1, 1]} : vector<2x384xf32> to vector<2x128xf32>
    %110 = vector.extract_strided_slice %105 {offsets = [0, 256], sizes = [2, 128], strides = [1, 1]} : vector<2x384xf32> to vector<2x128xf32>
    %111 = arith.mulf %109, %71 : vector<2x128xf32>
    %112 = arith.mulf %108, %107 : vector<2x128xf32>
    %113 = arith.addf %111, %112 : vector<2x128xf32>
    %114 = math.tanh %113 : vector<2x128xf32>
    %115 = arith.mulf %110, %114 : vector<2x128xf32>
    %116 = vector.extract_strided_slice %99 {offsets = [0, 0], sizes = [2, 384], strides = [1, 1]} : vector<2x512xf32> to vector<2x384xf32>
    %117 = arith.negf %116 : vector<2x384xf32>
    %118 = math.exp %117 : vector<2x384xf32>
    %cst_45 = arith.constant 1.000000e+00 : f32
    %119 = vector.broadcast %cst_45 : f32 to vector<2x384xf32>
    %120 = arith.addf %119, %118 : vector<2x384xf32>
    %121 = arith.divf %119, %120 : vector<2x384xf32>
    %122 = vector.extract_strided_slice %99 {offsets = [0, 384], sizes = [2, 128], strides = [1, 1]} : vector<2x512xf32> to vector<2x128xf32>
    %123 = math.tanh %122 : vector<2x128xf32>
    %124 = vector.extract_strided_slice %121 {offsets = [0, 0], sizes = [2, 128], strides = [1, 1]} : vector<2x384xf32> to vector<2x128xf32>
    %125 = vector.extract_strided_slice %121 {offsets = [0, 128], sizes = [2, 128], strides = [1, 1]} : vector<2x384xf32> to vector<2x128xf32>
    %126 = vector.extract_strided_slice %121 {offsets = [0, 256], sizes = [2, 128], strides = [1, 1]} : vector<2x384xf32> to vector<2x128xf32>
    %127 = arith.mulf %125, %87 : vector<2x128xf32>
    %128 = arith.mulf %124, %123 : vector<2x128xf32>
    %129 = arith.addf %127, %128 : vector<2x128xf32>
    %130 = math.tanh %129 : vector<2x128xf32>
    %131 = arith.mulf %126, %130 : vector<2x128xf32>
    %c4_46 = arith.constant 4 : index
    %c0_47 = arith.constant 0 : index
    %132 = vector.load %arg17[%c4_46, %c0_47] : memref<16x128xf32, #tpu.memory_space<vmem>>, vector<2x128xf32>
    tpu.vector_store %arg17[%c4_46, %c0_47], %115 {strides = array<i32>} : memref<16x128xf32, #tpu.memory_space<vmem>>, vector<2x128xf32>,
    %c10_48 = arith.constant 10 : index
    %c0_49 = arith.constant 0 : index
    %133 = vector.load %arg18[%c10_48, %c0_49] : memref<16x128xf32, #tpu.memory_space<vmem>>, vector<2x128xf32>
    tpu.vector_store %arg18[%c10_48, %c0_49], %131 {strides = array<i32>} : memref<16x128xf32, #tpu.memory_space<vmem>>, vector<2x128xf32>,
    %c6 = arith.constant 6 : index
    %c0_50 = arith.constant 0 : index
    %134 = vector.load %arg15[%c6, %c0_50] : memref<16x1024xf32, #tpu.memory_space<vmem>>, vector<2x512xf32>
    %c0_51 = arith.constant 0 : index
    %c0_52 = arith.constant 0 : index
    %135 = vector.load %arg3[%c0_51, %c0_52] : memref<128x512xf32, #tpu.memory_space<vmem>>, vector<128x512xf32>
    %cst_53 = arith.constant dense<0.000000e+00> : vector<2x512xf32>
    %136 = tpu.matmul %115, %135, %cst_53 {dimension_numbers = #tpu.dot_dimension_numbers<[1], [0], [0], [1], [0, 0, 1, 1], [], []>} : vector<2x128xf32>, vector<128x512xf32>, vector<2x512xf32> -> vector<2x512xf32>
    %137 = arith.addf %134, %136 : vector<2x512xf32>
    %c8 = arith.constant 8 : index
    %c512_54 = arith.constant 512 : index
    %138 = vector.load %arg15[%c8, %c512_54] : memref<16x1024xf32, #tpu.memory_space<vmem>>, vector<2x512xf32>
    %c0_55 = arith.constant 0 : index
    %c0_56 = arith.constant 0 : index
    %139 = vector.load %arg4[%c0_55, %c0_56] : memref<128x512xf32, #tpu.memory_space<vmem>>, vector<128x512xf32>
    %cst_57 = arith.constant dense<0.000000e+00> : vector<2x512xf32>
    %140 = tpu.matmul %131, %139, %cst_57 {dimension_numbers = #tpu.dot_dimension_numbers<[1], [0], [0], [1], [0, 0, 1, 1], [], []>} : vector<2x128xf32>, vector<128x512xf32>, vector<2x512xf32> -> vector<2x512xf32>
    %141 = arith.addf %138, %140 : vector<2x512xf32>
    %142 = vector.extract_strided_slice %137 {offsets = [0, 0], sizes = [2, 384], strides = [1, 1]} : vector<2x512xf32> to vector<2x384xf32>
    %143 = arith.negf %142 : vector<2x384xf32>
    %144 = math.exp %143 : vector<2x384xf32>
    %cst_58 = arith.constant 1.000000e+00 : f32
    %145 = vector.broadcast %cst_58 : f32 to vector<2x384xf32>
    %146 = arith.addf %145, %144 : vector<2x384xf32>
    %147 = arith.divf %145, %146 : vector<2x384xf32>
    %148 = vector.extract_strided_slice %137 {offsets = [0, 384], sizes = [2, 128], strides = [1, 1]} : vector<2x512xf32> to vector<2x128xf32>
    %149 = math.tanh %148 : vector<2x128xf32>
    %150 = vector.extract_strided_slice %147 {offsets = [0, 0], sizes = [2, 128], strides = [1, 1]} : vector<2x384xf32> to vector<2x128xf32>
    %151 = vector.extract_strided_slice %147 {offsets = [0, 128], sizes = [2, 128], strides = [1, 1]} : vector<2x384xf32> to vector<2x128xf32>
    %152 = vector.extract_strided_slice %147 {offsets = [0, 256], sizes = [2, 128], strides = [1, 1]} : vector<2x384xf32> to vector<2x128xf32>
    %153 = arith.mulf %151, %113 : vector<2x128xf32>
    %154 = arith.mulf %150, %149 : vector<2x128xf32>
    %155 = arith.addf %153, %154 : vector<2x128xf32>
    %156 = math.tanh %155 : vector<2x128xf32>
    %157 = arith.mulf %152, %156 : vector<2x128xf32>
    %158 = vector.extract_strided_slice %141 {offsets = [0, 0], sizes = [2, 384], strides = [1, 1]} : vector<2x512xf32> to vector<2x384xf32>
    %159 = arith.negf %158 : vector<2x384xf32>
    %160 = math.exp %159 : vector<2x384xf32>
    %cst_59 = arith.constant 1.000000e+00 : f32
    %161 = vector.broadcast %cst_59 : f32 to vector<2x384xf32>
    %162 = arith.addf %161, %160 : vector<2x384xf32>
    %163 = arith.divf %161, %162 : vector<2x384xf32>
    %164 = vector.extract_strided_slice %141 {offsets = [0, 384], sizes = [2, 128], strides = [1, 1]} : vector<2x512xf32> to vector<2x128xf32>
    %165 = math.tanh %164 : vector<2x128xf32>
    %166 = vector.extract_strided_slice %163 {offsets = [0, 0], sizes = [2, 128], strides = [1, 1]} : vector<2x384xf32> to vector<2x128xf32>
    %167 = vector.extract_strided_slice %163 {offsets = [0, 128], sizes = [2, 128], strides = [1, 1]} : vector<2x384xf32> to vector<2x128xf32>
    %168 = vector.extract_strided_slice %163 {offsets = [0, 256], sizes = [2, 128], strides = [1, 1]} : vector<2x384xf32> to vector<2x128xf32>
    %169 = arith.mulf %167, %129 : vector<2x128xf32>
    %170 = arith.mulf %166, %165 : vector<2x128xf32>
    %171 = arith.addf %169, %170 : vector<2x128xf32>
    %172 = math.tanh %171 : vector<2x128xf32>
    %173 = arith.mulf %168, %172 : vector<2x128xf32>
    %c6_60 = arith.constant 6 : index
    %c0_61 = arith.constant 0 : index
    %174 = vector.load %arg17[%c6_60, %c0_61] : memref<16x128xf32, #tpu.memory_space<vmem>>, vector<2x128xf32>
    tpu.vector_store %arg17[%c6_60, %c0_61], %157 {strides = array<i32>} : memref<16x128xf32, #tpu.memory_space<vmem>>, vector<2x128xf32>,
    %c8_62 = arith.constant 8 : index
    %c0_63 = arith.constant 0 : index
    %175 = vector.load %arg18[%c8_62, %c0_63] : memref<16x128xf32, #tpu.memory_space<vmem>>, vector<2x128xf32>
    tpu.vector_store %arg18[%c8_62, %c0_63], %173 {strides = array<i32>} : memref<16x128xf32, #tpu.memory_space<vmem>>, vector<2x128xf32>,
    %c8_64 = arith.constant 8 : index
    %c0_65 = arith.constant 0 : index
    %176 = vector.load %arg15[%c8_64, %c0_65] : memref<16x1024xf32, #tpu.memory_space<vmem>>, vector<2x512xf32>
    %c0_66 = arith.constant 0 : index
    %c0_67 = arith.constant 0 : index
    %177 = vector.load %arg3[%c0_66, %c0_67] : memref<128x512xf32, #tpu.memory_space<vmem>>, vector<128x512xf32>
    %cst_68 = arith.constant dense<0.000000e+00> : vector<2x512xf32>
    %178 = tpu.matmul %157, %177, %cst_68 {dimension_numbers = #tpu.dot_dimension_numbers<[1], [0], [0], [1], [0, 0, 1, 1], [], []>} : vector<2x128xf32>, vector<128x512xf32>, vector<2x512xf32> -> vector<2x512xf32>
    %179 = arith.addf %176, %178 : vector<2x512xf32>
    %c6_69 = arith.constant 6 : index
    %c512_70 = arith.constant 512 : index
    %180 = vector.load %arg15[%c6_69, %c512_70] : memref<16x1024xf32, #tpu.memory_space<vmem>>, vector<2x512xf32>
    %c0_71 = arith.constant 0 : index
    %c0_72 = arith.constant 0 : index
    %181 = vector.load %arg4[%c0_71, %c0_72] : memref<128x512xf32, #tpu.memory_space<vmem>>, vector<128x512xf32>
    %cst_73 = arith.constant dense<0.000000e+00> : vector<2x512xf32>
    %182 = tpu.matmul %173, %181, %cst_73 {dimension_numbers = #tpu.dot_dimension_numbers<[1], [0], [0], [1], [0, 0, 1, 1], [], []>} : vector<2x128xf32>, vector<128x512xf32>, vector<2x512xf32> -> vector<2x512xf32>
    %183 = arith.addf %180, %182 : vector<2x512xf32>
    %184 = vector.extract_strided_slice %179 {offsets = [0, 0], sizes = [2, 384], strides = [1, 1]} : vector<2x512xf32> to vector<2x384xf32>
    %185 = arith.negf %184 : vector<2x384xf32>
    %186 = math.exp %185 : vector<2x384xf32>
    %cst_74 = arith.constant 1.000000e+00 : f32
    %187 = vector.broadcast %cst_74 : f32 to vector<2x384xf32>
    %188 = arith.addf %187, %186 : vector<2x384xf32>
    %189 = arith.divf %187, %188 : vector<2x384xf32>
    %190 = vector.extract_strided_slice %179 {offsets = [0, 384], sizes = [2, 128], strides = [1, 1]} : vector<2x512xf32> to vector<2x128xf32>
    %191 = math.tanh %190 : vector<2x128xf32>
    %192 = vector.extract_strided_slice %189 {offsets = [0, 0], sizes = [2, 128], strides = [1, 1]} : vector<2x384xf32> to vector<2x128xf32>
    %193 = vector.extract_strided_slice %189 {offsets = [0, 128], sizes = [2, 128], strides = [1, 1]} : vector<2x384xf32> to vector<2x128xf32>
    %194 = vector.extract_strided_slice %189 {offsets = [0, 256], sizes = [2, 128], strides = [1, 1]} : vector<2x384xf32> to vector<2x128xf32>
    %195 = arith.mulf %193, %155 : vector<2x128xf32>
    %196 = arith.mulf %192, %191 : vector<2x128xf32>
    %197 = arith.addf %195, %196 : vector<2x128xf32>
    %198 = math.tanh %197 : vector<2x128xf32>
    %199 = arith.mulf %194, %198 : vector<2x128xf32>
    %200 = vector.extract_strided_slice %183 {offsets = [0, 0], sizes = [2, 384], strides = [1, 1]} : vector<2x512xf32> to vector<2x384xf32>
    %201 = arith.negf %200 : vector<2x384xf32>
    %202 = math.exp %201 : vector<2x384xf32>
    %cst_75 = arith.constant 1.000000e+00 : f32
    %203 = vector.broadcast %cst_75 : f32 to vector<2x384xf32>
    %204 = arith.addf %203, %202 : vector<2x384xf32>
    %205 = arith.divf %203, %204 : vector<2x384xf32>
    %206 = vector.extract_strided_slice %183 {offsets = [0, 384], sizes = [2, 128], strides = [1, 1]} : vector<2x512xf32> to vector<2x128xf32>
    %207 = math.tanh %206 : vector<2x128xf32>
    %208 = vector.extract_strided_slice %205 {offsets = [0, 0], sizes = [2, 128], strides = [1, 1]} : vector<2x384xf32> to vector<2x128xf32>
    %209 = vector.extract_strided_slice %205 {offsets = [0, 128], sizes = [2, 128], strides = [1, 1]} : vector<2x384xf32> to vector<2x128xf32>
    %210 = vector.extract_strided_slice %205 {offsets = [0, 256], sizes = [2, 128], strides = [1, 1]} : vector<2x384xf32> to vector<2x128xf32>
    %211 = arith.mulf %209, %171 : vector<2x128xf32>
    %212 = arith.mulf %208, %207 : vector<2x128xf32>
    %213 = arith.addf %211, %212 : vector<2x128xf32>
    %214 = math.tanh %213 : vector<2x128xf32>
    %215 = arith.mulf %210, %214 : vector<2x128xf32>
    %c8_76 = arith.constant 8 : index
    %c0_77 = arith.constant 0 : index
    %216 = vector.load %arg17[%c8_76, %c0_77] : memref<16x128xf32, #tpu.memory_space<vmem>>, vector<2x128xf32>
    tpu.vector_store %arg17[%c8_76, %c0_77], %199 {strides = array<i32>} : memref<16x128xf32, #tpu.memory_space<vmem>>, vector<2x128xf32>,
    %c6_78 = arith.constant 6 : index
    %c0_79 = arith.constant 0 : index
    %217 = vector.load %arg18[%c6_78, %c0_79] : memref<16x128xf32, #tpu.memory_space<vmem>>, vector<2x128xf32>
    tpu.vector_store %arg18[%c6_78, %c0_79], %215 {strides = array<i32>} : memref<16x128xf32, #tpu.memory_space<vmem>>, vector<2x128xf32>,
    %c10_80 = arith.constant 10 : index
    %c0_81 = arith.constant 0 : index
    %218 = vector.load %arg15[%c10_80, %c0_81] : memref<16x1024xf32, #tpu.memory_space<vmem>>, vector<2x512xf32>
    %c0_82 = arith.constant 0 : index
    %c0_83 = arith.constant 0 : index
    %219 = vector.load %arg3[%c0_82, %c0_83] : memref<128x512xf32, #tpu.memory_space<vmem>>, vector<128x512xf32>
    %cst_84 = arith.constant dense<0.000000e+00> : vector<2x512xf32>
    %220 = tpu.matmul %199, %219, %cst_84 {dimension_numbers = #tpu.dot_dimension_numbers<[1], [0], [0], [1], [0, 0, 1, 1], [], []>} : vector<2x128xf32>, vector<128x512xf32>, vector<2x512xf32> -> vector<2x512xf32>
    %221 = arith.addf %218, %220 : vector<2x512xf32>
    %c4_85 = arith.constant 4 : index
    %c512_86 = arith.constant 512 : index
    %222 = vector.load %arg15[%c4_85, %c512_86] : memref<16x1024xf32, #tpu.memory_space<vmem>>, vector<2x512xf32>
    %c0_87 = arith.constant 0 : index
    %c0_88 = arith.constant 0 : index
    %223 = vector.load %arg4[%c0_87, %c0_88] : memref<128x512xf32, #tpu.memory_space<vmem>>, vector<128x512xf32>
    %cst_89 = arith.constant dense<0.000000e+00> : vector<2x512xf32>
    %224 = tpu.matmul %215, %223, %cst_89 {dimension_numbers = #tpu.dot_dimension_numbers<[1], [0], [0], [1], [0, 0, 1, 1], [], []>} : vector<2x128xf32>, vector<128x512xf32>, vector<2x512xf32> -> vector<2x512xf32>
    %225 = arith.addf %222, %224 : vector<2x512xf32>
    %226 = vector.extract_strided_slice %221 {offsets = [0, 0], sizes = [2, 384], strides = [1, 1]} : vector<2x512xf32> to vector<2x384xf32>
    %227 = arith.negf %226 : vector<2x384xf32>
    %228 = math.exp %227 : vector<2x384xf32>
    %cst_90 = arith.constant 1.000000e+00 : f32
    %229 = vector.broadcast %cst_90 : f32 to vector<2x384xf32>
    %230 = arith.addf %229, %228 : vector<2x384xf32>
    %231 = arith.divf %229, %230 : vector<2x384xf32>
    %232 = vector.extract_strided_slice %221 {offsets = [0, 384], sizes = [2, 128], strides = [1, 1]} : vector<2x512xf32> to vector<2x128xf32>
    %233 = math.tanh %232 : vector<2x128xf32>
    %234 = vector.extract_strided_slice %231 {offsets = [0, 0], sizes = [2, 128], strides = [1, 1]} : vector<2x384xf32> to vector<2x128xf32>
    %235 = vector.extract_strided_slice %231 {offsets = [0, 128], sizes = [2, 128], strides = [1, 1]} : vector<2x384xf32> to vector<2x128xf32>
    %236 = vector.extract_strided_slice %231 {offsets = [0, 256], sizes = [2, 128], strides = [1, 1]} : vector<2x384xf32> to vector<2x128xf32>
    %237 = arith.mulf %235, %197 : vector<2x128xf32>
    %238 = arith.mulf %234, %233 : vector<2x128xf32>
    %239 = arith.addf %237, %238 : vector<2x128xf32>
    %240 = math.tanh %239 : vector<2x128xf32>
    %241 = arith.mulf %236, %240 : vector<2x128xf32>
    %242 = vector.extract_strided_slice %225 {offsets = [0, 0], sizes = [2, 384], strides = [1, 1]} : vector<2x512xf32> to vector<2x384xf32>
    %243 = arith.negf %242 : vector<2x384xf32>
    %244 = math.exp %243 : vector<2x384xf32>
    %cst_91 = arith.constant 1.000000e+00 : f32
    %245 = vector.broadcast %cst_91 : f32 to vector<2x384xf32>
    %246 = arith.addf %245, %244 : vector<2x384xf32>
    %247 = arith.divf %245, %246 : vector<2x384xf32>
    %248 = vector.extract_strided_slice %225 {offsets = [0, 384], sizes = [2, 128], strides = [1, 1]} : vector<2x512xf32> to vector<2x128xf32>
    %249 = math.tanh %248 : vector<2x128xf32>
    %250 = vector.extract_strided_slice %247 {offsets = [0, 0], sizes = [2, 128], strides = [1, 1]} : vector<2x384xf32> to vector<2x128xf32>
    %251 = vector.extract_strided_slice %247 {offsets = [0, 128], sizes = [2, 128], strides = [1, 1]} : vector<2x384xf32> to vector<2x128xf32>
    %252 = vector.extract_strided_slice %247 {offsets = [0, 256], sizes = [2, 128], strides = [1, 1]} : vector<2x384xf32> to vector<2x128xf32>
    %253 = arith.mulf %251, %213 : vector<2x128xf32>
    %254 = arith.mulf %250, %249 : vector<2x128xf32>
    %255 = arith.addf %253, %254 : vector<2x128xf32>
    %256 = math.tanh %255 : vector<2x128xf32>
    %257 = arith.mulf %252, %256 : vector<2x128xf32>
    %c10_92 = arith.constant 10 : index
    %c0_93 = arith.constant 0 : index
    %258 = vector.load %arg17[%c10_92, %c0_93] : memref<16x128xf32, #tpu.memory_space<vmem>>, vector<2x128xf32>
    tpu.vector_store %arg17[%c10_92, %c0_93], %241 {strides = array<i32>} : memref<16x128xf32, #tpu.memory_space<vmem>>, vector<2x128xf32>,
    %c4_94 = arith.constant 4 : index
    %c0_95 = arith.constant 0 : index
    %259 = vector.load %arg18[%c4_94, %c0_95] : memref<16x128xf32, #tpu.memory_space<vmem>>, vector<2x128xf32>
    tpu.vector_store %arg18[%c4_94, %c0_95], %257 {strides = array<i32>} : memref<16x128xf32, #tpu.memory_space<vmem>>, vector<2x128xf32>,
    %c12_96 = arith.constant 12 : index
    %c0_97 = arith.constant 0 : index
    %260 = vector.load %arg15[%c12_96, %c0_97] : memref<16x1024xf32, #tpu.memory_space<vmem>>, vector<2x512xf32>
    %c0_98 = arith.constant 0 : index
    %c0_99 = arith.constant 0 : index
    %261 = vector.load %arg3[%c0_98, %c0_99] : memref<128x512xf32, #tpu.memory_space<vmem>>, vector<128x512xf32>
    %cst_100 = arith.constant dense<0.000000e+00> : vector<2x512xf32>
    %262 = tpu.matmul %241, %261, %cst_100 {dimension_numbers = #tpu.dot_dimension_numbers<[1], [0], [0], [1], [0, 0, 1, 1], [], []>} : vector<2x128xf32>, vector<128x512xf32>, vector<2x512xf32> -> vector<2x512xf32>
    %263 = arith.addf %260, %262 : vector<2x512xf32>
    %c2_101 = arith.constant 2 : index
    %c512_102 = arith.constant 512 : index
    %264 = vector.load %arg15[%c2_101, %c512_102] : memref<16x1024xf32, #tpu.memory_space<vmem>>, vector<2x512xf32>
    %c0_103 = arith.constant 0 : index
    %c0_104 = arith.constant 0 : index
    %265 = vector.load %arg4[%c0_103, %c0_104] : memref<128x512xf32, #tpu.memory_space<vmem>>, vector<128x512xf32>
    %cst_105 = arith.constant dense<0.000000e+00> : vector<2x512xf32>
    %266 = tpu.matmul %257, %265, %cst_105 {dimension_numbers = #tpu.dot_dimension_numbers<[1], [0], [0], [1], [0, 0, 1, 1], [], []>} : vector<2x128xf32>, vector<128x512xf32>, vector<2x512xf32> -> vector<2x512xf32>
    %267 = arith.addf %264, %266 : vector<2x512xf32>
    %268 = vector.extract_strided_slice %263 {offsets = [0, 0], sizes = [2, 384], strides = [1, 1]} : vector<2x512xf32> to vector<2x384xf32>
    %269 = arith.negf %268 : vector<2x384xf32>
    %270 = math.exp %269 : vector<2x384xf32>
    %cst_106 = arith.constant 1.000000e+00 : f32
    %271 = vector.broadcast %cst_106 : f32 to vector<2x384xf32>
    %272 = arith.addf %271, %270 : vector<2x384xf32>
    %273 = arith.divf %271, %272 : vector<2x384xf32>
    %274 = vector.extract_strided_slice %263 {offsets = [0, 384], sizes = [2, 128], strides = [1, 1]} : vector<2x512xf32> to vector<2x128xf32>
    %275 = math.tanh %274 : vector<2x128xf32>
    %276 = vector.extract_strided_slice %273 {offsets = [0, 0], sizes = [2, 128], strides = [1, 1]} : vector<2x384xf32> to vector<2x128xf32>
    %277 = vector.extract_strided_slice %273 {offsets = [0, 128], sizes = [2, 128], strides = [1, 1]} : vector<2x384xf32> to vector<2x128xf32>
    %278 = vector.extract_strided_slice %273 {offsets = [0, 256], sizes = [2, 128], strides = [1, 1]} : vector<2x384xf32> to vector<2x128xf32>
    %279 = arith.mulf %277, %239 : vector<2x128xf32>
    %280 = arith.mulf %276, %275 : vector<2x128xf32>
    %281 = arith.addf %279, %280 : vector<2x128xf32>
    %282 = math.tanh %281 : vector<2x128xf32>
    %283 = arith.mulf %278, %282 : vector<2x128xf32>
    %284 = vector.extract_strided_slice %267 {offsets = [0, 0], sizes = [2, 384], strides = [1, 1]} : vector<2x512xf32> to vector<2x384xf32>
    %285 = arith.negf %284 : vector<2x384xf32>
    %286 = math.exp %285 : vector<2x384xf32>
    %cst_107 = arith.constant 1.000000e+00 : f32
    %287 = vector.broadcast %cst_107 : f32 to vector<2x384xf32>
    %288 = arith.addf %287, %286 : vector<2x384xf32>
    %289 = arith.divf %287, %288 : vector<2x384xf32>
    %290 = vector.extract_strided_slice %267 {offsets = [0, 384], sizes = [2, 128], strides = [1, 1]} : vector<2x512xf32> to vector<2x128xf32>
    %291 = math.tanh %290 : vector<2x128xf32>
    %292 = vector.extract_strided_slice %289 {offsets = [0, 0], sizes = [2, 128], strides = [1, 1]} : vector<2x384xf32> to vector<2x128xf32>
    %293 = vector.extract_strided_slice %289 {offsets = [0, 128], sizes = [2, 128], strides = [1, 1]} : vector<2x384xf32> to vector<2x128xf32>
    %294 = vector.extract_strided_slice %289 {offsets = [0, 256], sizes = [2, 128], strides = [1, 1]} : vector<2x384xf32> to vector<2x128xf32>
    %295 = arith.mulf %293, %255 : vector<2x128xf32>
    %296 = arith.mulf %292, %291 : vector<2x128xf32>
    %297 = arith.addf %295, %296 : vector<2x128xf32>
    %298 = math.tanh %297 : vector<2x128xf32>
    %299 = arith.mulf %294, %298 : vector<2x128xf32>
    %c12_108 = arith.constant 12 : index
    %c0_109 = arith.constant 0 : index
    %300 = vector.load %arg17[%c12_108, %c0_109] : memref<16x128xf32, #tpu.memory_space<vmem>>, vector<2x128xf32>
    tpu.vector_store %arg17[%c12_108, %c0_109], %283 {strides = array<i32>} : memref<16x128xf32, #tpu.memory_space<vmem>>, vector<2x128xf32>,
    %c2_110 = arith.constant 2 : index
    %c0_111 = arith.constant 0 : index
    %301 = vector.load %arg18[%c2_110, %c0_111] : memref<16x128xf32, #tpu.memory_space<vmem>>, vector<2x128xf32>
    tpu.vector_store %arg18[%c2_110, %c0_111], %299 {strides = array<i32>} : memref<16x128xf32, #tpu.memory_space<vmem>>, vector<2x128xf32>,
    %c14_112 = arith.constant 14 : index
    %c0_113 = arith.constant 0 : index
    %302 = vector.load %arg15[%c14_112, %c0_113] : memref<16x1024xf32, #tpu.memory_space<vmem>>, vector<2x512xf32>
    %c0_114 = arith.constant 0 : index
    %c0_115 = arith.constant 0 : index
    %303 = vector.load %arg3[%c0_114, %c0_115] : memref<128x512xf32, #tpu.memory_space<vmem>>, vector<128x512xf32>
    %cst_116 = arith.constant dense<0.000000e+00> : vector<2x512xf32>
    %304 = tpu.matmul %283, %303, %cst_116 {dimension_numbers = #tpu.dot_dimension_numbers<[1], [0], [0], [1], [0, 0, 1, 1], [], []>} : vector<2x128xf32>, vector<128x512xf32>, vector<2x512xf32> -> vector<2x512xf32>
    %305 = arith.addf %302, %304 : vector<2x512xf32>
    %c0_117 = arith.constant 0 : index
    %c512_118 = arith.constant 512 : index
    %306 = vector.load %arg15[%c0_117, %c512_118] : memref<16x1024xf32, #tpu.memory_space<vmem>>, vector<2x512xf32>
    %c0_119 = arith.constant 0 : index
    %c0_120 = arith.constant 0 : index
    %307 = vector.load %arg4[%c0_119, %c0_120] : memref<128x512xf32, #tpu.memory_space<vmem>>, vector<128x512xf32>
    %cst_121 = arith.constant dense<0.000000e+00> : vector<2x512xf32>
    %308 = tpu.matmul %299, %307, %cst_121 {dimension_numbers = #tpu.dot_dimension_numbers<[1], [0], [0], [1], [0, 0, 1, 1], [], []>} : vector<2x128xf32>, vector<128x512xf32>, vector<2x512xf32> -> vector<2x512xf32>
    %309 = arith.addf %306, %308 : vector<2x512xf32>
    %310 = vector.extract_strided_slice %305 {offsets = [0, 0], sizes = [2, 384], strides = [1, 1]} : vector<2x512xf32> to vector<2x384xf32>
    %311 = arith.negf %310 : vector<2x384xf32>
    %312 = math.exp %311 : vector<2x384xf32>
    %cst_122 = arith.constant 1.000000e+00 : f32
    %313 = vector.broadcast %cst_122 : f32 to vector<2x384xf32>
    %314 = arith.addf %313, %312 : vector<2x384xf32>
    %315 = arith.divf %313, %314 : vector<2x384xf32>
    %316 = vector.extract_strided_slice %305 {offsets = [0, 384], sizes = [2, 128], strides = [1, 1]} : vector<2x512xf32> to vector<2x128xf32>
    %317 = math.tanh %316 : vector<2x128xf32>
    %318 = vector.extract_strided_slice %315 {offsets = [0, 0], sizes = [2, 128], strides = [1, 1]} : vector<2x384xf32> to vector<2x128xf32>
    %319 = vector.extract_strided_slice %315 {offsets = [0, 128], sizes = [2, 128], strides = [1, 1]} : vector<2x384xf32> to vector<2x128xf32>
    %320 = vector.extract_strided_slice %315 {offsets = [0, 256], sizes = [2, 128], strides = [1, 1]} : vector<2x384xf32> to vector<2x128xf32>
    %321 = arith.mulf %319, %281 : vector<2x128xf32>
    %322 = arith.mulf %318, %317 : vector<2x128xf32>
    %323 = arith.addf %321, %322 : vector<2x128xf32>
    %324 = math.tanh %323 : vector<2x128xf32>
    %325 = arith.mulf %320, %324 : vector<2x128xf32>
    %326 = vector.extract_strided_slice %309 {offsets = [0, 0], sizes = [2, 384], strides = [1, 1]} : vector<2x512xf32> to vector<2x384xf32>
    %327 = arith.negf %326 : vector<2x384xf32>
    %328 = math.exp %327 : vector<2x384xf32>
    %cst_123 = arith.constant 1.000000e+00 : f32
    %329 = vector.broadcast %cst_123 : f32 to vector<2x384xf32>
    %330 = arith.addf %329, %328 : vector<2x384xf32>
    %331 = arith.divf %329, %330 : vector<2x384xf32>
    %332 = vector.extract_strided_slice %309 {offsets = [0, 384], sizes = [2, 128], strides = [1, 1]} : vector<2x512xf32> to vector<2x128xf32>
    %333 = math.tanh %332 : vector<2x128xf32>
    %334 = vector.extract_strided_slice %331 {offsets = [0, 0], sizes = [2, 128], strides = [1, 1]} : vector<2x384xf32> to vector<2x128xf32>
    %335 = vector.extract_strided_slice %331 {offsets = [0, 128], sizes = [2, 128], strides = [1, 1]} : vector<2x384xf32> to vector<2x128xf32>
    %336 = vector.extract_strided_slice %331 {offsets = [0, 256], sizes = [2, 128], strides = [1, 1]} : vector<2x384xf32> to vector<2x128xf32>
    %337 = arith.mulf %335, %297 : vector<2x128xf32>
    %338 = arith.mulf %334, %333 : vector<2x128xf32>
    %339 = arith.addf %337, %338 : vector<2x128xf32>
    %340 = math.tanh %339 : vector<2x128xf32>
    %341 = arith.mulf %336, %340 : vector<2x128xf32>
    %c14_124 = arith.constant 14 : index
    %c0_125 = arith.constant 0 : index
    %342 = vector.load %arg17[%c14_124, %c0_125] : memref<16x128xf32, #tpu.memory_space<vmem>>, vector<2x128xf32>
    tpu.vector_store %arg17[%c14_124, %c0_125], %325 {strides = array<i32>} : memref<16x128xf32, #tpu.memory_space<vmem>>, vector<2x128xf32>,
    %c0_126 = arith.constant 0 : index
    %c0_127 = arith.constant 0 : index
    %343 = vector.load %arg18[%c0_126, %c0_127] : memref<16x128xf32, #tpu.memory_space<vmem>>, vector<2x128xf32>
    tpu.vector_store %arg18[%c0_126, %c0_127], %341 {strides = array<i32>} : memref<16x128xf32, #tpu.memory_space<vmem>>, vector<2x128xf32>,
    %c0_128 = arith.constant 0 : index
    %c0_129 = arith.constant 0 : index
    %344 = vector.load %arg17[%c0_128, %c0_129] : memref<16x128xf32, #tpu.memory_space<vmem>>, vector<16x128xf32>
    %c0_130 = arith.constant 0 : index
    %c0_131 = arith.constant 0 : index
    %345 = vector.load %arg5[%c0_130, %c0_131] : memref<128x1024xf32, #tpu.memory_space<vmem>>, vector<128x1024xf32>
    %cst_132 = arith.constant dense<0.000000e+00> : vector<16x1024xf32>
    %346 = tpu.matmul %344, %345, %cst_132 {dimension_numbers = #tpu.dot_dimension_numbers<[1], [0], [0], [1], [0, 0, 1, 1], [], []>} : vector<16x128xf32>, vector<128x1024xf32>, vector<16x1024xf32> -> vector<16x1024xf32>
    %c0_133 = arith.constant 0 : index
    %c0_134 = arith.constant 0 : index
    %347 = vector.load %arg18[%c0_133, %c0_134] : memref<16x128xf32, #tpu.memory_space<vmem>>, vector<16x128xf32>
    %c0_135 = arith.constant 0 : index
    %c0_136 = arith.constant 0 : index
    %348 = vector.load %arg6[%c0_135, %c0_136] : memref<128x1024xf32, #tpu.memory_space<vmem>>, vector<128x1024xf32>
    %cst_137 = arith.constant dense<0.000000e+00> : vector<16x1024xf32>
    %349 = tpu.matmul %347, %348, %cst_137 {dimension_numbers = #tpu.dot_dimension_numbers<[1], [0], [0], [1], [0, 0, 1, 1], [], []>} : vector<16x128xf32>, vector<128x1024xf32>, vector<16x1024xf32> -> vector<16x1024xf32>
    %350 = arith.addf %346, %349 : vector<16x1024xf32>
    %c0_138 = arith.constant 0 : index
    %c0_139 = arith.constant 0 : index
    %351 = vector.load %arg7[%c0_138, %c0_139] : memref<1x1024xf32, #tpu.memory_space<vmem>>, vector<1x1024xf32>
    %352 = vector.broadcast %351 : vector<1x1024xf32> to vector<16x1024xf32>
    %353 = arith.addf %350, %352 : vector<16x1024xf32>
    %c0_140 = arith.constant 0 : index
    %c0_141 = arith.constant 0 : index
    %354 = vector.load %arg16[%c0_140, %c0_141] : memref<16x1024xf32, #tpu.memory_space<vmem>>, vector<16x1024xf32>
    tpu.vector_store %arg16[%c0_140, %c0_141], %353 {strides = array<i32>} : memref<16x1024xf32, #tpu.memory_space<vmem>>, vector<16x1024xf32>,
    %c0_142 = arith.constant 0 : index
    %c0_143 = arith.constant 0 : index
    %355 = vector.load %arg16[%c0_142, %c0_143] : memref<16x1024xf32, #tpu.memory_space<vmem>>, vector<2x512xf32>
    %c0_144 = arith.constant 0 : index
    %c0_145 = arith.constant 0 : index
    %356 = vector.load %arg8[%c0_144, %c0_145] : memref<128x512xf32, #tpu.memory_space<vmem>>, vector<128x512xf32>
    %cst_146 = arith.constant dense<0.000000e+00> : vector<2x512xf32>
    %357 = tpu.matmul %0, %356, %cst_146 {dimension_numbers = #tpu.dot_dimension_numbers<[1], [0], [0], [1], [0, 0, 1, 1], [], []>} : vector<2x128xf32>, vector<128x512xf32>, vector<2x512xf32> -> vector<2x512xf32>
    %358 = arith.addf %355, %357 : vector<2x512xf32>
    %359 = vector.extract_strided_slice %358 {offsets = [0, 0], sizes = [2, 384], strides = [1, 1]} : vector<2x512xf32> to vector<2x384xf32>
    %360 = arith.negf %359 : vector<2x384xf32>
    %361 = math.exp %360 : vector<2x384xf32>
    %cst_147 = arith.constant 1.000000e+00 : f32
    %362 = vector.broadcast %cst_147 : f32 to vector<2x384xf32>
    %363 = arith.addf %362, %361 : vector<2x384xf32>
    %364 = arith.divf %362, %363 : vector<2x384xf32>
    %365 = vector.extract_strided_slice %358 {offsets = [0, 384], sizes = [2, 128], strides = [1, 1]} : vector<2x512xf32> to vector<2x128xf32>
    %366 = math.tanh %365 : vector<2x128xf32>
    %367 = vector.extract_strided_slice %364 {offsets = [0, 0], sizes = [2, 128], strides = [1, 1]} : vector<2x384xf32> to vector<2x128xf32>
    %368 = vector.extract_strided_slice %364 {offsets = [0, 128], sizes = [2, 128], strides = [1, 1]} : vector<2x384xf32> to vector<2x128xf32>
    %369 = vector.extract_strided_slice %364 {offsets = [0, 256], sizes = [2, 128], strides = [1, 1]} : vector<2x384xf32> to vector<2x128xf32>
    %370 = arith.mulf %368, %0 : vector<2x128xf32>
    %371 = arith.mulf %367, %366 : vector<2x128xf32>
    %372 = arith.addf %370, %371 : vector<2x128xf32>
    %373 = math.tanh %372 : vector<2x128xf32>
    %374 = arith.mulf %369, %373 : vector<2x128xf32>
    %c2_148 = arith.constant 2 : index
    %c0_149 = arith.constant 0 : index
    %375 = vector.load %arg16[%c2_148, %c0_149] : memref<16x1024xf32, #tpu.memory_space<vmem>>, vector<2x512xf32>
    %c0_150 = arith.constant 0 : index
    %c0_151 = arith.constant 0 : index
    %376 = vector.load %arg8[%c0_150, %c0_151] : memref<128x512xf32, #tpu.memory_space<vmem>>, vector<128x512xf32>
    %cst_152 = arith.constant dense<0.000000e+00> : vector<2x512xf32>
    %377 = tpu.matmul %374, %376, %cst_152 {dimension_numbers = #tpu.dot_dimension_numbers<[1], [0], [0], [1], [0, 0, 1, 1], [], []>} : vector<2x128xf32>, vector<128x512xf32>, vector<2x512xf32> -> vector<2x512xf32>
    %378 = arith.addf %375, %377 : vector<2x512xf32>
    %379 = vector.extract_strided_slice %378 {offsets = [0, 0], sizes = [2, 384], strides = [1, 1]} : vector<2x512xf32> to vector<2x384xf32>
    %380 = arith.negf %379 : vector<2x384xf32>
    %381 = math.exp %380 : vector<2x384xf32>
    %cst_153 = arith.constant 1.000000e+00 : f32
    %382 = vector.broadcast %cst_153 : f32 to vector<2x384xf32>
    %383 = arith.addf %382, %381 : vector<2x384xf32>
    %384 = arith.divf %382, %383 : vector<2x384xf32>
    %385 = vector.extract_strided_slice %378 {offsets = [0, 384], sizes = [2, 128], strides = [1, 1]} : vector<2x512xf32> to vector<2x128xf32>
    %386 = math.tanh %385 : vector<2x128xf32>
    %387 = vector.extract_strided_slice %384 {offsets = [0, 0], sizes = [2, 128], strides = [1, 1]} : vector<2x384xf32> to vector<2x128xf32>
    %388 = vector.extract_strided_slice %384 {offsets = [0, 128], sizes = [2, 128], strides = [1, 1]} : vector<2x384xf32> to vector<2x128xf32>
    %389 = vector.extract_strided_slice %384 {offsets = [0, 256], sizes = [2, 128], strides = [1, 1]} : vector<2x384xf32> to vector<2x128xf32>
    %390 = arith.mulf %388, %372 : vector<2x128xf32>
    %391 = arith.mulf %387, %386 : vector<2x128xf32>
    %392 = arith.addf %390, %391 : vector<2x128xf32>
    %393 = math.tanh %392 : vector<2x128xf32>
    %394 = arith.mulf %389, %393 : vector<2x128xf32>
    %c4_154 = arith.constant 4 : index
    %c0_155 = arith.constant 0 : index
    %395 = vector.load %arg16[%c4_154, %c0_155] : memref<16x1024xf32, #tpu.memory_space<vmem>>, vector<2x512xf32>
    %c0_156 = arith.constant 0 : index
    %c0_157 = arith.constant 0 : index
    %396 = vector.load %arg8[%c0_156, %c0_157] : memref<128x512xf32, #tpu.memory_space<vmem>>, vector<128x512xf32>
    %cst_158 = arith.constant dense<0.000000e+00> : vector<2x512xf32>
    %397 = tpu.matmul %394, %396, %cst_158 {dimension_numbers = #tpu.dot_dimension_numbers<[1], [0], [0], [1], [0, 0, 1, 1], [], []>} : vector<2x128xf32>, vector<128x512xf32>, vector<2x512xf32> -> vector<2x512xf32>
    %398 = arith.addf %395, %397 : vector<2x512xf32>
    %399 = vector.extract_strided_slice %398 {offsets = [0, 0], sizes = [2, 384], strides = [1, 1]} : vector<2x512xf32> to vector<2x384xf32>
    %400 = arith.negf %399 : vector<2x384xf32>
    %401 = math.exp %400 : vector<2x384xf32>
    %cst_159 = arith.constant 1.000000e+00 : f32
    %402 = vector.broadcast %cst_159 : f32 to vector<2x384xf32>
    %403 = arith.addf %402, %401 : vector<2x384xf32>
    %404 = arith.divf %402, %403 : vector<2x384xf32>
    %405 = vector.extract_strided_slice %398 {offsets = [0, 384], sizes = [2, 128], strides = [1, 1]} : vector<2x512xf32> to vector<2x128xf32>
    %406 = math.tanh %405 : vector<2x128xf32>
    %407 = vector.extract_strided_slice %404 {offsets = [0, 0], sizes = [2, 128], strides = [1, 1]} : vector<2x384xf32> to vector<2x128xf32>
    %408 = vector.extract_strided_slice %404 {offsets = [0, 128], sizes = [2, 128], strides = [1, 1]} : vector<2x384xf32> to vector<2x128xf32>
    %409 = vector.extract_strided_slice %404 {offsets = [0, 256], sizes = [2, 128], strides = [1, 1]} : vector<2x384xf32> to vector<2x128xf32>
    %410 = arith.mulf %408, %392 : vector<2x128xf32>
    %411 = arith.mulf %407, %406 : vector<2x128xf32>
    %412 = arith.addf %410, %411 : vector<2x128xf32>
    %413 = math.tanh %412 : vector<2x128xf32>
    %414 = arith.mulf %409, %413 : vector<2x128xf32>
    %c6_160 = arith.constant 6 : index
    %c0_161 = arith.constant 0 : index
    %415 = vector.load %arg16[%c6_160, %c0_161] : memref<16x1024xf32, #tpu.memory_space<vmem>>, vector<2x512xf32>
    %c0_162 = arith.constant 0 : index
    %c0_163 = arith.constant 0 : index
    %416 = vector.load %arg8[%c0_162, %c0_163] : memref<128x512xf32, #tpu.memory_space<vmem>>, vector<128x512xf32>
    %cst_164 = arith.constant dense<0.000000e+00> : vector<2x512xf32>
    %417 = tpu.matmul %414, %416, %cst_164 {dimension_numbers = #tpu.dot_dimension_numbers<[1], [0], [0], [1], [0, 0, 1, 1], [], []>} : vector<2x128xf32>, vector<128x512xf32>, vector<2x512xf32> -> vector<2x512xf32>
    %418 = arith.addf %415, %417 : vector<2x512xf32>
    %419 = vector.extract_strided_slice %418 {offsets = [0, 0], sizes = [2, 384], strides = [1, 1]} : vector<2x512xf32> to vector<2x384xf32>
    %420 = arith.negf %419 : vector<2x384xf32>
    %421 = math.exp %420 : vector<2x384xf32>
    %cst_165 = arith.constant 1.000000e+00 : f32
    %422 = vector.broadcast %cst_165 : f32 to vector<2x384xf32>
    %423 = arith.addf %422, %421 : vector<2x384xf32>
    %424 = arith.divf %422, %423 : vector<2x384xf32>
    %425 = vector.extract_strided_slice %418 {offsets = [0, 384], sizes = [2, 128], strides = [1, 1]} : vector<2x512xf32> to vector<2x128xf32>
    %426 = math.tanh %425 : vector<2x128xf32>
    %427 = vector.extract_strided_slice %424 {offsets = [0, 0], sizes = [2, 128], strides = [1, 1]} : vector<2x384xf32> to vector<2x128xf32>
    %428 = vector.extract_strided_slice %424 {offsets = [0, 128], sizes = [2, 128], strides = [1, 1]} : vector<2x384xf32> to vector<2x128xf32>
    %429 = vector.extract_strided_slice %424 {offsets = [0, 256], sizes = [2, 128], strides = [1, 1]} : vector<2x384xf32> to vector<2x128xf32>
    %430 = arith.mulf %428, %412 : vector<2x128xf32>
    %431 = arith.mulf %427, %426 : vector<2x128xf32>
    %432 = arith.addf %430, %431 : vector<2x128xf32>
    %433 = math.tanh %432 : vector<2x128xf32>
    %434 = arith.mulf %429, %433 : vector<2x128xf32>
    %c8_166 = arith.constant 8 : index
    %c0_167 = arith.constant 0 : index
    %435 = vector.load %arg16[%c8_166, %c0_167] : memref<16x1024xf32, #tpu.memory_space<vmem>>, vector<2x512xf32>
    %c0_168 = arith.constant 0 : index
    %c0_169 = arith.constant 0 : index
    %436 = vector.load %arg8[%c0_168, %c0_169] : memref<128x512xf32, #tpu.memory_space<vmem>>, vector<128x512xf32>
    %cst_170 = arith.constant dense<0.000000e+00> : vector<2x512xf32>
    %437 = tpu.matmul %434, %436, %cst_170 {dimension_numbers = #tpu.dot_dimension_numbers<[1], [0], [0], [1], [0, 0, 1, 1], [], []>} : vector<2x128xf32>, vector<128x512xf32>, vector<2x512xf32> -> vector<2x512xf32>
    %438 = arith.addf %435, %437 : vector<2x512xf32>
    %439 = vector.extract_strided_slice %438 {offsets = [0, 0], sizes = [2, 384], strides = [1, 1]} : vector<2x512xf32> to vector<2x384xf32>
    %440 = arith.negf %439 : vector<2x384xf32>
    %441 = math.exp %440 : vector<2x384xf32>
    %cst_171 = arith.constant 1.000000e+00 : f32
    %442 = vector.broadcast %cst_171 : f32 to vector<2x384xf32>
    %443 = arith.addf %442, %441 : vector<2x384xf32>
    %444 = arith.divf %442, %443 : vector<2x384xf32>
    %445 = vector.extract_strided_slice %438 {offsets = [0, 384], sizes = [2, 128], strides = [1, 1]} : vector<2x512xf32> to vector<2x128xf32>
    %446 = math.tanh %445 : vector<2x128xf32>
    %447 = vector.extract_strided_slice %444 {offsets = [0, 0], sizes = [2, 128], strides = [1, 1]} : vector<2x384xf32> to vector<2x128xf32>
    %448 = vector.extract_strided_slice %444 {offsets = [0, 128], sizes = [2, 128], strides = [1, 1]} : vector<2x384xf32> to vector<2x128xf32>
    %449 = vector.extract_strided_slice %444 {offsets = [0, 256], sizes = [2, 128], strides = [1, 1]} : vector<2x384xf32> to vector<2x128xf32>
    %450 = arith.mulf %448, %432 : vector<2x128xf32>
    %451 = arith.mulf %447, %446 : vector<2x128xf32>
    %452 = arith.addf %450, %451 : vector<2x128xf32>
    %453 = math.tanh %452 : vector<2x128xf32>
    %454 = arith.mulf %449, %453 : vector<2x128xf32>
    %c10_172 = arith.constant 10 : index
    %c0_173 = arith.constant 0 : index
    %455 = vector.load %arg16[%c10_172, %c0_173] : memref<16x1024xf32, #tpu.memory_space<vmem>>, vector<2x512xf32>
    %c0_174 = arith.constant 0 : index
    %c0_175 = arith.constant 0 : index
    %456 = vector.load %arg8[%c0_174, %c0_175] : memref<128x512xf32, #tpu.memory_space<vmem>>, vector<128x512xf32>
    %cst_176 = arith.constant dense<0.000000e+00> : vector<2x512xf32>
    %457 = tpu.matmul %454, %456, %cst_176 {dimension_numbers = #tpu.dot_dimension_numbers<[1], [0], [0], [1], [0, 0, 1, 1], [], []>} : vector<2x128xf32>, vector<128x512xf32>, vector<2x512xf32> -> vector<2x512xf32>
    %458 = arith.addf %455, %457 : vector<2x512xf32>
    %459 = vector.extract_strided_slice %458 {offsets = [0, 0], sizes = [2, 384], strides = [1, 1]} : vector<2x512xf32> to vector<2x384xf32>
    %460 = arith.negf %459 : vector<2x384xf32>
    %461 = math.exp %460 : vector<2x384xf32>
    %cst_177 = arith.constant 1.000000e+00 : f32
    %462 = vector.broadcast %cst_177 : f32 to vector<2x384xf32>
    %463 = arith.addf %462, %461 : vector<2x384xf32>
    %464 = arith.divf %462, %463 : vector<2x384xf32>
    %465 = vector.extract_strided_slice %458 {offsets = [0, 384], sizes = [2, 128], strides = [1, 1]} : vector<2x512xf32> to vector<2x128xf32>
    %466 = math.tanh %465 : vector<2x128xf32>
    %467 = vector.extract_strided_slice %464 {offsets = [0, 0], sizes = [2, 128], strides = [1, 1]} : vector<2x384xf32> to vector<2x128xf32>
    %468 = vector.extract_strided_slice %464 {offsets = [0, 128], sizes = [2, 128], strides = [1, 1]} : vector<2x384xf32> to vector<2x128xf32>
    %469 = vector.extract_strided_slice %464 {offsets = [0, 256], sizes = [2, 128], strides = [1, 1]} : vector<2x384xf32> to vector<2x128xf32>
    %470 = arith.mulf %468, %452 : vector<2x128xf32>
    %471 = arith.mulf %467, %466 : vector<2x128xf32>
    %472 = arith.addf %470, %471 : vector<2x128xf32>
    %473 = math.tanh %472 : vector<2x128xf32>
    %474 = arith.mulf %469, %473 : vector<2x128xf32>
    %c12_178 = arith.constant 12 : index
    %c0_179 = arith.constant 0 : index
    %475 = vector.load %arg16[%c12_178, %c0_179] : memref<16x1024xf32, #tpu.memory_space<vmem>>, vector<2x512xf32>
    %c0_180 = arith.constant 0 : index
    %c0_181 = arith.constant 0 : index
    %476 = vector.load %arg8[%c0_180, %c0_181] : memref<128x512xf32, #tpu.memory_space<vmem>>, vector<128x512xf32>
    %cst_182 = arith.constant dense<0.000000e+00> : vector<2x512xf32>
    %477 = tpu.matmul %474, %476, %cst_182 {dimension_numbers = #tpu.dot_dimension_numbers<[1], [0], [0], [1], [0, 0, 1, 1], [], []>} : vector<2x128xf32>, vector<128x512xf32>, vector<2x512xf32> -> vector<2x512xf32>
    %478 = arith.addf %475, %477 : vector<2x512xf32>
    %479 = vector.extract_strided_slice %478 {offsets = [0, 0], sizes = [2, 384], strides = [1, 1]} : vector<2x512xf32> to vector<2x384xf32>
    %480 = arith.negf %479 : vector<2x384xf32>
    %481 = math.exp %480 : vector<2x384xf32>
    %cst_183 = arith.constant 1.000000e+00 : f32
    %482 = vector.broadcast %cst_183 : f32 to vector<2x384xf32>
    %483 = arith.addf %482, %481 : vector<2x384xf32>
    %484 = arith.divf %482, %483 : vector<2x384xf32>
    %485 = vector.extract_strided_slice %478 {offsets = [0, 384], sizes = [2, 128], strides = [1, 1]} : vector<2x512xf32> to vector<2x128xf32>
    %486 = math.tanh %485 : vector<2x128xf32>
    %487 = vector.extract_strided_slice %484 {offsets = [0, 0], sizes = [2, 128], strides = [1, 1]} : vector<2x384xf32> to vector<2x128xf32>
    %488 = vector.extract_strided_slice %484 {offsets = [0, 128], sizes = [2, 128], strides = [1, 1]} : vector<2x384xf32> to vector<2x128xf32>
    %489 = vector.extract_strided_slice %484 {offsets = [0, 256], sizes = [2, 128], strides = [1, 1]} : vector<2x384xf32> to vector<2x128xf32>
    %490 = arith.mulf %488, %472 : vector<2x128xf32>
    %491 = arith.mulf %487, %486 : vector<2x128xf32>
    %492 = arith.addf %490, %491 : vector<2x128xf32>
    %493 = math.tanh %492 : vector<2x128xf32>
    %494 = arith.mulf %489, %493 : vector<2x128xf32>
    %c14_184 = arith.constant 14 : index
    %c0_185 = arith.constant 0 : index
    %495 = vector.load %arg16[%c14_184, %c0_185] : memref<16x1024xf32, #tpu.memory_space<vmem>>, vector<2x512xf32>
    %c0_186 = arith.constant 0 : index
    %c0_187 = arith.constant 0 : index
    %496 = vector.load %arg8[%c0_186, %c0_187] : memref<128x512xf32, #tpu.memory_space<vmem>>, vector<128x512xf32>
    %cst_188 = arith.constant dense<0.000000e+00> : vector<2x512xf32>
    %497 = tpu.matmul %494, %496, %cst_188 {dimension_numbers = #tpu.dot_dimension_numbers<[1], [0], [0], [1], [0, 0, 1, 1], [], []>} : vector<2x128xf32>, vector<128x512xf32>, vector<2x512xf32> -> vector<2x512xf32>
    %498 = arith.addf %495, %497 : vector<2x512xf32>
    %499 = vector.extract_strided_slice %498 {offsets = [0, 0], sizes = [2, 384], strides = [1, 1]} : vector<2x512xf32> to vector<2x384xf32>
    %500 = arith.negf %499 : vector<2x384xf32>
    %501 = math.exp %500 : vector<2x384xf32>
    %cst_189 = arith.constant 1.000000e+00 : f32
    %502 = vector.broadcast %cst_189 : f32 to vector<2x384xf32>
    %503 = arith.addf %502, %501 : vector<2x384xf32>
    %504 = arith.divf %502, %503 : vector<2x384xf32>
    %505 = vector.extract_strided_slice %498 {offsets = [0, 384], sizes = [2, 128], strides = [1, 1]} : vector<2x512xf32> to vector<2x128xf32>
    %506 = math.tanh %505 : vector<2x128xf32>
    %507 = vector.extract_strided_slice %504 {offsets = [0, 0], sizes = [2, 128], strides = [1, 1]} : vector<2x384xf32> to vector<2x128xf32>
    %508 = vector.extract_strided_slice %504 {offsets = [0, 128], sizes = [2, 128], strides = [1, 1]} : vector<2x384xf32> to vector<2x128xf32>
    %509 = vector.extract_strided_slice %504 {offsets = [0, 256], sizes = [2, 128], strides = [1, 1]} : vector<2x384xf32> to vector<2x128xf32>
    %510 = arith.mulf %508, %492 : vector<2x128xf32>
    %511 = arith.mulf %507, %506 : vector<2x128xf32>
    %512 = arith.addf %510, %511 : vector<2x128xf32>
    %513 = math.tanh %512 : vector<2x128xf32>
    %514 = arith.mulf %509, %513 : vector<2x128xf32>
    %c14_190 = arith.constant 14 : index
    %c512_191 = arith.constant 512 : index
    %515 = vector.load %arg16[%c14_190, %c512_191] : memref<16x1024xf32, #tpu.memory_space<vmem>>, vector<2x512xf32>
    %516 = vector.extract_strided_slice %515 {offsets = [0, 0], sizes = [2, 384], strides = [1, 1]} : vector<2x512xf32> to vector<2x384xf32>
    %517 = arith.negf %516 : vector<2x384xf32>
    %518 = math.exp %517 : vector<2x384xf32>
    %cst_192 = arith.constant 1.000000e+00 : f32
    %519 = vector.broadcast %cst_192 : f32 to vector<2x384xf32>
    %520 = arith.addf %519, %518 : vector<2x384xf32>
    %521 = arith.divf %519, %520 : vector<2x384xf32>
    %522 = vector.extract_strided_slice %515 {offsets = [0, 384], sizes = [2, 128], strides = [1, 1]} : vector<2x512xf32> to vector<2x128xf32>
    %523 = math.tanh %522 : vector<2x128xf32>
    %524 = vector.extract_strided_slice %521 {offsets = [0, 0], sizes = [2, 128], strides = [1, 1]} : vector<2x384xf32> to vector<2x128xf32>
    %525 = vector.extract_strided_slice %521 {offsets = [0, 128], sizes = [2, 128], strides = [1, 1]} : vector<2x384xf32> to vector<2x128xf32>
    %526 = vector.extract_strided_slice %521 {offsets = [0, 256], sizes = [2, 128], strides = [1, 1]} : vector<2x384xf32> to vector<2x128xf32>
    %527 = arith.mulf %525, %0 : vector<2x128xf32>
    %528 = arith.mulf %524, %523 : vector<2x128xf32>
    %529 = arith.addf %527, %528 : vector<2x128xf32>
    %530 = math.tanh %529 : vector<2x128xf32>
    %531 = arith.mulf %526, %530 : vector<2x128xf32>
    %c0_193 = arith.constant 0 : index
    %c0_194 = arith.constant 0 : index
    %532 = vector.load %arg9[%c0_193, %c0_194] : memref<128x128xf32, #tpu.memory_space<vmem>>, vector<128x128xf32>
    %cst_195 = arith.constant dense<0.000000e+00> : vector<2x128xf32>
    %533 = tpu.matmul %514, %532, %cst_195 {dimension_numbers = #tpu.dot_dimension_numbers<[1], [0], [0], [1], [0, 0, 1, 1], [], []>} : vector<2x128xf32>, vector<128x128xf32>, vector<2x128xf32> -> vector<2x128xf32>
    %c0_196 = arith.constant 0 : index
    %c0_197 = arith.constant 0 : index
    %534 = vector.load %arg10[%c0_196, %c0_197] : memref<128x128xf32, #tpu.memory_space<vmem>>, vector<128x128xf32>
    %cst_198 = arith.constant dense<0.000000e+00> : vector<2x128xf32>
    %535 = tpu.matmul %531, %534, %cst_198 {dimension_numbers = #tpu.dot_dimension_numbers<[1], [0], [0], [1], [0, 0, 1, 1], [], []>} : vector<2x128xf32>, vector<128x128xf32>, vector<2x128xf32> -> vector<2x128xf32>
    %536 = arith.addf %533, %535 : vector<2x128xf32>
    %c0_199 = arith.constant 0 : index
    %c0_200 = arith.constant 0 : index
    %537 = vector.load %arg11[%c0_199, %c0_200] : memref<1x128xf32, #tpu.memory_space<vmem>>, vector<1x128xf32>
    %538 = vector.broadcast %537 : vector<1x128xf32> to vector<2x128xf32>
    %539 = arith.addf %536, %538 : vector<2x128xf32>
    %cst_201 = arith.constant 0.000000e+00 : f32
    %540 = vector.broadcast %cst_201 : f32 to vector<2x128xf32>
    %541 = arith.maximumf %539, %540 : vector<2x128xf32>
    %c0_202 = arith.constant 0 : index
    %c0_203 = arith.constant 0 : index
    %542 = vector.load %arg12[%c0_202, %c0_203] : memref<128x128xf32, #tpu.memory_space<vmem>>, vector<128x128xf32>
    %cst_204 = arith.constant dense<0.000000e+00> : vector<2x128xf32>
    %543 = tpu.matmul %541, %542, %cst_204 {dimension_numbers = #tpu.dot_dimension_numbers<[1], [0], [0], [1], [0, 0, 1, 1], [], []>} : vector<2x128xf32>, vector<128x128xf32>, vector<2x128xf32> -> vector<2x128xf32>
    %c0_205 = arith.constant 0 : index
    %c0_206 = arith.constant 0 : index
    %544 = vector.load %arg13[%c0_205, %c0_206] : memref<1x128xf32, #tpu.memory_space<vmem>>, vector<1x128xf32>
    %545 = vector.broadcast %544 : vector<1x128xf32> to vector<2x128xf32>
    %546 = arith.addf %543, %545 : vector<2x128xf32>
    %c0_207 = arith.constant 0 : index
    %c0_208 = arith.constant 0 : index
    %547 = vector.load %arg14[%c0_207, %c0_208] : memref<2x128xf32, #tpu.memory_space<vmem>>, vector<2x128xf32>
    tpu.vector_store %arg14[%c0_207, %c0_208], %546 {strides = array<i32>} : memref<2x128xf32, #tpu.memory_space<vmem>>, vector<2x128xf32>,
    return
  }
}

</mosaic_0001>

<bundles_post_ra>
// kernel: bi_lstm_forward.1
= control target key start
LH: loop header
LB: loop body
LE: loop exit
PB: predicated region body
PF: predicated region fallthrough
CT: control target
= control target key end

     0   :  { %s15492_s0 = inlined_call_operand.vmem [shape: f32[16,256], index: 0, kind: input, shape index: {}]   ;;  %s15493_s1 = inlined_call_operand.vmem [shape: f32[256,1024], index: 1, kind: input, shape index: {}]   ;;  %s15494_s2 = inlined_call_operand.vmem [shape: f32[1,1024], index: 2, kind: input, shape index: {}]   ;;  %s15495_s3 = inlined_call_operand.vmem [shape: f32[128,512], index: 3, kind: input, shape index: {}]   ;;  %s15496_s4 = inlined_call_operand.vmem [shape: f32[128,512], index: 4, kind: input, shape index: {}]   ;;  %s15497_s5 = inlined_call_operand.vmem [shape: f32[128,1024], index: 5, kind: input, shape index: {}]   ;;  %s15498_s6 = inlined_call_operand.vmem [shape: f32[128,1024], index: 6, kind: input, shape index: {}]   ;;  %s15499_s7 = inlined_call_operand.vmem [shape: f32[1,1024], index: 7, kind: input, shape index: {}]   ;;  %s15500_s8 = inlined_call_operand.vmem [shape: f32[128,512], index: 8, kind: input, shape index: {}]   ;;  %s15501_s9 = inlined_call_operand.vmem [shape: f32[128,128], index: 9, kind: input, shape index: {}]   ;;  %s15502_s10 = inlined_call_operand.vmem [shape: f32[128,128], index: 10, kind: input, shape index: {}]   ;;  %s15503_s11 = inlined_call_operand.vmem [shape: f32[1,128], index: 11, kind: input, shape index: {}]   ;;  %s15504_s12 = inlined_call_operand.vmem [shape: f32[128,128], index: 12, kind: input, shape index: {}]   ;;  %s15505_s13 = inlined_call_operand.vmem [shape: f32[1,128], index: 13, kind: input, shape index: {}]   ;;  %s15506_s14 = inlined_call_operand.hbm [shape: f32[2,128], index: 14, kind: output, shape index: {}]  }
   0x1   :  { %v53_v0 = vld [vmem:[%s15493_s1 + $0x8] sm:$0xff]  ;;  %v55_v2 = vld [vmem:[%s15493_s1 + $0x18] sm:$0xff]  ;;  %v52_v5 = vld [vmem:[%s15493_s1] sm:$0xff] }
   0x2   :  { %v61_v1 = vld [vmem:[%s15493_s1 + $0x48] sm:$0xff]  ;;  %v63_v4 = vld [vmem:[%s15493_s1 + $0x58] sm:$0xff]  ;;  %v60_v6 = vld [vmem:[%s15493_s1 + $0x40] sm:$0xff] }
   0x3   :  { %v7787_v3 = vpack.c.bf16 %v61_v1, %v53_v0  ;;  %v7851_v7 = vpack.c.bf16 %v63_v4, %v55_v2  ;;  %v7789_v8 = vpack.c.bf16 %v60_v6, %v52_v5  ;;  %v54_v9 = vld [vmem:[%s15493_s1 + $0x10] sm:$0xff]  ;;  %v69_v11 = vld [vmem:[%s15493_s1 + $0x88] sm:$0xff]  ;;  %v71_v14 = vld [vmem:[%s15493_s1 + $0x98] sm:$0xff] }
   0x4   :  { %v62_v10 = vld [vmem:[%s15493_s1 + $0x50] sm:$0xff]  ;;  %v77_v13 = vld [vmem:[%s15493_s1 + $0xc8] sm:$0xff]  ;;  %v79_v15 = vld [vmem:[%s15493_s1 + $0xd8] sm:$0xff] }
   0x5   :  { %7788 = vmatprep.subr.bf16.mxu0 %v7787_v3  ;;  %v7853_v12 = vpack.c.bf16 %v62_v10, %v54_v9  ;;  %7852 = vmatprep.subr.bf16.mxu1 %v7851_v7  ;;  %v7791_v16 = vpack.c.bf16 %v77_v13, %v69_v11  ;;  %v7855_v17 = vpack.c.bf16 %v79_v15, %v71_v14  ;;  %v68_v18 = vld [vmem:[%s15493_s1 + $0x80] sm:$0xff]  ;;  %v70_v20 = vld [vmem:[%s15493_s1 + $0x90] sm:$0xff]  ;;  %v85_v23 = vld [vmem:[%s15493_s1 + $0x108] sm:$0xff] }
   0x6   :  { %7790 = vmatpush1.bf16.msra.mxu0 %v7789_v8  ;;  %v76_v19 = vld [vmem:[%s15493_s1 + $0xc0] sm:$0xff]  ;;  %v78_v22 = vld [vmem:[%s15493_s1 + $0xd0] sm:$0xff]  ;;  %v93_v24 = vld [vmem:[%s15493_s1 + $0x148] sm:$0xff] }
   0x7   :  { %7854 = vmatpush1.bf16.msra.mxu1 %v7853_v12  ;;  %v7793_v21 = vpack.c.bf16 %v76_v19, %v68_v18  ;;  %7792 = vmatprep.subr.bf16.mxu0 %v7791_v16  ;;  %v7857_v25 = vpack.c.bf16 %v78_v22, %v70_v20  ;;  %v7795_v26 = vpack.c.bf16 %v93_v24, %v85_v23  ;;  %v87_v27 = vld [vmem:[%s15493_s1 + $0x118] sm:$0xff]  ;;  %v84_v29 = vld [vmem:[%s15493_s1 + $0x100] sm:$0xff]  ;;  %v86_v32 = vld [vmem:[%s15493_s1 + $0x110] sm:$0xff] }
   0x8   :  { %7856 = vmatprep.subr.bf16.mxu1 %v7855_v17  ;;  %v95_v28 = vld [vmem:[%s15493_s1 + $0x158] sm:$0xff]  ;;  %v92_v31 = vld [vmem:[%s15493_s1 + $0x140] sm:$0xff]  ;;  %v94_v33 = vld [vmem:[%s15493_s1 + $0x150] sm:$0xff] }
   0x9   :  { %v7859_v30 = vpack.c.bf16 %v95_v28, %v87_v27  ;;  %v7797_v34 = vpack.c.bf16 %v92_v31, %v84_v29  ;;  %v101_v35 = vld [vmem:[%s15493_s1 + $0x188] sm:$0xff]  ;;  %v103_v37 = vld [vmem:[%s15493_s1 + $0x198] sm:$0xff]  ;;  %v7861_v38 = vpack.c.bf16 %v94_v33, %v86_v32  ;;  %v100_v41 = vld [vmem:[%s15493_s1 + $0x180] sm:$0xff] }
   0xa   :  { %7794 = vmatpush1.bf16.msra.mxu0 %v7793_v21  ;;  %v109_v36 = vld [vmem:[%s15493_s1 + $0x1c8] sm:$0xff]  ;;  %v111_v40 = vld [vmem:[%s15493_s1 + $0x1d8] sm:$0xff]  ;;  %v108_v42 = vld [vmem:[%s15493_s1 + $0x1c0] sm:$0xff] }
   0xb   :  { %7858 = vmatpush1.bf16.msra.mxu1 %v7857_v25  ;;  %7796 = vmatprep.subr.bf16.mxu0 %v7795_v26  ;;  %v7799_v39 = vpack.c.bf16 %v109_v36, %v101_v35  ;;  %v7863_v43 = vpack.c.bf16 %v111_v40, %v103_v37  ;;  %v102_v44 = vld [vmem:[%s15493_s1 + $0x190] sm:$0xff]  ;;  %v117_v46 = vld [vmem:[%s15493_s1 + $0x208] sm:$0xff]  ;;  %v119_v48 = vld [vmem:[%s15493_s1 + $0x218] sm:$0xff]  ;;  %v7801_v50 = vpack.c.bf16 %v108_v42, %v100_v41 }
   0xc   :  { %7860 = vmatprep.subr.bf16.mxu1 %v7859_v30  ;;  %v110_v45 = vld [vmem:[%s15493_s1 + $0x1d0] sm:$0xff]  ;;  %v125_v47 = vld [vmem:[%s15493_s1 + $0x248] sm:$0xff]  ;;  %v127_v49 = vld [vmem:[%s15493_s1 + $0x258] sm:$0xff] }
   0xd   :  { %v7865_v51 = vpack.c.bf16 %v110_v45, %v102_v44  ;;  %v7803_v52 = vpack.c.bf16 %v125_v47, %v117_v46  ;;  %v116_v53 = vld [vmem:[%s15493_s1 + $0x200] sm:$0xff]  ;;  %v118_v55 = vld [vmem:[%s15493_s1 + $0x210] sm:$0xff]  ;;  %v7867_v56 = vpack.c.bf16 %v127_v49, %v119_v48  ;;  %v133_v58 = vld [vmem:[%s15493_s1 + $0x288] sm:$0xff] }
   0xe   :  { %7798 = vmatpush1.bf16.msra.mxu0 %v7797_v34  ;;  %v124_v54 = vld [vmem:[%s15493_s1 + $0x240] sm:$0xff]  ;;  %v126_v57 = vld [vmem:[%s15493_s1 + $0x250] sm:$0xff]  ;;  %v141_v59 = vld [vmem:[%s15493_s1 + $0x2c8] sm:$0xff] }
   0xf   :  { %7862 = vmatpush1.bf16.msra.mxu1 %v7861_v38  ;;  %7800 = vmatprep.subr.bf16.mxu0 %v7799_v39  ;;  %v135_v60 = vld [vmem:[%s15493_s1 + $0x298] sm:$0xff]  ;;  %v7805_v62 = vpack.c.bf16 %v124_v54, %v116_v53  ;;  %v7869_v63 = vpack.c.bf16 %v126_v57, %v118_v55  ;;  %v7807_v0 = vpack.c.bf16 %v141_v59, %v133_v58  ;;  %v132_v1 = vld [vmem:[%s15493_s1 + $0x280] sm:$0xff]  ;;  %v134_v3 = vld [vmem:[%s15493_s1 + $0x290] sm:$0xff] }
  0x10   :  { %7864 = vmatprep.subr.bf16.mxu1 %v7863_v43  ;;  %v143_v61 = vld [vmem:[%s15493_s1 + $0x2d8] sm:$0xff]  ;;  %v140_v2 = vld [vmem:[%s15493_s1 + $0x2c0] sm:$0xff]  ;;  %v142_v5 = vld [vmem:[%s15493_s1 + $0x2d0] sm:$0xff] }
  0x11   :  { %v7871_v4 = vpack.c.bf16 %v143_v61, %v135_v60  ;;  %v149_v6 = vld [vmem:[%s15493_s1 + $0x308] sm:$0xff]  ;;  %v151_v8 = vld [vmem:[%s15493_s1 + $0x318] sm:$0xff]  ;;  %v7809_v10 = vpack.c.bf16 %v140_v2, %v132_v1  ;;  %v7873_v11 = vpack.c.bf16 %v142_v5, %v134_v3  ;;  %v148_v13 = vld [vmem:[%s15493_s1 + $0x300] sm:$0xff] }
  0x12   :  { %7802 = vmatpush1.bf16.msra.mxu0 %v7801_v50  ;;  %v157_v7 = vld [vmem:[%s15493_s1 + $0x348] sm:$0xff]  ;;  %v159_v9 = vld [vmem:[%s15493_s1 + $0x358] sm:$0xff]  ;;  %v156_v14 = vld [vmem:[%s15493_s1 + $0x340] sm:$0xff] }
  0x13   :  { %7866 = vmatpush1.bf16.msra.mxu1 %v7865_v51  ;;  %7804 = vmatprep.subr.bf16.mxu0 %v7803_v52  ;;  %v7811_v12 = vpack.c.bf16 %v157_v7, %v149_v6  ;;  %v150_v15 = vld [vmem:[%s15493_s1 + $0x310] sm:$0xff]  ;;  %v7875_v16 = vpack.c.bf16 %v159_v9, %v151_v8  ;;  %v165_v18 = vld [vmem:[%s15493_s1 + $0x388] sm:$0xff]  ;;  %v167_v20 = vld [vmem:[%s15493_s1 + $0x398] sm:$0xff]  ;;  %v7813_v22 = vpack.c.bf16 %v156_v14, %v148_v13 }
  0x14   :  { %7868 = vmatprep.subr.bf16.mxu1 %v7867_v56  ;;  %v158_v17 = vld [vmem:[%s15493_s1 + $0x350] sm:$0xff]  ;;  %v173_v19 = vld [vmem:[%s15493_s1 + $0x3c8] sm:$0xff]  ;;  %v175_v21 = vld [vmem:[%s15493_s1 + $0x3d8] sm:$0xff] }
  0x15   :  { %v7877_v23 = vpack.c.bf16 %v158_v17, %v150_v15  ;;  %v7815_v24 = vpack.c.bf16 %v173_v19, %v165_v18  ;;  %v164_v25 = vld [vmem:[%s15493_s1 + $0x380] sm:$0xff]  ;;  %v166_v27 = vld [vmem:[%s15493_s1 + $0x390] sm:$0xff]  ;;  %v7879_v28 = vpack.c.bf16 %v175_v21, %v167_v20  ;;  %v181_v30 = vld [vmem:[%s15493_s1 + $0x408] sm:$0xff] }
  0x16   :  { %7806 = vmatpush1.bf16.msra.mxu0 %v7805_v62  ;;  %v172_v26 = vld [vmem:[%s15493_s1 + $0x3c0] sm:$0xff]  ;;  %v174_v29 = vld [vmem:[%s15493_s1 + $0x3d0] sm:$0xff]  ;;  %v189_v31 = vld [vmem:[%s15493_s1 + $0x448] sm:$0xff] }
  0x17   :  { %7870 = vmatpush1.bf16.msra.mxu1 %v7869_v63  ;;  %7808 = vmatprep.subr.bf16.mxu0 %v7807_v0  ;;  %v183_v32 = vld [vmem:[%s15493_s1 + $0x418] sm:$0xff]  ;;  %v7817_v34 = vpack.c.bf16 %v172_v26, %v164_v25  ;;  %v7881_v35 = vpack.c.bf16 %v174_v29, %v166_v27  ;;  %v7819_v36 = vpack.c.bf16 %v189_v31, %v181_v30  ;;  %v180_v37 = vld [vmem:[%s15493_s1 + $0x400] sm:$0xff]  ;;  %v182_v39 = vld [vmem:[%s15493_s1 + $0x410] sm:$0xff] }
  0x18   :  { %7872 = vmatprep.subr.bf16.mxu1 %v7871_v4  ;;  %v191_v33 = vld [vmem:[%s15493_s1 + $0x458] sm:$0xff]  ;;  %v188_v38 = vld [vmem:[%s15493_s1 + $0x440] sm:$0xff]  ;;  %v190_v41 = vld [vmem:[%s15493_s1 + $0x450] sm:$0xff] }
  0x19   :  { %v7883_v40 = vpack.c.bf16 %v191_v33, %v183_v32  ;;  %v197_v42 = vld [vmem:[%s15493_s1 + $0x488] sm:$0xff]  ;;  %v199_v44 = vld [vmem:[%s15493_s1 + $0x498] sm:$0xff]  ;;  %v7821_v46 = vpack.c.bf16 %v188_v38, %v180_v37  ;;  %v7885_v47 = vpack.c.bf16 %v190_v41, %v182_v39  ;;  %v196_v49 = vld [vmem:[%s15493_s1 + $0x480] sm:$0xff] }
  0x1a   :  { %7810 = vmatpush1.bf16.msra.mxu0 %v7809_v10  ;;  %v205_v43 = vld [vmem:[%s15493_s1 + $0x4c8] sm:$0xff]  ;;  %v207_v45 = vld [vmem:[%s15493_s1 + $0x4d8] sm:$0xff]  ;;  %v204_v50 = vld [vmem:[%s15493_s1 + $0x4c0] sm:$0xff] }
  0x1b   :  { %7874 = vmatpush1.bf16.msra.mxu1 %v7873_v11  ;;  %7812 = vmatprep.subr.bf16.mxu0 %v7811_v12  ;;  %v7823_v48 = vpack.c.bf16 %v205_v43, %v197_v42  ;;  %v198_v51 = vld [vmem:[%s15493_s1 + $0x490] sm:$0xff]  ;;  %v7887_v52 = vpack.c.bf16 %v207_v45, %v199_v44  ;;  %v213_v54 = vld [vmem:[%s15493_s1 + $0x508] sm:$0xff]  ;;  %v215_v56 = vld [vmem:[%s15493_s1 + $0x518] sm:$0xff]  ;;  %v7825_v58 = vpack.c.bf16 %v204_v50, %v196_v49 }
  0x1c   :  { %7876 = vmatprep.subr.bf16.mxu1 %v7875_v16  ;;  %v206_v53 = vld [vmem:[%s15493_s1 + $0x4d0] sm:$0xff]  ;;  %v221_v55 = vld [vmem:[%s15493_s1 + $0x548] sm:$0xff]  ;;  %v223_v57 = vld [vmem:[%s15493_s1 + $0x558] sm:$0xff] }
  0x1d   :  { %v7889_v59 = vpack.c.bf16 %v206_v53, %v198_v51  ;;  %v7827_v60 = vpack.c.bf16 %v221_v55, %v213_v54  ;;  %v212_v61 = vld [vmem:[%s15493_s1 + $0x500] sm:$0xff]  ;;  %v214_v63 = vld [vmem:[%s15493_s1 + $0x510] sm:$0xff]  ;;  %v7891_v0 = vpack.c.bf16 %v223_v57, %v215_v56  ;;  %v229_v2 = vld [vmem:[%s15493_s1 + $0x588] sm:$0xff] }
  0x1e   :  { %7814 = vmatpush1.bf16.msra.mxu0 %v7813_v22  ;;  %v220_v62 = vld [vmem:[%s15493_s1 + $0x540] sm:$0xff]  ;;  %v222_v1 = vld [vmem:[%s15493_s1 + $0x550] sm:$0xff]  ;;  %v237_v3 = vld [vmem:[%s15493_s1 + $0x5c8] sm:$0xff] }
  0x1f   :  { %7878 = vmatpush1.bf16.msra.mxu1 %v7877_v23  ;;  %7816 = vmatprep.subr.bf16.mxu0 %v7815_v24  ;;  %v231_v4 = vld [vmem:[%s15493_s1 + $0x598] sm:$0xff]  ;;  %v7829_v6 = vpack.c.bf16 %v220_v62, %v212_v61  ;;  %v228_v7 = vld [vmem:[%s15493_s1 + $0x580] sm:$0xff]  ;;  %v7893_v8 = vpack.c.bf16 %v222_v1, %v214_v63  ;;  %v7831_v9 = vpack.c.bf16 %v237_v3, %v229_v2  ;;  %v230_v11 = vld [vmem:[%s15493_s1 + $0x590] sm:$0xff] }
  0x20   :  { %7880 = vmatprep.subr.bf16.mxu1 %v7879_v28  ;;  %v239_v5 = vld [vmem:[%s15493_s1 + $0x5d8] sm:$0xff]  ;;  %v236_v10 = vld [vmem:[%s15493_s1 + $0x5c0] sm:$0xff]  ;;  %v238_v12 = vld [vmem:[%s15493_s1 + $0x5d0] sm:$0xff] }
  0x21   :  { %v7895_v13 = vpack.c.bf16 %v239_v5, %v231_v4  ;;  %v245_v14 = vld [vmem:[%s15493_s1 + $0x608] sm:$0xff]  ;;  %v247_v17 = vld [vmem:[%s15493_s1 + $0x618] sm:$0xff]  ;;  %v7833_v19 = vpack.c.bf16 %v236_v10, %v228_v7  ;;  %v7897_v20 = vpack.c.bf16 %v238_v12, %v230_v11  ;;  %v244_v22 = vld [vmem:[%s15493_s1 + $0x600] sm:$0xff] }
  0x22   :  { %7818 = vmatpush1.bf16.msra.mxu0 %v7817_v34  ;;  %v253_v15 = vld [vmem:[%s15493_s1 + $0x648] sm:$0xff]  ;;  %v255_v18 = vld [vmem:[%s15493_s1 + $0x658] sm:$0xff]  ;;  %v252_v23 = vld [vmem:[%s15493_s1 + $0x640] sm:$0xff] }
  0x23   :  { %7882 = vmatpush1.bf16.msra.mxu1 %v7881_v35  ;;  %7820 = vmatprep.subr.bf16.mxu0 %v7819_v36  ;;  %v10727_v16 = vld [vmem:[%s15492_s0 + $0x8] sm:$0xff]  ;;  %v7835_v21 = vpack.c.bf16 %v253_v15, %v245_v14  ;;  %v246_v24 = vld [vmem:[%s15493_s1 + $0x610] sm:$0xff]  ;;  %v7899_v25 = vpack.c.bf16 %v255_v18, %v247_v17  ;;  %v263_v29 = vld [vmem:[%s15493_s1 + $0x698] sm:$0xff]  ;;  %v7837_v31 = vpack.c.bf16 %v252_v23, %v244_v22 }
  0x24   :  { %7884 = vmatprep.subr.bf16.mxu1 %v7883_v40  ;;  %414 = vmatprep.mubr.f32.mxu0 %v10727_v16  ;;  %v254_v26 = vld [vmem:[%s15493_s1 + $0x650] sm:$0xff]  ;;  %v261_v27 = vld [vmem:[%s15493_s1 + $0x688] sm:$0xff]  ;;  %v271_v30 = vld [vmem:[%s15493_s1 + $0x6d8] sm:$0xff] }
  0x25   :  { %491 = vmatprep.mubr.f32.mxu1 %v10727_v16  ;;  %v269_v28 = vld [vmem:[%s15493_s1 + $0x6c8] sm:$0xff]  ;;  %v7901_v32 = vpack.c.bf16 %v254_v26, %v246_v24  ;;  %v260_v34 = vld [vmem:[%s15493_s1 + $0x680] sm:$0xff]  ;;  %v262_v36 = vld [vmem:[%s15493_s1 + $0x690] sm:$0xff]  ;;  %v7903_v37 = vpack.c.bf16 %v271_v30, %v263_v29 }
  0x26   :  { %7822 = vmatpush1.bf16.msra.mxu0 %v7821_v46  ;;  %v7839_v33 = vpack.c.bf16 %v269_v28, %v261_v27  ;;  %v268_v35 = vld [vmem:[%s15493_s1 + $0x6c0] sm:$0xff]  ;;  %v270_v38 = vld [vmem:[%s15493_s1 + $0x6d0] sm:$0xff]  ;;  %v277_v39 = vld [vmem:[%s15493_s1 + $0x708] sm:$0xff] }
  0x27   :  { %7886 = vmatpush1.bf16.msra.mxu1 %v7885_v47  ;;  %7824 = vmatprep.subr.bf16.mxu0 %v7823_v48  ;;  %v285_v40 = vld [vmem:[%s15493_s1 + $0x748] sm:$0xff]  ;;  %v279_v41 = vld [vmem:[%s15493_s1 + $0x718] sm:$0xff]  ;;  %v7841_v43 = vpack.c.bf16 %v268_v35, %v260_v34  ;;  %v7905_v44 = vpack.c.bf16 %v270_v38, %v262_v36  ;;  %v276_v46 = vld [vmem:[%s15493_s1 + $0x700] sm:$0xff] }
  0x28   :  { %7888 = vmatprep.subr.bf16.mxu1 %v7887_v52  ;;  %v287_v42 = vld [vmem:[%s15493_s1 + $0x758] sm:$0xff]  ;;  %v7843_v45 = vpack.c.bf16 %v285_v40, %v277_v39  ;;  %v284_v47 = vld [vmem:[%s15493_s1 + $0x740] sm:$0xff]  ;;  %v278_v48 = vld [vmem:[%s15493_s1 + $0x710] sm:$0xff] }
  0x29   :  { %v7907_v49 = vpack.c.bf16 %v287_v42, %v279_v41  ;;  %v286_v50 = vld [vmem:[%s15493_s1 + $0x750] sm:$0xff]  ;;  %v293_v51 = vld [vmem:[%s15493_s1 + $0x788] sm:$0xff]  ;;  %v295_v53 = vld [vmem:[%s15493_s1 + $0x798] sm:$0xff]  ;;  %v7845_v55 = vpack.c.bf16 %v284_v47, %v276_v46 }
  0x2a   :  { %7826 = vmatpush1.bf16.msra.mxu0 %v7825_v58  ;;  %v301_v52 = vld [vmem:[%s15493_s1 + $0x7c8] sm:$0xff]  ;;  %v303_v54 = vld [vmem:[%s15493_s1 + $0x7d8] sm:$0xff]  ;;  %v7909_v56 = vpack.c.bf16 %v286_v50, %v278_v48  ;;  %v292_v58 = vld [vmem:[%s15493_s1 + $0x780] sm:$0xff] }
  0x2b   :  { %7890 = vmatpush1.bf16.msra.mxu1 %v7889_v59  ;;  %7828 = vmatprep.subr.bf16.mxu0 %v7827_v60  ;;  %v7847_v57 = vpack.c.bf16 %v301_v52, %v293_v51  ;;  %v300_v59 = vld [vmem:[%s15493_s1 + $0x7c0] sm:$0xff]  ;;  %v294_v60 = vld [vmem:[%s15493_s1 + $0x790] sm:$0xff]  ;;  %v7911_v61 = vpack.c.bf16 %v303_v54, %v295_v53  ;;  %v57_v63 = vld [vmem:[%s15493_s1 + $0x28] sm:$0xff] }
  0x2c   :  { %7892 = vmatprep.subr.bf16.mxu1 %v7891_v0  ;;  %v302_v62 = vld [vmem:[%s15493_s1 + $0x7d0] sm:$0xff]  ;;  %v65_v0 = vld [vmem:[%s15493_s1 + $0x68] sm:$0xff]  ;;  %v59_v1 = vld [vmem:[%s15493_s1 + $0x38] sm:$0xff]  ;;  %v7849_v3 = vpack.c.bf16 %v300_v59, %v292_v58 }
  0x2d   :  { %v67_v2 = vld [vmem:[%s15493_s1 + $0x78] sm:$0xff]  ;;  %v7913_v4 = vpack.c.bf16 %v302_v62, %v294_v60  ;;  %v7915_v5 = vpack.c.bf16 %v65_v0, %v57_v63  ;;  %v64_v7 = vld [vmem:[%s15493_s1 + $0x60] sm:$0xff]  ;;  %v66_v10 = vld [vmem:[%s15493_s1 + $0x70] sm:$0xff] }
  0x2e   :  { %7830 = vmatpush1.bf16.msra.mxu0 %v7829_v6  ;;  %v56_v6 = vld [vmem:[%s15493_s1 + $0x20] sm:$0xff]  ;;  %v73_v11 = vld [vmem:[%s15493_s1 + $0xa8] sm:$0xff]  ;;  %v83_v14 = vld [vmem:[%s15493_s1 + $0xf8] sm:$0xff] }
  0x2f   :  { %7894 = vmatpush1.bf16.msra.mxu1 %v7893_v8  ;;  %7832 = vmatprep.subr.bf16.mxu0 %v7831_v9  ;;  %v58_v8 = vld [vmem:[%s15493_s1 + $0x30] sm:$0xff]  ;;  %v7979_v9 = vpack.c.bf16 %v67_v2, %v59_v1  ;;  %v81_v12 = vld [vmem:[%s15493_s1 + $0xe8] sm:$0xff]  ;;  %v10860_v15 = vld [vmem:[%s15492_s0] sm:$0xff]  ;;  %v7917_v17 = vpack.c.bf16 %v64_v7, %v56_v6 }
  0x30   :  { %7896 = vmatprep.subr.bf16.mxu1 %v7895_v13  ;;  %v75_v13 = vld [vmem:[%s15493_s1 + $0xb8] sm:$0xff]  ;;  %v7981_v18 = vpack.c.bf16 %v66_v10, %v58_v8  ;;  %v74_v22 = vld [vmem:[%s15493_s1 + $0xb0] sm:$0xff]  ;;  %v97_v26 = vld [vmem:[%s15493_s1 + $0x168] sm:$0xff] }
  0x31   :  { %v7983_v23 = vpack.c.bf16 %v83_v14, %v75_v13  ;;  %v82_v24 = vld [vmem:[%s15493_s1 + $0xf0] sm:$0xff]  ;;  %v91_v27 = vld [vmem:[%s15493_s1 + $0x138] sm:$0xff]  ;;  %v113_v38 = vld [vmem:[%s15493_s1 + $0x1e8] sm:$0xff] }
  0x32   :  { %7834 = vmatpush1.bf16.msra.mxu0 %v7833_v19  ;;  %v7919_v19 = vpack.c.bf16 %v81_v12, %v73_v11  ;;  %v99_v28 = vld [vmem:[%s15493_s1 + $0x178] sm:$0xff]  ;;  %v7985_v30 = vpack.c.bf16 %v82_v24, %v74_v22  ;;  %v90_v34 = vld [vmem:[%s15493_s1 + $0x130] sm:$0xff]  ;;  %v129_v50 = vld [vmem:[%s15493_s1 + $0x268] sm:$0xff] }
  0x33   :  { %7898 = vmatpush1.bf16.msra.mxu1 %v7897_v20  ;;  %7836 = vmatprep.subr.bf16.mxu0 %v7835_v21  ;;  %v72_v20 = vld [vmem:[%s15493_s1 + $0xa0] sm:$0xff]  ;;  %v7987_v35 = vpack.c.bf16 %v99_v28, %v91_v27  ;;  %v98_v36 = vld [vmem:[%s15493_s1 + $0x170] sm:$0xff]  ;;  %v107_v39 = vld [vmem:[%s15493_s1 + $0x1b8] sm:$0xff] }
  0x34   :  { %7900 = vmatprep.subr.bf16.mxu1 %v7899_v25  ;;  %v80_v21 = vld [vmem:[%s15493_s1 + $0xe0] sm:$0xff]  ;;  %v89_v25 = vld [vmem:[%s15493_s1 + $0x128] sm:$0xff]  ;;  %v115_v40 = vld [vmem:[%s15493_s1 + $0x1f8] sm:$0xff]  ;;  %v7989_v42 = vpack.c.bf16 %v98_v36, %v90_v34 }
  0x35   :  { %v7921_v29 = vpack.c.bf16 %v80_v21, %v72_v20  ;;  %v106_v46 = vld [vmem:[%s15493_s1 + $0x1b0] sm:$0xff]  ;;  %v7991_v47 = vpack.c.bf16 %v115_v40, %v107_v39  ;;  %v123_v51 = vld [vmem:[%s15493_s1 + $0x238] sm:$0xff]  ;;  %v145_v62 = vld [vmem:[%s15493_s1 + $0x2e8] sm:$0xff] }
  0x36   :  { %7838 = vmatpush1.bf16.msra.mxu0 %v7837_v31  ;;  %v7923_v31 = vpack.c.bf16 %v97_v26, %v89_v25  ;;  %v114_v48 = vld [vmem:[%s15493_s1 + $0x1f0] sm:$0xff]  ;;  %v131_v52 = vld [vmem:[%s15493_s1 + $0x278] sm:$0xff]  ;;  %v136_v2 = vld [vmem:[%s15493_s1 + $0x2a0] sm:$0xff] }
  0x37   :  { %7902 = vmatpush1.bf16.msra.mxu1 %v7901_v32  ;;  %7840 = vmatprep.subr.bf16.mxu0 %v7839_v33  ;;  %v88_v32 = vld [vmem:[%s15493_s1 + $0x120] sm:$0xff]  ;;  %v7993_v54 = vpack.c.bf16 %v114_v48, %v106_v46  ;;  %v122_v58 = vld [vmem:[%s15493_s1 + $0x230] sm:$0xff]  ;;  %v7995_v59 = vpack.c.bf16 %v131_v52, %v123_v51  ;;  %v139_v63 = vld [vmem:[%s15493_s1 + $0x2b8] sm:$0xff] }
  0x38   :  { %7904 = vmatprep.subr.bf16.mxu1 %v7903_v37  ;;  %v96_v33 = vld [vmem:[%s15493_s1 + $0x160] sm:$0xff]  ;;  %v105_v37 = vld [vmem:[%s15493_s1 + $0x1a8] sm:$0xff]  ;;  %v130_v60 = vld [vmem:[%s15493_s1 + $0x270] sm:$0xff] }
  0x39   :  { %v7925_v41 = vpack.c.bf16 %v96_v33, %v88_v32  ;;  %v147_v0 = vld [vmem:[%s15493_s1 + $0x2f8] sm:$0xff]  ;;  %v138_v6 = vld [vmem:[%s15493_s1 + $0x2b0] sm:$0xff]  ;;  %v161_v10 = vld [vmem:[%s15493_s1 + $0x368] sm:$0xff] }
  0x3a   :  { %7842 = vmatpush1.bf16.msra.mxu0 %v7841_v43  ;;  %v7927_v43 = vpack.c.bf16 %v113_v38, %v105_v37  ;;  %v146_v7 = vld [vmem:[%s15493_s1 + $0x2f0] sm:$0xff]  ;;  %v7999_v8 = vpack.c.bf16 %v147_v0, %v139_v63  ;;  %v155_v11 = vld [vmem:[%s15493_s1 + $0x338] sm:$0xff]  ;;  %v152_v20 = vld [vmem:[%s15493_s1 + $0x320] sm:$0xff] }
  0x3b   :  { %7906 = vmatpush1.bf16.msra.mxu1 %v7905_v44  ;;  %7844 = vmatprep.subr.bf16.mxu0 %v7843_v45  ;;  %v104_v44 = vld [vmem:[%s15493_s1 + $0x1a0] sm:$0xff]  ;;  %v163_v12 = vld [vmem:[%s15493_s1 + $0x378] sm:$0xff]  ;;  %v10992_v14 = vld [vmem:[%s15492_s0 + $0x10] sm:$0xff] }
  0x3c   :  { %7908 = vmatprep.subr.bf16.mxu1 %v7907_v49  ;;  %v112_v45 = vld [vmem:[%s15493_s1 + $0x1e0] sm:$0xff]  ;;  %v121_v49 = vld [vmem:[%s15493_s1 + $0x228] sm:$0xff]  ;;  %v10987_v13 = vld [vmem:[%s15492_s0 + $0x18] sm:$0xff] }
  0x3d   :  { %v7929_v53 = vpack.c.bf16 %v112_v45, %v104_v44  ;;  %v160_v21 = vld [vmem:[%s15493_s1 + $0x360] sm:$0xff]  ;;  %v154_v22 = vld [vmem:[%s15493_s1 + $0x330] sm:$0xff]  ;;  %v169_v25 = vld [vmem:[%s15493_s1 + $0x3a8] sm:$0xff] }
  0x3e   :  { %7846 = vmatpush1.bf16.msra.mxu0 %v7845_v55  ;;  %v7931_v55 = vpack.c.bf16 %v129_v50, %v121_v49  ;;  %v162_v24 = vld [vmem:[%s15493_s1 + $0x370] sm:$0xff]  ;;  %v177_v26 = vld [vmem:[%s15493_s1 + $0x3e8] sm:$0xff]  ;;  %v171_v27 = vld [vmem:[%s15493_s1 + $0x3b8] sm:$0xff] }
  0x3f   :  { %7910 = vmatpush1.bf16.msra.mxu1 %v7909_v56  ;;  %7848 = vmatprep.subr.bf16.mxu0 %v7847_v57  ;;  %v120_v56 = vld [vmem:[%s15493_s1 + $0x220] sm:$0xff]  ;;  %v179_v28 = vld [vmem:[%s15493_s1 + $0x3f8] sm:$0xff]  ;;  %v170_v34 = vld [vmem:[%s15493_s1 + $0x3b0] sm:$0xff] }
  0x40   :  { %7912 = vmatprep.subr.bf16.mxu1 %v7911_v61  ;;  %v128_v57 = vld [vmem:[%s15493_s1 + $0x260] sm:$0xff]  ;;  %v137_v61 = vld [vmem:[%s15493_s1 + $0x2a8] sm:$0xff]  ;;  %v178_v36 = vld [vmem:[%s15493_s1 + $0x3f0] sm:$0xff] }
  0x41   :  { %v7933_v1 = vpack.c.bf16 %v128_v57, %v120_v56  ;;  %v168_v32 = vld [vmem:[%s15493_s1 + $0x3a0] sm:$0xff]  ;;  %v185_v37 = vld [vmem:[%s15493_s1 + $0x428] sm:$0xff]  ;;  %v187_v39 = vld [vmem:[%s15493_s1 + $0x438] sm:$0xff] }
  0x42   :  { %7850 = vmatpush1.bf16.msra.mxu0 %v7849_v3  ;;  %v7997_v3 = vpack.c.bf16 %v130_v60, %v122_v58  ;;  %v176_v33 = vld [vmem:[%s15493_s1 + $0x3e0] sm:$0xff]  ;;  %v193_v38 = vld [vmem:[%s15493_s1 + $0x468] sm:$0xff]  ;;  %v195_v40 = vld [vmem:[%s15493_s1 + $0x478] sm:$0xff] }
  0x43   :  { %7914 = vmatpush1.bf16.msra.mxu1 %v7913_v4  ;;  %7916 = vmatprep.subr.bf16.mxu0 %v7915_v5  ;;  %v7935_v4 = vpack.c.bf16 %v145_v62, %v137_v61  ;;  %v144_v5 = vld [vmem:[%s15493_s1 + $0x2e0] sm:$0xff]  ;;  %v186_v45 = vld [vmem:[%s15493_s1 + $0x430] sm:$0xff]  ;;  %v8011_v46 = vpack.c.bf16 %v195_v40, %v187_v39  ;;  %v201_v48 = vld [vmem:[%s15493_s1 + $0x4a8] sm:$0xff] }
  0x44   :  { %7980 = vmatprep.subr.bf16.mxu1 %v7979_v9  ;;  %v153_v9 = vld [vmem:[%s15493_s1 + $0x328] sm:$0xff]  ;;  %v184_v44 = vld [vmem:[%s15493_s1 + $0x420] sm:$0xff]  ;;  %v203_v50 = vld [vmem:[%s15493_s1 + $0x4b8] sm:$0xff] }
  0x45   :  { %415 = vmatmul.mubr.f32.vlgmr.msra.gmra.mrb[0].mxu0 %v10860_v15  ;;  %v209_v49 = vld [vmem:[%s15493_s1 + $0x4e8] sm:$0xff]  ;;  %v211_v51 = vld [vmem:[%s15493_s1 + $0x4f8] sm:$0xff]  ;;  %v208_v56 = vld [vmem:[%s15493_s1 + $0x4e0] sm:$0xff] }
  0x46   :  { %492 = vmatmul.mubr.f32.vlgmr.msra.gmra.mrb[0].mxu1 %v10860_v15  ;;  %7918 = vmatpush1.bf16.msra.mxu0 %v7917_v17  ;;  %v7937_v17 = vpack.c.bf16 %v144_v5, %v136_v2  ;;  %v202_v57 = vld [vmem:[%s15493_s1 + $0x4b0] sm:$0xff]  ;;  %v8015_v58 = vpack.c.bf16 %v211_v51, %v203_v50  ;;  %v217_v60 = vld [vmem:[%s15493_s1 + $0x528] sm:$0xff]  ;;  %v219_v62 = vld [vmem:[%s15493_s1 + $0x538] sm:$0xff] }
  0x47   :  { %7982 = vmatpush1.bf16.msra.mxu1 %v7981_v18  ;;  %7920 = vmatprep.subr.bf16.mxu0 %v7919_v19  ;;  %v8001_v18 = vpack.c.bf16 %v146_v7, %v138_v6  ;;  %v7939_v19 = vpack.c.bf16 %v161_v10, %v153_v9  ;;  %v225_v61 = vld [vmem:[%s15493_s1 + $0x568] sm:$0xff]  ;;  %v227_v63 = vld [vmem:[%s15493_s1 + $0x578] sm:$0xff]  ;;  %v218_v5 = vld [vmem:[%s15493_s1 + $0x530] sm:$0xff] }
  0x48   :  { %7984 = vmatprep.subr.bf16.mxu1 %v7983_v23  ;;  %420 = vmatprep.mubr.f32.mxu0 %v10987_v13  ;;  %v8003_v23 = vpack.c.bf16 %v163_v12, %v155_v11  ;;  %v7955_v2 = vpack.c.bf16 %v225_v61, %v217_v60  ;;  %v8019_v6 = vpack.c.bf16 %v227_v63, %v219_v62  ;;  %v226_v7 = vld [vmem:[%s15493_s1 + $0x570] sm:$0xff]  ;;  %v241_v9 = vld [vmem:[%s15493_s1 + $0x5e8] sm:$0xff]  ;;  %v235_v10 = vld [vmem:[%s15493_s1 + $0x5b8] sm:$0xff] }
  0x49   :  { %421 = vmatmul.mubr.f32.gmra.mrb[2].mxu0 %v10992_v14  ;;  %497 = vmatprep.mubr.f32.mxu1 %v10987_v13  ;;  %v243_v11 = vld [vmem:[%s15493_s1 + $0x5f8] sm:$0xff]  ;;  %v305_v60 = vld [vmem:[%s15493_s1 + $0x7e8] sm:$0xff] }
  0x4a   :  { %7922 = vmatpush1.bf16.msra.mxu0 %v7921_v29  ;;  %568 = vmatprep.mubr.f32.mxu0 %v10727_v16  ;;  %v7941_v29 = vpack.c.bf16 %v160_v21, %v152_v20  ;;  %v240_v20 = vld [vmem:[%s15493_s1 + $0x5e0] sm:$0xff]  ;;  %v234_v21 = vld [vmem:[%s15493_s1 + $0x5b0] sm:$0xff]  ;;  %v275_v39 = vld [vmem:[%s15493_s1 + $0x6f8] sm:$0xff] }
  0x4b   :  { %7986 = vmatpush1.bf16.msra.mxu1 %v7985_v30  ;;  %7924 = vmatprep.subr.bf16.mxu0 %v7923_v31  ;;  %v8005_v30 = vpack.c.bf16 %v162_v24, %v154_v22  ;;  %v7943_v31 = vpack.c.bf16 %v177_v26, %v169_v25  ;;  %v8023_v22 = vpack.c.bf16 %v243_v11, %v235_v10  ;;  %v249_v24 = vld [vmem:[%s15493_s1 + $0x628] sm:$0xff]  ;;  %v251_v26 = vld [vmem:[%s15493_s1 + $0x638] sm:$0xff] }
  0x4c   :  { %7988 = vmatprep.subr.bf16.mxu1 %v7987_v35  ;;  %498 = vmatmul.mubr.f32.gmra.mrb[2].mxu1 %v10992_v14  ;;  %v8007_v35 = vpack.c.bf16 %v179_v28, %v171_v27  ;;  %v257_v25 = vld [vmem:[%s15493_s1 + $0x668] sm:$0xff]  ;;  %v259_v27 = vld [vmem:[%s15493_s1 + $0x678] sm:$0xff] }
  0x4d   :  { %645 = vmatprep.mubr.f32.mxu1 %v10727_v16  ;;  %v192_v16 = vld [vmem:[%s15493_s1 + $0x460] sm:$0xff]  ;;  %v291_v50 = vld [vmem:[%s15493_s1 + $0x778] sm:$0xff] }
  0x4e   :  { %7926 = vmatpush1.bf16.msra.mxu0 %v7925_v41  ;;  %v7945_v41 = vpack.c.bf16 %v176_v33, %v168_v32  ;;  %v7949_v52 = vpack.c.bf16 %v192_v16, %v184_v44  ;;  %v256_v32 = vld [vmem:[%s15493_s1 + $0x660] sm:$0xff]  ;;  %v250_v33 = vld [vmem:[%s15493_s1 + $0x630] sm:$0xff]  ;;  %v299_v61 = vld [vmem:[%s15493_s1 + $0x7b8] sm:$0xff] }
  0x4f   :  { %7990 = vmatpush1.bf16.msra.mxu1 %v7989_v42  ;;  %7928 = vmatprep.subr.bf16.mxu0 %v7927_v43  ;;  %v8009_v42 = vpack.c.bf16 %v178_v36, %v170_v34  ;;  %v7947_v43 = vpack.c.bf16 %v193_v38, %v185_v37  ;;  %v8027_v34 = vpack.c.bf16 %v259_v27, %v251_v26  ;;  %v265_v36 = vld [vmem:[%s15493_s1 + $0x6a8] sm:$0xff]  ;;  %v267_v38 = vld [vmem:[%s15493_s1 + $0x6b8] sm:$0xff]  ;;  %v272_v44 = vld [vmem:[%s15493_s1 + $0x6e0] sm:$0xff] }
  0x50   :  { %7992 = vmatprep.subr.bf16.mxu1 %v7991_v47  ;;  %v194_v47 = vld [vmem:[%s15493_s1 + $0x470] sm:$0xff]  ;;  %v273_v37 = vld [vmem:[%s15493_s1 + $0x6e8] sm:$0xff]  ;;  %v307_v62 = vld [vmem:[%s15493_s1 + $0x7f8] sm:$0xff] }
  0x51   :  { %v266_v16 = vld [vmem:[%s15493_s1 + $0x6b0] sm:$0xff]  ;;  %v685_v10 = vld [vmem:[%s15495_s3 + $0x38] sm:$0xff] }
  0x52   :  { %7930 = vmatpush1.bf16.msra.mxu0 %v7929_v53  ;;  %v8013_v53 = vpack.c.bf16 %v194_v47, %v186_v45  ;;  %v8031_v45 = vpack.c.bf16 %v275_v39, %v267_v38  ;;  %v281_v47 = vld [vmem:[%s15493_s1 + $0x728] sm:$0xff]  ;;  %v693_v26 = vld [vmem:[%s15495_s3 + $0x78] sm:$0xff] }
  0x53   :  { %7994 = vmatpush1.bf16.msra.mxu1 %v7993_v54  ;;  %7932 = vmatprep.subr.bf16.mxu0 %v7931_v55  ;;  %v7951_v54 = vpack.c.bf16 %v209_v49, %v201_v48  ;;  %v200_v55 = vld [vmem:[%s15493_s1 + $0x4a0] sm:$0xff]  ;;  %v289_v48 = vld [vmem:[%s15493_s1 + $0x768] sm:$0xff]  ;;  %v283_v49 = vld [vmem:[%s15493_s1 + $0x738] sm:$0xff] }
  0x54   :  { %7996 = vmatprep.subr.bf16.mxu1 %v7995_v59  ;;  %v210_v59 = vld [vmem:[%s15493_s1 + $0x4f0] sm:$0xff]  ;;  %v7953_v0 = vpack.c.bf16 %v208_v56, %v200_v55  ;;  %v288_v55 = vld [vmem:[%s15493_s1 + $0x760] sm:$0xff] }
  0x55   :  { %v282_v56 = vld [vmem:[%s15493_s1 + $0x730] sm:$0xff] }
  0x56   :  { %7934 = vmatpush1.bf16.msra.mxu0 %v7933_v1  ;;  %v8017_v1 = vpack.c.bf16 %v210_v59, %v202_v57  ;;  %v8035_v57 = vpack.c.bf16 %v291_v50, %v283_v49  ;;  %v297_v59 = vld [vmem:[%s15493_s1 + $0x7a8] sm:$0xff] }
  0x57   :  { %7998 = vmatpush1.bf16.msra.mxu1 %v7997_v3  ;;  %7936 = vmatprep.subr.bf16.mxu0 %v7935_v4  ;;  %v216_v3 = vld [vmem:[%s15493_s1 + $0x520] sm:$0xff] }
  0x58   :  { %8000 = vmatprep.subr.bf16.mxu1 %v7999_v8  ;;  %v224_v4 = vld [vmem:[%s15493_s1 + $0x560] sm:$0xff]  ;;  %v233_v8 = vld [vmem:[%s15493_s1 + $0x5a8] sm:$0xff] }
  0x59   :  { %v7957_v12 = vpack.c.bf16 %v224_v4, %v216_v3  ;;  %v304_v3 = vld [vmem:[%s15493_s1 + $0x7e0] sm:$0xff]  ;;  %v298_v4 = vld [vmem:[%s15493_s1 + $0x7b0] sm:$0xff] }
  0x5a   :  { %7938 = vmatpush1.bf16.msra.mxu0 %v7937_v17  ;;  %v8021_v17 = vpack.c.bf16 %v226_v7, %v218_v5  ;;  %v8039_v5 = vpack.c.bf16 %v307_v62, %v299_v61  ;;  %v679_v7 = vld [vmem:[%s15495_s3 + $0x8] sm:$0xff] }
  0x5b   :  { %8002 = vmatpush1.bf16.msra.mxu1 %v8001_v18  ;;  %7940 = vmatprep.subr.bf16.mxu0 %v7939_v19  ;;  %v7959_v18 = vpack.c.bf16 %v241_v9, %v233_v8  ;;  %v232_v19 = vld [vmem:[%s15493_s1 + $0x5a0] sm:$0xff]  ;;  %v683_v8 = vld [vmem:[%s15495_s3 + $0x28] sm:$0xff]  ;;  %v681_v9 = vld [vmem:[%s15495_s3 + $0x18] sm:$0xff] }
  0x5c   :  { %8004 = vmatprep.subr.bf16.mxu1 %v8003_v23  ;;  %v242_v23 = vld [vmem:[%s15493_s1 + $0x5f0] sm:$0xff]  ;;  %v7961_v28 = vpack.c.bf16 %v240_v20, %v232_v19  ;;  %v682_v19 = vld [vmem:[%s15495_s3 + $0x20] sm:$0xff] }
  0x5d   :  { %v680_v20 = vld [vmem:[%s15495_s3 + $0x10] sm:$0xff] }
  0x5e   :  { %7942 = vmatpush1.bf16.msra.mxu0 %v7941_v29  ;;  %v8025_v29 = vpack.c.bf16 %v242_v23, %v234_v21  ;;  %v11251_v21 = vpack.c.bf16 %v685_v10, %v681_v9  ;;  %v687_v23 = vld [vmem:[%s15495_s3 + $0x48] sm:$0xff] }
  0x5f   :  { %8006 = vmatpush1.bf16.msra.mxu1 %v8005_v30  ;;  %7944 = vmatprep.subr.bf16.mxu0 %v7943_v31  ;;  %v7963_v30 = vpack.c.bf16 %v257_v25, %v249_v24  ;;  %v248_v31 = vld [vmem:[%s15493_s1 + $0x620] sm:$0xff]  ;;  %v691_v24 = vld [vmem:[%s15495_s3 + $0x68] sm:$0xff]  ;;  %v689_v25 = vld [vmem:[%s15495_s3 + $0x58] sm:$0xff] }
  0x60   :  { %8008 = vmatprep.subr.bf16.mxu1 %v8007_v35  ;;  %v258_v35 = vld [vmem:[%s15493_s1 + $0x670] sm:$0xff]  ;;  %v7965_v40 = vpack.c.bf16 %v256_v32, %v248_v31  ;;  %v690_v31 = vld [vmem:[%s15495_s3 + $0x60] sm:$0xff] }
  0x61   :  { %v688_v32 = vld [vmem:[%s15495_s3 + $0x50] sm:$0xff] }
  0x62   :  { %7946 = vmatpush1.bf16.msra.mxu0 %v7945_v41  ;;  %v8029_v41 = vpack.c.bf16 %v258_v35, %v250_v33 }
  0x63   :  { %8010 = vmatpush1.bf16.msra.mxu1 %v8009_v42  ;;  %7948 = vmatprep.subr.bf16.mxu0 %v7947_v43  ;;  %v7967_v42 = vpack.c.bf16 %v273_v37, %v265_v36  ;;  %v264_v43 = vld [vmem:[%s15493_s1 + $0x6a0] sm:$0xff] }
  0x64   :  { %8012 = vmatprep.subr.bf16.mxu1 %v8011_v46  ;;  %v274_v46 = vld [vmem:[%s15493_s1 + $0x6f0] sm:$0xff]  ;;  %v7969_v51 = vpack.c.bf16 %v272_v44, %v264_v43 }
  0x66   :  { %7950 = vmatpush1.bf16.msra.mxu0 %v7949_v52  ;;  %v8033_v52 = vpack.c.bf16 %v274_v46, %v266_v16 }
  0x67   :  { %8014 = vmatpush1.bf16.msra.mxu1 %v8013_v53  ;;  %7952 = vmatprep.subr.bf16.mxu0 %v7951_v54  ;;  %v7971_v53 = vpack.c.bf16 %v289_v48, %v281_v47  ;;  %v280_v54 = vld [vmem:[%s15493_s1 + $0x720] sm:$0xff] }
  0x68   :  { %8016 = vmatprep.subr.bf16.mxu1 %v8015_v58  ;;  %v290_v58 = vld [vmem:[%s15493_s1 + $0x770] sm:$0xff]  ;;  %v7973_v63 = vpack.c.bf16 %v288_v55, %v280_v54 }
  0x6a   :  { %7954 = vmatpush1.bf16.msra.mxu0 %v7953_v0  ;;  %v8037_v0 = vpack.c.bf16 %v290_v58, %v282_v56 }
  0x6b   :  { %8018 = vmatpush1.bf16.msra.mxu1 %v8017_v1  ;;  %7956 = vmatprep.subr.bf16.mxu0 %v7955_v2  ;;  %v7975_v1 = vpack.c.bf16 %v305_v60, %v297_v59  ;;  %v296_v2 = vld [vmem:[%s15493_s1 + $0x7a0] sm:$0xff] }
  0x6c   :  { %8020 = vmatprep.subr.bf16.mxu1 %v8019_v6  ;;  %v306_v6 = vld [vmem:[%s15493_s1 + $0x7f0] sm:$0xff]  ;;  %v7977_v11 = vpack.c.bf16 %v304_v3, %v296_v2 }
  0x6e   :  { %7958 = vmatpush1.bf16.msra.mxu0 %v7957_v12  ;;  %v8041_v12 = vpack.c.bf16 %v306_v6, %v298_v4 }
  0x6f   :  { %8022 = vmatpush1.bf16.msra.mxu1 %v8021_v17  ;;  %7960 = vmatprep.subr.bf16.mxu0 %v7959_v18  ;;  %v11240_v17 = vpack.c.bf16 %v683_v8, %v679_v7  ;;  %v678_v18 = vld [vmem:[%s15495_s3] sm:$0xff] }
  0x70   :  { %8024 = vmatprep.subr.bf16.mxu1 %v8023_v22  ;;  %v684_v22 = vld [vmem:[%s15495_s3 + $0x30] sm:$0xff]  ;;  %v11268_v27 = vpack.c.bf16 %v682_v19, %v678_v18 }
  0x72   :  { %7962 = vmatpush1.bf16.msra.mxu0 %v7961_v28  ;;  %v686_v28 = vld [vmem:[%s15495_s3 + $0x40] sm:$0xff] }
  0x73   :  { %8026 = vmatpush1.bf16.msra.mxu1 %v8025_v29  ;;  %7964 = vmatprep.subr.bf16.mxu0 %v7963_v30  ;;  %v11274_v29 = vpack.c.bf16 %v684_v22, %v680_v20  ;;  %v11276_v30 = vpack.c.bf16 %v691_v24, %v687_v23 }
  0x74   :  { %8028 = vmatprep.subr.bf16.mxu1 %v8027_v34 }
  0x76   :  { %7966 = vmatpush1.bf16.msra.mxu0 %v7965_v40 }
  0x77   :  { %8030 = vmatpush1.bf16.msra.mxu1 %v8029_v41  ;;  %7968 = vmatprep.subr.bf16.mxu0 %v7967_v42 }
  0x78   :  { %8032 = vmatprep.subr.bf16.mxu1 %v8031_v45 }
  0x7a   :  { %7970 = vmatpush1.bf16.msra.mxu0 %v7969_v51 }
  0x7b   :  { %8034 = vmatpush1.bf16.msra.mxu1 %v8033_v52  ;;  %7972 = vmatprep.subr.bf16.mxu0 %v7971_v53 }
  0x7c   :  { %8036 = vmatprep.subr.bf16.mxu1 %v8035_v57 }
  0x7e   :  { %7974 = vmatpush1.bf16.msra.mxu0 %v7973_v63 }
  0x7f   :  { %8038 = vmatpush1.bf16.msra.mxu1 %v8037_v0  ;;  %7976 = vmatprep.subr.bf16.mxu0 %v7975_v1 }
  0x80   :  { %8040 = vmatprep.subr.bf16.mxu1 %v8039_v5 }
  0x82   :  { %7978 = vmatpush1.bf16.msra.mxu0 %v7977_v11 }
  0x83   :  { %8042 = vmatpush1.bf16.msra.mxu1 %v8041_v12  ;;  %8044 = vmatprep.subr.bf16.mxu0 %v11240_v17 }
  0x84   :  { %19 = vsyncpa [#allocation7], 0  ;;  %8076 = vmatprep.subr.bf16.mxu1 %v11251_v21  ;;  %v11285_v33 = vpack.c.bf16 %v693_v26, %v689_v25  ;;  %v692_v34 = vld [vmem:[%s15495_s3 + $0x70] sm:$0xff]  ;;  %v695_v35 = vld [vmem:[%s15495_s3 + $0x88] sm:$0xff]  ;;  %v11305_v39 = vpack.c.bf16 %v690_v31, %v686_v28  ;;  %v15507_v57 = vmov 0.0   ;;  %vm10353_vm0 = vmmov 0  }
  0x85   :  { %v699_v36 = vld [vmem:[%s15495_s3 + $0xa8] sm:$0xff]  ;;  %569 = vmatmul.mubr.f32.vlgmr.msra.gmra.mrb[4].mxu0 %v10860_v15  ;;  %v697_v37 = vld [vmem:[%s15495_s3 + $0x98] sm:$0xff]  ;;  %v11309_v40 = vpack.c.bf16 %v692_v34, %v688_v32  ;;  %v694_v42 = vld [vmem:[%s15495_s3 + $0x80] sm:$0xff]  ;;  %s10354_s20 = smov [#allocation6]  }
  0x86   :  { %v701_v38 = vld [vmem:[%s15495_s3 + $0xb8] sm:$0xff]  ;;  %646 = vmatmul.mubr.f32.vlgmr.msra.gmra.mrb[4].mxu1 %v10860_v15  ;;  %8046 = vmatpush1.bf16.msra.mxu0 %v11268_v27  ;;  %v11311_v41 = vpack.c.bf16 %v699_v36, %v695_v35  ;;  %v698_v15 = vld [vmem:[%s15495_s3 + $0xa0] sm:$0xff]  ;;  %v696_v43 = vld [vmem:[%s15495_s3 + $0x90] sm:$0xff]  ;;  %s7546_s21 = sshll.u32 %s10354_s20, 4  ;;  %s7547_s21 = int_to_ptr.vmem [resolvable:$true] %s7546_s21 }
  0x87   :  { %8078 = vmatpush1.bf16.msra.mxu1 %v11274_v29  ;;  %8048 = vmatprep.subr.bf16.mxu0 %v11276_v30  ;;  %v11323_v44 = vpack.c.bf16 %v701_v38, %v697_v37  ;;  %v700_v16 = vld [vmem:[%s15495_s3 + $0xb0] sm:$0xff]  ;;  %v703_v45 = vld [vmem:[%s15495_s3 + $0xc8] sm:$0xff]  ;;  %v705_v47 = vld [vmem:[%s15495_s3 + $0xd8] sm:$0xff]  ;;  %v11344_v49 = vpack.c.bf16 %v698_v15, %v694_v42  ;;  %p10332_p1 = scmp.lt.s32.totalorder %s7547_s21, %s7547_s21 }
  0x88   :  { %8080 = vmatprep.subr.bf16.mxu1 %v11285_v33  ;;  %v707_v46 = vld [vmem:[%s15495_s3 + $0xe8] sm:$0xff]  ;;  %574 = vmatprep.mubr.f32.mxu0 %v10987_v13  ;;  %v709_v48 = vld [vmem:[%s15495_s3 + $0xf8] sm:$0xff]  ;;  %v11349_v50 = vpack.c.bf16 %v700_v16, %v696_v43  ;;  %v706_v52 = vld [vmem:[%s15495_s3 + $0xe0] sm:$0xff] }
  0x89   :  { %651 = vmatprep.mubr.f32.mxu1 %v10987_v13  ;;  %575 = vmatmul.mubr.f32.gmra.mrb[6].mxu0 %v10992_v14  ;;  %v11351_v51 = vpack.c.bf16 %v707_v46, %v703_v45  ;;  %v702_v13 = vld [vmem:[%s15495_s3 + $0xc0] sm:$0xff]  ;;  %v11363_v53 = vpack.c.bf16 %v709_v48, %v705_v47  ;;  %v708_v54 = vld [vmem:[%s15495_s3 + $0xf0] sm:$0xff]  ;;  %v711_v55 = vld [vmem:[%s15495_s3 + $0x108] sm:$0xff] }
  0x8a   :  { %8050 = vmatpush1.bf16.msra.mxu0 %v11305_v39  ;;  %652 = vmatmul.mubr.f32.gmra.mrb[6].mxu1 %v10992_v14  ;;  %v704_v14 = vld [vmem:[%s15495_s3 + $0xd0] sm:$0xff]  ;;  %v715_v56 = vld [vmem:[%s15495_s3 + $0x128] sm:$0xff]  ;;  %v713_v58 = vld [vmem:[%s15495_s3 + $0x118] sm:$0xff]  ;;  %v11383_v60 = vpack.c.bf16 %v706_v52, %v702_v13 }
  0x8b   :  { %8082 = vmatpush1.bf16.msra.mxu1 %v11309_v40  ;;  %8052 = vmatprep.subr.bf16.mxu0 %v11311_v41  ;;  %v717_v59 = vld [vmem:[%s15495_s3 + $0x138] sm:$0xff]  ;;  %v11387_v61 = vpack.c.bf16 %v708_v54, %v704_v14  ;;  %v11389_v62 = vpack.c.bf16 %v715_v56, %v711_v55  ;;  %v710_v63 = vld [vmem:[%s15495_s3 + $0x100] sm:$0xff]  ;;  %v712_v1 = vld [vmem:[%s15495_s3 + $0x110] sm:$0xff] }
  0x8c   :  { %8084 = vmatprep.subr.bf16.mxu1 %v11323_v44  ;;  %806 = vmatprep.mubr.f32.mxu0 %v15507_v57  ;;  %v714_v0 = vld [vmem:[%s15495_s3 + $0x120] sm:$0xff]  ;;  %v11401_v2 = vpack.c.bf16 %v717_v59, %v713_v58  ;;  %v716_v3 = vld [vmem:[%s15495_s3 + $0x130] sm:$0xff]  ;;  %v719_v4 = vld [vmem:[%s15495_s3 + $0x148] sm:$0xff] }
  0x8d   :  { %877 = vmatprep.mubr.f32.mxu1 %v15507_v57  ;;  %v723_v5 = vld [vmem:[%s15495_s3 + $0x168] sm:$0xff]  ;;  %v721_v6 = vld [vmem:[%s15495_s3 + $0x158] sm:$0xff]  ;;  %v11419_v8 = vpack.c.bf16 %v714_v0, %v710_v63  ;;  %v11423_v9 = vpack.c.bf16 %v716_v3, %v712_v1  ;;  %v718_v11 = vld [vmem:[%s15495_s3 + $0x140] sm:$0xff] }
  0x8e   :  { %8054 = vmatpush1.bf16.msra.mxu0 %v11344_v49  ;;  %v725_v7 = vld [vmem:[%s15495_s3 + $0x178] sm:$0xff]  ;;  %v11425_v10 = vpack.c.bf16 %v723_v5, %v719_v4  ;;  %v722_v12 = vld [vmem:[%s15495_s3 + $0x160] sm:$0xff]  ;;  %v720_v18 = vld [vmem:[%s15495_s3 + $0x150] sm:$0xff] }
  0x8f   :  { %8086 = vmatpush1.bf16.msra.mxu1 %v11349_v50  ;;  %8056 = vmatprep.subr.bf16.mxu0 %v11351_v51  ;;  %v11437_v19 = vpack.c.bf16 %v725_v7, %v721_v6  ;;  %v724_v20 = vld [vmem:[%s15495_s3 + $0x170] sm:$0xff]  ;;  %v727_v22 = vld [vmem:[%s15495_s3 + $0x188] sm:$0xff]  ;;  %v729_v24 = vld [vmem:[%s15495_s3 + $0x198] sm:$0xff]  ;;  %v11455_v26 = vpack.c.bf16 %v722_v12, %v718_v11 }
  0x90   :  { %8088 = vmatprep.subr.bf16.mxu1 %v11363_v53  ;;  %v731_v23 = vld [vmem:[%s15495_s3 + $0x1a8] sm:$0xff]  ;;  %v733_v25 = vld [vmem:[%s15495_s3 + $0x1b8] sm:$0xff]  ;;  %v11459_v28 = vpack.c.bf16 %v724_v20, %v720_v18  ;;  %v726_v32 = vld [vmem:[%s15495_s3 + $0x180] sm:$0xff] }
  0x91   :  { %v11461_v31 = vpack.c.bf16 %v731_v23, %v727_v22  ;;  %v730_v34 = vld [vmem:[%s15495_s3 + $0x1a0] sm:$0xff]  ;;  %v728_v35 = vld [vmem:[%s15495_s3 + $0x190] sm:$0xff]  ;;  %v11473_v36 = vpack.c.bf16 %v733_v25, %v729_v24  ;;  %v735_v38 = vld [vmem:[%s15495_s3 + $0x1c8] sm:$0xff] }
  0x92   :  { %8058 = vmatpush1.bf16.msra.mxu0 %v11383_v60  ;;  %v732_v37 = vld [vmem:[%s15495_s3 + $0x1b0] sm:$0xff]  ;;  %v739_v42 = vld [vmem:[%s15495_s3 + $0x1e8] sm:$0xff]  ;;  %v737_v15 = vld [vmem:[%s15495_s3 + $0x1d8] sm:$0xff]  ;;  %v11491_v16 = vpack.c.bf16 %v730_v34, %v726_v32 }
  0x93   :  { %8090 = vmatpush1.bf16.msra.mxu1 %v11387_v61  ;;  %8060 = vmatprep.subr.bf16.mxu0 %v11389_v62  ;;  %v741_v43 = vld [vmem:[%s15495_s3 + $0x1f8] sm:$0xff]  ;;  %v11495_v45 = vpack.c.bf16 %v732_v37, %v728_v35  ;;  %v11497_v46 = vpack.c.bf16 %v739_v42, %v735_v38  ;;  %v734_v47 = vld [vmem:[%s15495_s3 + $0x1c0] sm:$0xff]  ;;  %v736_v13 = vld [vmem:[%s15495_s3 + $0x1d0] sm:$0xff] }
  0x94   :  { %8092 = vmatprep.subr.bf16.mxu1 %v11401_v2  ;;  %v738_v48 = vld [vmem:[%s15495_s3 + $0x1e0] sm:$0xff]  ;;  %v11509_v52 = vpack.c.bf16 %v741_v43, %v737_v15  ;;  %v740_v14 = vld [vmem:[%s15495_s3 + $0x1f0] sm:$0xff]  ;;  %v893_v54 = vld [vmem:[%s15496_s4 + $0x8] sm:$0xff] }
  0x95   :  { %v897_v55 = vld [vmem:[%s15496_s4 + $0x28] sm:$0xff]  ;;  %v895_v56 = vld [vmem:[%s15496_s4 + $0x18] sm:$0xff]  ;;  %v11527_v59 = vpack.c.bf16 %v738_v48, %v734_v47  ;;  %v11531_v63 = vpack.c.bf16 %v740_v14, %v736_v13  ;;  %v892_v1 = vld [vmem:[%s15496_s4] sm:$0xff] }
  0x96   :  { %8062 = vmatpush1.bf16.msra.mxu0 %v11419_v8  ;;  %v899_v58 = vld [vmem:[%s15496_s4 + $0x38] sm:$0xff]  ;;  %v11533_v0 = vpack.c.bf16 %v897_v55, %v893_v54  ;;  %v896_v3 = vld [vmem:[%s15496_s4 + $0x20] sm:$0xff]  ;;  %v894_v4 = vld [vmem:[%s15496_s4 + $0x10] sm:$0xff] }
  0x97   :  { %8094 = vmatpush1.bf16.msra.mxu1 %v11423_v9  ;;  %8064 = vmatprep.subr.bf16.mxu0 %v11425_v10  ;;  %v11545_v5 = vpack.c.bf16 %v899_v58, %v895_v56  ;;  %v898_v6 = vld [vmem:[%s15496_s4 + $0x30] sm:$0xff]  ;;  %v901_v7 = vld [vmem:[%s15496_s4 + $0x48] sm:$0xff]  ;;  %v903_v12 = vld [vmem:[%s15496_s4 + $0x58] sm:$0xff]  ;;  %v11563_v20 = vpack.c.bf16 %v896_v3, %v892_v1 }
  0x98   :  { %8096 = vmatprep.subr.bf16.mxu1 %v11437_v19  ;;  %v905_v11 = vld [vmem:[%s15496_s4 + $0x68] sm:$0xff]  ;;  %v907_v18 = vld [vmem:[%s15496_s4 + $0x78] sm:$0xff]  ;;  %v11567_v22 = vpack.c.bf16 %v898_v6, %v894_v4  ;;  %v900_v24 = vld [vmem:[%s15496_s4 + $0x40] sm:$0xff] }
  0x99   :  { %v11569_v23 = vpack.c.bf16 %v905_v11, %v901_v7  ;;  %v904_v25 = vld [vmem:[%s15496_s4 + $0x60] sm:$0xff]  ;;  %v902_v32 = vld [vmem:[%s15496_s4 + $0x50] sm:$0xff]  ;;  %v11581_v34 = vpack.c.bf16 %v907_v18, %v903_v12  ;;  %v909_v37 = vld [vmem:[%s15496_s4 + $0x88] sm:$0xff] }
  0x9a   :  { %8066 = vmatpush1.bf16.msra.mxu0 %v11455_v26  ;;  %v906_v35 = vld [vmem:[%s15496_s4 + $0x70] sm:$0xff]  ;;  %v913_v38 = vld [vmem:[%s15496_s4 + $0xa8] sm:$0xff]  ;;  %v911_v42 = vld [vmem:[%s15496_s4 + $0x98] sm:$0xff]  ;;  %v11601_v43 = vpack.c.bf16 %v904_v25, %v900_v24 }
  0x9b   :  { %8098 = vmatpush1.bf16.msra.mxu1 %v11459_v28  ;;  %8068 = vmatprep.subr.bf16.mxu0 %v11461_v31  ;;  %v915_v15 = vld [vmem:[%s15496_s4 + $0xb8] sm:$0xff]  ;;  %v11605_v47 = vpack.c.bf16 %v906_v35, %v902_v32  ;;  %v11607_v48 = vpack.c.bf16 %v913_v38, %v909_v37  ;;  %v908_v13 = vld [vmem:[%s15496_s4 + $0x80] sm:$0xff]  ;;  %v910_v54 = vld [vmem:[%s15496_s4 + $0x90] sm:$0xff] }
  0x9c   :  { %8100 = vmatprep.subr.bf16.mxu1 %v11473_v36  ;;  %v912_v14 = vld [vmem:[%s15496_s4 + $0xa0] sm:$0xff]  ;;  %v11619_v55 = vpack.c.bf16 %v915_v15, %v911_v42  ;;  %v914_v56 = vld [vmem:[%s15496_s4 + $0xb0] sm:$0xff]  ;;  %v917_v58 = vld [vmem:[%s15496_s4 + $0xc8] sm:$0xff] }
  0x9d   :  { %v921_v1 = vld [vmem:[%s15496_s4 + $0xe8] sm:$0xff]  ;;  %v919_v3 = vld [vmem:[%s15496_s4 + $0xd8] sm:$0xff]  ;;  %v11639_v6 = vpack.c.bf16 %v912_v14, %v908_v13  ;;  %v11643_v7 = vpack.c.bf16 %v914_v56, %v910_v54  ;;  %v916_v12 = vld [vmem:[%s15496_s4 + $0xc0] sm:$0xff] }
  0x9e   :  { %8070 = vmatpush1.bf16.msra.mxu0 %v11491_v16  ;;  %v923_v4 = vld [vmem:[%s15496_s4 + $0xf8] sm:$0xff]  ;;  %v11645_v11 = vpack.c.bf16 %v921_v1, %v917_v58  ;;  %v920_v18 = vld [vmem:[%s15496_s4 + $0xe0] sm:$0xff]  ;;  %v918_v24 = vld [vmem:[%s15496_s4 + $0xd0] sm:$0xff] }
  0x9f   :  { %8102 = vmatpush1.bf16.msra.mxu1 %v11495_v45  ;;  %8072 = vmatprep.subr.bf16.mxu0 %v11497_v46  ;;  %v11657_v25 = vpack.c.bf16 %v923_v4, %v919_v3  ;;  %v922_v32 = vld [vmem:[%s15496_s4 + $0xf0] sm:$0xff]  ;;  %v925_v35 = vld [vmem:[%s15496_s4 + $0x108] sm:$0xff]  ;;  %v927_v38 = vld [vmem:[%s15496_s4 + $0x118] sm:$0xff]  ;;  %v11675_v15 = vpack.c.bf16 %v920_v18, %v916_v12 }
  0xa0   :  { %8104 = vmatprep.subr.bf16.mxu1 %v11509_v52  ;;  %v929_v37 = vld [vmem:[%s15496_s4 + $0x128] sm:$0xff]  ;;  %v931_v42 = vld [vmem:[%s15496_s4 + $0x138] sm:$0xff]  ;;  %v11679_v13 = vpack.c.bf16 %v922_v32, %v918_v24  ;;  %v924_v54 = vld [vmem:[%s15496_s4 + $0x100] sm:$0xff] }
  0xa1   :  { %v11681_v14 = vpack.c.bf16 %v929_v37, %v925_v35  ;;  %v928_v56 = vld [vmem:[%s15496_s4 + $0x120] sm:$0xff]  ;;  %v926_v58 = vld [vmem:[%s15496_s4 + $0x110] sm:$0xff]  ;;  %v11693_v1 = vpack.c.bf16 %v931_v42, %v927_v38  ;;  %v933_v4 = vld [vmem:[%s15496_s4 + $0x148] sm:$0xff] }
  0xa2   :  { %8074 = vmatpush1.bf16.msra.mxu0 %v11527_v59  ;;  %15559 = vst [vmem:[#allocation9_spill] sm:$0xff] %v11679_v13  ;;  %v930_v3 = vld [vmem:[%s15496_s4 + $0x130] sm:$0xff]  ;;  %v937_v12 = vld [vmem:[%s15496_s4 + $0x168] sm:$0xff]  ;;  %v935_v18 = vld [vmem:[%s15496_s4 + $0x158] sm:$0xff]  ;;  %v11711_v32 = vpack.c.bf16 %v928_v56, %v924_v54 }
  0xa3   :  { %8106 = vmatpush1.bf16.msra.mxu1 %v11531_v63  ;;  %8108 = vmatprep.subr.bf16.mxu0 %v11533_v0  ;;  %15560 = vst [vmem:[#allocation10_spill] sm:$0xff] %v11681_v14  ;;  %15561 = vst [vmem:[#allocation11_spill] sm:$0xff] %v11693_v1  ;;  %v939_v24 = vld [vmem:[%s15496_s4 + $0x178] sm:$0xff]  ;;  %v11715_v35 = vpack.c.bf16 %v930_v3, %v926_v58  ;;  %v11717_v37 = vpack.c.bf16 %v937_v12, %v933_v4  ;;  %v932_v38 = vld [vmem:[%s15496_s4 + $0x140] sm:$0xff] }
  0xa4   :  { %8140 = vmatprep.subr.bf16.mxu1 %v11545_v5  ;;  %15562 = vst [vmem:[#allocation12_spill] sm:$0xff] %v11711_v32  ;;  %v936_v42 = vld [vmem:[%s15496_s4 + $0x160] sm:$0xff]  ;;  %v934_v54 = vld [vmem:[%s15496_s4 + $0x150] sm:$0xff]  ;;  %v11729_v56 = vpack.c.bf16 %v939_v24, %v935_v18  ;;  %v941_v3 = vld [vmem:[%s15496_s4 + $0x188] sm:$0xff] }
  0xa5   :  { %807 = vmatmul.mubr.f32.vlgmr.msra.gmra.mrb[8].mxu0 %v15507_v57  ;;  %15563 = vst [vmem:[#allocation13_spill] sm:$0xff] %v11715_v35  ;;  %15564 = vst [vmem:[#allocation14_spill] sm:$0xff] %v11717_v37  ;;  %v938_v58 = vld [vmem:[%s15496_s4 + $0x170] sm:$0xff]  ;;  %v945_v4 = vld [vmem:[%s15496_s4 + $0x1a8] sm:$0xff]  ;;  %v11747_v24 = vpack.c.bf16 %v936_v42, %v932_v38 }
  0xa6   :  { %878 = vmatmul.mubr.f32.vlgmr.msra.gmra.mrb[8].mxu1 %v15507_v57  ;;  %8110 = vmatpush1.bf16.msra.mxu0 %v11563_v20  ;;  %15565 = vst [vmem:[#allocation15_spill] sm:$0xff] %v11729_v56  ;;  %v943_v12 = vld [vmem:[%s15496_s4 + $0x198] sm:$0xff]  ;;  %v942_v38 = vld [vmem:[%s15496_s4 + $0x190] sm:$0xff] }
  0xa7   :  { %8142 = vmatpush1.bf16.msra.mxu1 %v11567_v22  ;;  %8112 = vmatprep.subr.bf16.mxu0 %v11569_v23  ;;  %v947_v18 = vld [vmem:[%s15496_s4 + $0x1b8] sm:$0xff] }
  0xa8   :  { %8144 = vmatprep.subr.bf16.mxu1 %v11581_v34  ;;  %1020 = vmatprep.mubr.f32.mxu0 %v15507_v57  ;;  %v11765_v42 = vpack.c.bf16 %v947_v18, %v943_v12  ;;  %v955_v12 = vld [vmem:[%s15496_s4 + $0x1f8] sm:$0xff] }
  0xa9   :  { %1091 = vmatprep.mubr.f32.mxu1 %v15507_v57  ;;  %v11751_v57 = vpack.c.bf16 %v938_v58, %v934_v54  ;;  %v946_v54 = vld [vmem:[%s15496_s4 + $0x1b0] sm:$0xff]  ;;  %v949_v58 = vld [vmem:[%s15496_s4 + $0x1c8] sm:$0xff] }
  0xaa   :  { %8114 = vmatpush1.bf16.msra.mxu0 %v11601_v43 }
  0xab   :  { %8146 = vmatpush1.bf16.msra.mxu1 %v11605_v47  ;;  %8116 = vmatprep.subr.bf16.mxu0 %v11607_v48 }
  0xac   :  { %8148 = vmatprep.subr.bf16.mxu1 %v11619_v55 }
  0xae   :  { %8118 = vmatpush1.bf16.msra.mxu0 %v11639_v6 }
  0xaf   :  { %8150 = vmatpush1.bf16.msra.mxu1 %v11643_v7  ;;  %8120 = vmatprep.subr.bf16.mxu0 %v11645_v11 }
  0xb0   :  { %8152 = vmatprep.subr.bf16.mxu1 %v11657_v25 }
  0xb2   :  { %8122 = vmatpush1.bf16.msra.mxu0 %v11675_v15 }
  0xb3   :  { %8154 = vmatpush1.bf16.msra.mxu1 %v11679_v13  ;;  %8124 = vmatprep.subr.bf16.mxu0 %v11681_v14  ;;  %v940_v14 = vld [vmem:[%s15496_s4 + $0x180] sm:$0xff] }
  0xb4   :  { %8156 = vmatprep.subr.bf16.mxu1 %v11693_v1  ;;  %v11753_v1 = vpack.c.bf16 %v945_v4, %v941_v3  ;;  %v944_v13 = vld [vmem:[%s15496_s4 + $0x1a0] sm:$0xff]  ;;  %v953_v3 = vld [vmem:[%s15496_s4 + $0x1e8] sm:$0xff]  ;;  %v951_v4 = vld [vmem:[%s15496_s4 + $0x1d8] sm:$0xff] }
  0xb5   :  { %v11783_v18 = vpack.c.bf16 %v944_v13, %v940_v14  ;;  %v11798_v13 = vpack.c.bf16 %v955_v12, %v951_v4  ;;  %v950_v14 = vld [vmem:[%s15496_s4 + $0x1d0] sm:$0xff] }
  0xb6   :  { %8126 = vmatpush1.bf16.msra.mxu0 %v11711_v32  ;;  %v952_v32 = vld [vmem:[%s15496_s4 + $0x1e0] sm:$0xff] }
  0xb7   :  { %8158 = vmatpush1.bf16.msra.mxu1 %v11715_v35  ;;  %8128 = vmatprep.subr.bf16.mxu0 %v11717_v37  ;;  %v11789_v37 = vpack.c.bf16 %v953_v3, %v949_v58  ;;  %v948_v35 = vld [vmem:[%s15496_s4 + $0x1c0] sm:$0xff]  ;;  %v15566_v3 = vmov 0.0  }
  0xb8   :  { %8160 = vmatprep.subr.bf16.mxu1 %v11729_v56  ;;  %v11787_v56 = vpack.c.bf16 %v946_v54, %v942_v38  ;;  %v954_v38 = vld [vmem:[%s15496_s4 + $0x1f0] sm:$0xff]  ;;  %v11807_v54 = vpack.c.bf16 %v952_v32, %v948_v35 }
  0xb9   :  { %v11811_v58 = vpack.c.bf16 %v954_v38, %v950_v14 }
  0xba   :  { %8130 = vmatpush1.bf16.msra.mxu0 %v11747_v24 }
  0xbb   :  { %8162 = vmatpush1.bf16.msra.mxu1 %v11751_v57  ;;  %8132 = vmatprep.subr.bf16.mxu0 %v11753_v1 }
  0xbc   :  { %8164 = vmatprep.subr.bf16.mxu1 %v11765_v42 }
  0xbe   :  { %8134 = vmatpush1.bf16.msra.mxu0 %v11783_v18 }
  0xbf   :  { %8166 = vmatpush1.bf16.msra.mxu1 %v11787_v56  ;;  %8136 = vmatprep.subr.bf16.mxu0 %v11789_v37 }
  0xc0   :  { %8168 = vmatprep.subr.bf16.mxu1 %v11798_v13 }
  0xc2   :  { %8138 = vmatpush1.bf16.msra.mxu0 %v11807_v54 }
  0xc3   :  { %8170 = vmatpush1.bf16.msra.mxu1 %v11811_v58  ;;  %8172 = vmatprep.subr.bf16.mxu0 %v11240_v17  ;;  %v310_v17 = vlaneseq }
  0xc4   :  { %8204 = vmatprep.subr.bf16.mxu1 %v11251_v21 }
  0xc5   :  { %1021 = vmatmul.mubr.f32.vlgmr.msra.gmra.mrb[10].mxu0 %v15566_v3  ;;  %v11854_v21 = vshrl.u32 %v310_v17, 7 }
  0xc6   :  { %1092 = vmatmul.mubr.f32.vlgmr.msra.gmra.mrb[10].mxu1 %v15566_v3  ;;  %8174 = vmatpush1.bf16.msra.mxu0 %v11268_v27 }
  0xc7   :  { %8206 = vmatpush1.bf16.msra.mxu1 %v11274_v29  ;;  %8176 = vmatprep.subr.bf16.mxu0 %v11276_v30  ;;  %15567 = vst [vmem:[#allocation16_spill] sm:$0xff] %v11854_v21  ;;  %v15523_v27 = vsub.s32 0, %v11854_v21  ;;  %v308_v29 = vld [vmem:[%s15494_s2] sm:$0xff]  ;;  %v15521_v30 = vsub.s32 1, %v11854_v21 }
  0xc8   :  { %8208 = vmatprep.subr.bf16.mxu1 %v11285_v33  ;;  %1296 = vmatprep.mubr.f32.mxu0 %v15566_v3  ;;  %v15522_v33 = vsub.s32 2, %v11854_v21 }
  0xc9   :  { %1367 = vmatprep.mubr.f32.mxu1 %v15566_v3 }
  0xca   :  { %8178 = vmatpush1.bf16.msra.mxu0 %v11305_v39  ;;  %v15520_v39 = vsub.s32 3, %v11854_v21 }
  0xcb   :  { %8210 = vmatpush1.bf16.msra.mxu1 %v11309_v40  ;;  %8180 = vmatprep.subr.bf16.mxu0 %v11311_v41  ;;  %v313_v40 = vrot.slane %v308_v29, %v15523_v27  ;;  %v317_v41 = vrot.slane %v308_v29, %v15521_v30  ;;  %v1944_v30 = vld [vmem:[%s15496_s4 + $0x120] sm:$0xff] }
  0xcc   :  { %8212 = vmatprep.subr.bf16.mxu1 %v11323_v44  ;;  %v321_v44 = vrot.slane %v308_v29, %v15522_v33 }
  0xce   :  { %8182 = vmatpush1.bf16.msra.mxu0 %v11344_v49  ;;  %v325_v49 = vrot.slane %v308_v29, %v15520_v39  ;;  %v1936_v39 = vld [vmem:[%s15496_s4 + $0xe0] sm:$0xff] }
  0xcf   :  { %8214 = vmatpush1.bf16.msra.mxu1 %v11349_v50  ;;  %8184 = vmatprep.subr.bf16.mxu0 %v11351_v51 }
  0xd0   :  { %8216 = vmatprep.subr.bf16.mxu1 %v11363_v53 }
  0xd2   :  { %8186 = vmatpush1.bf16.msra.mxu0 %v11383_v60 }
  0xd3   :  { %8218 = vmatpush1.bf16.msra.mxu1 %v11387_v61  ;;  %8188 = vmatprep.subr.bf16.mxu0 %v11389_v62 }
  0xd4   :  { %8220 = vmatprep.subr.bf16.mxu1 %v11401_v2 }
  0xd6   :  { %8190 = vmatpush1.bf16.msra.mxu0 %v11419_v8 }
  0xd7   :  { %8222 = vmatpush1.bf16.msra.mxu1 %v11423_v9  ;;  %8192 = vmatprep.subr.bf16.mxu0 %v11425_v10 }
  0xd8   :  { %8224 = vmatprep.subr.bf16.mxu1 %v11437_v19 }
  0xda   :  { %8194 = vmatpush1.bf16.msra.mxu0 %v11455_v26 }
  0xdb   :  { %8226 = vmatpush1.bf16.msra.mxu1 %v11459_v28  ;;  %8196 = vmatprep.subr.bf16.mxu0 %v11461_v31 }
  0xdc   :  { %8228 = vmatprep.subr.bf16.mxu1 %v11473_v36 }
  0xde   :  { %8198 = vmatpush1.bf16.msra.mxu0 %v11491_v16 }
  0xdf   :  { %8230 = vmatpush1.bf16.msra.mxu1 %v11495_v45  ;;  %8200 = vmatprep.subr.bf16.mxu0 %v11497_v46  ;;  %v15519_v45 = vsub.s32 4, %v11854_v21  ;;  %v15517_v46 = vsub.s32 5, %v11854_v21 }
  0xe0   :  { %8232 = vmatprep.subr.bf16.mxu1 %v11509_v52  ;;  %v15518_v52 = vsub.s32 6, %v11854_v21 }
  0xe2   :  { %8202 = vmatpush1.bf16.msra.mxu0 %v11527_v59  ;;  %v15516_v59 = vsub.s32 7, %v11854_v21 }
  0xe3   :  { %8234 = vmatpush1.bf16.msra.mxu1 %v11531_v63  ;;  %8236 = vmatprep.subr.bf16.mxu0 %v11533_v0  ;;  %v329_v63 = vrot.slane %v308_v29, %v15519_v45  ;;  %v333_v0 = vrot.slane %v308_v29, %v15517_v46 }
  0xe4   :  { %8268 = vmatprep.subr.bf16.mxu1 %v11545_v5  ;;  %v337_v5 = vrot.slane %v308_v29, %v15518_v52  ;;  %v341_v32 = vrot.slane %v308_v29, %v15516_v59 }
 0x118   :  { %v416_v50 = vpop.f32.mrb[0].mxu0 }
 0x119   :  { %v417_v51 = vadd.f32 %v416_v50, %v313_v40  ;;  %v418_v53 = vpop.f32.mrb[1].mxu0  ;;  %v493_v60 = vpop.f32.mrb[0].mxu1 }
 0x11a   :  { %v419_v61 = vadd.f32 %v418_v53, %v317_v41  ;;  %v494_v62 = vadd.f32 %v493_v60, %v321_v44  ;;  %v495_v2 = vpop.f32.mrb[1].mxu1 }
 0x11b   :  { %658 = vst [vmem:[#allocation2] sm:$0xff] %v417_v51  ;;  %v496_v8 = vadd.f32 %v495_v2, %v325_v49 }
 0x11c   :  { %659 = vst [vmem:[#allocation2 + $0x8] sm:$0xff] %v419_v61  ;;  %660 = vst [vmem:[#allocation2 + $0x10] sm:$0xff] %v494_v62  ;;  %v422_v9 = vpop.f32.mrb[2].mxu0 }
 0x11d   :  { %661 = vst [vmem:[#allocation2 + $0x18] sm:$0xff] %v496_v8  ;;  %v423_v10 = vadd.f32 %v422_v9, %v313_v40  ;;  %v424_v19 = vpop.f32.mrb[3].mxu0 }
 0x11e   :  { %v425_v26 = vadd.f32 %v424_v19, %v317_v41 }
 0x11f   :  { %v499_v28 = vpop.f32.mrb[2].mxu1  ;;  %666 = vst [vmem:[#allocation2 + $0x40] sm:$0xff] %v423_v10 }
 0x120   :  { %v500_v31 = vadd.f32 %v499_v28, %v321_v44  ;;  %v501_v36 = vpop.f32.mrb[3].mxu1  ;;  %667 = vst [vmem:[#allocation2 + $0x48] sm:$0xff] %v425_v26 }
 0x121   :  { %v502_v16 = vadd.f32 %v501_v36, %v325_v49 }
 0x122   :  { %668 = vst [vmem:[#allocation2 + $0x50] sm:$0xff] %v500_v31  ;;  %v674_v62 = vld [vmem:[#allocation2] sm:$0x3] }
 0x123   :  { %669 = vst [vmem:[#allocation2 + $0x58] sm:$0xff] %v502_v16  ;;  %v675_v10 = vld [vmem:[#allocation2 + $0x8] sm:$0x3]  ;;  %v676_v16 = vld [vmem:[#allocation2 + $0x10] sm:$0x3] }
 0x158   :  { %v570_v35 = vpop.f32.mrb[4].mxu0 }
 0x159   :  { %v571_v4 = vadd.f32 %v570_v35, %v329_v63  ;;  %v572_v12 = vpop.f32.mrb[5].mxu0  ;;  %v647_v14 = vpop.f32.mrb[4].mxu1 }
 0x15a   :  { %v573_v38 = vadd.f32 %v572_v12, %v333_v0  ;;  %v648_v17 = vadd.f32 %v647_v14, %v337_v5  ;;  %v649_v40 = vpop.f32.mrb[5].mxu1 }
 0x15b   :  { %662 = vst [vmem:[#allocation2 + $0x20] sm:$0xff] %v571_v4  ;;  %v650_v41 = vadd.f32 %v649_v40, %v341_v32 }
 0x15c   :  { %663 = vst [vmem:[#allocation2 + $0x28] sm:$0xff] %v573_v38  ;;  %664 = vst [vmem:[#allocation2 + $0x30] sm:$0xff] %v648_v17  ;;  %v576_v44 = vpop.f32.mrb[6].mxu0 }
 0x15d   :  { %665 = vst [vmem:[#allocation2 + $0x38] sm:$0xff] %v650_v41  ;;  %v577_v49 = vadd.f32 %v576_v44, %v329_v63  ;;  %v578_v50 = vpop.f32.mrb[7].mxu0  ;;  %v653_v51 = vpop.f32.mrb[6].mxu1 }
 0x15e   :  { %v579_v53 = vadd.f32 %v578_v50, %v333_v0  ;;  %v654_v60 = vadd.f32 %v653_v51, %v337_v5  ;;  %v655_v61 = vpop.f32.mrb[7].mxu1  ;;  %v677_v5 = vld [vmem:[#allocation2 + $0x18] sm:$0x3] }
 0x15f   :  { %670 = vst [vmem:[#allocation2 + $0x60] sm:$0xff] %v577_v49  ;;  %v656_v29 = vadd.f32 %v655_v61, %v341_v32 }
 0x160   :  { %671 = vst [vmem:[#allocation2 + $0x68] sm:$0xff] %v579_v53  ;;  %672 = vst [vmem:[#allocation2 + $0x70] sm:$0xff] %v654_v60 }
 0x161   :  { %673 = vst [vmem:[#allocation2 + $0x78] sm:$0xff] %v656_v29 }
 0x178   :  { %v808_v2 = vpop.f32.mrb[8].mxu0 }
 0x179   :  { %v884_v8 = vadd.f32 %v808_v2, %v674_v62  ;;  %v879_v9 = vpop.f32.mrb[8].mxu1  ;;  %v810_v19 = vpop.f32.mrb[9].mxu0  ;;  %v888_v62 = vld [vmem:[#allocation2 + $0x60] sm:$0xc0] }
 0x17a   :  { %v885_v26 = vadd.f32 %v810_v19, %v675_v10  ;;  %v881_v28 = vpop.f32.mrb[9].mxu1  ;;  %v886_v63 = vadd.f32 %v879_v9, %v676_v16  ;;  %v889_v10 = vld [vmem:[#allocation2 + $0x68] sm:$0xc0] }
 0x17b   :  { %v7554_v31 = vmul.f32 -1.442695, %v884_v8  ;;  %v887_v32 = vadd.f32 %v881_v28, %v677_v5 }
 0x17c   :  { %v7555_v36 = vmul.f32 -1.442695, %v885_v26  ;;  %v7556_v0 = vmul.f32 -1.442695, %v886_v63 }
 0x17d   :  { %9927 = vpow2.f32 %v7554_v31 }
 0x17e   :  { %9929 = vpow2.f32 %v7555_v36  ;;  %v890_v36 = vld [vmem:[#allocation2 + $0x70] sm:$0xc0] }
 0x17f   :  { %9931 = vpow2.f32 %v7556_v0 }
 0x180   :  { %9933 = vtanh.f32 %v887_v32 }
 0x187   :  { %v9928_v35 = vpop.eup %9927 }
 0x188   :  { %v1123_v4 = vadd.f32 1.0, %v9928_v35  ;;  %v9930_v12 = vpop.eup %9929  ;;  %v891_v35 = vld [vmem:[#allocation2 + $0x78] sm:$0xc0] }
 0x189   :  { %v1124_v14 = vadd.f32 1.0, %v9930_v12  ;;  %v9932_v38 = vpop.eup %9931 }
 0x18a   :  { %9935 = vrcp.f32 %v1123_v4  ;;  %v9934_v17 = vpop.eup %9933  ;;  %v1125_v49 = vadd.f32 1.0, %v9932_v38 }
 0x18b   :  { %9937 = vrcp.f32 %v1124_v14 }
 0x18c   :  { %9939 = vrcp.f32 %v1125_v49 }
 0x194   :  { %v9936_v40 = vpop.eup %9935 }
 0x195   :  { %v1134_v41 = vmul.f32 %v9936_v40, %v9934_v17  ;;  %v9938_v44 = vpop.eup %9937 }
 0x196   :  { %v1133_v50 = vmul.f32 0.0, %v9938_v44  ;;  %v9940_v0 = vpop.eup %9939  ;;  %v15574_v44 = vld [vmem:[#allocation15_spill] sm:$0xff] }
 0x198   :  { %v1022_v51 = vpop.f32.mrb[10].mxu0  ;;  %v11883_v53 = vadd.f32 %v1134_v41, %v1133_v50 }
 0x199   :  { %v1102_v60 = vrot.slane %v1022_v51, 2  ;;  %v1093_v61 = vpop.f32.mrb[10].mxu1  ;;  %v1024_v29 = vpop.f32.mrb[11].mxu0 }
 0x19a   :  { %v1103_v2 = vrot.slane %v1024_v29, 2  ;;  %v1095_v8 = vpop.f32.mrb[11].mxu1  ;;  %9941 = vtanh.f32 %v11883_v53  ;;  %v1104_v28 = vrot.slane %v1093_v61, 2  ;;  %v1685_v61 = vld [vmem:[%s15495_s3 + $0x30] sm:$0xff] }
 0x19b   :  { %v1110_v9 = vadd.f32 %v1102_v60, %v888_v62  ;;  %v1105_v63 = vrot.slane %v1095_v8, 2  ;;  %v1681_v60 = vld [vmem:[%s15495_s3 + $0x10] sm:$0xff]  ;;  %v1688_v62 = vld [vmem:[%s15495_s3 + $0x48] sm:$0xff]  ;;  %v1690_v8 = vld [vmem:[%s15495_s3 + $0x58] sm:$0xff] }
 0x19c   :  { %v1111_v19 = vadd.f32 %v1103_v2, %v889_v10  ;;  %v1112_v16 = vadd.f32 %v1104_v28, %v890_v36  ;;  %v11954_v29 = vpack.c.bf16 %v1685_v61, %v1681_v60  ;;  %v1692_v2 = vld [vmem:[%s15495_s3 + $0x68] sm:$0xff]  ;;  %v1694_v10 = vld [vmem:[%s15495_s3 + $0x78] sm:$0xff]  ;;  %v1689_v36 = vld [vmem:[%s15495_s3 + $0x50] sm:$0xff] }
 0x19d   :  { %v7557_v26 = vmul.f32 -1.442695, %v1110_v9  ;;  %v1113_v12 = vadd.f32 %v1105_v63, %v891_v35  ;;  %v11968_v9 = vpack.c.bf16 %v1692_v2, %v1688_v62  ;;  %v11979_v28 = vpack.c.bf16 %v1694_v10, %v1690_v8  ;;  %v1717_v60 = vld [vmem:[%s15495_s3 + $0x130] sm:$0xff]  ;;  %v1720_v62 = vld [vmem:[%s15495_s3 + $0x148] sm:$0xff]  ;;  %v1722_v8 = vld [vmem:[%s15495_s3 + $0x158] sm:$0xff] }
 0x19e   :  { %v7558_v31 = vmul.f32 -1.442695, %v1111_v19  ;;  %v7559_v32 = vmul.f32 -1.442695, %v1112_v16  ;;  %v1687_v19 = vld [vmem:[%s15495_s3 + $0x40] sm:$0xff]  ;;  %v1693_v16 = vld [vmem:[%s15495_s3 + $0x70] sm:$0xff] }
 0x19f   :  { %9943 = vpow2.f32 %v7557_v26  ;;  %v1691_v26 = vld [vmem:[%s15495_s3 + $0x60] sm:$0xff]  ;;  %v11990_v63 = vpack.c.bf16 %v1693_v16, %v1689_v36  ;;  %v1724_v2 = vld [vmem:[%s15495_s3 + $0x168] sm:$0xff] }
 0x1a0   :  { %9945 = vpow2.f32 %v7558_v31  ;;  %v11981_v31 = vpack.c.bf16 %v1691_v26, %v1687_v19  ;;  %v12112_v10 = vpack.c.bf16 %v1724_v2, %v1720_v62  ;;  %v1726_v19 = vld [vmem:[%s15495_s3 + $0x178] sm:$0xff]  ;;  %v1719_v26 = vld [vmem:[%s15495_s3 + $0x140] sm:$0xff]  ;;  %v1737_v2 = vld [vmem:[%s15495_s3 + $0x1d0] sm:$0xff] }
 0x1a1   :  { %9947 = vpow2.f32 %v7559_v32  ;;  %v1698_v32 = vld [vmem:[%s15495_s3 + $0x98] sm:$0xff]  ;;  %v1723_v36 = vld [vmem:[%s15495_s3 + $0x160] sm:$0xff]  ;;  %v12123_v16 = vpack.c.bf16 %v1726_v19, %v1722_v8  ;;  %v1741_v8 = vld [vmem:[%s15495_s3 + $0x1f0] sm:$0xff] }
 0x1a2   :  { %9949 = vtanh.f32 %v1113_v12  ;;  %v1695_v12 = vld [vmem:[%s15495_s3 + $0x80] sm:$0xff]  ;;  %v12206_v19 = vpack.c.bf16 %v1741_v8, %v1737_v2  ;;  %v1166_v8 = vld [vmem:[#allocation2 + $0x10] sm:$0xc] }
 0x1a4   :  { %v9942_v5 = vpop.eup %9941 }
 0x1a5   :  { %v1137_v4 = vmul.f32 %v9942_v5, %v9940_v0  ;;  %v1696_v0 = vld [vmem:[%s15495_s3 + $0x88] sm:$0xff] }
 0x1a6   :  { %v1700_v5 = vld [vmem:[%s15495_s3 + $0xa8] sm:$0xff] }
 0x1a7   :  { %1162 = vst [vmem:[#allocation4] sm:$0x3] %v1137_v4  ;;  %1297 = vmatmul.mubr.f32.vlgmr.msra.gmra.mrb[12].mxu0 %v1137_v4  ;;  %1368 = vmatmul.mubr.f32.vlgmr.msra.gmra.mrb[12].mxu1 %v1137_v4  ;;  %v12004_v35 = vpack.c.bf16 %v1700_v5, %v1696_v0  ;;  %v1702_v4 = vld [vmem:[%s15495_s3 + $0xb8] sm:$0xff]  ;;  %v12125_v0 = vpack.c.bf16 %v1723_v36, %v1719_v26  ;;  %v1721_v5 = vld [vmem:[%s15495_s3 + $0x150] sm:$0xff]  ;;  %v1909_v26 = vld [vmem:[%s15496_s4 + $0x8] sm:$0xff] }
 0x1a8   :  { %8238 = vmatpush1.bf16.msra.mxu0 %v11563_v20  ;;  %8270 = vmatpush1.bf16.msra.mxu1 %v11567_v22  ;;  %v1913_v36 = vld [vmem:[%s15496_s4 + $0x28] sm:$0xff] }
 0x1a9   :  { %v9944_v14 = vpop.eup %9943  ;;  %8240 = vmatprep.subr.bf16.mxu0 %v11569_v23  ;;  %8272 = vmatprep.subr.bf16.mxu1 %v11581_v34  ;;  %v15568_v23 = vld [vmem:[#allocation9_spill] sm:$0xff] }
 0x1aa   :  { %v1147_v38 = vadd.f32 1.0, %v9944_v14  ;;  %v9946_v17 = vpop.eup %9945  ;;  %1525 = vmatprep.mubr.f32.mxu0 %v15566_v3  ;;  %1596 = vmatprep.mubr.f32.mxu1 %v15566_v3  ;;  %v1699_v14 = vld [vmem:[%s15495_s3 + $0xa0] sm:$0xff] }
 0x1ab   :  { %v1148_v40 = vadd.f32 1.0, %v9946_v17  ;;  %v9948_v20 = vpop.eup %9947  ;;  %v12017_v17 = vpack.c.bf16 %v1699_v14, %v1695_v12  ;;  %v1728_v12 = vld [vmem:[%s15495_s3 + $0x188] sm:$0xff] }
 0x1ac   :  { %9951 = vrcp.f32 %v1147_v38  ;;  %8242 = vmatpush1.bf16.msra.mxu0 %v11601_v43  ;;  %8274 = vmatpush1.bf16.msra.mxu1 %v11605_v47  ;;  %v9950_v22 = vpop.eup %9949  ;;  %v15569_v43 = vld [vmem:[#allocation10_spill] sm:$0xff]  ;;  %v15570_v47 = vld [vmem:[#allocation11_spill] sm:$0xff]  ;;  %v12015_v38 = vpack.c.bf16 %v1702_v4, %v1698_v32 }
 0x1ad   :  { %9953 = vrcp.f32 %v1148_v40  ;;  %8244 = vmatprep.subr.bf16.mxu0 %v11607_v48  ;;  %8276 = vmatprep.subr.bf16.mxu1 %v11619_v55  ;;  %v1697_v40 = vld [vmem:[%s15495_s3 + $0x90] sm:$0xff]  ;;  %v1732_v14 = vld [vmem:[%s15495_s3 + $0x1a8] sm:$0xff] }
 0x1ae   :  { %v1725_v32 = vld [vmem:[%s15495_s3 + $0x170] sm:$0xff] }
 0x1af   :  { %v12134_v4 = vpack.c.bf16 %v1725_v32, %v1721_v5  ;;  %v1911_v5 = vld [vmem:[%s15496_s4 + $0x18] sm:$0xff]  ;;  %v12220_v32 = vpack.c.bf16 %v1913_v36, %v1909_v26 }
 0x1b0   :  { %8246 = vmatpush1.bf16.msra.mxu0 %v11639_v6  ;;  %8278 = vmatpush1.bf16.msra.mxu1 %v11643_v7  ;;  %v1149_v6 = vadd.f32 1.0, %v9948_v20  ;;  %v15571_v7 = vld [vmem:[#allocation12_spill] sm:$0xff]  ;;  %v1701_v20 = vld [vmem:[%s15495_s3 + $0xb0] sm:$0xff] }
 0x1b1   :  { %8248 = vmatprep.subr.bf16.mxu0 %v11645_v11  ;;  %8280 = vmatprep.subr.bf16.mxu1 %v11657_v25  ;;  %v15572_v11 = vld [vmem:[#allocation13_spill] sm:$0xff]  ;;  %v15573_v25 = vld [vmem:[#allocation14_spill] sm:$0xff] }
 0x1b2   :  { %9955 = vrcp.f32 %v1149_v6  ;;  %v1707_v6 = vld [vmem:[%s15495_s3 + $0xe0] sm:$0xff] }
 0x1b4   :  { %8250 = vmatpush1.bf16.msra.mxu0 %v11675_v15  ;;  %8282 = vmatpush1.bf16.msra.mxu1 %v15568_v23  ;;  %v1704_v23 = vld [vmem:[%s15495_s3 + $0xc8] sm:$0xff] }
 0x1b5   :  { %8252 = vmatprep.subr.bf16.mxu0 %v15569_v43  ;;  %8284 = vmatprep.subr.bf16.mxu1 %v15570_v47  ;;  %v1706_v43 = vld [vmem:[%s15495_s3 + $0xd8] sm:$0xff] }
 0x1b6   :  { %v9952_v34 = vpop.eup %9951 }
 0x1b7   :  { %v1158_v48 = vmul.f32 %v9952_v34, %v9950_v22  ;;  %v9954_v55 = vpop.eup %9953  ;;  %v12026_v22 = vpack.c.bf16 %v1701_v20, %v1697_v40  ;;  %v1708_v34 = vld [vmem:[%s15495_s3 + $0xe8] sm:$0xff]  ;;  %v1730_v40 = vld [vmem:[%s15495_s3 + $0x198] sm:$0xff]  ;;  %v12148_v20 = vpack.c.bf16 %v1732_v14, %v1728_v12 }
 0x1b8   :  { %v1157_v41 = vmul.f32 0.0, %v9954_v55  ;;  %8254 = vmatpush1.bf16.msra.mxu0 %v15571_v7  ;;  %8286 = vmatpush1.bf16.msra.mxu1 %v15572_v11  ;;  %v12040_v47 = vpack.c.bf16 %v1708_v34, %v1704_v23  ;;  %v1703_v55 = vld [vmem:[%s15495_s3 + $0xc0] sm:$0xff]  ;;  %v1705_v11 = vld [vmem:[%s15495_s3 + $0xd0] sm:$0xff]  ;;  %v1734_v23 = vld [vmem:[%s15495_s3 + $0x1b8] sm:$0xff] }
 0x1b9   :  { %8256 = vmatprep.subr.bf16.mxu0 %v15573_v25  ;;  %8288 = vmatprep.subr.bf16.mxu1 %v15574_v44  ;;  %v12053_v7 = vpack.c.bf16 %v1707_v6, %v1703_v55  ;;  %v1709_v25 = vld [vmem:[%s15495_s3 + $0xf0] sm:$0xff]  ;;  %v1727_v34 = vld [vmem:[%s15495_s3 + $0x180] sm:$0xff]  ;;  %v1915_v12 = vld [vmem:[%s15496_s4 + $0x38] sm:$0xff] }
 0x1ba   :  { %v11908_v15 = vadd.f32 %v1158_v48, %v1157_v41  ;;  %v1710_v48 = vld [vmem:[%s15495_s3 + $0xf8] sm:$0xff]  ;;  %v12062_v44 = vpack.c.bf16 %v1709_v25, %v1705_v11  ;;  %v1729_v6 = vld [vmem:[%s15495_s3 + $0x190] sm:$0xff]  ;;  %v12225_v14 = vpack.c.bf16 %v1915_v12, %v1911_v5 }
 0x1bb   :  { %v12051_v41 = vpack.c.bf16 %v1710_v48, %v1706_v43  ;;  %v1731_v43 = vld [vmem:[%s15495_s3 + $0x1a0] sm:$0xff]  ;;  %v12159_v48 = vpack.c.bf16 %v1734_v23, %v1730_v40  ;;  %v1733_v11 = vld [vmem:[%s15495_s3 + $0x1b0] sm:$0xff]  ;;  %v1167_v5 = vld [vmem:[#allocation2 + $0x18] sm:$0xc] }
 0x1bc   :  { %9957 = vtanh.f32 %v11908_v15  ;;  %8258 = vmatpush1.bf16.msra.mxu0 %v11747_v24  ;;  %8290 = vmatpush1.bf16.msra.mxu1 %v11751_v57  ;;  %v9956_v49 = vpop.eup %9955  ;;  %v12161_v55 = vpack.c.bf16 %v1731_v43, %v1727_v34  ;;  %v12170_v25 = vpack.c.bf16 %v1733_v11, %v1729_v6  ;;  %v1164_v11 = vld [vmem:[#allocation2] sm:$0xc] }
 0x1bd   :  { %8260 = vmatprep.subr.bf16.mxu0 %v11753_v1  ;;  %8292 = vmatprep.subr.bf16.mxu1 %v11765_v42  ;;  %v1680_v1 = vld [vmem:[%s15495_s3 + $0x8] sm:$0xff] }
 0x1c0   :  { %8262 = vmatpush1.bf16.msra.mxu0 %v11783_v18  ;;  %8294 = vmatpush1.bf16.msra.mxu1 %v11787_v56  ;;  %v1682_v56 = vld [vmem:[%s15495_s3 + $0x18] sm:$0xff] }
 0x1c1   :  { %8264 = vmatprep.subr.bf16.mxu0 %v11789_v37  ;;  %8296 = vmatprep.subr.bf16.mxu1 %v11798_v13  ;;  %v1684_v37 = vld [vmem:[%s15495_s3 + $0x28] sm:$0xff]  ;;  %v1686_v18 = vld [vmem:[%s15495_s3 + $0x38] sm:$0xff]  ;;  %v1679_v13 = vld [vmem:[%s15495_s3] sm:$0xff] }
 0x1c2   :  { %v11932_v42 = vpack.c.bf16 %v1684_v37, %v1680_v1  ;;  %v1718_v1 = vld [vmem:[%s15495_s3 + $0x138] sm:$0xff]  ;;  %v1711_v37 = vld [vmem:[%s15495_s3 + $0x100] sm:$0xff] }
 0x1c4   :  { %8266 = vmatpush1.bf16.msra.mxu0 %v11807_v54  ;;  %8298 = vmatpush1.bf16.msra.mxu1 %v11811_v58  ;;  %v1683_v54 = vld [vmem:[%s15495_s3 + $0x20] sm:$0xff]  ;;  %v11943_v58 = vpack.c.bf16 %v1686_v18, %v1682_v56 }
 0x1c5   :  { %v11945_v51 = vpack.c.bf16 %v1683_v54, %v1679_v13  ;;  %8300 = vmatprep.subr.bf16.mxu0 %v11932_v42  ;;  %v1715_v56 = vld [vmem:[%s15495_s3 + $0x120] sm:$0xff]  ;;  %v1713_v54 = vld [vmem:[%s15495_s3 + $0x110] sm:$0xff] }
 0x1c6   :  { %v9958_v24 = vpop.eup %9957  ;;  %8332 = vmatprep.subr.bf16.mxu1 %v11943_v58  ;;  %v12089_v13 = vpack.c.bf16 %v1715_v56, %v1711_v37  ;;  %v12098_v61 = vpack.c.bf16 %v1717_v60, %v1713_v54  ;;  %v1742_v37 = vld [vmem:[%s15495_s3 + $0x1f8] sm:$0xff]  ;;  %v1735_v56 = vld [vmem:[%s15495_s3 + $0x1c0] sm:$0xff] }
 0x1c7   :  { %v1161_v50 = vmul.f32 %v9958_v24, %v9956_v49  ;;  %v1712_v49 = vld [vmem:[%s15495_s3 + $0x108] sm:$0xff]  ;;  %v1739_v54 = vld [vmem:[%s15495_s3 + $0x1e0] sm:$0xff] }
 0x1c8   :  { %v1716_v24 = vld [vmem:[%s15495_s3 + $0x128] sm:$0xff]  ;;  %v12197_v62 = vpack.c.bf16 %v1739_v54, %v1735_v56 }
 0x1c9   :  { %1163 = vst [vmem:[#allocation5 + $0x8] sm:$0xc0] %v1161_v50  ;;  %v1459_v57 = vrot.slane %v1161_v50, 6  ;;  %v1714_v50 = vld [vmem:[%s15495_s3 + $0x118] sm:$0xff] }
 0x1ca   :  { %v12087_v18 = vpack.c.bf16 %v1718_v1, %v1714_v50  ;;  %v1738_v50 = vld [vmem:[%s15495_s3 + $0x1d8] sm:$0xff] }
 0x1cb   :  { %1526 = vmatmul.mubr.f32.vlgmr.msra.gmra.mrb[14].mxu0 %v1459_v57  ;;  %1597 = vmatmul.mubr.f32.vlgmr.msra.gmra.mrb[14].mxu1 %v1459_v57  ;;  %v12076_v57 = vpack.c.bf16 %v1716_v24, %v1712_v49  ;;  %v1736_v49 = vld [vmem:[%s15495_s3 + $0x1c8] sm:$0xff]  ;;  %v12195_v60 = vpack.c.bf16 %v1742_v37, %v1738_v50 }
 0x1cc   :  { %1810 = vmatprep.mubr.f32.mxu0 %v15566_v3  ;;  %1881 = vmatprep.mubr.f32.mxu1 %v15566_v3  ;;  %v1740_v24 = vld [vmem:[%s15495_s3 + $0x1e8] sm:$0xff] }
 0x1cd   :  { %8302 = vmatpush1.bf16.msra.mxu0 %v11945_v51  ;;  %8334 = vmatpush1.bf16.msra.mxu1 %v11954_v29  ;;  %v12184_v1 = vpack.c.bf16 %v1740_v24, %v1736_v49  ;;  %v1165_v50 = vld [vmem:[#allocation2 + $0x8] sm:$0xc] }
 0x1ce   :  { %8304 = vmatprep.subr.bf16.mxu0 %v11968_v9  ;;  %8336 = vmatprep.subr.bf16.mxu1 %v11979_v28 }
 0x1d1   :  { %8306 = vmatpush1.bf16.msra.mxu0 %v11981_v31  ;;  %8338 = vmatpush1.bf16.msra.mxu1 %v11990_v63 }
 0x1d2   :  { %8308 = vmatprep.subr.bf16.mxu0 %v12004_v35  ;;  %8340 = vmatprep.subr.bf16.mxu1 %v12015_v38 }
 0x1d5   :  { %8310 = vmatpush1.bf16.msra.mxu0 %v12017_v17  ;;  %8342 = vmatpush1.bf16.msra.mxu1 %v12026_v22 }
 0x1d6   :  { %8312 = vmatprep.subr.bf16.mxu0 %v12040_v47  ;;  %8344 = vmatprep.subr.bf16.mxu1 %v12051_v41 }
 0x1d9   :  { %8314 = vmatpush1.bf16.msra.mxu0 %v12053_v7  ;;  %8346 = vmatpush1.bf16.msra.mxu1 %v12062_v44 }
 0x1da   :  { %8316 = vmatprep.subr.bf16.mxu0 %v12076_v57  ;;  %8348 = vmatprep.subr.bf16.mxu1 %v12087_v18 }
 0x1dd   :  { %8318 = vmatpush1.bf16.msra.mxu0 %v12089_v13  ;;  %8350 = vmatpush1.bf16.msra.mxu1 %v12098_v61 }
 0x1de   :  { %8320 = vmatprep.subr.bf16.mxu0 %v12112_v10  ;;  %8352 = vmatprep.subr.bf16.mxu1 %v12123_v16 }
 0x1e1   :  { %8322 = vmatpush1.bf16.msra.mxu0 %v12125_v0  ;;  %8354 = vmatpush1.bf16.msra.mxu1 %v12134_v4 }
 0x1e2   :  { %8324 = vmatprep.subr.bf16.mxu0 %v12148_v20  ;;  %8356 = vmatprep.subr.bf16.mxu1 %v12159_v48 }
 0x1e5   :  { %8326 = vmatpush1.bf16.msra.mxu0 %v12161_v55  ;;  %8358 = vmatpush1.bf16.msra.mxu1 %v12170_v25 }
 0x1e6   :  { %8328 = vmatprep.subr.bf16.mxu0 %v12184_v1  ;;  %8360 = vmatprep.subr.bf16.mxu1 %v12195_v60 }
 0x1e9   :  { %8330 = vmatpush1.bf16.msra.mxu0 %v12197_v62  ;;  %8362 = vmatpush1.bf16.msra.mxu1 %v12206_v19 }
 0x1ea   :  { %8364 = vmatprep.subr.bf16.mxu0 %v12220_v32  ;;  %8396 = vmatprep.subr.bf16.mxu1 %v12225_v14 }
 0x27a   :  { %v1298_v40 = vpop.f32.mrb[12].mxu0  ;;  %v1369_v23 = vpop.f32.mrb[12].mxu1 }
 0x27b   :  { %v1378_v34 = vrot.slane %v1298_v40, 6  ;;  %v1300_v43 = vpop.f32.mrb[13].mxu0  ;;  %v1371_v6 = vpop.f32.mrb[13].mxu1  ;;  %v1380_v2 = vrot.slane %v1369_v23, 6  ;;  %v1639_v23 = vrot.slane %v11883_v53, 6 }
 0x27c   :  { %v1379_v49 = vrot.slane %v1300_v43, 6  ;;  %v1381_v26 = vrot.slane %v1371_v6, 6 }
 0x27d   :  { %v1386_v24 = vadd.f32 %v1378_v34, %v1164_v11  ;;  %v1388_v36 = vadd.f32 %v1380_v2, %v1166_v8  ;;  %v1390_v8 = vld [vmem:[#allocation2 + $0x60] sm:$0x30] }
 0x27e   :  { %v1387_v37 = vadd.f32 %v1379_v49, %v1165_v50  ;;  %v1389_v12 = vadd.f32 %v1381_v26, %v1167_v5  ;;  %v1391_v5 = vld [vmem:[#allocation2 + $0x68] sm:$0x30] }
 0x27f   :  { %v7560_v56 = vmul.f32 -1.442695, %v1386_v24  ;;  %v7562_v59 = vmul.f32 -1.442695, %v1388_v36 }
 0x280   :  { %v7561_v54 = vmul.f32 -1.442695, %v1387_v37 }
 0x281   :  { %9959 = vpow2.f32 %v7560_v56 }
 0x282   :  { %9961 = vpow2.f32 %v7561_v54 }
 0x283   :  { %9963 = vtanh.f32 %v1389_v12 }
 0x284   :  { %9965 = vpow2.f32 %v7562_v59 }
 0x28b   :  { %v9960_v46 = vpop.eup %9959 }
 0x28c   :  { %v1628_v40 = vadd.f32 1.0, %v9960_v46  ;;  %v9962_v52 = vpop.eup %9961 }
 0x28d   :  { %v1629_v34 = vadd.f32 1.0, %v9962_v52  ;;  %v9964_v43 = vpop.eup %9963 }
 0x28e   :  { %9967 = vrcp.f32 %v1628_v40  ;;  %v9966_v11 = vpop.eup %9965 }
 0x28f   :  { %9969 = vrcp.f32 %v1629_v34  ;;  %v1630_v6 = vadd.f32 1.0, %v9966_v11  ;;  %v1908_v11 = vld [vmem:[%s15496_s4] sm:$0xff] }
 0x291   :  { %9971 = vrcp.f32 %v1630_v6  ;;  %v1914_v6 = vld [vmem:[%s15496_s4 + $0x30] sm:$0xff] }
 0x298   :  { %v9968_v49 = vpop.eup %9967 }
 0x299   :  { %v1642_v24 = vmul.f32 %v9968_v49, %v9964_v43  ;;  %v9970_v50 = vpop.eup %9969  ;;  %v1392_v43 = vld [vmem:[#allocation2 + $0x70] sm:$0x30]  ;;  %v1912_v49 = vld [vmem:[%s15496_s4 + $0x20] sm:$0xff] }
 0x29a   :  { %v1641_v37 = vmul.f32 %v9970_v50, %v1639_v23  ;;  %v1910_v50 = vld [vmem:[%s15496_s4 + $0x10] sm:$0xff] }
 0x29b   :  { %v9972_v23 = vpop.eup %9971 }
 0x29c   :  { %v12230_v56 = vadd.f32 %v1642_v24, %v1641_v37  ;;  %v1917_v37 = vld [vmem:[%s15496_s4 + $0x48] sm:$0xff] }
 0x29e   :  { %v1527_v54 = vpop.f32.mrb[14].mxu0  ;;  %v1598_v46 = vpop.f32.mrb[14].mxu1  ;;  %9973 = vtanh.f32 %v12230_v56 }
 0x29f   :  { %v1607_v59 = vrot.slane %v1527_v54, 4  ;;  %v1529_v2 = vpop.f32.mrb[15].mxu0  ;;  %v1600_v52 = vpop.f32.mrb[15].mxu1  ;;  %v1609_v34 = vrot.slane %v1598_v46, 4 }
 0x2a0   :  { %v1608_v26 = vrot.slane %v1529_v2, 4  ;;  %v1610_v24 = vrot.slane %v1600_v52, 4  ;;  %v1919_v2 = vld [vmem:[%s15496_s4 + $0x58] sm:$0xff] }
 0x2a1   :  { %v1615_v36 = vadd.f32 %v1607_v59, %v1390_v8  ;;  %v1617_v46 = vadd.f32 %v1609_v34, %v1392_v43  ;;  %v1921_v59 = vld [vmem:[%s15496_s4 + $0x68] sm:$0xff]  ;;  %v1923_v52 = vld [vmem:[%s15496_s4 + $0x78] sm:$0xff] }
 0x2a2   :  { %v1616_v12 = vadd.f32 %v1608_v26, %v1391_v5  ;;  %v1393_v26 = vld [vmem:[#allocation2 + $0x78] sm:$0x30]  ;;  %v12259_v5 = vpack.c.bf16 %v1914_v6, %v1910_v50  ;;  %v12267_v43 = vpack.c.bf16 %v1921_v59, %v1917_v37  ;;  %v12269_v45 = vpack.c.bf16 %v1923_v52, %v1919_v2  ;;  %v1924_v2 = vld [vmem:[%s15496_s4 + $0x80] sm:$0xff] }
 0x2a3   :  { %v7563_v53 = vmul.f32 -1.442695, %v1615_v36  ;;  %v12257_v36 = vpack.c.bf16 %v1912_v49, %v1908_v11  ;;  %v1918_v11 = vld [vmem:[%s15496_s4 + $0x50] sm:$0xff]  ;;  %v7565_v50 = vmul.f32 -1.442695, %v1617_v46  ;;  %v1927_v6 = vld [vmem:[%s15496_s4 + $0x98] sm:$0xff] }
 0x2a4   :  { %v7564_v40 = vmul.f32 -1.442695, %v1616_v12  ;;  %v1916_v12 = vld [vmem:[%s15496_s4 + $0x40] sm:$0xff]  ;;  %v1922_v49 = vld [vmem:[%s15496_s4 + $0x70] sm:$0xff]  ;;  %v1931_v37 = vld [vmem:[%s15496_s4 + $0xb8] sm:$0xff] }
 0x2a5   :  { %9975 = vpow2.f32 %v7563_v53  ;;  %v1920_v53 = vld [vmem:[%s15496_s4 + $0x60] sm:$0xff]  ;;  %v12293_v59 = vpack.c.bf16 %v1922_v49, %v1918_v11  ;;  %v1937_v49 = vld [vmem:[%s15496_s4 + $0xe8] sm:$0xff] }
 0x2a6   :  { %9977 = vpow2.f32 %v7564_v40  ;;  %v1618_v40 = vadd.f32 %v1610_v24, %v1393_v26  ;;  %v1929_v24 = vld [vmem:[%s15496_s4 + $0xa8] sm:$0xff]  ;;  %v12291_v46 = vpack.c.bf16 %v1920_v53, %v1916_v12  ;;  %v1928_v52 = vld [vmem:[%s15496_s4 + $0xa0] sm:$0xff]  ;;  %v12305_v12 = vpack.c.bf16 %v1931_v37, %v1927_v6  ;;  %v1926_v53 = vld [vmem:[%s15496_s4 + $0x90] sm:$0xff] }
 0x2a8   :  { %v9974_v54 = vpop.eup %9973  ;;  %9979 = vtanh.f32 %v1618_v40  ;;  %15576 = vst [vmem:[#allocation10_spill] sm:$0xff] %v12305_v12  ;;  %v1933_v40 = vld [vmem:[%s15496_s4 + $0xc8] sm:$0xff] }
 0x2a9   :  { %v1645_v8 = vmul.f32 %v9974_v54, %v9972_v23  ;;  %v1925_v23 = vld [vmem:[%s15496_s4 + $0x88] sm:$0xff]  ;;  %9981 = vpow2.f32 %v7565_v50  ;;  %v12329_v50 = vpack.c.bf16 %v1928_v52, %v1924_v2  ;;  %v1934_v2 = vld [vmem:[%s15496_s4 + $0xd0] sm:$0xff] }
 0x2aa   :  { %v12303_v26 = vpack.c.bf16 %v1929_v24, %v1925_v23  ;;  %v1935_v23 = vld [vmem:[%s15496_s4 + $0xd8] sm:$0xff]  ;;  %v1938_v52 = vld [vmem:[%s15496_s4 + $0xf0] sm:$0xff] }
 0x2ab   :  { %1673 = vst [vmem:[#allocation4] sm:$0xc] %v1645_v8  ;;  %v1744_v34 = vrot.slane %v1645_v8, 2  ;;  %v1939_v24 = vld [vmem:[%s15496_s4 + $0xf8] sm:$0xff]  ;;  %15577 = vst [vmem:[#allocation11_spill] sm:$0xff] %v12329_v50 }
 0x2ac   :  { %15575 = vst [vmem:[#allocation9_spill] sm:$0xff] %v12303_v26 }
 0x2ad   :  { %1811 = vmatmul.mubr.f32.vlgmr.msra.gmra.mrb[16].mxu0 %v1744_v34  ;;  %1882 = vmatmul.mubr.f32.vlgmr.msra.gmra.mrb[16].mxu1 %v1744_v34  ;;  %v1930_v34 = vld [vmem:[%s15496_s4 + $0xb0] sm:$0xff] }
 0x2ae   :  { %8366 = vmatpush1.bf16.msra.mxu0 %v12257_v36  ;;  %8398 = vmatpush1.bf16.msra.mxu1 %v12259_v5  ;;  %v12331_v37 = vpack.c.bf16 %v1930_v34, %v1926_v53  ;;  %v1941_v53 = vld [vmem:[%s15496_s4 + $0x108] sm:$0xff] }
 0x2af   :  { %v9976_v54 = vpop.eup %9975  ;;  %8368 = vmatprep.subr.bf16.mxu0 %v12267_v43  ;;  %8400 = vmatprep.subr.bf16.mxu1 %v12269_v45  ;;  %v1945_v34 = vld [vmem:[%s15496_s4 + $0x128] sm:$0xff] }
 0x2b0   :  { %v1655_v8 = vadd.f32 1.0, %v9976_v54  ;;  %v9978_v11 = vpop.eup %9977  ;;  %2039 = vmatprep.mubr.f32.mxu0 %v15566_v3  ;;  %2110 = vmatprep.mubr.f32.mxu1 %v15566_v3  ;;  %15578 = vst [vmem:[#allocation12_spill] sm:$0xff] %v12331_v37  ;;  %v1932_v54 = vld [vmem:[%s15496_s4 + $0xc0] sm:$0xff]  ;;  %v12377_v33 = vpack.c.bf16 %v1945_v34, %v1941_v53  ;;  %v1951_v53 = vld [vmem:[%s15496_s4 + $0x158] sm:$0xff] }
 0x2b1   :  { %v1656_v6 = vadd.f32 1.0, %v9978_v11  ;;  %v12343_v11 = vpack.c.bf16 %v1939_v24, %v1935_v23  ;;  %v12365_v23 = vpack.c.bf16 %v1936_v39, %v1932_v54  ;;  %v12367_v24 = vpack.c.bf16 %v1938_v52, %v1934_v2  ;;  %v1942_v39 = vld [vmem:[%s15496_s4 + $0x110] sm:$0xff]  ;;  %v1949_v2 = vld [vmem:[%s15496_s4 + $0x148] sm:$0xff]  ;;  %v1955_v34 = vld [vmem:[%s15496_s4 + $0x178] sm:$0xff] }
 0x2b2   :  { %9983 = vrcp.f32 %v1655_v8  ;;  %8370 = vmatpush1.bf16.msra.mxu0 %v12291_v46  ;;  %8402 = vmatpush1.bf16.msra.mxu1 %v12293_v59  ;;  %v12341_v8 = vpack.c.bf16 %v1937_v49, %v1933_v40  ;;  %v1943_v40 = vld [vmem:[%s15496_s4 + $0x118] sm:$0xff]  ;;  %15583 = vst [vmem:[#allocation18_spill] sm:$0xff] %v12377_v33  ;;  %v1946_v54 = vld [vmem:[%s15496_s4 + $0x130] sm:$0xff]  ;;  %v1953_v52 = vld [vmem:[%s15496_s4 + $0x168] sm:$0xff] }
 0x2b3   :  { %9985 = vrcp.f32 %v1656_v6  ;;  %8372 = vmatprep.subr.bf16.mxu0 %v12303_v26  ;;  %8404 = vmatprep.subr.bf16.mxu1 %v12305_v12  ;;  %15580 = vst [vmem:[#allocation14_spill] sm:$0xff] %v12343_v11  ;;  %v1947_v49 = vld [vmem:[%s15496_s4 + $0x138] sm:$0xff]  ;;  %15581 = vst [vmem:[#allocation15_spill] sm:$0xff] %v12365_v23  ;;  %v1940_v6 = vld [vmem:[%s15496_s4 + $0x100] sm:$0xff] }
 0x2b4   :  { %15579 = vst [vmem:[#allocation13_spill] sm:$0xff] %v12341_v8  ;;  %15582 = vst [vmem:[#allocation17_spill] sm:$0xff] %v12367_v24  ;;  %v12379_v27 = vpack.c.bf16 %v1947_v49, %v1943_v40  ;;  %v9980_v40 = vpop.eup %9979  ;;  %v12401_v21 = vpack.c.bf16 %v1944_v30, %v1940_v6  ;;  %v1950_v30 = vld [vmem:[%s15496_s4 + $0x150] sm:$0xff]  ;;  %v1960_v26 = vld [vmem:[%s15496_s4 + $0x1a0] sm:$0xff] }
 0x2b5   :  { %v9982_v49 = vpop.eup %9981  ;;  %v1954_v6 = vld [vmem:[%s15496_s4 + $0x170] sm:$0xff] }
 0x2b6   :  { %8374 = vmatpush1.bf16.msra.mxu0 %v12329_v50  ;;  %8406 = vmatpush1.bf16.msra.mxu1 %v12331_v37  ;;  %15584 = vst [vmem:[#allocation19_spill] sm:$0xff] %v12379_v27  ;;  %v1952_v37 = vld [vmem:[%s15496_s4 + $0x160] sm:$0xff] }
 0x2b7   :  { %8376 = vmatprep.subr.bf16.mxu0 %v12341_v8  ;;  %8408 = vmatprep.subr.bf16.mxu1 %v12343_v11  ;;  %v12403_v11 = vpack.c.bf16 %v1946_v54, %v1942_v39  ;;  %v1948_v8 = vld [vmem:[%s15496_s4 + $0x140] sm:$0xff]  ;;  %v1957_v39 = vld [vmem:[%s15496_s4 + $0x188] sm:$0xff]  ;;  %v1666_v54 = vrot.slane %v11908_v15, 2 }
 0x2b8   :  { %v12438_v15 = vpack.c.bf16 %v1952_v37, %v1948_v8  ;;  %v1958_v37 = vld [vmem:[%s15496_s4 + $0x190] sm:$0xff] }
 0x2b9   :  { %v1962_v8 = vld [vmem:[%s15496_s4 + $0x1b0] sm:$0xff] }
 0x2ba   :  { %8378 = vmatpush1.bf16.msra.mxu0 %v12365_v23  ;;  %8410 = vmatpush1.bf16.msra.mxu1 %v12367_v24  ;;  %v12413_v23 = vpack.c.bf16 %v1953_v52, %v1949_v2  ;;  %v12415_v24 = vpack.c.bf16 %v1955_v34, %v1951_v53  ;;  %v1961_v2 = vld [vmem:[%s15496_s4 + $0x1a8] sm:$0xff]  ;;  %v1959_v52 = vld [vmem:[%s15496_s4 + $0x198] sm:$0xff] }
 0x2bb   :  { %8380 = vmatprep.subr.bf16.mxu0 %v12377_v33  ;;  %8412 = vmatprep.subr.bf16.mxu1 %v12379_v27  ;;  %v1963_v53 = vld [vmem:[%s15496_s4 + $0x1b8] sm:$0xff]  ;;  %v1657_v27 = vadd.f32 1.0, %v9982_v49  ;;  %v12450_v49 = vpack.c.bf16 %v1961_v2, %v1957_v39  ;;  %v1969_v39 = vld [vmem:[%s15496_s4 + $0x1e8] sm:$0xff] }
 0x2bc   :  { %v9984_v50 = vpop.eup %9983  ;;  %v1967_v2 = vld [vmem:[%s15496_s4 + $0x1d8] sm:$0xff] }
 0x2bd   :  { %v1669_v33 = vmul.f32 %v9984_v50, %v9980_v40  ;;  %v9986_v34 = vpop.eup %9985  ;;  %v12440_v50 = vpack.c.bf16 %v1954_v6, %v1950_v30  ;;  %v1956_v40 = vld [vmem:[%s15496_s4 + $0x180] sm:$0xff]  ;;  %v1965_v30 = vld [vmem:[%s15496_s4 + $0x1c8] sm:$0xff]  ;;  %9987 = vrcp.f32 %v1657_v27 }
 0x2be   :  { %v1668_v12 = vmul.f32 %v9986_v34, %v1666_v54  ;;  %8382 = vmatpush1.bf16.msra.mxu0 %v12401_v21  ;;  %8414 = vmatpush1.bf16.msra.mxu1 %v12403_v11  ;;  %v12452_v54 = vpack.c.bf16 %v1963_v53, %v1959_v52  ;;  %v1971_v52 = vld [vmem:[%s15496_s4 + $0x1f8] sm:$0xff]  ;;  %v1964_v53 = vld [vmem:[%s15496_s4 + $0x1c0] sm:$0xff]  ;;  %v12486_v34 = vpack.c.bf16 %v1969_v39, %v1965_v30 }
 0x2bf   :  { %15585 = vst [vmem:[#allocation20_spill] sm:$0xff] %v12440_v50  ;;  %8384 = vmatprep.subr.bf16.mxu0 %v12413_v23  ;;  %8416 = vmatprep.subr.bf16.mxu1 %v12415_v24  ;;  %v12488_v27 = vpack.c.bf16 %v1971_v52, %v1967_v2 }
 0x2c0   :  { %v12463_v6 = vadd.f32 %v1669_v33, %v1668_v12  ;;  %v12477_v33 = vpack.c.bf16 %v1960_v26, %v1956_v40  ;;  %v12479_v12 = vpack.c.bf16 %v1962_v8, %v1958_v37  ;;  %v1966_v26 = vld [vmem:[%s15496_s4 + $0x1d0] sm:$0xff] }
 0x2c1   :  { %v1970_v40 = vld [vmem:[%s15496_s4 + $0x1f0] sm:$0xff] }
 0x2c2   :  { %9989 = vtanh.f32 %v12463_v6  ;;  %8386 = vmatpush1.bf16.msra.mxu0 %v12438_v15  ;;  %8418 = vmatpush1.bf16.msra.mxu1 %v12440_v50  ;;  %v1968_v50 = vld [vmem:[%s15496_s4 + $0x1e0] sm:$0xff]  ;;  %v12503_v8 = vpack.c.bf16 %v1970_v40, %v1966_v26 }
 0x2c3   :  { %8388 = vmatprep.subr.bf16.mxu0 %v12450_v49  ;;  %8420 = vmatprep.subr.bf16.mxu1 %v12452_v54  ;;  %v12501_v37 = vpack.c.bf16 %v1968_v50, %v1964_v53  ;;  %v1904_v40 = vld [vmem:[#allocation2 + $0x60] sm:$0xc] }
 0x2c6   :  { %8390 = vmatpush1.bf16.msra.mxu0 %v12477_v33  ;;  %8422 = vmatpush1.bf16.msra.mxu1 %v12479_v12 }
 0x2c7   :  { %8392 = vmatprep.subr.bf16.mxu0 %v12486_v34  ;;  %8424 = vmatprep.subr.bf16.mxu1 %v12488_v27  ;;  %v9988_v30 = vpop.eup %9987 }
 0x2ca   :  { %8394 = vmatpush1.bf16.msra.mxu0 %v12501_v37  ;;  %8426 = vmatpush1.bf16.msra.mxu1 %v12503_v8 }
 0x2cb   :  { %8428 = vmatprep.subr.bf16.mxu0 %v11932_v42  ;;  %8460 = vmatprep.subr.bf16.mxu1 %v11943_v58 }
 0x2cc   :  { %v9990_v39 = vpop.eup %9989 }
 0x2cd   :  { %v1672_v2 = vmul.f32 %v9990_v39, %v9988_v30 }
 0x2cf   :  { %1674 = vst [vmem:[#allocation5 + $0x8] sm:$0x30] %v1672_v2  ;;  %v1973_v50 = vrot.slane %v1672_v2, 4  ;;  %v1905_v2 = vld [vmem:[#allocation2 + $0x68] sm:$0xc] }
 0x2d1   :  { %2040 = vmatmul.mubr.f32.vlgmr.msra.gmra.mrb[18].mxu0 %v1973_v50  ;;  %2111 = vmatmul.mubr.f32.vlgmr.msra.gmra.mrb[18].mxu1 %v1973_v50 }
 0x2d2   :  { %8430 = vmatpush1.bf16.msra.mxu0 %v11945_v51  ;;  %8462 = vmatpush1.bf16.msra.mxu1 %v11954_v29 }
 0x2d3   :  { %8432 = vmatprep.subr.bf16.mxu0 %v11968_v9  ;;  %8464 = vmatprep.subr.bf16.mxu1 %v11979_v28  ;;  %v1675_v28 = vld [vmem:[#allocation2] sm:$0x30] }
 0x2d4   :  { %2324 = vmatprep.mubr.f32.mxu0 %v15566_v3  ;;  %2395 = vmatprep.mubr.f32.mxu1 %v15566_v3 }
 0x2d6   :  { %8434 = vmatpush1.bf16.msra.mxu0 %v11981_v31  ;;  %8466 = vmatpush1.bf16.msra.mxu1 %v11990_v63 }
 0x2d7   :  { %8436 = vmatprep.subr.bf16.mxu0 %v12004_v35  ;;  %8468 = vmatprep.subr.bf16.mxu1 %v12015_v38  ;;  %v1676_v35 = vld [vmem:[#allocation2 + $0x8] sm:$0x30] }
 0x2da   :  { %8438 = vmatpush1.bf16.msra.mxu0 %v12017_v17  ;;  %8470 = vmatpush1.bf16.msra.mxu1 %v12026_v22 }
 0x2db   :  { %8440 = vmatprep.subr.bf16.mxu0 %v12040_v47  ;;  %8472 = vmatprep.subr.bf16.mxu1 %v12051_v41  ;;  %v1677_v41 = vld [vmem:[#allocation2 + $0x10] sm:$0x30] }
 0x2de   :  { %8442 = vmatpush1.bf16.msra.mxu0 %v12053_v7  ;;  %8474 = vmatpush1.bf16.msra.mxu1 %v12062_v44 }
 0x2df   :  { %8444 = vmatprep.subr.bf16.mxu0 %v12076_v57  ;;  %8476 = vmatprep.subr.bf16.mxu1 %v12087_v18  ;;  %v1678_v57 = vld [vmem:[#allocation2 + $0x18] sm:$0x30] }
 0x2e2   :  { %8446 = vmatpush1.bf16.msra.mxu0 %v12089_v13  ;;  %8478 = vmatpush1.bf16.msra.mxu1 %v12098_v61 }
 0x2e3   :  { %8448 = vmatprep.subr.bf16.mxu0 %v12112_v10  ;;  %8480 = vmatprep.subr.bf16.mxu1 %v12123_v16 }
 0x2e6   :  { %8450 = vmatpush1.bf16.msra.mxu0 %v12125_v0  ;;  %8482 = vmatpush1.bf16.msra.mxu1 %v12134_v4 }
 0x2e7   :  { %8452 = vmatprep.subr.bf16.mxu0 %v12148_v20  ;;  %8484 = vmatprep.subr.bf16.mxu1 %v12159_v48 }
 0x2ea   :  { %8454 = vmatpush1.bf16.msra.mxu0 %v12161_v55  ;;  %8486 = vmatpush1.bf16.msra.mxu1 %v12170_v25  ;;  %v2153_v55 = vrot.slane %v12230_v56, 6 }
 0x2eb   :  { %8456 = vmatprep.subr.bf16.mxu0 %v12184_v1  ;;  %8488 = vmatprep.subr.bf16.mxu1 %v12195_v60 }
 0x2ee   :  { %8458 = vmatpush1.bf16.msra.mxu0 %v12197_v62  ;;  %8490 = vmatpush1.bf16.msra.mxu1 %v12206_v19 }
 0x2ef   :  { %8492 = vmatprep.subr.bf16.mxu0 %v12220_v32  ;;  %8524 = vmatprep.subr.bf16.mxu1 %v12225_v14 }
 0x380   :  { %v1812_v42 = vpop.f32.mrb[16].mxu0  ;;  %v1883_v58 = vpop.f32.mrb[16].mxu1 }
 0x381   :  { %v1892_v51 = vrot.slane %v1812_v42, 4  ;;  %v1814_v29 = vpop.f32.mrb[17].mxu0  ;;  %v1885_v9 = vpop.f32.mrb[17].mxu1  ;;  %v1894_v47 = vrot.slane %v1883_v58, 4 }
 0x382   :  { %v1893_v31 = vrot.slane %v1814_v29, 4  ;;  %v1895_v7 = vrot.slane %v1885_v9, 4  ;;  %v1906_v29 = vld [vmem:[#allocation2 + $0x70] sm:$0xc] }
 0x383   :  { %v1900_v63 = vadd.f32 %v1892_v51, %v1675_v28  ;;  %v1902_v44 = vadd.f32 %v1894_v47, %v1677_v41 }
 0x384   :  { %v1901_v38 = vadd.f32 %v1893_v31, %v1676_v35  ;;  %v1903_v18 = vadd.f32 %v1895_v7, %v1678_v57  ;;  %v1907_v35 = vld [vmem:[#allocation2 + $0x78] sm:$0xc]  ;;  %v15590_v57 = vld [vmem:[#allocation13_spill] sm:$0xff] }
 0x385   :  { %v7566_v17 = vmul.f32 -1.442695, %v1900_v63  ;;  %v7568_v13 = vmul.f32 -1.442695, %v1902_v44 }
 0x386   :  { %v7567_v22 = vmul.f32 -1.442695, %v1901_v38 }
 0x387   :  { %9991 = vpow2.f32 %v7566_v17 }
 0x388   :  { %9993 = vpow2.f32 %v7567_v22 }
 0x389   :  { %9995 = vtanh.f32 %v1903_v18  ;;  %v15591_v18 = vld [vmem:[#allocation14_spill] sm:$0xff] }
 0x38a   :  { %9997 = vpow2.f32 %v7568_v13 }
 0x391   :  { %v9992_v61 = vpop.eup %9991 }
 0x392   :  { %v2142_v10 = vadd.f32 1.0, %v9992_v61  ;;  %v9994_v16 = vpop.eup %9993 }
 0x393   :  { %v2143_v0 = vadd.f32 1.0, %v9994_v16  ;;  %v9996_v4 = vpop.eup %9995  ;;  %v15594_v16 = vld [vmem:[#allocation18_spill] sm:$0xff] }
 0x394   :  { %9999 = vrcp.f32 %v2142_v10  ;;  %v9998_v20 = vpop.eup %9997  ;;  %v15592_v10 = vld [vmem:[#allocation15_spill] sm:$0xff] }
 0x395   :  { %10001 = vrcp.f32 %v2143_v0  ;;  %v2144_v60 = vadd.f32 1.0, %v9998_v20  ;;  %v15595_v0 = vld [vmem:[#allocation19_spill] sm:$0xff] }
 0x397   :  { %10003 = vrcp.f32 %v2144_v60  ;;  %v2697_v60 = vld [vmem:[%s15495_s3 + $0x10] sm:$0xff] }
 0x39e   :  { %v10000_v48 = vpop.eup %9999 }
 0x39f   :  { %v2156_v25 = vmul.f32 %v10000_v48, %v9996_v4  ;;  %v10002_v1 = vpop.eup %10001  ;;  %v2180_v4 = vrot.slane %v12463_v6, 2  ;;  %v15596_v6 = vld [vmem:[#allocation20_spill] sm:$0xff] }
 0x3a0   :  { %v2155_v62 = vmul.f32 %v10002_v1, %v2153_v55 }
 0x3a1   :  { %v10004_v51 = vpop.eup %10003 }
 0x3a2   :  { %v12546_v19 = vadd.f32 %v2156_v25, %v2155_v62  ;;  %v2701_v62 = vld [vmem:[%s15495_s3 + $0x30] sm:$0xff] }
 0x3a4   :  { %v2041_v32 = vpop.f32.mrb[18].mxu0  ;;  %v2112_v14 = vpop.f32.mrb[18].mxu1  ;;  %10005 = vtanh.f32 %v12546_v19 }
 0x3a5   :  { %v2121_v52 = vrot.slane %v2041_v32, 6  ;;  %v2043_v53 = vpop.f32.mrb[19].mxu0  ;;  %v2114_v26 = vpop.f32.mrb[19].mxu1  ;;  %v2123_v58 = vrot.slane %v2112_v14, 6  ;;  %v12618_v32 = vpack.c.bf16 %v2701_v62, %v2697_v60  ;;  %v2704_v14 = vld [vmem:[%s15495_s3 + $0x48] sm:$0xff] }
 0x3a6   :  { %v2122_v30 = vrot.slane %v2043_v53, 6  ;;  %v2124_v9 = vrot.slane %v2114_v26, 6  ;;  %v2706_v53 = vld [vmem:[%s15495_s3 + $0x58] sm:$0xff] }
 0x3a7   :  { %v2129_v39 = vadd.f32 %v2121_v52, %v1904_v40  ;;  %v2131_v31 = vadd.f32 %v2123_v58, %v1906_v29  ;;  %v2708_v52 = vld [vmem:[%s15495_s3 + $0x68] sm:$0xff]  ;;  %v2710_v40 = vld [vmem:[%s15495_s3 + $0x78] sm:$0xff] }
 0x3a8   :  { %v2130_v50 = vadd.f32 %v2122_v30, %v1905_v2  ;;  %v2132_v38 = vadd.f32 %v2124_v9, %v1907_v35  ;;  %v12632_v26 = vpack.c.bf16 %v2708_v52, %v2704_v14  ;;  %v2703_v30 = vld [vmem:[%s15495_s3 + $0x40] sm:$0xff]  ;;  %v12643_v2 = vpack.c.bf16 %v2710_v40, %v2706_v53  ;;  %v2716_v29 = vld [vmem:[%s15495_s3 + $0xa8] sm:$0xff]  ;;  %v2714_v9 = vld [vmem:[%s15495_s3 + $0x98] sm:$0xff] }
 0x3a9   :  { %v7569_v56 = vmul.f32 -1.442695, %v2129_v39  ;;  %v7571_v22 = vmul.f32 -1.442695, %v2131_v31  ;;  %v2707_v39 = vld [vmem:[%s15495_s3 + $0x60] sm:$0xff]  ;;  %v2718_v31 = vld [vmem:[%s15495_s3 + $0xb8] sm:$0xff] }
 0x3aa   :  { %v7570_v42 = vmul.f32 -1.442695, %v2130_v50  ;;  %v12645_v50 = vpack.c.bf16 %v2707_v39, %v2703_v30  ;;  %v2715_v35 = vld [vmem:[%s15495_s3 + $0xa0] sm:$0xff]  ;;  %v2737_v14 = vld [vmem:[%s15495_s3 + $0x150] sm:$0xff]  ;;  %v2744_v40 = vld [vmem:[%s15495_s3 + $0x188] sm:$0xff] }
 0x3ab   :  { %10007 = vpow2.f32 %v7569_v56  ;;  %v2705_v56 = vld [vmem:[%s15495_s3 + $0x50] sm:$0xff]  ;;  %v2748_v30 = vld [vmem:[%s15495_s3 + $0x1a8] sm:$0xff]  ;;  %v2746_v39 = vld [vmem:[%s15495_s3 + $0x198] sm:$0xff] }
 0x3ac   :  { %10009 = vpow2.f32 %v7570_v42  ;;  %v2709_v42 = vld [vmem:[%s15495_s3 + $0x70] sm:$0xff] }
 0x3ad   :  { %10011 = vtanh.f32 %v2132_v38  ;;  %v12654_v58 = vpack.c.bf16 %v2709_v42, %v2705_v56  ;;  %v12679_v38 = vpack.c.bf16 %v2718_v31, %v2714_v9  ;;  %v2741_v52 = vld [vmem:[%s15495_s3 + $0x170] sm:$0xff]  ;;  %v12812_v56 = vpack.c.bf16 %v2748_v30, %v2744_v40  ;;  %v2750_v42 = vld [vmem:[%s15495_s3 + $0x1b8] sm:$0xff]  ;;  %v2190_v30 = vld [vmem:[#allocation2 + $0x8] sm:$0xc0] }
 0x3ae   :  { %v10006_v28 = vpop.eup %10005  ;;  %10013 = vpow2.f32 %v7571_v22  ;;  %v2713_v22 = vld [vmem:[%s15495_s3 + $0x90] sm:$0xff]  ;;  %v12798_v53 = vpack.c.bf16 %v2741_v52, %v2737_v14  ;;  %v12823_v9 = vpack.c.bf16 %v2750_v42, %v2746_v39  ;;  %v2189_v14 = vld [vmem:[#allocation2] sm:$0xc0] }
 0x3af   :  { %v2159_v63 = vmul.f32 %v10006_v28, %v10004_v51  ;;  %v2712_v51 = vld [vmem:[%s15495_s3 + $0x88] sm:$0xff] }
 0x3b0   :  { %v12668_v28 = vpack.c.bf16 %v2716_v29, %v2712_v51  ;;  %v2743_v51 = vld [vmem:[%s15495_s3 + $0x180] sm:$0xff] }
 0x3b1   :  { %2187 = vst [vmem:[#allocation4] sm:$0x30] %v2159_v63  ;;  %v2258_v17 = vrot.slane %v2159_v63, 4  ;;  %v2711_v63 = vld [vmem:[%s15495_s3 + $0x80] sm:$0xff] }
 0x3b2   :  { %v2747_v29 = vld [vmem:[%s15495_s3 + $0x1a0] sm:$0xff] }
 0x3b3   :  { %2325 = vmatmul.mubr.f32.vlgmr.msra.gmra.mrb[20].mxu0 %v2258_v17  ;;  %2396 = vmatmul.mubr.f32.vlgmr.msra.gmra.mrb[20].mxu1 %v2258_v17  ;;  %v12681_v17 = vpack.c.bf16 %v2715_v35, %v2711_v63  ;;  %v12825_v31 = vpack.c.bf16 %v2747_v29, %v2743_v51  ;;  %v2745_v63 = vld [vmem:[%s15495_s3 + $0x190] sm:$0xff] }
 0x3b4   :  { %8494 = vmatpush1.bf16.msra.mxu0 %v12257_v36  ;;  %8526 = vmatpush1.bf16.msra.mxu1 %v12259_v5  ;;  %v15586_v36 = vld [vmem:[#allocation9_spill] sm:$0xff]  ;;  %v15587_v5 = vld [vmem:[#allocation10_spill] sm:$0xff] }
 0x3b5   :  { %v10008_v47 = vpop.eup %10007  ;;  %8496 = vmatprep.subr.bf16.mxu0 %v12267_v43  ;;  %8528 = vmatprep.subr.bf16.mxu1 %v12269_v45  ;;  %v15588_v43 = vld [vmem:[#allocation11_spill] sm:$0xff]  ;;  %v15589_v45 = vld [vmem:[#allocation12_spill] sm:$0xff] }
 0x3b6   :  { %v2169_v41 = vadd.f32 1.0, %v10008_v47  ;;  %v10010_v7 = vpop.eup %10009  ;;  %2553 = vmatprep.mubr.f32.mxu0 %v15566_v3  ;;  %2624 = vmatprep.mubr.f32.mxu1 %v15566_v3  ;;  %v2717_v47 = vld [vmem:[%s15495_s3 + $0xb0] sm:$0xff] }
 0x3b7   :  { %v2170_v44 = vadd.f32 1.0, %v10010_v7  ;;  %v10012_v13 = vpop.eup %10011  ;;  %v2720_v7 = vld [vmem:[%s15495_s3 + $0xc8] sm:$0xff]  ;;  %v2749_v35 = vld [vmem:[%s15495_s3 + $0x1b0] sm:$0xff] }
 0x3b8   :  { %10015 = vrcp.f32 %v2169_v41  ;;  %8498 = vmatpush1.bf16.msra.mxu0 %v12291_v46  ;;  %8530 = vmatpush1.bf16.msra.mxu1 %v12293_v59  ;;  %v10014_v61 = vpop.eup %10013  ;;  %v15593_v46 = vld [vmem:[#allocation17_spill] sm:$0xff]  ;;  %v12690_v41 = vpack.c.bf16 %v2717_v47, %v2713_v22  ;;  %v12834_v22 = vpack.c.bf16 %v2749_v35, %v2745_v63  ;;  %v2191_v63 = vld [vmem:[#allocation2 + $0x10] sm:$0xc0] }
 0x3b9   :  { %10017 = vrcp.f32 %v2170_v44  ;;  %8500 = vmatprep.subr.bf16.mxu0 %v15586_v36  ;;  %8532 = vmatprep.subr.bf16.mxu1 %v15587_v5  ;;  %v2171_v55 = vadd.f32 1.0, %v10014_v61  ;;  %v2724_v44 = vld [vmem:[%s15495_s3 + $0xe8] sm:$0xff]  ;;  %v2722_v36 = vld [vmem:[%s15495_s3 + $0xd8] sm:$0xff]  ;;  %v2721_v61 = vld [vmem:[%s15495_s3 + $0xd0] sm:$0xff] }
 0x3ba   :  { %v12704_v5 = vpack.c.bf16 %v2724_v44, %v2720_v7  ;;  %v2752_v47 = vld [vmem:[%s15495_s3 + $0x1c8] sm:$0xff]  ;;  %v2754_v44 = vld [vmem:[%s15495_s3 + $0x1d8] sm:$0xff] }
 0x3bb   :  { %10019 = vrcp.f32 %v2171_v55  ;;  %v2731_v55 = vld [vmem:[%s15495_s3 + $0x120] sm:$0xff]  ;;  %v2756_v7 = vld [vmem:[%s15495_s3 + $0x1e8] sm:$0xff] }
 0x3bc   :  { %8502 = vmatpush1.bf16.msra.mxu0 %v15588_v43  ;;  %8534 = vmatpush1.bf16.msra.mxu1 %v15589_v45  ;;  %v2726_v43 = vld [vmem:[%s15495_s3 + $0xf8] sm:$0xff]  ;;  %v2719_v45 = vld [vmem:[%s15495_s3 + $0xc0] sm:$0xff] }
 0x3bd   :  { %8504 = vmatprep.subr.bf16.mxu0 %v15590_v57  ;;  %8536 = vmatprep.subr.bf16.mxu1 %v15591_v18  ;;  %v2723_v57 = vld [vmem:[%s15495_s3 + $0xe0] sm:$0xff]  ;;  %v12715_v18 = vpack.c.bf16 %v2726_v43, %v2722_v36  ;;  %v12848_v36 = vpack.c.bf16 %v2756_v7, %v2752_v47  ;;  %v2758_v43 = vld [vmem:[%s15495_s3 + $0x1f8] sm:$0xff] }
 0x3be   :  { %v2192_v7 = vld [vmem:[#allocation2 + $0x18] sm:$0xc0] }
 0x3c0   :  { %8506 = vmatpush1.bf16.msra.mxu0 %v15592_v10  ;;  %8538 = vmatpush1.bf16.msra.mxu1 %v15593_v46  ;;  %v2725_v10 = vld [vmem:[%s15495_s3 + $0xf0] sm:$0xff] }
 0x3c1   :  { %8508 = vmatprep.subr.bf16.mxu0 %v15594_v16  ;;  %8540 = vmatprep.subr.bf16.mxu1 %v15595_v0  ;;  %v12726_v46 = vpack.c.bf16 %v2725_v10, %v2721_v61  ;;  %v2732_v16 = vld [vmem:[%s15495_s3 + $0x128] sm:$0xff]  ;;  %v2730_v0 = vld [vmem:[%s15495_s3 + $0x118] sm:$0xff]  ;;  %v12859_v61 = vpack.c.bf16 %v2758_v43, %v2754_v44 }
 0x3c2   :  { %v10016_v59 = vpop.eup %10015 }
 0x3c3   :  { %v2183_v20 = vmul.f32 %v10016_v59, %v10012_v13  ;;  %v10018_v48 = vpop.eup %10017  ;;  %v12717_v13 = vpack.c.bf16 %v2723_v57, %v2719_v45  ;;  %v2728_v59 = vld [vmem:[%s15495_s3 + $0x108] sm:$0xff]  ;;  %v2751_v45 = vld [vmem:[%s15495_s3 + $0x1c0] sm:$0xff] }
 0x3c4   :  { %v2182_v25 = vmul.f32 %v10018_v48, %v2180_v4  ;;  %8510 = vmatpush1.bf16.msra.mxu0 %v12401_v21  ;;  %8542 = vmatpush1.bf16.msra.mxu1 %v12403_v11  ;;  %v12740_v4 = vpack.c.bf16 %v2732_v16, %v2728_v59  ;;  %v2727_v48 = vld [vmem:[%s15495_s3 + $0x100] sm:$0xff]  ;;  %v2753_v59 = vld [vmem:[%s15495_s3 + $0x1d0] sm:$0xff] }
 0x3c5   :  { %8512 = vmatprep.subr.bf16.mxu0 %v12413_v23  ;;  %8544 = vmatprep.subr.bf16.mxu1 %v12415_v24  ;;  %v10020_v21 = vpop.eup %10019  ;;  %v2755_v57 = vld [vmem:[%s15495_s3 + $0x1e0] sm:$0xff]  ;;  %v2757_v16 = vld [vmem:[%s15495_s3 + $0x1f0] sm:$0xff] }
 0x3c6   :  { %v12572_v1 = vadd.f32 %v2183_v20, %v2182_v25  ;;  %v2734_v20 = vld [vmem:[%s15495_s3 + $0x138] sm:$0xff]  ;;  %v12861_v10 = vpack.c.bf16 %v2755_v57, %v2751_v45 }
 0x3c7   :  { %v12751_v25 = vpack.c.bf16 %v2734_v20, %v2730_v0  ;;  %v12870_v0 = vpack.c.bf16 %v2757_v16, %v2753_v59  ;;  %v2913_v20 = vld [vmem:[%s15496_s4 + $0x8] sm:$0xff] }
 0x3c8   :  { %10021 = vtanh.f32 %v12572_v1  ;;  %8514 = vmatpush1.bf16.msra.mxu0 %v12438_v15  ;;  %8546 = vmatpush1.bf16.msra.mxu1 %v15596_v6  ;;  %v2696_v15 = vld [vmem:[%s15495_s3 + $0x8] sm:$0xff]  ;;  %v12753_v6 = vpack.c.bf16 %v2731_v55, %v2727_v48  ;;  %v2915_v55 = vld [vmem:[%s15496_s4 + $0x18] sm:$0xff] }
 0x3c9   :  { %8516 = vmatprep.subr.bf16.mxu0 %v12450_v49  ;;  %8548 = vmatprep.subr.bf16.mxu1 %v12452_v54  ;;  %v2700_v49 = vld [vmem:[%s15495_s3 + $0x28] sm:$0xff]  ;;  %v2698_v54 = vld [vmem:[%s15495_s3 + $0x18] sm:$0xff] }
 0x3ca   :  { %v2917_v48 = vld [vmem:[%s15496_s4 + $0x28] sm:$0xff] }
 0x3cc   :  { %8518 = vmatpush1.bf16.msra.mxu0 %v12477_v33  ;;  %8550 = vmatpush1.bf16.msra.mxu1 %v12479_v12  ;;  %v12596_v33 = vpack.c.bf16 %v2700_v49, %v2696_v15  ;;  %v2702_v12 = vld [vmem:[%s15495_s3 + $0x38] sm:$0xff]  ;;  %v2740_v15 = vld [vmem:[%s15495_s3 + $0x168] sm:$0xff] }
 0x3cd   :  { %8520 = vmatprep.subr.bf16.mxu0 %v12486_v34  ;;  %8552 = vmatprep.subr.bf16.mxu1 %v12488_v27  ;;  %v2695_v34 = vld [vmem:[%s15495_s3] sm:$0xff]  ;;  %v2738_v49 = vld [vmem:[%s15495_s3 + $0x158] sm:$0xff] }
 0x3ce   :  { %v2699_v27 = vld [vmem:[%s15495_s3 + $0x20] sm:$0xff] }
 0x3d0   :  { %8522 = vmatpush1.bf16.msra.mxu0 %v12501_v37  ;;  %8554 = vmatpush1.bf16.msra.mxu1 %v12503_v8  ;;  %v12607_v37 = vpack.c.bf16 %v2702_v12, %v2698_v54  ;;  %v12609_v8 = vpack.c.bf16 %v2699_v27, %v2695_v34  ;;  %v2742_v12 = vld [vmem:[%s15495_s3 + $0x178] sm:$0xff]  ;;  %v2735_v34 = vld [vmem:[%s15495_s3 + $0x140] sm:$0xff] }
 0x3d1   :  { %8556 = vmatprep.subr.bf16.mxu0 %v12596_v33  ;;  %v2739_v27 = vld [vmem:[%s15495_s3 + $0x160] sm:$0xff]  ;;  %v12787_v60 = vpack.c.bf16 %v2742_v12, %v2738_v49 }
 0x3d2   :  { %v10022_v11 = vpop.eup %10021  ;;  %8588 = vmatprep.subr.bf16.mxu1 %v12607_v37  ;;  %v12789_v62 = vpack.c.bf16 %v2739_v27, %v2735_v34 }
 0x3d3   :  { %v2186_v23 = vmul.f32 %v10022_v11, %v10020_v21  ;;  %v2729_v21 = vld [vmem:[%s15495_s3 + $0x110] sm:$0xff] }
 0x3d4   :  { %v2733_v11 = vld [vmem:[%s15495_s3 + $0x130] sm:$0xff] }
 0x3d5   :  { %2188 = vst [vmem:[#allocation5 + $0x8] sm:$0xc] %v2186_v23  ;;  %v2487_v24 = vrot.slane %v2186_v23, 2  ;;  %v12762_v23 = vpack.c.bf16 %v2733_v11, %v2729_v21  ;;  %v12884_v21 = vpack.c.bf16 %v2917_v48, %v2913_v20  ;;  %v2919_v11 = vld [vmem:[%s15496_s4 + $0x38] sm:$0xff] }
 0x3d7   :  { %2554 = vmatmul.mubr.f32.vlgmr.msra.gmra.mrb[22].mxu0 %v2487_v24  ;;  %2625 = vmatmul.mubr.f32.vlgmr.msra.gmra.mrb[22].mxu1 %v2487_v24  ;;  %v2736_v24 = vld [vmem:[%s15495_s3 + $0x148] sm:$0xff] }
 0x3d8   :  { %2826 = vmatprep.mubr.f32.mxu0 %v15566_v3  ;;  %2897 = vmatprep.mubr.f32.mxu1 %v15566_v3  ;;  %v12776_v54 = vpack.c.bf16 %v2740_v15, %v2736_v24  ;;  %v12889_v24 = vpack.c.bf16 %v2919_v11, %v2915_v55  ;;  %v2655_v11 = vrot.slane %v12546_v19, 6  ;;  %v2420_v19 = vld [vmem:[#allocation2 + $0x70] sm:$0x3] }
 0x3d9   :  { %8558 = vmatpush1.bf16.msra.mxu0 %v12609_v8  ;;  %8590 = vmatpush1.bf16.msra.mxu1 %v12618_v32 }
 0x3da   :  { %8560 = vmatprep.subr.bf16.mxu0 %v12632_v26  ;;  %8592 = vmatprep.subr.bf16.mxu1 %v12643_v2 }
 0x3dd   :  { %8562 = vmatpush1.bf16.msra.mxu0 %v12645_v50  ;;  %8594 = vmatpush1.bf16.msra.mxu1 %v12654_v58 }
 0x3de   :  { %8564 = vmatprep.subr.bf16.mxu0 %v12668_v28  ;;  %8596 = vmatprep.subr.bf16.mxu1 %v12679_v38 }
 0x3e1   :  { %8566 = vmatpush1.bf16.msra.mxu0 %v12681_v17  ;;  %8598 = vmatpush1.bf16.msra.mxu1 %v12690_v41 }
 0x3e2   :  { %8568 = vmatprep.subr.bf16.mxu0 %v12704_v5  ;;  %8600 = vmatprep.subr.bf16.mxu1 %v12715_v18 }
 0x3e5   :  { %8570 = vmatpush1.bf16.msra.mxu0 %v12717_v13  ;;  %8602 = vmatpush1.bf16.msra.mxu1 %v12726_v46 }
 0x3e6   :  { %8572 = vmatprep.subr.bf16.mxu0 %v12740_v4  ;;  %8604 = vmatprep.subr.bf16.mxu1 %v12751_v25 }
 0x3e9   :  { %8574 = vmatpush1.bf16.msra.mxu0 %v12753_v6  ;;  %8606 = vmatpush1.bf16.msra.mxu1 %v12762_v23 }
 0x3ea   :  { %8576 = vmatprep.subr.bf16.mxu0 %v12776_v54  ;;  %8608 = vmatprep.subr.bf16.mxu1 %v12787_v60 }
 0x3ed   :  { %8578 = vmatpush1.bf16.msra.mxu0 %v12789_v62  ;;  %8610 = vmatpush1.bf16.msra.mxu1 %v12798_v53 }
 0x3ee   :  { %8580 = vmatprep.subr.bf16.mxu0 %v12812_v56  ;;  %8612 = vmatprep.subr.bf16.mxu1 %v12823_v9 }
 0x3f1   :  { %8582 = vmatpush1.bf16.msra.mxu0 %v12825_v31  ;;  %8614 = vmatpush1.bf16.msra.mxu1 %v12834_v22 }
 0x3f2   :  { %8584 = vmatprep.subr.bf16.mxu0 %v12848_v36  ;;  %8616 = vmatprep.subr.bf16.mxu1 %v12859_v61 }
 0x3f5   :  { %8586 = vmatpush1.bf16.msra.mxu0 %v12861_v10  ;;  %8618 = vmatpush1.bf16.msra.mxu1 %v12870_v0 }
 0x3f6   :  { %8620 = vmatprep.subr.bf16.mxu0 %v12884_v21  ;;  %8652 = vmatprep.subr.bf16.mxu1 %v12889_v24 }
 0x486   :  { %v2326_v15 = vpop.f32.mrb[20].mxu0  ;;  %v2397_v49 = vpop.f32.mrb[20].mxu1 }
 0x487   :  { %v2406_v12 = vrot.slane %v2326_v15, 2  ;;  %v2328_v34 = vpop.f32.mrb[21].mxu0  ;;  %v2399_v27 = vpop.f32.mrb[21].mxu1  ;;  %v2408_v29 = vrot.slane %v2397_v49, 2 }
 0x488   :  { %v2407_v52 = vrot.slane %v2328_v34, 2  ;;  %v2409_v35 = vrot.slane %v2399_v27, 2 }
 0x489   :  { %v2414_v40 = vadd.f32 %v2406_v12, %v2189_v14  ;;  %v2416_v47 = vadd.f32 %v2408_v29, %v2191_v63  ;;  %v2418_v14 = vld [vmem:[#allocation2 + $0x60] sm:$0x3] }
 0x48a   :  { %v2415_v39 = vadd.f32 %v2407_v52, %v2190_v30  ;;  %v2417_v44 = vadd.f32 %v2409_v35, %v2192_v7  ;;  %v2421_v7 = vld [vmem:[#allocation2 + $0x78] sm:$0x3] }
 0x48b   :  { %v7572_v42 = vmul.f32 -1.442695, %v2414_v40  ;;  %v7574_v43 = vmul.f32 -1.442695, %v2416_v47 }
 0x48c   :  { %v7573_v51 = vmul.f32 -1.442695, %v2415_v39  ;;  %v2419_v39 = vld [vmem:[#allocation2 + $0x68] sm:$0x3] }
 0x48d   :  { %10023 = vpow2.f32 %v7572_v42 }
 0x48e   :  { %10025 = vpow2.f32 %v7573_v51 }
 0x48f   :  { %10027 = vtanh.f32 %v2417_v44  ;;  %v2912_v44 = vld [vmem:[%s15496_s4] sm:$0xff] }
 0x490   :  { %10029 = vpow2.f32 %v7574_v43  ;;  %v2916_v43 = vld [vmem:[%s15496_s4 + $0x20] sm:$0xff] }
 0x497   :  { %v10024_v45 = vpop.eup %10023 }
 0x498   :  { %v2644_v57 = vadd.f32 1.0, %v10024_v45  ;;  %v10026_v59 = vpop.eup %10025 }
 0x499   :  { %v2645_v16 = vadd.f32 1.0, %v10026_v59  ;;  %v10028_v20 = vpop.eup %10027  ;;  %v2918_v59 = vld [vmem:[%s15496_s4 + $0x30] sm:$0xff] }
 0x49a   :  { %10031 = vrcp.f32 %v2644_v57  ;;  %v10030_v48 = vpop.eup %10029  ;;  %v2914_v57 = vld [vmem:[%s15496_s4 + $0x10] sm:$0xff] }
 0x49b   :  { %10033 = vrcp.f32 %v2645_v16  ;;  %v2646_v12 = vadd.f32 1.0, %v10030_v48  ;;  %v2921_v16 = vld [vmem:[%s15496_s4 + $0x48] sm:$0xff] }
 0x49c   :  { %v2925_v48 = vld [vmem:[%s15496_s4 + $0x68] sm:$0xff] }
 0x49d   :  { %10035 = vrcp.f32 %v2646_v12 }
 0x4a4   :  { %v10032_v55 = vpop.eup %10031 }
 0x4a5   :  { %v2658_v15 = vmul.f32 %v10032_v55, %v10028_v20  ;;  %v10034_v49 = vpop.eup %10033  ;;  %v2923_v55 = vld [vmem:[%s15496_s4 + $0x58] sm:$0xff] }
 0x4a6   :  { %v2657_v34 = vmul.f32 %v10034_v49, %v2655_v11  ;;  %v2927_v11 = vld [vmem:[%s15496_s4 + $0x78] sm:$0xff] }
 0x4a7   :  { %v10036_v45 = vpop.eup %10035 }
 0x4a8   :  { %v12894_v27 = vadd.f32 %v2658_v15, %v2657_v34  ;;  %v12921_v34 = vpack.c.bf16 %v2916_v43, %v2912_v44 }
 0x4aa   :  { %v2555_v52 = vpop.f32.mrb[22].mxu0  ;;  %v2626_v40 = vpop.f32.mrb[22].mxu1  ;;  %10037 = vtanh.f32 %v12894_v27 }
 0x4ab   :  { %v2631_v30 = vadd.f32 %v2555_v52, %v2418_v14  ;;  %v2557_v42 = vpop.f32.mrb[23].mxu0  ;;  %v2628_v51 = vpop.f32.mrb[23].mxu1  ;;  %v2633_v47 = vadd.f32 %v2626_v40, %v2420_v19  ;;  %v12923_v14 = vpack.c.bf16 %v2918_v59, %v2914_v57  ;;  %v2920_v52 = vld [vmem:[%s15496_s4 + $0x40] sm:$0xff]  ;;  %v2933_v19 = vld [vmem:[%s15496_s4 + $0xa8] sm:$0xff] }
 0x4ac   :  { %v2632_v29 = vadd.f32 %v2557_v42, %v2419_v39  ;;  %v2634_v15 = vadd.f32 %v2628_v51, %v2421_v7  ;;  %v2924_v40 = vld [vmem:[%s15496_s4 + $0x60] sm:$0xff]  ;;  %v12931_v39 = vpack.c.bf16 %v2925_v48, %v2921_v16  ;;  %v12933_v42 = vpack.c.bf16 %v2927_v11, %v2923_v55  ;;  %v2922_v51 = vld [vmem:[%s15496_s4 + $0x50] sm:$0xff]  ;;  %v2935_v7 = vld [vmem:[%s15496_s4 + $0xb8] sm:$0xff] }
 0x4ad   :  { %v7575_v63 = vmul.f32 -1.442695, %v2631_v30  ;;  %v7577_v12 = vmul.f32 -1.442695, %v2633_v47  ;;  %v2931_v47 = vld [vmem:[%s15496_s4 + $0x98] sm:$0xff]  ;;  %v2928_v59 = vld [vmem:[%s15496_s4 + $0x80] sm:$0xff] }
 0x4ae   :  { %v7576_v35 = vmul.f32 -1.442695, %v2632_v29  ;;  %v2926_v29 = vld [vmem:[%s15496_s4 + $0x70] sm:$0xff]  ;;  %v2932_v16 = vld [vmem:[%s15496_s4 + $0xa0] sm:$0xff]  ;;  %v12969_v55 = vpack.c.bf16 %v2935_v7, %v2931_v47 }
 0x4af   :  { %10039 = vpow2.f32 %v7575_v63  ;;  %v2929_v63 = vld [vmem:[%s15496_s4 + $0x88] sm:$0xff]  ;;  %v12957_v57 = vpack.c.bf16 %v2926_v29, %v2922_v51  ;;  %v2930_v11 = vld [vmem:[%s15496_s4 + $0x90] sm:$0xff]  ;;  %v2936_v29 = vld [vmem:[%s15496_s4 + $0xc0] sm:$0xff] }
 0x4b0   :  { %10041 = vpow2.f32 %v7576_v35  ;;  %v12967_v48 = vpack.c.bf16 %v2933_v19, %v2929_v63  ;;  %15600 = vst [vmem:[#allocation12_spill] sm:$0xff] %v12969_v55  ;;  %v2940_v63 = vld [vmem:[%s15496_s4 + $0xe0] sm:$0xff]  ;;  %v2938_v47 = vld [vmem:[%s15496_s4 + $0xd0] sm:$0xff] }
 0x4b1   :  { %10043 = vtanh.f32 %v2634_v15  ;;  %15598 = vst [vmem:[#allocation10_spill] sm:$0xff] %v12957_v57  ;;  %v2934_v15 = vld [vmem:[%s15496_s4 + $0xb0] sm:$0xff] }
 0x4b2   :  { %10045 = vpow2.f32 %v7577_v12  ;;  %15599 = vst [vmem:[#allocation11_spill] sm:$0xff] %v12967_v48  ;;  %v2941_v12 = vld [vmem:[%s15496_s4 + $0xe8] sm:$0xff]  ;;  %v12995_v51 = vpack.c.bf16 %v2934_v15, %v2930_v11  ;;  %v2942_v7 = vld [vmem:[%s15496_s4 + $0xf0] sm:$0xff]  ;;  %v2944_v15 = vld [vmem:[%s15496_s4 + $0x100] sm:$0xff] }
 0x4b3   :  { %v13031_v11 = vpack.c.bf16 %v2942_v7, %v2938_v47  ;;  %v2953_v47 = vld [vmem:[%s15496_s4 + $0x148] sm:$0xff] }
 0x4b4   :  { %v10038_v20 = vpop.eup %10037  ;;  %15602 = vst [vmem:[#allocation14_spill] sm:$0xff] %v12995_v51 }
 0x4b5   :  { %v2661_v49 = vmul.f32 %v10038_v20, %v10036_v45  ;;  %v12955_v45 = vpack.c.bf16 %v2924_v40, %v2920_v52  ;;  %v2939_v52 = vld [vmem:[%s15496_s4 + $0xd8] sm:$0xff] }
 0x4b6   :  { %v2943_v40 = vld [vmem:[%s15496_s4 + $0xf8] sm:$0xff] }
 0x4b7   :  { %2689 = vst [vmem:[#allocation4] sm:$0xc0] %v2661_v49  ;;  %v2760_v30 = vrot.slane %v2661_v49, 6  ;;  %15597 = vst [vmem:[#allocation9_spill] sm:$0xff] %v12955_v45  ;;  %v2937_v49 = vld [vmem:[%s15496_s4 + $0xc8] sm:$0xff]  ;;  %v13007_v19 = vpack.c.bf16 %v2943_v40, %v2939_v52 }
 0x4b9   :  { %v10040_v35 = vpop.eup %10039  ;;  %2827 = vmatmul.mubr.f32.vlgmr.msra.gmra.mrb[24].mxu0 %v2760_v30  ;;  %2898 = vmatmul.mubr.f32.vlgmr.msra.gmra.mrb[24].mxu1 %v2760_v30  ;;  %v12993_v30 = vpack.c.bf16 %v2932_v16, %v2928_v59  ;;  %15604 = vst [vmem:[#allocation17_spill] sm:$0xff] %v13007_v19  ;;  %v2947_v59 = vld [vmem:[%s15496_s4 + $0x118] sm:$0xff] }
 0x4ba   :  { %v2671_v44 = vadd.f32 1.0, %v10040_v35  ;;  %v10042_v43 = vpop.eup %10041  ;;  %8622 = vmatpush1.bf16.msra.mxu0 %v12921_v34  ;;  %8654 = vmatpush1.bf16.msra.mxu1 %v12923_v14  ;;  %v13005_v35 = vpack.c.bf16 %v2941_v12, %v2937_v49  ;;  %v2951_v16 = vld [vmem:[%s15496_s4 + $0x138] sm:$0xff]  ;;  %v2948_v49 = vld [vmem:[%s15496_s4 + $0x120] sm:$0xff] }
 0x4bb   :  { %v2672_v20 = vadd.f32 1.0, %v10042_v43  ;;  %8624 = vmatprep.subr.bf16.mxu0 %v12931_v39  ;;  %8656 = vmatprep.subr.bf16.mxu1 %v12933_v42  ;;  %15601 = vst [vmem:[#allocation13_spill] sm:$0xff] %v12993_v30  ;;  %v2949_v43 = vld [vmem:[%s15496_s4 + $0x128] sm:$0xff]  ;;  %v10044_v12 = vpop.eup %10043  ;;  %v13043_v40 = vpack.c.bf16 %v2951_v16, %v2947_v59  ;;  %v2959_v59 = vld [vmem:[%s15496_s4 + $0x178] sm:$0xff] }
 0x4bc   :  { %10047 = vrcp.f32 %v2671_v44  ;;  %3040 = vmatprep.mubr.f32.mxu0 %v15566_v3  ;;  %3111 = vmatprep.mubr.f32.mxu1 %v15566_v3  ;;  %15603 = vst [vmem:[#allocation15_spill] sm:$0xff] %v13005_v35  ;;  %v2945_v44 = vld [vmem:[%s15496_s4 + $0x108] sm:$0xff]  ;;  %v10046_v7 = vpop.eup %10045 }
 0x4bd   :  { %10049 = vrcp.f32 %v2672_v20  ;;  %v13029_v20 = vpack.c.bf16 %v2940_v63, %v2936_v29  ;;  %v13041_v52 = vpack.c.bf16 %v2949_v43, %v2945_v44  ;;  %v2946_v29 = vld [vmem:[%s15496_s4 + $0x110] sm:$0xff]  ;;  %v2957_v44 = vld [vmem:[%s15496_s4 + $0x168] sm:$0xff]  ;;  %v2955_v43 = vld [vmem:[%s15496_s4 + $0x158] sm:$0xff] }
 0x4be   :  { %8626 = vmatpush1.bf16.msra.mxu0 %v12955_v45  ;;  %8658 = vmatpush1.bf16.msra.mxu1 %v12957_v57  ;;  %v2950_v63 = vld [vmem:[%s15496_s4 + $0x130] sm:$0xff]  ;;  %v2673_v45 = vadd.f32 1.0, %v10046_v7  ;;  %v2963_v7 = vld [vmem:[%s15496_s4 + $0x198] sm:$0xff] }
 0x4bf   :  { %8628 = vmatprep.subr.bf16.mxu0 %v12967_v48  ;;  %8660 = vmatprep.subr.bf16.mxu1 %v12969_v55  ;;  %v2952_v55 = vld [vmem:[%s15496_s4 + $0x140] sm:$0xff] }
 0x4c0   :  { %v2956_v48 = vld [vmem:[%s15496_s4 + $0x160] sm:$0xff]  ;;  %10051 = vrcp.f32 %v2673_v45  ;;  %v2969_v45 = vld [vmem:[%s15496_s4 + $0x1c8] sm:$0xff] }
 0x4c2   :  { %8630 = vmatpush1.bf16.msra.mxu0 %v12993_v30  ;;  %8662 = vmatpush1.bf16.msra.mxu1 %v12995_v51  ;;  %v13066_v51 = vpack.c.bf16 %v2948_v49, %v2944_v15  ;;  %v13068_v30 = vpack.c.bf16 %v2950_v63, %v2946_v29  ;;  %v13080_v15 = vpack.c.bf16 %v2959_v59, %v2955_v43  ;;  %v2954_v49 = vld [vmem:[%s15496_s4 + $0x150] sm:$0xff]  ;;  %v2961_v29 = vld [vmem:[%s15496_s4 + $0x188] sm:$0xff] }
 0x4c3   :  { %8632 = vmatprep.subr.bf16.mxu0 %v13005_v35  ;;  %8664 = vmatprep.subr.bf16.mxu1 %v13007_v19  ;;  %v2682_v19 = vrot.slane %v12572_v1, 2  ;;  %v13078_v1 = vpack.c.bf16 %v2957_v44, %v2953_v47  ;;  %v2965_v47 = vld [vmem:[%s15496_s4 + $0x1a8] sm:$0xff]  ;;  %v2967_v44 = vld [vmem:[%s15496_s4 + $0x1b8] sm:$0xff]  ;;  %v13104_v59 = vpack.c.bf16 %v2956_v48, %v2952_v55  ;;  %v2962_v48 = vld [vmem:[%s15496_s4 + $0x190] sm:$0xff] }
 0x4c4   :  { %15606 = vst [vmem:[#allocation19_spill] sm:$0xff] %v13080_v15  ;;  %v2966_v55 = vld [vmem:[%s15496_s4 + $0x1b0] sm:$0xff] }
 0x4c5   :  { %15605 = vst [vmem:[#allocation18_spill] sm:$0xff] %v13078_v1 }
 0x4c6   :  { %v10048_v16 = vpop.eup %10047  ;;  %8634 = vmatpush1.bf16.msra.mxu0 %v13029_v20  ;;  %8666 = vmatpush1.bf16.msra.mxu1 %v13031_v11 }
 0x4c7   :  { %v2685_v35 = vmul.f32 %v10048_v16, %v10044_v12  ;;  %v10050_v57 = vpop.eup %10049  ;;  %8636 = vmatprep.subr.bf16.mxu0 %v13041_v52  ;;  %8668 = vmatprep.subr.bf16.mxu1 %v13043_v40  ;;  %v2958_v12 = vld [vmem:[%s15496_s4 + $0x170] sm:$0xff]  ;;  %v2964_v16 = vld [vmem:[%s15496_s4 + $0x1a0] sm:$0xff] }
 0x4c8   :  { %v2684_v63 = vmul.f32 %v10050_v57, %v2682_v19  ;;  %v13106_v57 = vpack.c.bf16 %v2958_v12, %v2954_v49  ;;  %v2960_v19 = vld [vmem:[%s15496_s4 + $0x180] sm:$0xff]  ;;  %v2973_v49 = vld [vmem:[%s15496_s4 + $0x1e8] sm:$0xff]  ;;  %v2971_v12 = vld [vmem:[%s15496_s4 + $0x1d8] sm:$0xff] }
 0x4ca   :  { %v13100_v43 = vadd.f32 %v2685_v35, %v2684_v63  ;;  %8638 = vmatpush1.bf16.msra.mxu0 %v13066_v51  ;;  %8670 = vmatpush1.bf16.msra.mxu1 %v13068_v30  ;;  %15607 = vst [vmem:[#allocation20_spill] sm:$0xff] %v13106_v57  ;;  %v13116_v35 = vpack.c.bf16 %v2965_v47, %v2961_v29  ;;  %v2975_v29 = vld [vmem:[%s15496_s4 + $0x1f8] sm:$0xff] }
 0x4cb   :  { %8640 = vmatprep.subr.bf16.mxu0 %v13078_v1  ;;  %8672 = vmatprep.subr.bf16.mxu1 %v13080_v15  ;;  %v13118_v63 = vpack.c.bf16 %v2967_v44, %v2963_v7  ;;  %v13141_v47 = vpack.c.bf16 %v2964_v16, %v2960_v19  ;;  %v13143_v7 = vpack.c.bf16 %v2966_v55, %v2962_v48  ;;  %v2968_v44 = vld [vmem:[%s15496_s4 + $0x1c0] sm:$0xff]  ;;  %v2970_v19 = vld [vmem:[%s15496_s4 + $0x1d0] sm:$0xff] }
 0x4cc   :  { %10053 = vtanh.f32 %v13100_v43  ;;  %v13150_v15 = vpack.c.bf16 %v2973_v49, %v2969_v45  ;;  %v13152_v1 = vpack.c.bf16 %v2975_v29, %v2971_v12  ;;  %v2974_v16 = vld [vmem:[%s15496_s4 + $0x1f0] sm:$0xff]  ;;  %v10052_v45 = vpop.eup %10051 }
 0x4cd   :  { %v13167_v55 = vpack.c.bf16 %v2974_v16, %v2970_v19 }
 0x4ce   :  { %8642 = vmatpush1.bf16.msra.mxu0 %v13104_v59  ;;  %8674 = vmatpush1.bf16.msra.mxu1 %v13106_v57  ;;  %v2972_v57 = vld [vmem:[%s15496_s4 + $0x1e0] sm:$0xff] }
 0x4cf   :  { %8644 = vmatprep.subr.bf16.mxu0 %v13116_v35  ;;  %8676 = vmatprep.subr.bf16.mxu1 %v13118_v63  ;;  %v13165_v48 = vpack.c.bf16 %v2972_v57, %v2968_v44  ;;  %v2909_v44 = vld [vmem:[#allocation2 + $0x28] sm:$0xc0] }
 0x4d2   :  { %8646 = vmatpush1.bf16.msra.mxu0 %v13141_v47  ;;  %8678 = vmatpush1.bf16.msra.mxu1 %v13143_v7 }
 0x4d3   :  { %8648 = vmatprep.subr.bf16.mxu0 %v13150_v15  ;;  %8680 = vmatprep.subr.bf16.mxu1 %v13152_v1 }
 0x4d6   :  { %v10054_v49 = vpop.eup %10053  ;;  %8650 = vmatpush1.bf16.msra.mxu0 %v13165_v48  ;;  %8682 = vmatpush1.bf16.msra.mxu1 %v13167_v55 }
 0x4d7   :  { %v2688_v12 = vmul.f32 %v10054_v49, %v10052_v45  ;;  %8684 = vmatprep.subr.bf16.mxu0 %v12596_v33  ;;  %8716 = vmatprep.subr.bf16.mxu1 %v12607_v37  ;;  %v2691_v33 = vld [vmem:[#allocation2 + $0x40] sm:$0x3]  ;;  %v2910_v49 = vld [vmem:[#allocation2 + $0x30] sm:$0xc0] }
 0x4d9   :  { %2690 = vst [vmem:[#allocation5 + $0x8] sm:$0x3] %v2688_v12  ;;  %3041 = vmatmul.mubr.f32.vlgmr.msra.gmra.mrb[26].mxu0 %v2688_v12  ;;  %3112 = vmatmul.mubr.f32.vlgmr.msra.gmra.mrb[26].mxu1 %v2688_v12 }
 0x4da   :  { %8686 = vmatpush1.bf16.msra.mxu0 %v12609_v8  ;;  %8718 = vmatpush1.bf16.msra.mxu1 %v12618_v32 }
 0x4db   :  { %8688 = vmatprep.subr.bf16.mxu0 %v12632_v26  ;;  %8720 = vmatprep.subr.bf16.mxu1 %v12643_v2  ;;  %v2692_v26 = vld [vmem:[#allocation2 + $0x48] sm:$0x3] }
 0x4dc   :  { %3322 = vmatprep.mubr.f32.mxu0 %v15566_v3  ;;  %3393 = vmatprep.mubr.f32.mxu1 %v15566_v3 }
 0x4de   :  { %8690 = vmatpush1.bf16.msra.mxu0 %v12645_v50  ;;  %8722 = vmatpush1.bf16.msra.mxu1 %v12654_v58 }
 0x4df   :  { %8692 = vmatprep.subr.bf16.mxu0 %v12668_v28  ;;  %8724 = vmatprep.subr.bf16.mxu1 %v12679_v38 }
 0x4e2   :  { %8694 = vmatpush1.bf16.msra.mxu0 %v12681_v17  ;;  %8726 = vmatpush1.bf16.msra.mxu1 %v12690_v41  ;;  %v2693_v17 = vld [vmem:[#allocation2 + $0x50] sm:$0x3] }
 0x4e3   :  { %8696 = vmatprep.subr.bf16.mxu0 %v12704_v5  ;;  %8728 = vmatprep.subr.bf16.mxu1 %v12715_v18  ;;  %v2694_v5 = vld [vmem:[#allocation2 + $0x58] sm:$0x3] }
 0x4e6   :  { %8698 = vmatpush1.bf16.msra.mxu0 %v12717_v13  ;;  %8730 = vmatpush1.bf16.msra.mxu1 %v12726_v46 }
 0x4e7   :  { %8700 = vmatprep.subr.bf16.mxu0 %v12740_v4  ;;  %8732 = vmatprep.subr.bf16.mxu1 %v12751_v25 }
 0x4ea   :  { %8702 = vmatpush1.bf16.msra.mxu0 %v12753_v6  ;;  %8734 = vmatpush1.bf16.msra.mxu1 %v12762_v23 }
 0x4eb   :  { %8704 = vmatprep.subr.bf16.mxu0 %v12776_v54  ;;  %8736 = vmatprep.subr.bf16.mxu1 %v12787_v60 }
 0x4ee   :  { %8706 = vmatpush1.bf16.msra.mxu0 %v12789_v62  ;;  %8738 = vmatpush1.bf16.msra.mxu1 %v12798_v53  ;;  %v3154_v62 = vrot.slane %v12894_v27, 6 }
 0x4ef   :  { %8708 = vmatprep.subr.bf16.mxu0 %v12812_v56  ;;  %8740 = vmatprep.subr.bf16.mxu1 %v12823_v9 }
 0x4f2   :  { %8710 = vmatpush1.bf16.msra.mxu0 %v12825_v31  ;;  %8742 = vmatpush1.bf16.msra.mxu1 %v12834_v22 }
 0x4f3   :  { %8712 = vmatprep.subr.bf16.mxu0 %v12848_v36  ;;  %8744 = vmatprep.subr.bf16.mxu1 %v12859_v61 }
 0x4f6   :  { %8714 = vmatpush1.bf16.msra.mxu0 %v12861_v10  ;;  %8746 = vmatpush1.bf16.msra.mxu1 %v12870_v0 }
 0x4f7   :  { %8748 = vmatprep.subr.bf16.mxu0 %v12884_v21  ;;  %8780 = vmatprep.subr.bf16.mxu1 %v12889_v24  ;;  %v2908_v24 = vld [vmem:[#allocation2 + $0x20] sm:$0xc0] }
 0x58c   :  { %v2828_v37 = vpop.f32.mrb[24].mxu0  ;;  %v2899_v8 = vpop.f32.mrb[24].mxu1 }
 0x58d   :  { %v2904_v32 = vadd.f32 %v2828_v37, %v2691_v33  ;;  %v2830_v2 = vpop.f32.mrb[25].mxu0  ;;  %v2901_v50 = vpop.f32.mrb[25].mxu1  ;;  %v2906_v41 = vadd.f32 %v2899_v8, %v2693_v17 }
 0x58e   :  { %v2905_v58 = vadd.f32 %v2830_v2, %v2692_v26  ;;  %v2907_v18 = vadd.f32 %v2901_v50, %v2694_v5  ;;  %v15609_v5 = vld [vmem:[#allocation10_spill] sm:$0xff] }
 0x58f   :  { %v7578_v28 = vmul.f32 -1.442695, %v2904_v32  ;;  %v7580_v13 = vmul.f32 -1.442695, %v2906_v41  ;;  %v2911_v32 = vld [vmem:[#allocation2 + $0x38] sm:$0xc0] }
 0x590   :  { %v7579_v38 = vmul.f32 -1.442695, %v2905_v58  ;;  %v15608_v41 = vld [vmem:[#allocation9_spill] sm:$0xff] }
 0x591   :  { %10055 = vpow2.f32 %v7578_v28 }
 0x592   :  { %10057 = vpow2.f32 %v7579_v38 }
 0x593   :  { %10059 = vtanh.f32 %v2907_v18  ;;  %v15614_v18 = vld [vmem:[#allocation15_spill] sm:$0xff] }
 0x594   :  { %10061 = vpow2.f32 %v7580_v13  ;;  %v15615_v13 = vld [vmem:[#allocation17_spill] sm:$0xff] }
 0x59b   :  { %v10056_v46 = vpop.eup %10055 }
 0x59c   :  { %v3143_v4 = vadd.f32 1.0, %v10056_v46  ;;  %v10058_v25 = vpop.eup %10057 }
 0x59d   :  { %v3144_v6 = vadd.f32 1.0, %v10058_v25  ;;  %v10060_v23 = vpop.eup %10059 }
 0x59e   :  { %10063 = vrcp.f32 %v3143_v4  ;;  %v10062_v54 = vpop.eup %10061 }
 0x59f   :  { %10065 = vrcp.f32 %v3144_v6  ;;  %v3145_v9 = vadd.f32 1.0, %v10062_v54  ;;  %v3181_v6 = vrot.slane %v13100_v43, 2 }
 0x5a1   :  { %10067 = vrcp.f32 %v3145_v9  ;;  %v3711_v9 = vld [vmem:[%s15495_s3 + $0x30] sm:$0xff] }
 0x5a8   :  { %v10064_v60 = vpop.eup %10063 }
 0x5a9   :  { %v3157_v53 = vmul.f32 %v10064_v60, %v10060_v23  ;;  %v10066_v56 = vpop.eup %10065 }
 0x5aa   :  { %v3156_v31 = vmul.f32 %v10066_v56, %v3154_v62  ;;  %v3707_v56 = vld [vmem:[%s15495_s3 + $0x10] sm:$0xff] }
 0x5ab   :  { %v10068_v37 = vpop.eup %10067 }
 0x5ac   :  { %v3042_v22 = vpop.f32.mrb[26].mxu0  ;;  %v3113_v36 = vpop.f32.mrb[26].mxu1  ;;  %v13210_v61 = vadd.f32 %v3157_v53, %v3156_v31  ;;  %v15616_v53 = vld [vmem:[#allocation18_spill] sm:$0xff]  ;;  %v13282_v31 = vpack.c.bf16 %v3711_v9, %v3707_v56 }
 0x5ad   :  { %v3122_v10 = vrot.slane %v3042_v22, 2  ;;  %v3044_v0 = vpop.f32.mrb[27].mxu0  ;;  %v3115_v21 = vpop.f32.mrb[27].mxu1  ;;  %v3124_v45 = vrot.slane %v3113_v36, 2  ;;  %v3714_v22 = vld [vmem:[%s15495_s3 + $0x48] sm:$0xff] }
 0x5ae   :  { %v3123_v57 = vrot.slane %v3044_v0, 2  ;;  %10069 = vtanh.f32 %v13210_v61  ;;  %v3125_v12 = vrot.slane %v3115_v21, 2  ;;  %v3718_v36 = vld [vmem:[%s15495_s3 + $0x68] sm:$0xff]  ;;  %v3720_v21 = vld [vmem:[%s15495_s3 + $0x78] sm:$0xff] }
 0x5af   :  { %v3130_v29 = vadd.f32 %v3122_v10, %v2908_v24  ;;  %v3132_v33 = vadd.f32 %v3124_v45, %v2910_v49  ;;  %v3716_v10 = vld [vmem:[%s15495_s3 + $0x58] sm:$0xff]  ;;  %v13296_v0 = vpack.c.bf16 %v3718_v36, %v3714_v22  ;;  %v3713_v24 = vld [vmem:[%s15495_s3 + $0x40] sm:$0xff]  ;;  %v3722_v45 = vld [vmem:[%s15495_s3 + $0x88] sm:$0xff] }
 0x5b0   :  { %v3131_v19 = vadd.f32 %v3123_v57, %v2909_v44  ;;  %v3133_v26 = vadd.f32 %v3125_v12, %v2911_v32  ;;  %v3717_v57 = vld [vmem:[%s15495_s3 + $0x60] sm:$0xff]  ;;  %v3726_v49 = vld [vmem:[%s15495_s3 + $0xa8] sm:$0xff]  ;;  %v3724_v12 = vld [vmem:[%s15495_s3 + $0x98] sm:$0xff] }
 0x5b1   :  { %v7581_v27 = vmul.f32 -1.442695, %v3130_v29  ;;  %v7583_v50 = vmul.f32 -1.442695, %v3132_v33  ;;  %v13307_v29 = vpack.c.bf16 %v3720_v21, %v3716_v10  ;;  %v13309_v44 = vpack.c.bf16 %v3717_v57, %v3713_v24  ;;  %v3725_v32 = vld [vmem:[%s15495_s3 + $0xa0] sm:$0xff]  ;;  %v3747_v22 = vld [vmem:[%s15495_s3 + $0x150] sm:$0xff] }
 0x5b2   :  { %v7582_v16 = vmul.f32 -1.442695, %v3131_v19  ;;  %v3715_v19 = vld [vmem:[%s15495_s3 + $0x50] sm:$0xff]  ;;  %v13332_v33 = vpack.c.bf16 %v3726_v49, %v3722_v45  ;;  %v3754_v21 = vld [vmem:[%s15495_s3 + $0x188] sm:$0xff]  ;;  %v3756_v57 = vld [vmem:[%s15495_s3 + $0x198] sm:$0xff] }
 0x5b3   :  { %10071 = vpow2.f32 %v7581_v27  ;;  %v3719_v27 = vld [vmem:[%s15495_s3 + $0x70] sm:$0xff]  ;;  %v3758_v24 = vld [vmem:[%s15495_s3 + $0x1a8] sm:$0xff]  ;;  %v3753_v45 = vld [vmem:[%s15495_s3 + $0x180] sm:$0xff] }
 0x5b4   :  { %10073 = vpow2.f32 %v7582_v16  ;;  %v13318_v16 = vpack.c.bf16 %v3719_v27, %v3715_v19  ;;  %v3751_v36 = vld [vmem:[%s15495_s3 + $0x170] sm:$0xff]  ;;  %v13476_v19 = vpack.c.bf16 %v3758_v24, %v3754_v21  ;;  %v3760_v27 = vld [vmem:[%s15495_s3 + $0x1b8] sm:$0xff]  ;;  %v3757_v49 = vld [vmem:[%s15495_s3 + $0x1a0] sm:$0xff] }
 0x5b5   :  { %10075 = vtanh.f32 %v3133_v26  ;;  %v13462_v10 = vpack.c.bf16 %v3751_v36, %v3747_v22  ;;  %v3190_v22 = vld [vmem:[#allocation2 + $0x40] sm:$0xc]  ;;  %v3191_v24 = vld [vmem:[#allocation2 + $0x48] sm:$0xc] }
 0x5b6   :  { %10077 = vpow2.f32 %v7583_v50  ;;  %v3723_v50 = vld [vmem:[%s15495_s3 + $0x90] sm:$0xff] }
 0x5b8   :  { %v10070_v8 = vpop.eup %10069 }
 0x5b9   :  { %v3160_v2 = vmul.f32 %v10070_v8, %v10068_v37  ;;  %v3728_v37 = vld [vmem:[%s15495_s3 + $0xb8] sm:$0xff]  ;;  %v3721_v8 = vld [vmem:[%s15495_s3 + $0x80] sm:$0xff] }
 0x5ba   :  { %v13343_v26 = vpack.c.bf16 %v3728_v37, %v3724_v12  ;;  %v13487_v12 = vpack.c.bf16 %v3760_v27, %v3756_v57  ;;  %v13489_v37 = vpack.c.bf16 %v3757_v49, %v3753_v45 }
 0x5bb   :  { %3188 = vst [vmem:[#allocation4 + $0x8] sm:$0x3] %v3160_v2  ;;  %3323 = vmatmul.mubr.f32.vlgmr.msra.gmra.mrb[28].mxu0 %v3160_v2  ;;  %3394 = vmatmul.mubr.f32.vlgmr.msra.gmra.mrb[28].mxu1 %v3160_v2  ;;  %v13345_v2 = vpack.c.bf16 %v3725_v32, %v3721_v8  ;;  %v3755_v8 = vld [vmem:[%s15495_s3 + $0x190] sm:$0xff] }
 0x5bc   :  { %8750 = vmatpush1.bf16.msra.mxu0 %v12921_v34  ;;  %8782 = vmatpush1.bf16.msra.mxu1 %v12923_v14  ;;  %v15610_v34 = vld [vmem:[#allocation11_spill] sm:$0xff]  ;;  %v15611_v14 = vld [vmem:[#allocation12_spill] sm:$0xff] }
 0x5bd   :  { %v10072_v58 = vpop.eup %10071  ;;  %8752 = vmatprep.subr.bf16.mxu0 %v12931_v39  ;;  %8784 = vmatprep.subr.bf16.mxu1 %v12933_v42  ;;  %v15612_v39 = vld [vmem:[#allocation13_spill] sm:$0xff]  ;;  %v15613_v42 = vld [vmem:[#allocation14_spill] sm:$0xff] }
 0x5be   :  { %v3170_v28 = vadd.f32 1.0, %v10072_v58  ;;  %v10074_v38 = vpop.eup %10073  ;;  %3551 = vmatprep.mubr.f32.mxu0 %v15566_v3  ;;  %3622 = vmatprep.mubr.f32.mxu1 %v15566_v3  ;;  %v3727_v58 = vld [vmem:[%s15495_s3 + $0xb0] sm:$0xff] }
 0x5bf   :  { %v3171_v17 = vadd.f32 1.0, %v10074_v38  ;;  %v10076_v46 = vpop.eup %10075  ;;  %v3730_v38 = vld [vmem:[%s15495_s3 + $0xc8] sm:$0xff]  ;;  %v3759_v32 = vld [vmem:[%s15495_s3 + $0x1b0] sm:$0xff] }
 0x5c0   :  { %10079 = vrcp.f32 %v3170_v28  ;;  %8754 = vmatpush1.bf16.msra.mxu0 %v15608_v41  ;;  %8786 = vmatpush1.bf16.msra.mxu1 %v15609_v5  ;;  %v10078_v4 = vpop.eup %10077  ;;  %v13354_v28 = vpack.c.bf16 %v3727_v58, %v3723_v50  ;;  %v3732_v41 = vld [vmem:[%s15495_s3 + $0xd8] sm:$0xff]  ;;  %v13498_v50 = vpack.c.bf16 %v3759_v32, %v3755_v8  ;;  %v3762_v58 = vld [vmem:[%s15495_s3 + $0x1c8] sm:$0xff]  ;;  %v3192_v8 = vld [vmem:[#allocation2 + $0x50] sm:$0xc] }
 0x5c1   :  { %10081 = vrcp.f32 %v3171_v17  ;;  %8756 = vmatprep.subr.bf16.mxu0 %v15610_v34  ;;  %8788 = vmatprep.subr.bf16.mxu1 %v15611_v14  ;;  %v3172_v60 = vadd.f32 1.0, %v10078_v4  ;;  %v3734_v17 = vld [vmem:[%s15495_s3 + $0xe8] sm:$0xff]  ;;  %v3736_v34 = vld [vmem:[%s15495_s3 + $0xf8] sm:$0xff]  ;;  %v3729_v14 = vld [vmem:[%s15495_s3 + $0xc0] sm:$0xff] }
 0x5c2   :  { %v13368_v5 = vpack.c.bf16 %v3734_v17, %v3730_v38  ;;  %v3766_v38 = vld [vmem:[%s15495_s3 + $0x1e8] sm:$0xff]  ;;  %v3764_v17 = vld [vmem:[%s15495_s3 + $0x1d8] sm:$0xff] }
 0x5c3   :  { %10083 = vrcp.f32 %v3172_v60  ;;  %v3744_v60 = vld [vmem:[%s15495_s3 + $0x138] sm:$0xff] }
 0x5c4   :  { %8758 = vmatpush1.bf16.msra.mxu0 %v15612_v39  ;;  %8790 = vmatpush1.bf16.msra.mxu1 %v15613_v42  ;;  %v3733_v39 = vld [vmem:[%s15495_s3 + $0xe0] sm:$0xff]  ;;  %v13379_v42 = vpack.c.bf16 %v3736_v34, %v3732_v41  ;;  %v13512_v41 = vpack.c.bf16 %v3766_v38, %v3762_v58  ;;  %v3768_v34 = vld [vmem:[%s15495_s3 + $0x1f8] sm:$0xff] }
 0x5c5   :  { %8760 = vmatprep.subr.bf16.mxu0 %v15614_v18  ;;  %8792 = vmatprep.subr.bf16.mxu1 %v15615_v13  ;;  %v13381_v18 = vpack.c.bf16 %v3733_v39, %v3729_v14  ;;  %v3731_v13 = vld [vmem:[%s15495_s3 + $0xd0] sm:$0xff]  ;;  %v3761_v14 = vld [vmem:[%s15495_s3 + $0x1c0] sm:$0xff]  ;;  %v3193_v38 = vld [vmem:[#allocation2 + $0x58] sm:$0xc] }
 0x5c6   :  { %v3765_v39 = vld [vmem:[%s15495_s3 + $0x1e0] sm:$0xff] }
 0x5c8   :  { %8762 = vmatpush1.bf16.msra.mxu0 %v13029_v20  ;;  %8794 = vmatpush1.bf16.msra.mxu1 %v13031_v11  ;;  %v15617_v20 = vld [vmem:[#allocation19_spill] sm:$0xff] }
 0x5c9   :  { %8764 = vmatprep.subr.bf16.mxu0 %v13041_v52  ;;  %8796 = vmatprep.subr.bf16.mxu1 %v13043_v40  ;;  %v15618_v52 = vld [vmem:[#allocation20_spill] sm:$0xff] }
 0x5ca   :  { %v10080_v25 = vpop.eup %10079 }
 0x5cb   :  { %v3184_v23 = vmul.f32 %v10080_v25, %v10076_v46  ;;  %v10082_v54 = vpop.eup %10081  ;;  %v3735_v46 = vld [vmem:[%s15495_s3 + $0xf0] sm:$0xff]  ;;  %v3738_v25 = vld [vmem:[%s15495_s3 + $0x108] sm:$0xff] }
 0x5cc   :  { %v3183_v62 = vmul.f32 %v10082_v54, %v3181_v6  ;;  %8766 = vmatpush1.bf16.msra.mxu0 %v13066_v51  ;;  %8798 = vmatpush1.bf16.msra.mxu1 %v13068_v30  ;;  %v13390_v4 = vpack.c.bf16 %v3735_v46, %v3731_v13  ;;  %v3742_v6 = vld [vmem:[%s15495_s3 + $0x128] sm:$0xff]  ;;  %v13523_v13 = vpack.c.bf16 %v3768_v34, %v3764_v17 }
 0x5cd   :  { %8768 = vmatprep.subr.bf16.mxu0 %v15616_v53  ;;  %8800 = vmatprep.subr.bf16.mxu1 %v15617_v20  ;;  %v10084_v30 = vpop.eup %10083  ;;  %v13404_v54 = vpack.c.bf16 %v3742_v6, %v3738_v25  ;;  %v3741_v53 = vld [vmem:[%s15495_s3 + $0x120] sm:$0xff]  ;;  %v13525_v46 = vpack.c.bf16 %v3765_v39, %v3761_v14  ;;  %v3763_v25 = vld [vmem:[%s15495_s3 + $0x1d0] sm:$0xff] }
 0x5ce   :  { %v13236_v11 = vadd.f32 %v3184_v23, %v3183_v62  ;;  %v3740_v23 = vld [vmem:[%s15495_s3 + $0x118] sm:$0xff]  ;;  %v3737_v62 = vld [vmem:[%s15495_s3 + $0x100] sm:$0xff]  ;;  %v3767_v6 = vld [vmem:[%s15495_s3 + $0x1f0] sm:$0xff] }
 0x5cf   :  { %v13415_v20 = vpack.c.bf16 %v3744_v60, %v3740_v23  ;;  %v13534_v23 = vpack.c.bf16 %v3767_v6, %v3763_v25  ;;  %v3935_v60 = vld [vmem:[%s15496_s4 + $0x8] sm:$0xff] }
 0x5d0   :  { %10085 = vtanh.f32 %v13236_v11  ;;  %8770 = vmatpush1.bf16.msra.mxu0 %v13104_v59  ;;  %8802 = vmatpush1.bf16.msra.mxu1 %v15618_v52  ;;  %v3708_v59 = vld [vmem:[%s15495_s3 + $0x18] sm:$0xff]  ;;  %v13417_v52 = vpack.c.bf16 %v3741_v53, %v3737_v62  ;;  %v3939_v62 = vld [vmem:[%s15496_s4 + $0x28] sm:$0xff] }
 0x5d1   :  { %8772 = vmatprep.subr.bf16.mxu0 %v13116_v35  ;;  %8804 = vmatprep.subr.bf16.mxu1 %v13118_v63  ;;  %v3712_v63 = vld [vmem:[%s15495_s3 + $0x38] sm:$0xff] }
 0x5d2   :  { %v3937_v53 = vld [vmem:[%s15496_s4 + $0x18] sm:$0xff] }
 0x5d4   :  { %8774 = vmatpush1.bf16.msra.mxu0 %v13141_v47  ;;  %8806 = vmatpush1.bf16.msra.mxu1 %v13143_v7  ;;  %v3705_v47 = vld [vmem:[%s15495_s3] sm:$0xff] }
 0x5d5   :  { %8776 = vmatprep.subr.bf16.mxu0 %v13150_v15  ;;  %8808 = vmatprep.subr.bf16.mxu1 %v13152_v1  ;;  %v3706_v15 = vld [vmem:[%s15495_s3 + $0x8] sm:$0xff]  ;;  %v3709_v7 = vld [vmem:[%s15495_s3 + $0x20] sm:$0xff] }
 0x5d6   :  { %v3710_v1 = vld [vmem:[%s15495_s3 + $0x28] sm:$0xff] }
 0x5d7   :  { %v13260_v35 = vpack.c.bf16 %v3710_v1, %v3706_v15  ;;  %v3750_v15 = vld [vmem:[%s15495_s3 + $0x168] sm:$0xff]  ;;  %v3748_v1 = vld [vmem:[%s15495_s3 + $0x158] sm:$0xff] }
 0x5d8   :  { %8778 = vmatpush1.bf16.msra.mxu0 %v13165_v48  ;;  %8810 = vmatpush1.bf16.msra.mxu1 %v13167_v55  ;;  %v13271_v48 = vpack.c.bf16 %v3712_v63, %v3708_v59  ;;  %v13273_v55 = vpack.c.bf16 %v3709_v7, %v3705_v47  ;;  %v3752_v63 = vld [vmem:[%s15495_s3 + $0x178] sm:$0xff]  ;;  %v3745_v47 = vld [vmem:[%s15495_s3 + $0x140] sm:$0xff] }
 0x5d9   :  { %8812 = vmatprep.subr.bf16.mxu0 %v13260_v35  ;;  %v3749_v7 = vld [vmem:[%s15495_s3 + $0x160] sm:$0xff]  ;;  %v13451_v56 = vpack.c.bf16 %v3752_v63, %v3748_v1 }
 0x5da   :  { %v10086_v51 = vpop.eup %10085  ;;  %8844 = vmatprep.subr.bf16.mxu1 %v13271_v48  ;;  %v13453_v9 = vpack.c.bf16 %v3749_v7, %v3745_v47 }
 0x5db   :  { %v3187_v40 = vmul.f32 %v10086_v51, %v10084_v30  ;;  %v3739_v30 = vld [vmem:[%s15495_s3 + $0x110] sm:$0xff] }
 0x5dc   :  { %v3743_v51 = vld [vmem:[%s15495_s3 + $0x130] sm:$0xff] }
 0x5dd   :  { %3189 = vst [vmem:[#allocation5] sm:$0xc0] %v3187_v40  ;;  %v3485_v43 = vrot.slane %v3187_v40, 6  ;;  %v13426_v40 = vpack.c.bf16 %v3743_v51, %v3739_v30  ;;  %v13548_v30 = vpack.c.bf16 %v3939_v62, %v3935_v60  ;;  %v3941_v51 = vld [vmem:[%s15496_s4 + $0x38] sm:$0xff] }
 0x5df   :  { %3552 = vmatmul.mubr.f32.vlgmr.msra.gmra.mrb[30].mxu0 %v3485_v43  ;;  %3623 = vmatmul.mubr.f32.vlgmr.msra.gmra.mrb[30].mxu1 %v3485_v43  ;;  %v3746_v43 = vld [vmem:[%s15495_s3 + $0x148] sm:$0xff] }
 0x5e0   :  { %3836 = vmatprep.mubr.f32.mxu0 %v15566_v3  ;;  %3907 = vmatprep.mubr.f32.mxu1 %v15566_v3  ;;  %v13440_v59 = vpack.c.bf16 %v3750_v15, %v3746_v43  ;;  %v13553_v43 = vpack.c.bf16 %v3941_v51, %v3937_v53  ;;  %v3665_v51 = vrot.slane %v13210_v61, 6 }
 0x5e1   :  { %8814 = vmatpush1.bf16.msra.mxu0 %v13273_v55  ;;  %8846 = vmatpush1.bf16.msra.mxu1 %v13282_v31 }
 0x5e2   :  { %8816 = vmatprep.subr.bf16.mxu0 %v13296_v0  ;;  %8848 = vmatprep.subr.bf16.mxu1 %v13307_v29 }
 0x5e5   :  { %8818 = vmatpush1.bf16.msra.mxu0 %v13309_v44  ;;  %8850 = vmatpush1.bf16.msra.mxu1 %v13318_v16 }
 0x5e6   :  { %8820 = vmatprep.subr.bf16.mxu0 %v13332_v33  ;;  %8852 = vmatprep.subr.bf16.mxu1 %v13343_v26 }
 0x5e9   :  { %8822 = vmatpush1.bf16.msra.mxu0 %v13345_v2  ;;  %8854 = vmatpush1.bf16.msra.mxu1 %v13354_v28 }
 0x5ea   :  { %8824 = vmatprep.subr.bf16.mxu0 %v13368_v5  ;;  %8856 = vmatprep.subr.bf16.mxu1 %v13379_v42 }
 0x5ed   :  { %8826 = vmatpush1.bf16.msra.mxu0 %v13381_v18  ;;  %8858 = vmatpush1.bf16.msra.mxu1 %v13390_v4 }
 0x5ee   :  { %8828 = vmatprep.subr.bf16.mxu0 %v13404_v54  ;;  %8860 = vmatprep.subr.bf16.mxu1 %v13415_v20 }
 0x5f1   :  { %8830 = vmatpush1.bf16.msra.mxu0 %v13417_v52  ;;  %8862 = vmatpush1.bf16.msra.mxu1 %v13426_v40 }
 0x5f2   :  { %8832 = vmatprep.subr.bf16.mxu0 %v13440_v59  ;;  %8864 = vmatprep.subr.bf16.mxu1 %v13451_v56 }
 0x5f5   :  { %8834 = vmatpush1.bf16.msra.mxu0 %v13453_v9  ;;  %8866 = vmatpush1.bf16.msra.mxu1 %v13462_v10 }
 0x5f6   :  { %8836 = vmatprep.subr.bf16.mxu0 %v13476_v19  ;;  %8868 = vmatprep.subr.bf16.mxu1 %v13487_v12 }
 0x5f9   :  { %8838 = vmatpush1.bf16.msra.mxu0 %v13489_v37  ;;  %8870 = vmatpush1.bf16.msra.mxu1 %v13498_v50 }
 0x5fa   :  { %8840 = vmatprep.subr.bf16.mxu0 %v13512_v41  ;;  %8872 = vmatprep.subr.bf16.mxu1 %v13523_v13 }
 0x5fd   :  { %8842 = vmatpush1.bf16.msra.mxu0 %v13525_v46  ;;  %8874 = vmatpush1.bf16.msra.mxu1 %v13534_v23 }
 0x5fe   :  { %8876 = vmatprep.subr.bf16.mxu0 %v13548_v30  ;;  %8908 = vmatprep.subr.bf16.mxu1 %v13553_v43 }
 0x68e   :  { %v3324_v15 = vpop.f32.mrb[28].mxu0  ;;  %v3395_v1 = vpop.f32.mrb[28].mxu1 }
 0x68f   :  { %v3404_v63 = vrot.slane %v3324_v15, 6  ;;  %v3326_v47 = vpop.f32.mrb[29].mxu0  ;;  %v3397_v7 = vpop.f32.mrb[29].mxu1  ;;  %v3406_v49 = vrot.slane %v3395_v1, 6 }
 0x690   :  { %v3405_v36 = vrot.slane %v3326_v47, 6  ;;  %v3407_v32 = vrot.slane %v3397_v7, 6 }
 0x691   :  { %v3412_v21 = vadd.f32 %v3404_v63, %v3190_v22  ;;  %v3414_v58 = vadd.f32 %v3406_v49, %v3192_v8  ;;  %v3417_v8 = vld [vmem:[#allocation2 + $0x28] sm:$0x30] }
 0x692   :  { %v3413_v57 = vadd.f32 %v3405_v36, %v3191_v24  ;;  %v3415_v17 = vadd.f32 %v3407_v32, %v3193_v38 }
 0x693   :  { %v7584_v27 = vmul.f32 -1.442695, %v3412_v21  ;;  %v7586_v34 = vmul.f32 -1.442695, %v3414_v58 }
 0x694   :  { %v7585_v45 = vmul.f32 -1.442695, %v3413_v57 }
 0x695   :  { %10087 = vpow2.f32 %v7584_v27  ;;  %v3416_v27 = vld [vmem:[#allocation2 + $0x20] sm:$0x30] }
 0x696   :  { %10089 = vpow2.f32 %v7585_v45 }
 0x697   :  { %10091 = vtanh.f32 %v3415_v17  ;;  %v3418_v17 = vld [vmem:[#allocation2 + $0x30] sm:$0x30] }
 0x698   :  { %10093 = vpow2.f32 %v7586_v34  ;;  %v3934_v34 = vld [vmem:[%s15496_s4] sm:$0xff] }
 0x69f   :  { %v10088_v14 = vpop.eup %10087 }
 0x6a0   :  { %v3654_v39 = vadd.f32 1.0, %v10088_v14  ;;  %v10090_v25 = vpop.eup %10089  ;;  %v3938_v14 = vld [vmem:[%s15496_s4 + $0x20] sm:$0xff] }
 0x6a1   :  { %v3655_v6 = vadd.f32 1.0, %v10090_v25  ;;  %v10092_v60 = vpop.eup %10091 }
 0x6a2   :  { %10095 = vrcp.f32 %v3654_v39  ;;  %v10094_v62 = vpop.eup %10093 }
 0x6a3   :  { %10097 = vrcp.f32 %v3655_v6  ;;  %v3656_v63 = vadd.f32 1.0, %v10094_v62  ;;  %v3936_v6 = vld [vmem:[%s15496_s4 + $0x10] sm:$0xff]  ;;  %v3943_v62 = vld [vmem:[%s15496_s4 + $0x48] sm:$0xff] }
 0x6a5   :  { %10099 = vrcp.f32 %v3656_v63  ;;  %v3949_v63 = vld [vmem:[%s15496_s4 + $0x78] sm:$0xff] }
 0x6ac   :  { %v10096_v53 = vpop.eup %10095 }
 0x6ad   :  { %v3668_v15 = vmul.f32 %v10096_v53, %v10092_v60  ;;  %v10098_v1 = vpop.eup %10097  ;;  %v3940_v60 = vld [vmem:[%s15496_s4 + $0x30] sm:$0xff] }
 0x6ae   :  { %v3667_v47 = vmul.f32 %v10098_v1, %v3665_v51  ;;  %v3945_v1 = vld [vmem:[%s15496_s4 + $0x58] sm:$0xff] }
 0x6af   :  { %v10100_v39 = vpop.eup %10099 }
 0x6b0   :  { %v13558_v7 = vadd.f32 %v3668_v15, %v3667_v47  ;;  %v3947_v15 = vld [vmem:[%s15496_s4 + $0x68] sm:$0xff] }
 0x6b2   :  { %v3553_v22 = vpop.f32.mrb[30].mxu0  ;;  %v3624_v36 = vpop.f32.mrb[30].mxu1  ;;  %10101 = vtanh.f32 %v13558_v7 }
 0x6b3   :  { %v3633_v21 = vrot.slane %v3553_v22, 4  ;;  %v3555_v24 = vpop.f32.mrb[31].mxu0  ;;  %v3626_v57 = vpop.f32.mrb[31].mxu1  ;;  %v3635_v38 = vrot.slane %v3624_v36, 4  ;;  %v3419_v22 = vld [vmem:[#allocation2 + $0x38] sm:$0x30]  ;;  %v13585_v36 = vpack.c.bf16 %v3938_v14, %v3934_v34 }
 0x6b4   :  { %v3634_v45 = vrot.slane %v3555_v24, 4  ;;  %v3636_v25 = vrot.slane %v3626_v57, 4  ;;  %v3942_v24 = vld [vmem:[%s15496_s4 + $0x40] sm:$0xff]  ;;  %v3953_v34 = vld [vmem:[%s15496_s4 + $0x98] sm:$0xff] }
 0x6b5   :  { %v3641_v49 = vadd.f32 %v3633_v21, %v3416_v27  ;;  %v3643_v51 = vadd.f32 %v3635_v38, %v3418_v17  ;;  %v13587_v21 = vpack.c.bf16 %v3940_v60, %v3936_v6  ;;  %v3946_v57 = vld [vmem:[%s15496_s4 + $0x60] sm:$0xff]  ;;  %v3955_v17 = vld [vmem:[%s15496_s4 + $0xa8] sm:$0xff]  ;;  %v3957_v14 = vld [vmem:[%s15496_s4 + $0xb8] sm:$0xff] }
 0x6b6   :  { %v3642_v32 = vadd.f32 %v3634_v45, %v3417_v8  ;;  %v3644_v27 = vadd.f32 %v3636_v25, %v3419_v22  ;;  %v13597_v8 = vpack.c.bf16 %v3949_v63, %v3945_v1  ;;  %v13619_v25 = vpack.c.bf16 %v3946_v57, %v3942_v24  ;;  %v3950_v60 = vld [vmem:[%s15496_s4 + $0x80] sm:$0xff]  ;;  %v3952_v1 = vld [vmem:[%s15496_s4 + $0x90] sm:$0xff]  ;;  %v3963_v24 = vld [vmem:[%s15496_s4 + $0xe8] sm:$0xff] }
 0x6b7   :  { %v7587_v61 = vmul.f32 -1.442695, %v3641_v49  ;;  %v13595_v49 = vpack.c.bf16 %v3947_v15, %v3943_v62  ;;  %v7589_v38 = vmul.f32 -1.442695, %v3643_v51  ;;  %v3954_v62 = vld [vmem:[%s15496_s4 + $0xa0] sm:$0xff]  ;;  %v13633_v15 = vpack.c.bf16 %v3957_v14, %v3953_v34  ;;  %v3956_v63 = vld [vmem:[%s15496_s4 + $0xb0] sm:$0xff] }
 0x6b8   :  { %v7588_v58 = vmul.f32 -1.442695, %v3642_v32  ;;  %v3944_v32 = vld [vmem:[%s15496_s4 + $0x50] sm:$0xff]  ;;  %v3961_v57 = vld [vmem:[%s15496_s4 + $0xd8] sm:$0xff] }
 0x6b9   :  { %10103 = vpow2.f32 %v7587_v61  ;;  %v3948_v61 = vld [vmem:[%s15496_s4 + $0x70] sm:$0xff]  ;;  %15620 = vst [vmem:[#allocation10_spill] sm:$0xff] %v13633_v15 }
 0x6ba   :  { %10105 = vpow2.f32 %v7588_v58  ;;  %v3951_v58 = vld [vmem:[%s15496_s4 + $0x88] sm:$0xff]  ;;  %v13621_v6 = vpack.c.bf16 %v3948_v61, %v3944_v32  ;;  %v13657_v32 = vpack.c.bf16 %v3954_v62, %v3950_v60  ;;  %v13659_v61 = vpack.c.bf16 %v3956_v63, %v3952_v1  ;;  %v3960_v14 = vld [vmem:[%s15496_s4 + $0xd0] sm:$0xff]  ;;  %v3973_v1 = vld [vmem:[%s15496_s4 + $0x138] sm:$0xff] }
 0x6bb   :  { %10107 = vtanh.f32 %v3644_v27  ;;  %v13631_v51 = vpack.c.bf16 %v3955_v17, %v3951_v58  ;;  %v3965_v27 = vld [vmem:[%s15496_s4 + $0xf8] sm:$0xff]  ;;  %v3958_v58 = vld [vmem:[%s15496_s4 + $0xc0] sm:$0xff]  ;;  %v3967_v60 = vld [vmem:[%s15496_s4 + $0x108] sm:$0xff] }
 0x6bc   :  { %v10102_v53 = vpop.eup %10101  ;;  %10109 = vpow2.f32 %v7589_v38  ;;  %15621 = vst [vmem:[#allocation11_spill] sm:$0xff] %v13657_v32  ;;  %15622 = vst [vmem:[#allocation12_spill] sm:$0xff] %v13659_v61  ;;  %v3962_v38 = vld [vmem:[%s15496_s4 + $0xe0] sm:$0xff]  ;;  %v13671_v34 = vpack.c.bf16 %v3965_v27, %v3961_v57  ;;  %v3971_v62 = vld [vmem:[%s15496_s4 + $0x128] sm:$0xff] }
 0x6bd   :  { %v3671_v47 = vmul.f32 %v10102_v53, %v10100_v39  ;;  %15619 = vst [vmem:[#allocation9_spill] sm:$0xff] %v13631_v51  ;;  %v13693_v63 = vpack.c.bf16 %v3962_v38, %v3958_v58  ;;  %v13705_v57 = vpack.c.bf16 %v3971_v62, %v3967_v60  ;;  %v3972_v58 = vld [vmem:[%s15496_s4 + $0x130] sm:$0xff]  ;;  %v3975_v38 = vld [vmem:[%s15496_s4 + $0x148] sm:$0xff]  ;;  %v3981_v60 = vld [vmem:[%s15496_s4 + $0x178] sm:$0xff] }
 0x6be   :  { %15624 = vst [vmem:[#allocation14_spill] sm:$0xff] %v13671_v34 }
 0x6bf   :  { %3699 = vst [vmem:[#allocation4 + $0x8] sm:$0xc] %v3671_v47  ;;  %v3770_v45 = vrot.slane %v3671_v47, 2  ;;  %v3959_v47 = vld [vmem:[%s15496_s4 + $0xc8] sm:$0xff]  ;;  %15625 = vst [vmem:[#allocation15_spill] sm:$0xff] %v13693_v63 }
 0x6c0   :  { %v13669_v17 = vpack.c.bf16 %v3963_v24, %v3959_v47  ;;  %v3970_v24 = vld [vmem:[%s15496_s4 + $0x120] sm:$0xff]  ;;  %15627 = vst [vmem:[#allocation18_spill] sm:$0xff] %v13705_v57 }
 0x6c1   :  { %3837 = vmatmul.mubr.f32.vlgmr.msra.gmra.mrb[32].mxu0 %v3770_v45  ;;  %3908 = vmatmul.mubr.f32.vlgmr.msra.gmra.mrb[32].mxu1 %v3770_v45 }
 0x6c2   :  { %8878 = vmatpush1.bf16.msra.mxu0 %v13585_v36  ;;  %8910 = vmatpush1.bf16.msra.mxu1 %v13587_v21  ;;  %15623 = vst [vmem:[#allocation13_spill] sm:$0xff] %v13669_v17 }
 0x6c3   :  { %v10104_v39 = vpop.eup %10103  ;;  %8880 = vmatprep.subr.bf16.mxu0 %v13595_v49  ;;  %8912 = vmatprep.subr.bf16.mxu1 %v13597_v8 }
 0x6c4   :  { %v3681_v53 = vadd.f32 1.0, %v10104_v39  ;;  %v10106_v22 = vpop.eup %10105  ;;  %4065 = vmatprep.mubr.f32.mxu0 %v15566_v3  ;;  %4136 = vmatprep.mubr.f32.mxu1 %v15566_v3  ;;  %v3964_v39 = vld [vmem:[%s15496_s4 + $0xf0] sm:$0xff] }
 0x6c5   :  { %v3682_v45 = vadd.f32 1.0, %v10106_v22  ;;  %v13695_v47 = vpack.c.bf16 %v3964_v39, %v3960_v14  ;;  %v3966_v22 = vld [vmem:[%s15496_s4 + $0x100] sm:$0xff]  ;;  %v3979_v14 = vld [vmem:[%s15496_s4 + $0x168] sm:$0xff]  ;;  %v3977_v39 = vld [vmem:[%s15496_s4 + $0x158] sm:$0xff]  ;;  %v10108_v62 = vpop.eup %10107 }
 0x6c6   :  { %10111 = vrcp.f32 %v3681_v53  ;;  %8882 = vmatpush1.bf16.msra.mxu0 %v13619_v25  ;;  %8914 = vmatpush1.bf16.msra.mxu1 %v13621_v6  ;;  %v3969_v53 = vld [vmem:[%s15496_s4 + $0x118] sm:$0xff] }
 0x6c7   :  { %10113 = vrcp.f32 %v3682_v45  ;;  %8884 = vmatprep.subr.bf16.mxu0 %v13631_v51  ;;  %8916 = vmatprep.subr.bf16.mxu1 %v13633_v15  ;;  %15626 = vst [vmem:[#allocation17_spill] sm:$0xff] %v13695_v47  ;;  %v13707_v27 = vpack.c.bf16 %v3973_v1, %v3969_v53  ;;  %v3968_v45 = vld [vmem:[%s15496_s4 + $0x110] sm:$0xff]  ;;  %v10110_v53 = vpop.eup %10109  ;;  %v13729_v1 = vpack.c.bf16 %v3970_v24, %v3966_v22  ;;  %v3986_v51 = vld [vmem:[%s15496_s4 + $0x1a0] sm:$0xff] }
 0x6c8   :  { %v3976_v22 = vld [vmem:[%s15496_s4 + $0x150] sm:$0xff] }
 0x6c9   :  { %15628 = vst [vmem:[#allocation19_spill] sm:$0xff] %v13707_v27  ;;  %v3980_v24 = vld [vmem:[%s15496_s4 + $0x170] sm:$0xff] }
 0x6ca   :  { %8886 = vmatpush1.bf16.msra.mxu0 %v13657_v32  ;;  %8918 = vmatpush1.bf16.msra.mxu1 %v13659_v61  ;;  %v3978_v61 = vld [vmem:[%s15496_s4 + $0x160] sm:$0xff] }
 0x6cb   :  { %8888 = vmatprep.subr.bf16.mxu0 %v13669_v17  ;;  %8920 = vmatprep.subr.bf16.mxu1 %v13671_v34  ;;  %v13731_v34 = vpack.c.bf16 %v3972_v58, %v3968_v45  ;;  %v3974_v17 = vld [vmem:[%s15496_s4 + $0x140] sm:$0xff]  ;;  %v3983_v45 = vld [vmem:[%s15496_s4 + $0x188] sm:$0xff]  ;;  %v3692_v58 = vrot.slane %v13236_v11, 2 }
 0x6cc   :  { %v13766_v11 = vpack.c.bf16 %v3978_v61, %v3974_v17  ;;  %v3984_v61 = vld [vmem:[%s15496_s4 + $0x190] sm:$0xff] }
 0x6cd   :  { %v3988_v17 = vld [vmem:[%s15496_s4 + $0x1b0] sm:$0xff] }
 0x6ce   :  { %8890 = vmatpush1.bf16.msra.mxu0 %v13693_v63  ;;  %8922 = vmatpush1.bf16.msra.mxu1 %v13695_v47  ;;  %v13741_v63 = vpack.c.bf16 %v3979_v14, %v3975_v38  ;;  %v13743_v47 = vpack.c.bf16 %v3981_v60, %v3977_v39  ;;  %v3987_v38 = vld [vmem:[%s15496_s4 + $0x1a8] sm:$0xff]  ;;  %v3985_v14 = vld [vmem:[%s15496_s4 + $0x198] sm:$0xff] }
 0x6cf   :  { %8892 = vmatprep.subr.bf16.mxu0 %v13705_v57  ;;  %8924 = vmatprep.subr.bf16.mxu1 %v13707_v27  ;;  %v3989_v39 = vld [vmem:[%s15496_s4 + $0x1b8] sm:$0xff]  ;;  %v3683_v27 = vadd.f32 1.0, %v10110_v53  ;;  %v13778_v53 = vpack.c.bf16 %v3987_v38, %v3983_v45  ;;  %v3995_v45 = vld [vmem:[%s15496_s4 + $0x1e8] sm:$0xff] }
 0x6d0   :  { %v10112_v32 = vpop.eup %10111  ;;  %v3993_v38 = vld [vmem:[%s15496_s4 + $0x1d8] sm:$0xff] }
 0x6d1   :  { %v3695_v57 = vmul.f32 %v10112_v32, %v10108_v62  ;;  %v10114_v60 = vpop.eup %10113  ;;  %v13768_v32 = vpack.c.bf16 %v3980_v24, %v3976_v22  ;;  %v3982_v62 = vld [vmem:[%s15496_s4 + $0x180] sm:$0xff]  ;;  %v3991_v22 = vld [vmem:[%s15496_s4 + $0x1c8] sm:$0xff]  ;;  %10115 = vrcp.f32 %v3683_v27 }
 0x6d2   :  { %v3694_v15 = vmul.f32 %v10114_v60, %v3692_v58  ;;  %8894 = vmatpush1.bf16.msra.mxu0 %v13729_v1  ;;  %8926 = vmatpush1.bf16.msra.mxu1 %v13731_v34  ;;  %v13780_v58 = vpack.c.bf16 %v3989_v39, %v3985_v14  ;;  %v3997_v14 = vld [vmem:[%s15496_s4 + $0x1f8] sm:$0xff]  ;;  %v3990_v39 = vld [vmem:[%s15496_s4 + $0x1c0] sm:$0xff]  ;;  %v13814_v60 = vpack.c.bf16 %v3995_v45, %v3991_v22 }
 0x6d3   :  { %15629 = vst [vmem:[#allocation20_spill] sm:$0xff] %v13768_v32  ;;  %8896 = vmatprep.subr.bf16.mxu0 %v13741_v63  ;;  %8928 = vmatprep.subr.bf16.mxu1 %v13743_v47  ;;  %v13816_v27 = vpack.c.bf16 %v3997_v14, %v3993_v38 }
 0x6d4   :  { %v13791_v24 = vadd.f32 %v3695_v57, %v3694_v15  ;;  %v13805_v15 = vpack.c.bf16 %v3986_v51, %v3982_v62  ;;  %v13807_v57 = vpack.c.bf16 %v3988_v17, %v3984_v61  ;;  %v3992_v51 = vld [vmem:[%s15496_s4 + $0x1d0] sm:$0xff] }
 0x6d5   :  { %v3996_v62 = vld [vmem:[%s15496_s4 + $0x1f0] sm:$0xff] }
 0x6d6   :  { %10117 = vtanh.f32 %v13791_v24  ;;  %8898 = vmatpush1.bf16.msra.mxu0 %v13766_v11  ;;  %8930 = vmatpush1.bf16.msra.mxu1 %v13768_v32  ;;  %v3994_v32 = vld [vmem:[%s15496_s4 + $0x1e0] sm:$0xff]  ;;  %v13831_v17 = vpack.c.bf16 %v3996_v62, %v3992_v51 }
 0x6d7   :  { %8900 = vmatprep.subr.bf16.mxu0 %v13778_v53  ;;  %8932 = vmatprep.subr.bf16.mxu1 %v13780_v58  ;;  %v13829_v61 = vpack.c.bf16 %v3994_v32, %v3990_v39  ;;  %v3930_v62 = vld [vmem:[#allocation2 + $0x20] sm:$0xc] }
 0x6da   :  { %8902 = vmatpush1.bf16.msra.mxu0 %v13805_v15  ;;  %8934 = vmatpush1.bf16.msra.mxu1 %v13807_v57 }
 0x6db   :  { %8904 = vmatprep.subr.bf16.mxu0 %v13814_v60  ;;  %8936 = vmatprep.subr.bf16.mxu1 %v13816_v27  ;;  %v10116_v22 = vpop.eup %10115 }
 0x6de   :  { %8906 = vmatpush1.bf16.msra.mxu0 %v13829_v61  ;;  %8938 = vmatpush1.bf16.msra.mxu1 %v13831_v17 }
 0x6df   :  { %8940 = vmatprep.subr.bf16.mxu0 %v13260_v35  ;;  %8972 = vmatprep.subr.bf16.mxu1 %v13271_v48 }
 0x6e0   :  { %v10118_v45 = vpop.eup %10117 }
 0x6e1   :  { %v3698_v38 = vmul.f32 %v10118_v45, %v10116_v22 }
 0x6e3   :  { %3700 = vst [vmem:[#allocation5] sm:$0x30] %v3698_v38  ;;  %v3999_v32 = vrot.slane %v3698_v38, 4  ;;  %v3931_v38 = vld [vmem:[#allocation2 + $0x28] sm:$0xc] }
 0x6e5   :  { %4066 = vmatmul.mubr.f32.vlgmr.msra.gmra.mrb[34].mxu0 %v3999_v32  ;;  %4137 = vmatmul.mubr.f32.vlgmr.msra.gmra.mrb[34].mxu1 %v3999_v32 }
 0x6e6   :  { %8942 = vmatpush1.bf16.msra.mxu0 %v13273_v55  ;;  %8974 = vmatpush1.bf16.msra.mxu1 %v13282_v31 }
 0x6e7   :  { %8944 = vmatprep.subr.bf16.mxu0 %v13296_v0  ;;  %8976 = vmatprep.subr.bf16.mxu1 %v13307_v29  ;;  %v3701_v29 = vld [vmem:[#allocation2 + $0x40] sm:$0x30] }
 0x6e8   :  { %4350 = vmatprep.mubr.f32.mxu0 %v15566_v3  ;;  %4421 = vmatprep.mubr.f32.mxu1 %v15566_v3 }
 0x6ea   :  { %8946 = vmatpush1.bf16.msra.mxu0 %v13309_v44  ;;  %8978 = vmatpush1.bf16.msra.mxu1 %v13318_v16 }
 0x6eb   :  { %8948 = vmatprep.subr.bf16.mxu0 %v13332_v33  ;;  %8980 = vmatprep.subr.bf16.mxu1 %v13343_v26  ;;  %v3702_v33 = vld [vmem:[#allocation2 + $0x48] sm:$0x30] }
 0x6ee   :  { %8950 = vmatpush1.bf16.msra.mxu0 %v13345_v2  ;;  %8982 = vmatpush1.bf16.msra.mxu1 %v13354_v28 }
 0x6ef   :  { %8952 = vmatprep.subr.bf16.mxu0 %v13368_v5  ;;  %8984 = vmatprep.subr.bf16.mxu1 %v13379_v42  ;;  %v3703_v42 = vld [vmem:[#allocation2 + $0x50] sm:$0x30] }
 0x6f2   :  { %8954 = vmatpush1.bf16.msra.mxu0 %v13381_v18  ;;  %8986 = vmatpush1.bf16.msra.mxu1 %v13390_v4 }
 0x6f3   :  { %8956 = vmatprep.subr.bf16.mxu0 %v13404_v54  ;;  %8988 = vmatprep.subr.bf16.mxu1 %v13415_v20  ;;  %v3704_v54 = vld [vmem:[#allocation2 + $0x58] sm:$0x30] }
 0x6f6   :  { %8958 = vmatpush1.bf16.msra.mxu0 %v13417_v52  ;;  %8990 = vmatpush1.bf16.msra.mxu1 %v13426_v40 }
 0x6f7   :  { %8960 = vmatprep.subr.bf16.mxu0 %v13440_v59  ;;  %8992 = vmatprep.subr.bf16.mxu1 %v13451_v56 }
 0x6fa   :  { %8962 = vmatpush1.bf16.msra.mxu0 %v13453_v9  ;;  %8994 = vmatpush1.bf16.msra.mxu1 %v13462_v10 }
 0x6fb   :  { %8964 = vmatprep.subr.bf16.mxu0 %v13476_v19  ;;  %8996 = vmatprep.subr.bf16.mxu1 %v13487_v12 }
 0x6fe   :  { %8966 = vmatpush1.bf16.msra.mxu0 %v13489_v37  ;;  %8998 = vmatpush1.bf16.msra.mxu1 %v13498_v50  ;;  %v4179_v37 = vrot.slane %v13558_v7, 6 }
 0x6ff   :  { %8968 = vmatprep.subr.bf16.mxu0 %v13512_v41  ;;  %9000 = vmatprep.subr.bf16.mxu1 %v13523_v13 }
 0x702   :  { %8970 = vmatpush1.bf16.msra.mxu0 %v13525_v46  ;;  %9002 = vmatpush1.bf16.msra.mxu1 %v13534_v23 }
 0x703   :  { %9004 = vmatprep.subr.bf16.mxu0 %v13548_v30  ;;  %9036 = vmatprep.subr.bf16.mxu1 %v13553_v43 }
 0x794   :  { %v3838_v35 = vpop.f32.mrb[32].mxu0  ;;  %v3909_v48 = vpop.f32.mrb[32].mxu1 }
 0x795   :  { %v3918_v55 = vrot.slane %v3838_v35, 4  ;;  %v3840_v31 = vpop.f32.mrb[33].mxu0  ;;  %v3911_v0 = vpop.f32.mrb[33].mxu1  ;;  %v3920_v5 = vrot.slane %v3909_v48, 4 }
 0x796   :  { %v3919_v44 = vrot.slane %v3840_v31, 4  ;;  %v3921_v18 = vrot.slane %v3911_v0, 4  ;;  %v3932_v31 = vld [vmem:[#allocation2 + $0x30] sm:$0xc] }
 0x797   :  { %v3926_v16 = vadd.f32 %v3918_v55, %v3701_v29  ;;  %v3928_v4 = vadd.f32 %v3920_v5, %v3703_v42 }
 0x798   :  { %v3927_v26 = vadd.f32 %v3919_v44, %v3702_v33  ;;  %v3929_v20 = vadd.f32 %v3921_v18, %v3704_v54  ;;  %v3933_v33 = vld [vmem:[#allocation2 + $0x38] sm:$0xc]  ;;  %v15634_v54 = vld [vmem:[#allocation13_spill] sm:$0xff] }
 0x799   :  { %v7590_v2 = vmul.f32 -1.442695, %v3926_v16  ;;  %v7592_v52 = vmul.f32 -1.442695, %v3928_v4 }
 0x79a   :  { %v7591_v28 = vmul.f32 -1.442695, %v3927_v26 }
 0x79b   :  { %10119 = vpow2.f32 %v7590_v2 }
 0x79c   :  { %10121 = vpow2.f32 %v7591_v28 }
 0x79d   :  { %10123 = vtanh.f32 %v3929_v20  ;;  %v15635_v20 = vld [vmem:[#allocation14_spill] sm:$0xff] }
 0x79e   :  { %10125 = vpow2.f32 %v7592_v52 }
 0x7a5   :  { %v10120_v40 = vpop.eup %10119 }
 0x7a6   :  { %v4168_v59 = vadd.f32 1.0, %v10120_v40  ;;  %v10122_v56 = vpop.eup %10121 }
 0x7a7   :  { %v4169_v9 = vadd.f32 1.0, %v10122_v56  ;;  %v10124_v10 = vpop.eup %10123  ;;  %v15638_v56 = vld [vmem:[#allocation18_spill] sm:$0xff] }
 0x7a8   :  { %10127 = vrcp.f32 %v4168_v59  ;;  %v10126_v19 = vpop.eup %10125  ;;  %v15636_v59 = vld [vmem:[#allocation15_spill] sm:$0xff] }
 0x7a9   :  { %10129 = vrcp.f32 %v4169_v9  ;;  %v4170_v13 = vadd.f32 1.0, %v10126_v19  ;;  %v15639_v9 = vld [vmem:[#allocation19_spill] sm:$0xff] }
 0x7ab   :  { %10131 = vrcp.f32 %v4170_v13  ;;  %v4851_v13 = vld [vmem:[%s15498_s6 + $0x10] sm:$0xff] }
 0x7b2   :  { %v10128_v12 = vpop.eup %10127 }
 0x7b3   :  { %v4182_v50 = vmul.f32 %v10128_v12, %v10124_v10  ;;  %v10130_v41 = vpop.eup %10129  ;;  %v4206_v10 = vrot.slane %v13791_v24, 2  ;;  %v15640_v24 = vld [vmem:[#allocation20_spill] sm:$0xff] }
 0x7b4   :  { %v4181_v46 = vmul.f32 %v10130_v41, %v4179_v37 }
 0x7b5   :  { %v10132_v55 = vpop.eup %10131 }
 0x7b6   :  { %v13874_v23 = vadd.f32 %v4182_v50, %v4181_v46  ;;  %v4859_v46 = vld [vmem:[%s15498_s6 + $0x50] sm:$0xff] }
 0x7b8   :  { %v4067_v30 = vpop.f32.mrb[34].mxu0  ;;  %v4138_v43 = vpop.f32.mrb[34].mxu1  ;;  %10133 = vtanh.f32 %v13874_v23 }
 0x7b9   :  { %v4147_v14 = vrot.slane %v4067_v30, 6  ;;  %v4069_v39 = vpop.f32.mrb[35].mxu0  ;;  %v4140_v51 = vpop.f32.mrb[35].mxu1  ;;  %v4149_v48 = vrot.slane %v4138_v43, 6  ;;  %v9101_v30 = vpack.c.bf16 %v4859_v46, %v4851_v13  ;;  %v4866_v43 = vld [vmem:[%s15498_s6 + $0x88] sm:$0xff]  ;;  %v4939_v13 = vld [vmem:[%s15498_s6 + $0x2d0] sm:$0xff] }
 0x7ba   :  { %v4148_v22 = vrot.slane %v4069_v39, 6  ;;  %v4150_v0 = vrot.slane %v4140_v51, 6  ;;  %v4868_v39 = vld [vmem:[%s15498_s6 + $0x98] sm:$0xff] }
 0x7bb   :  { %v4155_v45 = vadd.f32 %v4147_v14, %v3930_v62  ;;  %v4157_v44 = vadd.f32 %v4149_v48, %v3932_v31  ;;  %v4874_v14 = vld [vmem:[%s15498_s6 + $0xc8] sm:$0xff]  ;;  %v4876_v62 = vld [vmem:[%s15498_s6 + $0xd8] sm:$0xff] }
 0x7bc   :  { %v4156_v32 = vadd.f32 %v4148_v22, %v3931_v38  ;;  %v4158_v26 = vadd.f32 %v4150_v0, %v3933_v33  ;;  %v9071_v51 = vpack.c.bf16 %v4874_v14, %v4866_v43  ;;  %v4865_v22 = vld [vmem:[%s15498_s6 + $0x80] sm:$0xff]  ;;  %v9103_v38 = vpack.c.bf16 %v4876_v62, %v4868_v39  ;;  %v4890_v31 = vld [vmem:[%s15498_s6 + $0x148] sm:$0xff]  ;;  %v4884_v0 = vld [vmem:[%s15498_s6 + $0x118] sm:$0xff] }
 0x7bd   :  { %v7593_v7 = vmul.f32 -1.442695, %v4155_v45  ;;  %v7595_v28 = vmul.f32 -1.442695, %v4157_v44  ;;  %v4873_v45 = vld [vmem:[%s15498_s6 + $0xc0] sm:$0xff]  ;;  %v4892_v44 = vld [vmem:[%s15498_s6 + $0x158] sm:$0xff] }
 0x7be   :  { %v7594_v35 = vmul.f32 -1.442695, %v4156_v32  ;;  %v9073_v32 = vpack.c.bf16 %v4873_v45, %v4865_v22  ;;  %v4889_v33 = vld [vmem:[%s15498_s6 + $0x140] sm:$0xff]  ;;  %v4954_v43 = vld [vmem:[%s15498_s6 + $0x348] sm:$0xff]  ;;  %v4948_v14 = vld [vmem:[%s15498_s6 + $0x318] sm:$0xff] }
 0x7bf   :  { %10135 = vpow2.f32 %v7593_v7  ;;  %v4867_v7 = vld [vmem:[%s15498_s6 + $0x90] sm:$0xff]  ;;  %v4945_v62 = vld [vmem:[%s15498_s6 + $0x300] sm:$0xff] }
 0x7c0   :  { %10137 = vpow2.f32 %v7594_v35  ;;  %v4875_v35 = vld [vmem:[%s15498_s6 + $0xd0] sm:$0xff]  ;;  %v4953_v22 = vld [vmem:[%s15498_s6 + $0x340] sm:$0xff] }
 0x7c1   :  { %10139 = vtanh.f32 %v4158_v26  ;;  %v9105_v48 = vpack.c.bf16 %v4875_v35, %v4867_v7  ;;  %v9107_v26 = vpack.c.bf16 %v4892_v44, %v4884_v0  ;;  %v4955_v7 = vld [vmem:[%s15498_s6 + $0x350] sm:$0xff]  ;;  %v4961_v44 = vld [vmem:[%s15498_s6 + $0x380] sm:$0xff] }
 0x7c2   :  { %v10134_v29 = vpop.eup %10133  ;;  %10141 = vpow2.f32 %v7595_v28  ;;  %v4883_v28 = vld [vmem:[%s15498_s6 + $0x110] sm:$0xff] }
 0x7c3   :  { %v4185_v16 = vmul.f32 %v10134_v29, %v10132_v55  ;;  %v4882_v55 = vld [vmem:[%s15498_s6 + $0x108] sm:$0xff] }
 0x7c4   :  { %v9075_v29 = vpack.c.bf16 %v4890_v31, %v4882_v55  ;;  %v4970_v55 = vld [vmem:[%s15498_s6 + $0x3c8] sm:$0xff]  ;;  %v4964_v31 = vld [vmem:[%s15498_s6 + $0x398] sm:$0xff] }
 0x7c5   :  { %4213 = vst [vmem:[#allocation4 + $0x8] sm:$0x30] %v4185_v16  ;;  %v4284_v2 = vrot.slane %v4185_v16, 4  ;;  %v4881_v16 = vld [vmem:[%s15498_s6 + $0x100] sm:$0xff] }
 0x7c7   :  { %4351 = vmatmul.mubr.f32.vlgmr.msra.gmra.mrb[36].mxu0 %v4284_v2  ;;  %4422 = vmatmul.mubr.f32.vlgmr.msra.gmra.mrb[36].mxu1 %v4284_v2  ;;  %v9077_v2 = vpack.c.bf16 %v4889_v33, %v4881_v16  ;;  %v4969_v16 = vld [vmem:[%s15498_s6 + $0x3c0] sm:$0xff] }
 0x7c8   :  { %9006 = vmatpush1.bf16.msra.mxu0 %v13585_v36  ;;  %9038 = vmatpush1.bf16.msra.mxu1 %v13587_v21  ;;  %v15630_v36 = vld [vmem:[#allocation9_spill] sm:$0xff]  ;;  %v15631_v21 = vld [vmem:[#allocation10_spill] sm:$0xff] }
 0x7c9   :  { %v10136_v5 = vpop.eup %10135  ;;  %9008 = vmatprep.subr.bf16.mxu0 %v13595_v49  ;;  %9040 = vmatprep.subr.bf16.mxu1 %v13597_v8  ;;  %v15632_v49 = vld [vmem:[#allocation11_spill] sm:$0xff]  ;;  %v15633_v8 = vld [vmem:[#allocation12_spill] sm:$0xff] }
 0x7ca   :  { %v4195_v42 = vadd.f32 1.0, %v10136_v5  ;;  %v10138_v18 = vpop.eup %10137  ;;  %4579 = vmatprep.mubr.f32.mxu0 %v15566_v3  ;;  %4650 = vmatprep.mubr.f32.mxu1 %v15566_v3  ;;  %v4891_v5 = vld [vmem:[%s15498_s6 + $0x150] sm:$0xff] }
 0x7cb   :  { %v4196_v4 = vadd.f32 1.0, %v10138_v18  ;;  %v10140_v52 = vpop.eup %10139  ;;  %v4898_v18 = vld [vmem:[%s15498_s6 + $0x188] sm:$0xff] }
 0x7cc   :  { %10143 = vrcp.f32 %v4195_v42  ;;  %9010 = vmatpush1.bf16.msra.mxu0 %v13619_v25  ;;  %9042 = vmatpush1.bf16.msra.mxu1 %v13621_v6  ;;  %v10142_v40 = vpop.eup %10141  ;;  %v15637_v25 = vld [vmem:[#allocation17_spill] sm:$0xff]  ;;  %v9109_v42 = vpack.c.bf16 %v4891_v5, %v4883_v28  ;;  %v4971_v28 = vld [vmem:[%s15498_s6 + $0x3d0] sm:$0xff] }
 0x7cd   :  { %10145 = vrcp.f32 %v4196_v4  ;;  %9012 = vmatprep.subr.bf16.mxu0 %v15630_v36  ;;  %9044 = vmatprep.subr.bf16.mxu1 %v15631_v21  ;;  %v4197_v37 = vadd.f32 1.0, %v10142_v40  ;;  %v4906_v4 = vld [vmem:[%s15498_s6 + $0x1c8] sm:$0xff]  ;;  %v4900_v36 = vld [vmem:[%s15498_s6 + $0x198] sm:$0xff]  ;;  %v4899_v40 = vld [vmem:[%s15498_s6 + $0x190] sm:$0xff] }
 0x7ce   :  { %v9079_v21 = vpack.c.bf16 %v4906_v4, %v4898_v18  ;;  %v4854_v5 = vld [vmem:[%s15498_s6 + $0x28] sm:$0xff]  ;;  %v4856_v4 = vld [vmem:[%s15498_s6 + $0x38] sm:$0xff] }
 0x7cf   :  { %10147 = vrcp.f32 %v4197_v37  ;;  %v4921_v37 = vld [vmem:[%s15498_s6 + $0x240] sm:$0xff]  ;;  %v4862_v18 = vld [vmem:[%s15498_s6 + $0x68] sm:$0xff] }
 0x7d0   :  { %9014 = vmatpush1.bf16.msra.mxu0 %v15632_v49  ;;  %9046 = vmatpush1.bf16.msra.mxu1 %v15633_v8  ;;  %v4908_v49 = vld [vmem:[%s15498_s6 + $0x1d8] sm:$0xff]  ;;  %v4897_v8 = vld [vmem:[%s15498_s6 + $0x180] sm:$0xff] }
 0x7d1   :  { %9016 = vmatprep.subr.bf16.mxu0 %v15634_v54  ;;  %9048 = vmatprep.subr.bf16.mxu1 %v15635_v20  ;;  %v4905_v54 = vld [vmem:[%s15498_s6 + $0x1c0] sm:$0xff]  ;;  %v9111_v20 = vpack.c.bf16 %v4908_v49, %v4900_v36  ;;  %v4864_v36 = vld [vmem:[%s15498_s6 + $0x78] sm:$0xff] }
 0x7d2   :  { %v9163_v49 = vpack.c.bf16 %v4864_v36, %v4856_v4 }
 0x7d4   :  { %9018 = vmatpush1.bf16.msra.mxu0 %v15636_v59  ;;  %9050 = vmatpush1.bf16.msra.mxu1 %v15637_v25  ;;  %v4907_v59 = vld [vmem:[%s15498_s6 + $0x1d0] sm:$0xff] }
 0x7d5   :  { %9020 = vmatprep.subr.bf16.mxu0 %v15638_v56  ;;  %9052 = vmatprep.subr.bf16.mxu1 %v15639_v9  ;;  %v9113_v25 = vpack.c.bf16 %v4907_v59, %v4899_v40  ;;  %v4922_v56 = vld [vmem:[%s15498_s6 + $0x248] sm:$0xff]  ;;  %v4916_v9 = vld [vmem:[%s15498_s6 + $0x218] sm:$0xff]  ;;  %v4215_v59 = vld [vmem:[#allocation2 + $0x40] sm:$0xc0] }
 0x7d6   :  { %v10144_v6 = vpop.eup %10143 }
 0x7d7   :  { %v4209_v19 = vmul.f32 %v10144_v6, %v10140_v52  ;;  %v10146_v12 = vpop.eup %10145  ;;  %v9081_v52 = vpack.c.bf16 %v4905_v54, %v4897_v8  ;;  %v4914_v6 = vld [vmem:[%s15498_s6 + $0x208] sm:$0xff] }
 0x7d8   :  { %v4208_v50 = vmul.f32 %v10146_v12, %v4206_v10  ;;  %9022 = vmatpush1.bf16.msra.mxu0 %v13729_v1  ;;  %9054 = vmatpush1.bf16.msra.mxu1 %v13731_v34  ;;  %v9083_v10 = vpack.c.bf16 %v4922_v56, %v4914_v6  ;;  %v4913_v12 = vld [vmem:[%s15498_s6 + $0x200] sm:$0xff]  ;;  %v4216_v56 = vld [vmem:[#allocation2 + $0x48] sm:$0xc0] }
 0x7d9   :  { %9024 = vmatprep.subr.bf16.mxu0 %v13741_v63  ;;  %9056 = vmatprep.subr.bf16.mxu1 %v13743_v47  ;;  %v10148_v34 = vpop.eup %10147 }
 0x7da   :  { %v13900_v41 = vadd.f32 %v4209_v19, %v4208_v50  ;;  %v4924_v19 = vld [vmem:[%s15498_s6 + $0x258] sm:$0xff] }
 0x7db   :  { %v9115_v50 = vpack.c.bf16 %v4924_v19, %v4916_v9 }
 0x7dc   :  { %10149 = vtanh.f32 %v13900_v41  ;;  %9026 = vmatpush1.bf16.msra.mxu0 %v13766_v11  ;;  %9058 = vmatpush1.bf16.msra.mxu1 %v15640_v24  ;;  %v4850_v11 = vld [vmem:[%s15498_s6 + $0x8] sm:$0xff]  ;;  %v9085_v24 = vpack.c.bf16 %v4921_v37, %v4913_v12  ;;  %v4217_v37 = vld [vmem:[#allocation2 + $0x50] sm:$0xc0] }
 0x7dd   :  { %9028 = vmatprep.subr.bf16.mxu0 %v13778_v53  ;;  %9060 = vmatprep.subr.bf16.mxu1 %v13780_v58  ;;  %v4858_v53 = vld [vmem:[%s15498_s6 + $0x48] sm:$0xff]  ;;  %v4852_v58 = vld [vmem:[%s15498_s6 + $0x18] sm:$0xff] }
 0x7e0   :  { %9030 = vmatpush1.bf16.msra.mxu0 %v13805_v15  ;;  %9062 = vmatpush1.bf16.msra.mxu1 %v13807_v57  ;;  %v9067_v15 = vpack.c.bf16 %v4858_v53, %v4850_v11  ;;  %v4860_v57 = vld [vmem:[%s15498_s6 + $0x58] sm:$0xff]  ;;  %v4938_v11 = vld [vmem:[%s15498_s6 + $0x2c8] sm:$0xff] }
 0x7e1   :  { %9032 = vmatprep.subr.bf16.mxu0 %v13814_v60  ;;  %9064 = vmatprep.subr.bf16.mxu1 %v13816_v27  ;;  %v4849_v60 = vld [vmem:[%s15498_s6] sm:$0xff]  ;;  %v4932_v53 = vld [vmem:[%s15498_s6 + $0x298] sm:$0xff] }
 0x7e2   :  { %v4857_v27 = vld [vmem:[%s15498_s6 + $0x40] sm:$0xff] }
 0x7e4   :  { %9034 = vmatpush1.bf16.msra.mxu0 %v13829_v61  ;;  %9066 = vmatpush1.bf16.msra.mxu1 %v13831_v17  ;;  %v9099_v61 = vpack.c.bf16 %v4860_v57, %v4852_v58  ;;  %v9069_v17 = vpack.c.bf16 %v4857_v27, %v4849_v60  ;;  %v4929_v57 = vld [vmem:[%s15498_s6 + $0x280] sm:$0xff] }
 0x7e5   :  { %9068 = vmatprep.subr.bf16.mxu0 %v9067_v15  ;;  %v4940_v15 = vld [vmem:[%s15498_s6 + $0x2d8] sm:$0xff]  ;;  %v4937_v60 = vld [vmem:[%s15498_s6 + $0x2c0] sm:$0xff] }
 0x7e6   :  { %v10150_v63 = vpop.eup %10149  ;;  %9100 = vmatprep.subr.bf16.mxu1 %v9099_v61  ;;  %v9119_v27 = vpack.c.bf16 %v4940_v15, %v4932_v53  ;;  %v9089_v61 = vpack.c.bf16 %v4937_v60, %v4929_v57 }
 0x7e7   :  { %v4212_v47 = vmul.f32 %v10150_v63, %v10148_v34  ;;  %v4915_v34 = vld [vmem:[%s15498_s6 + $0x210] sm:$0xff] }
 0x7e8   :  { %v4923_v63 = vld [vmem:[%s15498_s6 + $0x250] sm:$0xff] }
 0x7e9   :  { %4214 = vst [vmem:[#allocation5] sm:$0xc] %v4212_v47  ;;  %v4513_v1 = vrot.slane %v4212_v47, 2  ;;  %v9117_v47 = vpack.c.bf16 %v4923_v63, %v4915_v34  ;;  %v4218_v34 = vld [vmem:[#allocation2 + $0x58] sm:$0xc0] }
 0x7eb   :  { %4580 = vmatmul.mubr.f32.vlgmr.msra.gmra.mrb[38].mxu0 %v4513_v1  ;;  %4651 = vmatmul.mubr.f32.vlgmr.msra.gmra.mrb[38].mxu1 %v4513_v1  ;;  %v4930_v1 = vld [vmem:[%s15498_s6 + $0x288] sm:$0xff] }
 0x7ec   :  { %5041 = vmatprep.mubr.f32.mxu0 %v15566_v3  ;;  %5118 = vmatprep.mubr.f32.mxu1 %v15566_v3  ;;  %v9087_v58 = vpack.c.bf16 %v4938_v11, %v4930_v1 }
 0x7ed   :  { %9070 = vmatpush1.bf16.msra.mxu0 %v9069_v17  ;;  %9102 = vmatpush1.bf16.msra.mxu1 %v9101_v30  ;;  %v4931_v17 = vld [vmem:[%s15498_s6 + $0x290] sm:$0xff]  ;;  %v4946_v30 = vld [vmem:[%s15498_s6 + $0x308] sm:$0xff] }
 0x7ee   :  { %9072 = vmatprep.subr.bf16.mxu0 %v9071_v51  ;;  %9104 = vmatprep.subr.bf16.mxu1 %v9103_v38  ;;  %v9121_v46 = vpack.c.bf16 %v4939_v13, %v4931_v17  ;;  %v9091_v39 = vpack.c.bf16 %v4954_v43, %v4946_v30  ;;  %v4956_v51 = vld [vmem:[%s15498_s6 + $0x358] sm:$0xff]  ;;  %v9093_v38 = vpack.c.bf16 %v4953_v22, %v4945_v62  ;;  %v4444_v43 = vld [vmem:[#allocation2 + $0x20] sm:$0x3]  ;;  %v4445_v62 = vld [vmem:[#allocation2 + $0x28] sm:$0x3] }
 0x7ef   :  { %v9123_v45 = vpack.c.bf16 %v4956_v51, %v4948_v14 }
 0x7f1   :  { %9074 = vmatpush1.bf16.msra.mxu0 %v9073_v32  ;;  %9106 = vmatpush1.bf16.msra.mxu1 %v9105_v48  ;;  %v4947_v32 = vld [vmem:[%s15498_s6 + $0x310] sm:$0xff]  ;;  %v4962_v48 = vld [vmem:[%s15498_s6 + $0x388] sm:$0xff] }
 0x7f2   :  { %9076 = vmatprep.subr.bf16.mxu0 %v9075_v29  ;;  %9108 = vmatprep.subr.bf16.mxu1 %v9107_v26  ;;  %v9125_v35 = vpack.c.bf16 %v4955_v7, %v4947_v32  ;;  %v9095_v0 = vpack.c.bf16 %v4970_v55, %v4962_v48  ;;  %v4972_v29 = vld [vmem:[%s15498_s6 + $0x3d8] sm:$0xff]  ;;  %v9097_v26 = vpack.c.bf16 %v4969_v16, %v4961_v44 }
 0x7f3   :  { %v9127_v33 = vpack.c.bf16 %v4972_v29, %v4964_v31  ;;  %v4447_v31 = vld [vmem:[#allocation2 + $0x38] sm:$0x3] }
 0x7f5   :  { %9078 = vmatpush1.bf16.msra.mxu0 %v9077_v2  ;;  %9110 = vmatpush1.bf16.msra.mxu1 %v9109_v42  ;;  %v4963_v2 = vld [vmem:[%s15498_s6 + $0x390] sm:$0xff] }
 0x7f6   :  { %9080 = vmatprep.subr.bf16.mxu0 %v9079_v21  ;;  %9112 = vmatprep.subr.bf16.mxu1 %v9111_v20  ;;  %v9129_v42 = vpack.c.bf16 %v4971_v28, %v4963_v2  ;;  %v9131_v21 = vpack.c.bf16 %v4862_v18, %v4854_v5  ;;  %v4708_v18 = vrot.slane %v13900_v41, 2  ;;  %v4855_v41 = vld [vmem:[%s15498_s6 + $0x30] sm:$0xff] }
 0x7f9   :  { %9082 = vmatpush1.bf16.msra.mxu0 %v9081_v52  ;;  %9114 = vmatpush1.bf16.msra.mxu1 %v9113_v25 }
 0x7fa   :  { %9084 = vmatprep.subr.bf16.mxu0 %v9083_v10  ;;  %9116 = vmatprep.subr.bf16.mxu1 %v9115_v50 }
 0x7fd   :  { %9086 = vmatpush1.bf16.msra.mxu0 %v9085_v24  ;;  %9118 = vmatpush1.bf16.msra.mxu1 %v9117_v47 }
 0x7fe   :  { %9088 = vmatprep.subr.bf16.mxu0 %v9087_v58  ;;  %9120 = vmatprep.subr.bf16.mxu1 %v9119_v27  ;;  %v4681_v27 = vrot.slane %v13874_v23, 6  ;;  %v4446_v23 = vld [vmem:[#allocation2 + $0x30] sm:$0x3] }
 0x801   :  { %9090 = vmatpush1.bf16.msra.mxu0 %v9089_v61  ;;  %9122 = vmatpush1.bf16.msra.mxu1 %v9121_v46 }
 0x802   :  { %9092 = vmatprep.subr.bf16.mxu0 %v9091_v39  ;;  %9124 = vmatprep.subr.bf16.mxu1 %v9123_v45 }
 0x805   :  { %9094 = vmatpush1.bf16.msra.mxu0 %v9093_v38  ;;  %9126 = vmatpush1.bf16.msra.mxu1 %v9125_v35 }
 0x806   :  { %9096 = vmatprep.subr.bf16.mxu0 %v9095_v0  ;;  %9128 = vmatprep.subr.bf16.mxu1 %v9127_v33 }
 0x809   :  { %9098 = vmatpush1.bf16.msra.mxu0 %v9097_v26  ;;  %9130 = vmatpush1.bf16.msra.mxu1 %v9129_v42 }
 0x80a   :  { %9132 = vmatprep.subr.bf16.mxu0 %v9131_v21  ;;  %9164 = vmatprep.subr.bf16.mxu1 %v9163_v49 }
 0x89a   :  { %v4352_v8 = vpop.f32.mrb[36].mxu0  ;;  %v4423_v54 = vpop.f32.mrb[36].mxu1 }
 0x89b   :  { %v4432_v20 = vrot.slane %v4352_v8, 2  ;;  %v4354_v52 = vpop.f32.mrb[37].mxu0  ;;  %v4425_v40 = vpop.f32.mrb[37].mxu1  ;;  %v4434_v12 = vrot.slane %v4423_v54, 2 }
 0x89c   :  { %v4433_v25 = vrot.slane %v4354_v52, 2  ;;  %v4435_v50 = vrot.slane %v4425_v40, 2  ;;  %v4853_v40 = vld [vmem:[%s15498_s6 + $0x20] sm:$0xff] }
 0x89d   :  { %v4440_v6 = vadd.f32 %v4432_v20, %v4215_v59  ;;  %v4442_v24 = vadd.f32 %v4434_v12, %v4217_v37  ;;  %v4861_v59 = vld [vmem:[%s15498_s6 + $0x60] sm:$0xff] }
 0x89e   :  { %v4441_v9 = vadd.f32 %v4433_v25, %v4216_v56  ;;  %v4443_v63 = vadd.f32 %v4435_v50, %v4218_v34  ;;  %v4863_v25 = vld [vmem:[%s15498_s6 + $0x70] sm:$0xff]  ;;  %v4878_v56 = vld [vmem:[%s15498_s6 + $0xe8] sm:$0xff]  ;;  %v4869_v37 = vld [vmem:[%s15498_s6 + $0xa0] sm:$0xff] }
 0x89f   :  { %v7596_v10 = vmul.f32 -1.442695, %v4440_v6  ;;  %v7598_v47 = vmul.f32 -1.442695, %v4442_v24  ;;  %v4870_v6 = vld [vmem:[%s15498_s6 + $0xa8] sm:$0xff]  ;;  %v9165_v12 = vpack.c.bf16 %v4863_v25, %v4855_v41  ;;  %v4877_v50 = vld [vmem:[%s15498_s6 + $0xe0] sm:$0xff] }
 0x8a0   :  { %v7597_v19 = vmul.f32 -1.442695, %v4441_v9  ;;  %v4872_v9 = vld [vmem:[%s15498_s6 + $0xb8] sm:$0xff]  ;;  %v4871_v24 = vld [vmem:[%s15498_s6 + $0xb0] sm:$0xff]  ;;  %v4950_v25 = vld [vmem:[%s15498_s6 + $0x328] sm:$0xff] }
 0x8a1   :  { %10151 = vpow2.f32 %v7596_v10  ;;  %v4880_v10 = vld [vmem:[%s15498_s6 + $0xf8] sm:$0xff]  ;;  %v4879_v34 = vld [vmem:[%s15498_s6 + $0xf0] sm:$0xff] }
 0x8a2   :  { %10153 = vpow2.f32 %v7597_v19  ;;  %v9133_v19 = vpack.c.bf16 %v4861_v59, %v4853_v40  ;;  %v4935_v59 = vld [vmem:[%s15498_s6 + $0x2b0] sm:$0xff] }
 0x8a3   :  { %10155 = vtanh.f32 %v4443_v63  ;;  %v4886_v63 = vld [vmem:[%s15498_s6 + $0x128] sm:$0xff]  ;;  %v4943_v41 = vld [vmem:[%s15498_s6 + $0x2f0] sm:$0xff] }
 0x8a4   :  { %10157 = vpow2.f32 %v7598_v47  ;;  %v4894_v47 = vld [vmem:[%s15498_s6 + $0x168] sm:$0xff] }
 0x8ab   :  { %v10152_v1 = vpop.eup %10151 }
 0x8ac   :  { %v4670_v11 = vadd.f32 1.0, %v10152_v1  ;;  %v10154_v53 = vpop.eup %10153 }
 0x8ad   :  { %v4671_v58 = vadd.f32 1.0, %v10154_v53  ;;  %v10156_v15 = vpop.eup %10155  ;;  %v9167_v53 = vpack.c.bf16 %v4880_v10, %v4872_v9  ;;  %v4960_v9 = vld [vmem:[%s15498_s6 + $0x378] sm:$0xff] }
 0x8ae   :  { %10159 = vrcp.f32 %v4670_v11  ;;  %v10158_v57 = vpop.eup %10157  ;;  %v9135_v11 = vpack.c.bf16 %v4878_v56, %v4870_v6  ;;  %v4958_v6 = vld [vmem:[%s15498_s6 + $0x368] sm:$0xff]  ;;  %v4952_v56 = vld [vmem:[%s15498_s6 + $0x338] sm:$0xff] }
 0x8af   :  { %10161 = vrcp.f32 %v4671_v58  ;;  %v4672_v13 = vadd.f32 1.0, %v10158_v57  ;;  %v4888_v58 = vld [vmem:[%s15498_s6 + $0x138] sm:$0xff] }
 0x8b0   :  { %v14173_v57 = vld [vmem:[#allocation5 + $0x8] sm:$0xff] }
 0x8b1   :  { %10163 = vrcp.f32 %v4672_v13  ;;  %v9139_v13 = vpack.c.bf16 %v4894_v47, %v4886_v63  ;;  %v4959_v63 = vld [vmem:[%s15498_s6 + $0x370] sm:$0xff]  ;;  %v4966_v47 = vld [vmem:[%s15498_s6 + $0x3a8] sm:$0xff] }
 0x8b8   :  { %v10160_v60 = vpop.eup %10159 }
 0x8b9   :  { %v4684_v61 = vmul.f32 %v10160_v60, %v10156_v15  ;;  %v10162_v17 = vpop.eup %10161  ;;  %v4896_v15 = vld [vmem:[%s15498_s6 + $0x178] sm:$0xff]  ;;  %v9137_v60 = vpack.c.bf16 %v4877_v50, %v4869_v37  ;;  %v4957_v37 = vld [vmem:[%s15498_s6 + $0x360] sm:$0xff]  ;;  %v9155_v50 = vpack.c.bf16 %v4958_v6, %v4950_v25 }
 0x8ba   :  { %v4683_v46 = vmul.f32 %v10162_v17, %v4681_v27  ;;  %v9169_v27 = vpack.c.bf16 %v4879_v34, %v4871_v24  ;;  %v4893_v17 = vld [vmem:[%s15498_s6 + $0x160] sm:$0xff]  ;;  %v9187_v24 = vpack.c.bf16 %v4960_v9, %v4952_v56  ;;  %v4951_v34 = vld [vmem:[%s15498_s6 + $0x330] sm:$0xff]  ;;  %v4770_v25 = vld [vmem:[%s15497_s5 + $0x198] sm:$0xff] }
 0x8bb   :  { %v10164_v48 = vpop.eup %10163  ;;  %v4778_v6 = vld [vmem:[%s15497_s5 + $0x1d8] sm:$0xff] }
 0x8bc   :  { %v4685_v30 = vadd.f32 %v4684_v61, %v4683_v46  ;;  %v4885_v61 = vld [vmem:[%s15498_s6 + $0x120] sm:$0xff]  ;;  %v9171_v46 = vpack.c.bf16 %v4896_v15, %v4888_v58  ;;  %v4976_v58 = vld [vmem:[%s15498_s6 + $0x3f8] sm:$0xff] }
 0x8be   :  { %v4581_v14 = vpop.f32.mrb[38].mxu0  ;;  %v4652_v39 = vpop.f32.mrb[38].mxu1  ;;  %10165 = vtanh.f32 %v4685_v30  ;;  %v4887_v30 = vld [vmem:[%s15498_s6 + $0x130] sm:$0xff] }
 0x8bf   :  { %v4657_v51 = vadd.f32 %v4581_v14, %v4444_v43  ;;  %v4583_v22 = vpop.f32.mrb[39].mxu0  ;;  %v4654_v45 = vpop.f32.mrb[39].mxu1  ;;  %v4659_v35 = vadd.f32 %v4652_v39, %v4446_v23  ;;  %v4895_v43 = vld [vmem:[%s15498_s6 + $0x170] sm:$0xff]  ;;  %v4902_v14 = vld [vmem:[%s15498_s6 + $0x1a8] sm:$0xff] }
 0x8c0   :  { %v4658_v38 = vadd.f32 %v4583_v22, %v4445_v62  ;;  %v4660_v29 = vadd.f32 %v4654_v45, %v4447_v31  ;;  %v4910_v39 = vld [vmem:[%s15498_s6 + $0x1e8] sm:$0xff]  ;;  %v4912_v62 = vld [vmem:[%s15498_s6 + $0x1f8] sm:$0xff]  ;;  %v9141_v22 = vpack.c.bf16 %v4893_v17, %v4885_v61  ;;  %v9173_v45 = vpack.c.bf16 %v4895_v43, %v4887_v30  ;;  %v4973_v61 = vld [vmem:[%s15498_s6 + $0x3e0] sm:$0xff] }
 0x8c1   :  { %v7599_v32 = vmul.f32 -1.442695, %v4657_v51  ;;  %v7601_v44 = vmul.f32 -1.442695, %v4659_v35  ;;  %v4904_v51 = vld [vmem:[%s15498_s6 + $0x1b8] sm:$0xff]  ;;  %v4903_v35 = vld [vmem:[%s15498_s6 + $0x1b0] sm:$0xff] }
 0x8c2   :  { %v7600_v7 = vmul.f32 -1.442695, %v4658_v38  ;;  %v4901_v38 = vld [vmem:[%s15498_s6 + $0x1a0] sm:$0xff]  ;;  %v9175_v23 = vpack.c.bf16 %v4912_v62, %v4904_v51  ;;  %v4926_v31 = vld [vmem:[%s15498_s6 + $0x268] sm:$0xff]  ;;  %v4975_v30 = vld [vmem:[%s15498_s6 + $0x3f0] sm:$0xff] }
 0x8c3   :  { %10167 = vpow2.f32 %v7599_v32  ;;  %v4909_v32 = vld [vmem:[%s15498_s6 + $0x1e0] sm:$0xff]  ;;  %v4720_v43 = vld [vmem:[%s15497_s5 + $0x8] sm:$0xff]  ;;  %v4730_v51 = vld [vmem:[%s15497_s5 + $0x58] sm:$0xff] }
 0x8c4   :  { %10169 = vpow2.f32 %v7600_v7  ;;  %v9143_v7 = vpack.c.bf16 %v4910_v39, %v4902_v14  ;;  %v4728_v14 = vld [vmem:[%s15497_s5 + $0x48] sm:$0xff]  ;;  %v4722_v39 = vld [vmem:[%s15497_s5 + $0x18] sm:$0xff] }
 0x8c5   :  { %10171 = vtanh.f32 %v4660_v29  ;;  %v4928_v29 = vld [vmem:[%s15498_s6 + $0x278] sm:$0xff] }
 0x8c6   :  { %10173 = vpow2.f32 %v7601_v44  ;;  %v9145_v44 = vpack.c.bf16 %v4909_v32, %v4901_v38  ;;  %v9195_v38 = vpack.c.bf16 %v4728_v14, %v4720_v43  ;;  %v9227_v32 = vpack.c.bf16 %v4730_v51, %v4722_v39  ;;  %v4810_v43 = vld [vmem:[%s15497_s5 + $0x2d8] sm:$0xff]  ;;  %v4799_v51 = vld [vmem:[%s15497_s5 + $0x280] sm:$0xff] }
 0x8c8   :  { %v10166_v55 = vpop.eup %10165 }
 0x8c9   :  { %v4687_v0 = vmul.f32 %v10166_v55, %v10164_v48  ;;  %v4911_v48 = vld [vmem:[%s15498_s6 + $0x1f0] sm:$0xff]  ;;  %v4918_v55 = vld [vmem:[%s15498_s6 + $0x228] sm:$0xff] }
 0x8cb   :  { %4715 = vst [vmem:[#allocation4 + $0x8] sm:$0xc0] %v4687_v0  ;;  %v4920_v0 = vld [vmem:[%s15498_s6 + $0x238] sm:$0xff] }
 0x8cd   :  { %v10168_v16 = vpop.eup %10167 }
 0x8ce   :  { %v4697_v33 = vadd.f32 1.0, %v10168_v16  ;;  %v10170_v26 = vpop.eup %10169  ;;  %v9177_v16 = vpack.c.bf16 %v4911_v48, %v4903_v35  ;;  %v4729_v35 = vld [vmem:[%s15497_s5 + $0x50] sm:$0xff]  ;;  %v4736_v48 = vld [vmem:[%s15497_s5 + $0x88] sm:$0xff] }
 0x8cf   :  { %v4698_v2 = vadd.f32 1.0, %v10170_v26  ;;  %v10172_v28 = vpop.eup %10171  ;;  %v4925_v26 = vld [vmem:[%s15498_s6 + $0x260] sm:$0xff] }
 0x8d0   :  { %10175 = vrcp.f32 %v4697_v33  ;;  %v10174_v5 = vpop.eup %10173  ;;  %v4917_v33 = vld [vmem:[%s15498_s6 + $0x220] sm:$0xff] }
 0x8d1   :  { %10177 = vrcp.f32 %v4698_v2  ;;  %v4699_v21 = vadd.f32 1.0, %v10174_v5  ;;  %v9147_v2 = vpack.c.bf16 %v4926_v31, %v4918_v55  ;;  %v4919_v5 = vld [vmem:[%s15498_s6 + $0x230] sm:$0xff]  ;;  %v4744_v55 = vld [vmem:[%s15497_s5 + $0xc8] sm:$0xff]  ;;  %v4738_v31 = vld [vmem:[%s15497_s5 + $0x98] sm:$0xff] }
 0x8d3   :  { %10179 = vrcp.f32 %v4699_v21  ;;  %v4944_v21 = vld [vmem:[%s15498_s6 + $0x2f8] sm:$0xff] }
 0x8da   :  { %v10176_v42 = vpop.eup %10175 }
 0x8db   :  { %v4711_v4 = vmul.f32 %v10176_v42, %v10172_v28  ;;  %v10178_v36 = vpop.eup %10177  ;;  %v9179_v28 = vpack.c.bf16 %v4928_v29, %v4920_v0  ;;  %v4927_v42 = vld [vmem:[%s15498_s6 + $0x270] sm:$0xff]  ;;  %v4746_v0 = vld [vmem:[%s15497_s5 + $0xd8] sm:$0xff] }
 0x8dc   :  { %v4710_v49 = vmul.f32 %v10178_v36, %v4708_v18  ;;  %v4934_v18 = vld [vmem:[%s15498_s6 + $0x2a8] sm:$0xff]  ;;  %v4936_v36 = vld [vmem:[%s15498_s6 + $0x2b8] sm:$0xff] }
 0x8dd   :  { %v10180_v54 = vpop.eup %10179  ;;  %v9183_v40 = vpack.c.bf16 %v4944_v21, %v4936_v36  ;;  %v4762_v36 = vld [vmem:[%s15497_s5 + $0x158] sm:$0xff] }
 0x8de   :  { %v4712_v8 = vadd.f32 %v4711_v4, %v4710_v49  ;;  %v4942_v4 = vld [vmem:[%s15498_s6 + $0x2e8] sm:$0xff]  ;;  %v9149_v49 = vpack.c.bf16 %v4925_v26, %v4917_v33  ;;  %v4743_v33 = vld [vmem:[%s15497_s5 + $0xc0] sm:$0xff]  ;;  %v4737_v26 = vld [vmem:[%s15497_s5 + $0x90] sm:$0xff] }
 0x8e0   :  { %10181 = vtanh.f32 %v4712_v8  ;;  %v9181_v8 = vpack.c.bf16 %v4927_v42, %v4919_v5  ;;  %v9199_v5 = vpack.c.bf16 %v4744_v55, %v4736_v48  ;;  %v9231_v42 = vpack.c.bf16 %v4746_v0, %v4738_v31  ;;  %v4826_v48 = vld [vmem:[%s15497_s5 + $0x358] sm:$0xff]  ;;  %v4815_v0 = vld [vmem:[%s15497_s5 + $0x300] sm:$0xff] }
 0x8ea   :  { %v10182_v20 = vpop.eup %10181 }
 0x8eb   :  { %v4714_v52 = vmul.f32 %v10182_v20, %v10180_v54  ;;  %v4933_v54 = vld [vmem:[%s15498_s6 + $0x2a0] sm:$0xff] }
 0x8ec   :  { %v4941_v20 = vld [vmem:[%s15498_s6 + $0x2e0] sm:$0xff] }
 0x8ed   :  { %4716 = vst [vmem:[#allocation5] sm:$0x3] %v4714_v52  ;;  %v9151_v52 = vpack.c.bf16 %v4942_v4, %v4934_v18  ;;  %v9153_v10 = vpack.c.bf16 %v4941_v20, %v4933_v54  ;;  %v4760_v18 = vld [vmem:[%s15497_s5 + $0x148] sm:$0xff]  ;;  %v4754_v4 = vld [vmem:[%s15497_s5 + $0x118] sm:$0xff]  ;;  %v4759_v54 = vld [vmem:[%s15497_s5 + $0x140] sm:$0xff] }
 0x8f4   :  { %v14163_v1 = vld [vmem:[#allocation5] sm:$0xff] }
 0x8f5   :  { %5042 = vmatmul.mubr.f32.vlgmr.msra.gmra.mrb[40].mxu0 %v14163_v1  ;;  %5119 = vmatmul.mubr.f32.vlgmr.msra.gmra.mrb[40].mxu1 %v14163_v1 }
 0x8f6   :  { %9134 = vmatpush1.bf16.msra.mxu0 %v9133_v19  ;;  %9166 = vmatpush1.bf16.msra.mxu1 %v9165_v12  ;;  %v9185_v19 = vpack.c.bf16 %v4943_v41, %v4935_v59  ;;  %v4949_v12 = vld [vmem:[%s15498_s6 + $0x320] sm:$0xff]  ;;  %v4768_v59 = vld [vmem:[%s15497_s5 + $0x188] sm:$0xff] }
 0x8f7   :  { %5047 = vmatprep.mubr.f32.mxu0 %v15566_v3  ;;  %5124 = vmatprep.mubr.f32.mxu1 %v15566_v3  ;;  %v9157_v15 = vpack.c.bf16 %v4957_v37, %v4949_v12  ;;  %v4776_v41 = vld [vmem:[%s15497_s5 + $0x1c8] sm:$0xff]  ;;  %v9239_v37 = vpack.c.bf16 %v4778_v6, %v4770_v25  ;;  %v4723_v6 = vld [vmem:[%s15497_s5 + $0x20] sm:$0xff] }
 0x8f8   :  { %9136 = vmatprep.subr.bf16.mxu0 %v9135_v11  ;;  %9168 = vmatprep.subr.bf16.mxu1 %v9167_v53  ;;  %v4974_v11 = vld [vmem:[%s15498_s6 + $0x3e8] sm:$0xff]  ;;  %v4968_v53 = vld [vmem:[%s15498_s6 + $0x3b8] sm:$0xff]  ;;  %v9207_v12 = vpack.c.bf16 %v4776_v41, %v4768_v59 }
 0x8f9   :  { %5048 = vmatmul.mubr.f32.gmra.mrb[42].mxu0 %v14173_v57  ;;  %5125 = vmatmul.mubr.f32.gmra.mrb[42].mxu1 %v14173_v57  ;;  %v9159_v17 = vpack.c.bf16 %v4974_v11, %v4966_v47  ;;  %v4794_v47 = vld [vmem:[%s15497_s5 + $0x258] sm:$0xff] }
 0x8fa   :  { %9138 = vmatpush1.bf16.msra.mxu0 %v9137_v60  ;;  %9170 = vmatpush1.bf16.msra.mxu1 %v9169_v27  ;;  %v9189_v60 = vpack.c.bf16 %v4959_v63, %v4951_v34  ;;  %v4965_v27 = vld [vmem:[%s15498_s6 + $0x3a0] sm:$0xff]  ;;  %v4792_v34 = vld [vmem:[%s15497_s5 + $0x248] sm:$0xff]  ;;  %v4786_v63 = vld [vmem:[%s15497_s5 + $0x218] sm:$0xff] }
 0x8fb   :  { %9140 = vmatprep.subr.bf16.mxu0 %v9139_v13  ;;  %9172 = vmatprep.subr.bf16.mxu1 %v9171_v46  ;;  %v9191_v13 = vpack.c.bf16 %v4976_v58, %v4968_v53  ;;  %v4967_v46 = vld [vmem:[%s15498_s6 + $0x3b0] sm:$0xff]  ;;  %v9161_v62 = vpack.c.bf16 %v4973_v61, %v4965_v27  ;;  %v4783_v58 = vld [vmem:[%s15497_s5 + $0x200] sm:$0xff]  ;;  %v9243_v27 = vpack.c.bf16 %v4794_v47, %v4786_v63  ;;  %v4734_v59 = vld [vmem:[%s15497_s5 + $0x78] sm:$0xff] }
 0x8fc   :  { %5195 = vmatprep.mubr.f32.mxu0 %v15566_v3  ;;  %5272 = vmatprep.mubr.f32.mxu1 %v15566_v3  ;;  %v4785_v61 = vld [vmem:[%s15497_s5 + $0x210] sm:$0xff] }
 0x8fe   :  { %9142 = vmatpush1.bf16.msra.mxu0 %v9141_v22  ;;  %9174 = vmatpush1.bf16.msra.mxu1 %v9173_v45  ;;  %v9193_v22 = vpack.c.bf16 %v4975_v30, %v4967_v46  ;;  %v4719_v45 = vld [vmem:[%s15497_s5] sm:$0xff]  ;;  %v4808_v46 = vld [vmem:[%s15497_s5 + $0x2c8] sm:$0xff]  ;;  %v4802_v30 = vld [vmem:[%s15497_s5 + $0x298] sm:$0xff] }
 0x8ff   :  { %9144 = vmatprep.subr.bf16.mxu0 %v9143_v7  ;;  %9176 = vmatprep.subr.bf16.mxu1 %v9175_v23  ;;  %v4727_v7 = vld [vmem:[%s15497_s5 + $0x40] sm:$0xff]  ;;  %v4721_v23 = vld [vmem:[%s15497_s5 + $0x10] sm:$0xff] }
 0x900   :  { %v9197_v29 = vpack.c.bf16 %v4727_v7, %v4719_v45  ;;  %v9247_v45 = vpack.c.bf16 %v4810_v43, %v4802_v30  ;;  %v4816_v7 = vld [vmem:[%s15497_s5 + $0x308] sm:$0xff] }
 0x902   :  { %9146 = vmatpush1.bf16.msra.mxu0 %v9145_v44  ;;  %9178 = vmatpush1.bf16.msra.mxu1 %v9177_v16  ;;  %v9229_v44 = vpack.c.bf16 %v4729_v35, %v4721_v23  ;;  %v4735_v16 = vld [vmem:[%s15497_s5 + $0x80] sm:$0xff]  ;;  %v4824_v23 = vld [vmem:[%s15497_s5 + $0x348] sm:$0xff]  ;;  %v4818_v35 = vld [vmem:[%s15497_s5 + $0x318] sm:$0xff] }
 0x903   :  { %9148 = vmatprep.subr.bf16.mxu0 %v9147_v2  ;;  %9180 = vmatprep.subr.bf16.mxu1 %v9179_v28  ;;  %v4745_v2 = vld [vmem:[%s15497_s5 + $0xd0] sm:$0xff]  ;;  %v4752_v28 = vld [vmem:[%s15497_s5 + $0x108] sm:$0xff]  ;;  %v9201_v21 = vpack.c.bf16 %v4743_v33, %v4735_v16  ;;  %v9251_v16 = vpack.c.bf16 %v4826_v48, %v4818_v35  ;;  %v4782_v35 = vld [vmem:[%s15497_s5 + $0x1f8] sm:$0xff] }
 0x904   :  { %v9203_v20 = vpack.c.bf16 %v4760_v18, %v4752_v28  ;;  %v4817_v33 = vld [vmem:[%s15497_s5 + $0x310] sm:$0xff]  ;;  %v4840_v28 = vld [vmem:[%s15497_s5 + $0x3c8] sm:$0xff] }
 0x906   :  { %9150 = vmatpush1.bf16.msra.mxu0 %v9149_v49  ;;  %9182 = vmatpush1.bf16.msra.mxu1 %v9181_v8  ;;  %v9233_v49 = vpack.c.bf16 %v4745_v2, %v4737_v26  ;;  %v4751_v8 = vld [vmem:[%s15497_s5 + $0x100] sm:$0xff]  ;;  %v4825_v26 = vld [vmem:[%s15497_s5 + $0x350] sm:$0xff]  ;;  %v4832_v2 = vld [vmem:[%s15497_s5 + $0x388] sm:$0xff] }
 0x907   :  { %9152 = vmatprep.subr.bf16.mxu0 %v9151_v52  ;;  %9184 = vmatprep.subr.bf16.mxu1 %v9183_v40  ;;  %v9235_v52 = vpack.c.bf16 %v4762_v36, %v4754_v4  ;;  %v4761_v40 = vld [vmem:[%s15497_s5 + $0x150] sm:$0xff]  ;;  %v9205_v56 = vpack.c.bf16 %v4759_v54, %v4751_v8  ;;  %v9253_v4 = vpack.c.bf16 %v4825_v26, %v4817_v33  ;;  %v4831_v36 = vld [vmem:[%s15497_s5 + $0x380] sm:$0xff]  ;;  %v4788_v26 = vld [vmem:[%s15497_s5 + $0x228] sm:$0xff] }
 0x908   :  { %v4833_v54 = vld [vmem:[%s15497_s5 + $0x390] sm:$0xff] }
 0x909   :  { %v4781_v33 = vld [vmem:[%s15497_s5 + $0x1f0] sm:$0xff] }
 0x90a   :  { %9154 = vmatpush1.bf16.msra.mxu0 %v9153_v10  ;;  %9186 = vmatpush1.bf16.msra.mxu1 %v9185_v19  ;;  %v4767_v10 = vld [vmem:[%s15497_s5 + $0x180] sm:$0xff] }
 0x90b   :  { %9156 = vmatprep.subr.bf16.mxu0 %v9155_v50  ;;  %9188 = vmatprep.subr.bf16.mxu1 %v9187_v24  ;;  %v4775_v19 = vld [vmem:[%s15497_s5 + $0x1c0] sm:$0xff]  ;;  %v4777_v50 = vld [vmem:[%s15497_s5 + $0x1d0] sm:$0xff]  ;;  %v4784_v24 = vld [vmem:[%s15497_s5 + $0x208] sm:$0xff] }
 0x90c   :  { %v9209_v11 = vpack.c.bf16 %v4775_v19, %v4767_v10  ;;  %v4731_v10 = vld [vmem:[%s15497_s5 + $0x60] sm:$0xff]  ;;  %v4725_v19 = vld [vmem:[%s15497_s5 + $0x30] sm:$0xff] }
 0x90d   :  { %v9261_v63 = vpack.c.bf16 %v4731_v10, %v4723_v6  ;;  %v4811_v6 = vld [vmem:[%s15497_s5 + $0x2e0] sm:$0xff]  ;;  %v4805_v10 = vld [vmem:[%s15497_s5 + $0x2b0] sm:$0xff] }
 0x90e   :  { %9158 = vmatpush1.bf16.msra.mxu0 %v9157_v15  ;;  %9190 = vmatpush1.bf16.msra.mxu1 %v9189_v60  ;;  %v4791_v15 = vld [vmem:[%s15497_s5 + $0x240] sm:$0xff]  ;;  %v9211_v60 = vpack.c.bf16 %v4792_v34, %v4784_v24  ;;  %v4750_v24 = vld [vmem:[%s15497_s5 + $0xf8] sm:$0xff] }
 0x90f   :  { %9160 = vmatprep.subr.bf16.mxu0 %v9159_v17  ;;  %9192 = vmatprep.subr.bf16.mxu1 %v9191_v13  ;;  %v4793_v17 = vld [vmem:[%s15497_s5 + $0x250] sm:$0xff]  ;;  %v4800_v13 = vld [vmem:[%s15497_s5 + $0x288] sm:$0xff]  ;;  %v9213_v14 = vpack.c.bf16 %v4791_v15, %v4783_v58  ;;  %v14549_v34 = vld [vmem:[#allocation4] sm:$0xff] }
 0x910   :  { %v9245_v39 = vpack.c.bf16 %v4793_v17, %v4785_v61  ;;  %v4741_v58 = vld [vmem:[%s15497_s5 + $0xb0] sm:$0xff]  ;;  %v4764_v17 = vld [vmem:[%s15497_s5 + $0x168] sm:$0xff] }
 0x911   :  { %v4749_v15 = vld [vmem:[%s15497_s5 + $0xf0] sm:$0xff] }
 0x912   :  { %9162 = vmatpush1.bf16.msra.mxu0 %v9161_v62  ;;  %9194 = vmatpush1.bf16.msra.mxu1 %v9193_v22  ;;  %v4807_v62 = vld [vmem:[%s15497_s5 + $0x2c0] sm:$0xff]  ;;  %v9215_v22 = vpack.c.bf16 %v4808_v46, %v4800_v13  ;;  %v4758_v13 = vld [vmem:[%s15497_s5 + $0x138] sm:$0xff]  ;;  %v9297_v43 = vpack.c.bf16 %v4749_v15, %v4741_v58  ;;  %v4821_v15 = vld [vmem:[%s15497_s5 + $0x330] sm:$0xff] }
 0x913   :  { %9196 = vmatprep.subr.bf16.mxu0 %v9195_v38  ;;  %9228 = vmatprep.subr.bf16.mxu1 %v9227_v32  ;;  %v4801_v38 = vld [vmem:[%s15497_s5 + $0x290] sm:$0xff]  ;;  %v9217_v55 = vpack.c.bf16 %v4807_v62, %v4799_v51  ;;  %v4766_v46 = vld [vmem:[%s15497_s5 + $0x178] sm:$0xff] }
 0x914   :  { %v4809_v32 = vld [vmem:[%s15497_s5 + $0x2d0] sm:$0xff] }
 0x915   :  { %5196 = vmatmul.mubr.f32.vlgmr.msra.gmra.mrb[44].mxu0 %v14163_v1  ;;  %5273 = vmatmul.mubr.f32.vlgmr.msra.gmra.mrb[44].mxu1 %v14163_v1  ;;  %v4753_v1 = vld [vmem:[%s15497_s5 + $0x110] sm:$0xff]  ;;  %v9249_v31 = vpack.c.bf16 %v4809_v32, %v4801_v38  ;;  %v4772_v38 = vld [vmem:[%s15497_s5 + $0x1a8] sm:$0xff] }
 0x916   :  { %9198 = vmatpush1.bf16.msra.mxu0 %v9197_v29  ;;  %9230 = vmatpush1.bf16.msra.mxu1 %v9229_v44  ;;  %v9237_v9 = vpack.c.bf16 %v4761_v40, %v4753_v1  ;;  %v4823_v29 = vld [vmem:[%s15497_s5 + $0x340] sm:$0xff]  ;;  %v9219_v44 = vpack.c.bf16 %v4824_v23, %v4816_v7  ;;  %v4732_v1 = vld [vmem:[%s15497_s5 + $0x68] sm:$0xff]  ;;  %v4726_v40 = vld [vmem:[%s15497_s5 + $0x38] sm:$0xff] }
 0x917   :  { %5201 = vmatprep.mubr.f32.mxu0 %v15566_v3  ;;  %5278 = vmatprep.mubr.f32.mxu1 %v15566_v3  ;;  %v9221_v18 = vpack.c.bf16 %v4823_v29, %v4815_v0  ;;  %v4757_v51 = vld [vmem:[%s15497_s5 + $0x130] sm:$0xff]  ;;  %v4780_v32 = vld [vmem:[%s15497_s5 + $0x1e8] sm:$0xff]  ;;  %v4774_v23 = vld [vmem:[%s15497_s5 + $0x1b8] sm:$0xff] }
 0x918   :  { %9200 = vmatprep.subr.bf16.mxu0 %v9199_v5  ;;  %9232 = vmatprep.subr.bf16.mxu1 %v9231_v42  ;;  %v4834_v5 = vld [vmem:[%s15497_s5 + $0x398] sm:$0xff]  ;;  %v14597_v7 = vld [vmem:[#allocation4 + $0x8] sm:$0xff]  ;;  %v4779_v0 = vld [vmem:[%s15497_s5 + $0x1e0] sm:$0xff]  ;;  %v9271_v29 = vpack.c.bf16 %v4780_v32, %v4772_v38 }
 0x919   :  { %5202 = vmatmul.mubr.f32.gmra.mrb[46].mxu0 %v14173_v57  ;;  %5279 = vmatmul.mubr.f32.gmra.mrb[46].mxu1 %v14173_v57  ;;  %v4769_v57 = vld [vmem:[%s15497_s5 + $0x190] sm:$0xff]  ;;  %v4842_v42 = vld [vmem:[%s15497_s5 + $0x3d8] sm:$0xff]  ;;  %v5676_v38 = vld [vmem:[%s15500_s8 + $0x28] sm:$0xff] }
 0x91a   :  { %9202 = vmatpush1.bf16.msra.mxu0 %v9201_v21  ;;  %9234 = vmatpush1.bf16.msra.mxu1 %v9233_v49  ;;  %v9241_v53 = vpack.c.bf16 %v4777_v50, %v4769_v57  ;;  %v4839_v21 = vld [vmem:[%s15497_s5 + $0x3c0] sm:$0xff]  ;;  %v9223_v49 = vpack.c.bf16 %v4840_v28, %v4832_v2  ;;  %v9255_v8 = vpack.c.bf16 %v4842_v42, %v4834_v5  ;;  %v4748_v57 = vld [vmem:[%s15497_s5 + $0xe8] sm:$0xff]  ;;  %v4742_v50 = vld [vmem:[%s15497_s5 + $0xb8] sm:$0xff] }
 0x91b   :  { %9204 = vmatprep.subr.bf16.mxu0 %v9203_v20  ;;  %9236 = vmatprep.subr.bf16.mxu1 %v9235_v52  ;;  %v4841_v20 = vld [vmem:[%s15497_s5 + $0x3d0] sm:$0xff]  ;;  %v4724_v52 = vld [vmem:[%s15497_s5 + $0x28] sm:$0xff]  ;;  %v9225_v41 = vpack.c.bf16 %v4839_v21, %v4831_v36  ;;  %v9295_v61 = vpack.c.bf16 %v4750_v24, %v4742_v50  ;;  %v4790_v28 = vld [vmem:[%s15497_s5 + $0x238] sm:$0xff] }
 0x91c   :  { %5349 = vmatprep.mubr.f32.mxu0 %v15566_v3  ;;  %5426 = vmatprep.mubr.f32.mxu1 %v15566_v3  ;;  %v9257_v25 = vpack.c.bf16 %v4841_v20, %v4833_v54  ;;  %v4796_v2 = vld [vmem:[%s15497_s5 + $0x268] sm:$0xff]  ;;  %v4798_v5 = vld [vmem:[%s15497_s5 + $0x278] sm:$0xff]  ;;  %v4795_v36 = vld [vmem:[%s15497_s5 + $0x260] sm:$0xff] }
 0x91d   :  { %v9275_v21 = vpack.c.bf16 %v4796_v2, %v4788_v26  ;;  %v4797_v54 = vld [vmem:[%s15497_s5 + $0x270] sm:$0xff]  ;;  %v4804_v20 = vld [vmem:[%s15497_s5 + $0x2a8] sm:$0xff]  ;;  %v4830_v50 = vld [vmem:[%s15497_s5 + $0x378] sm:$0xff] }
 0x91e   :  { %9206 = vmatpush1.bf16.msra.mxu0 %v9205_v56  ;;  %9238 = vmatpush1.bf16.msra.mxu1 %v9237_v9  ;;  %v9259_v56 = vpack.c.bf16 %v4732_v1, %v4724_v52  ;;  %v9291_v9 = vpack.c.bf16 %v4734_v59, %v4726_v40  ;;  %v4812_v52 = vld [vmem:[%s15497_s5 + $0x2e8] sm:$0xff]  ;;  %v4806_v1 = vld [vmem:[%s15497_s5 + $0x2b8] sm:$0xff] }
 0x91f   :  { %9208 = vmatprep.subr.bf16.mxu0 %v9207_v12  ;;  %9240 = vmatprep.subr.bf16.mxu1 %v9239_v37  ;;  %v4733_v12 = vld [vmem:[%s15497_s5 + $0x70] sm:$0xff]  ;;  %v4740_v37 = vld [vmem:[%s15497_s5 + $0xa8] sm:$0xff]  ;;  %v4814_v40 = vld [vmem:[%s15497_s5 + $0x2f8] sm:$0xff] }
 0x920   :  { %v9293_v47 = vpack.c.bf16 %v4733_v12, %v4725_v19  ;;  %v4813_v19 = vld [vmem:[%s15497_s5 + $0x2f0] sm:$0xff]  ;;  %v4820_v12 = vld [vmem:[%s15497_s5 + $0x328] sm:$0xff]  ;;  %v5674_v32 = vld [vmem:[%s15500_s8 + $0x18] sm:$0xff] }
 0x921   :  { %v5684_v26 = vld [vmem:[%s15500_s8 + $0x68] sm:$0xff]  ;;  %v5682_v2 = vld [vmem:[%s15500_s8 + $0x58] sm:$0xff] }
 0x922   :  { %9210 = vmatpush1.bf16.msra.mxu0 %v9209_v11  ;;  %9242 = vmatpush1.bf16.msra.mxu1 %v9241_v53  ;;  %v4739_v11 = vld [vmem:[%s15497_s5 + $0xa0] sm:$0xff] }
 0x923   :  { %9212 = vmatprep.subr.bf16.mxu0 %v9211_v60  ;;  %9244 = vmatprep.subr.bf16.mxu1 %v9243_v27  ;;  %v4747_v53 = vld [vmem:[%s15497_s5 + $0xe0] sm:$0xff]  ;;  %v4756_v60 = vld [vmem:[%s15497_s5 + $0x128] sm:$0xff]  ;;  %v9263_v27 = vpack.c.bf16 %v4748_v57, %v4740_v37  ;;  %v4822_v57 = vld [vmem:[%s15497_s5 + $0x338] sm:$0xff] }
 0x924   :  { %v9265_v30 = vpack.c.bf16 %v4747_v53, %v4739_v11  ;;  %v9267_v62 = vpack.c.bf16 %v4764_v17, %v4756_v60  ;;  %v4828_v37 = vld [vmem:[%s15497_s5 + $0x368] sm:$0xff]  ;;  %v4827_v11 = vld [vmem:[%s15497_s5 + $0x360] sm:$0xff]  ;;  %v9315_v58 = vpack.c.bf16 %v4830_v50, %v4822_v57  ;;  %v4829_v60 = vld [vmem:[%s15497_s5 + $0x370] sm:$0xff] }
 0x925   :  { %v9283_v53 = vpack.c.bf16 %v4828_v37, %v4820_v12  ;;  %v4838_v17 = vld [vmem:[%s15497_s5 + $0x3b8] sm:$0xff] }
 0x926   :  { %9214 = vmatpush1.bf16.msra.mxu0 %v9213_v14  ;;  %9246 = vmatpush1.bf16.msra.mxu1 %v9245_v39  ;;  %v4755_v14 = vld [vmem:[%s15497_s5 + $0x120] sm:$0xff]  ;;  %v5698_v12 = vld [vmem:[%s15500_s8 + $0xd8] sm:$0xff] }
 0x927   :  { %9216 = vmatprep.subr.bf16.mxu0 %v9215_v22  ;;  %9248 = vmatprep.subr.bf16.mxu1 %v9247_v45  ;;  %v4763_v39 = vld [vmem:[%s15497_s5 + $0x160] sm:$0xff]  ;;  %v9299_v22 = vpack.c.bf16 %v4766_v46, %v4758_v13  ;;  %v4765_v45 = vld [vmem:[%s15497_s5 + $0x170] sm:$0xff]  ;;  %v4846_v13 = vld [vmem:[%s15497_s5 + $0x3f8] sm:$0xff] }
 0x928   :  { %v9269_v48 = vpack.c.bf16 %v4763_v39, %v4755_v14  ;;  %v4843_v14 = vld [vmem:[%s15497_s5 + $0x3e0] sm:$0xff]  ;;  %v5702_v37 = vld [vmem:[%s15500_s8 + $0xf8] sm:$0xff] }
 0x92a   :  { %9218 = vmatpush1.bf16.msra.mxu0 %v9217_v55  ;;  %9250 = vmatpush1.bf16.msra.mxu1 %v9249_v31  ;;  %v9301_v55 = vpack.c.bf16 %v4765_v45, %v4757_v51  ;;  %v4771_v31 = vld [vmem:[%s15497_s5 + $0x1a0] sm:$0xff]  ;;  %v9319_v51 = vpack.c.bf16 %v4846_v13, %v4838_v17  ;;  %v5672_v45 = vld [vmem:[%s15500_s8 + $0x8] sm:$0xff] }
 0x92b   :  { %9220 = vmatprep.subr.bf16.mxu0 %v9219_v44  ;;  %9252 = vmatprep.subr.bf16.mxu1 %v9251_v16  ;;  %v9303_v44 = vpack.c.bf16 %v4782_v35, %v4774_v23  ;;  %v4773_v16 = vld [vmem:[%s15497_s5 + $0x1b0] sm:$0xff]  ;;  %v9273_v42 = vpack.c.bf16 %v4779_v0, %v4771_v31  ;;  %v5678_v23 = vld [vmem:[%s15500_s8 + $0x38] sm:$0xff]  ;;  %v14732_v31 = vpack.c.bf16 %v5676_v38, %v5672_v45  ;;  %v5703_v13 = vld [vmem:[%s15500_s8 + $0x100] sm:$0xff] }
 0x92c   :  { %v14734_v0 = vpack.c.bf16 %v5678_v23, %v5674_v32  ;;  %v5718_v45 = vld [vmem:[%s15500_s8 + $0x178] sm:$0xff]  ;;  %v5711_v23 = vld [vmem:[%s15500_s8 + $0x140] sm:$0xff] }
 0x92e   :  { %9222 = vmatpush1.bf16.msra.mxu0 %v9221_v18  ;;  %9254 = vmatpush1.bf16.msra.mxu1 %v9253_v4  ;;  %v9305_v18 = vpack.c.bf16 %v4781_v33, %v4773_v16  ;;  %v4787_v4 = vld [vmem:[%s15497_s5 + $0x220] sm:$0xff]  ;;  %v5677_v16 = vld [vmem:[%s15500_s8 + $0x30] sm:$0xff]  ;;  %v5680_v33 = vld [vmem:[%s15500_s8 + $0x48] sm:$0xff] }
 0x92f   :  { %9224 = vmatprep.subr.bf16.mxu0 %v9223_v49  ;;  %9256 = vmatprep.subr.bf16.mxu1 %v9255_v8  ;;  %v9307_v49 = vpack.c.bf16 %v4798_v5, %v4790_v28  ;;  %v4789_v8 = vld [vmem:[%s15497_s5 + $0x230] sm:$0xff]  ;;  %v9277_v59 = vpack.c.bf16 %v4795_v36, %v4787_v4  ;;  %v5686_v28 = vld [vmem:[%s15500_s8 + $0x78] sm:$0xff]  ;;  %v5683_v4 = vld [vmem:[%s15500_s8 + $0x60] sm:$0xff] }
 0x930   :  { %v5681_v36 = vld [vmem:[%s15500_s8 + $0x50] sm:$0xff] }
 0x932   :  { %9226 = vmatpush1.bf16.msra.mxu0 %v9225_v41  ;;  %9258 = vmatpush1.bf16.msra.mxu1 %v9257_v25  ;;  %v9309_v41 = vpack.c.bf16 %v4797_v54, %v4789_v8  ;;  %v4803_v25 = vld [vmem:[%s15497_s5 + $0x2a0] sm:$0xff]  ;;  %v14778_v8 = vpack.c.bf16 %v5684_v26, %v5680_v33  ;;  %v14780_v54 = vpack.c.bf16 %v5686_v28, %v5682_v2  ;;  %v5724_v33 = vld [vmem:[%s15500_s8 + $0x1a8] sm:$0xff]  ;;  %v5722_v26 = vld [vmem:[%s15500_s8 + $0x198] sm:$0xff] }
 0x933   :  { %9260 = vmatprep.subr.bf16.mxu0 %v9259_v56  ;;  %9292 = vmatprep.subr.bf16.mxu1 %v9291_v9  ;;  %v9279_v56 = vpack.c.bf16 %v4812_v52, %v4804_v20  ;;  %v9311_v9 = vpack.c.bf16 %v4814_v40, %v4806_v1  ;;  %v9281_v24 = vpack.c.bf16 %v4811_v6, %v4803_v25  ;;  %v5692_v20 = vld [vmem:[%s15500_s8 + $0xa8] sm:$0xff]  ;;  %v5690_v52 = vld [vmem:[%s15500_s8 + $0x98] sm:$0xff]  ;;  %v5691_v25 = vld [vmem:[%s15500_s8 + $0xa0] sm:$0xff] }
 0x934   :  { %v5694_v1 = vld [vmem:[%s15500_s8 + $0xb8] sm:$0xff] }
 0x935   :  { %5350 = vmatmul.mubr.f32.vlgmr.msra.gmra.mrb[40].mxu0 %v14549_v34  ;;  %5427 = vmatmul.mubr.f32.vlgmr.msra.gmra.mrb[40].mxu1 %v14549_v34  ;;  %v14809_v6 = vpack.c.bf16 %v5694_v1, %v5690_v52  ;;  %v5726_v2 = vld [vmem:[%s15500_s8 + $0x1b8] sm:$0xff]  ;;  %v5725_v52 = vld [vmem:[%s15500_s8 + $0x1b0] sm:$0xff]  ;;  %v5728_v1 = vld [vmem:[%s15500_s8 + $0x1c8] sm:$0xff] }
 0x936   :  { %9262 = vmatpush1.bf16.msra.mxu0 %v9261_v63  ;;  %9294 = vmatpush1.bf16.msra.mxu1 %v9293_v47  ;;  %v9313_v63 = vpack.c.bf16 %v4813_v19, %v4805_v10  ;;  %v4819_v47 = vld [vmem:[%s15497_s5 + $0x320] sm:$0xff]  ;;  %v5696_v10 = vld [vmem:[%s15500_s8 + $0xc8] sm:$0xff] }
 0x937   :  { %5355 = vmatprep.mubr.f32.mxu0 %v15566_v3  ;;  %5432 = vmatprep.mubr.f32.mxu1 %v15566_v3  ;;  %v9285_v46 = vpack.c.bf16 %v4827_v11, %v4819_v47  ;;  %v5700_v19 = vld [vmem:[%s15500_s8 + $0xe8] sm:$0xff]  ;;  %v14849_v47 = vpack.c.bf16 %v5702_v37, %v5698_v12  ;;  %v5697_v11 = vld [vmem:[%s15500_s8 + $0xd0] sm:$0xff] }
 0x938   :  { %9264 = vmatprep.subr.bf16.mxu0 %v9263_v27  ;;  %9296 = vmatprep.subr.bf16.mxu1 %v9295_v61  ;;  %v4836_v27 = vld [vmem:[%s15497_s5 + $0x3a8] sm:$0xff] }
 0x939   :  { %5356 = vmatmul.mubr.f32.gmra.mrb[42].mxu0 %v14597_v7  ;;  %5433 = vmatmul.mubr.f32.gmra.mrb[42].mxu1 %v14597_v7  ;;  %v4844_v61 = vld [vmem:[%s15497_s5 + $0x3e8] sm:$0xff] }
 0x93a   :  { %9266 = vmatpush1.bf16.msra.mxu0 %v9265_v30  ;;  %9298 = vmatpush1.bf16.msra.mxu1 %v9297_v43  ;;  %v9317_v30 = vpack.c.bf16 %v4829_v60, %v4821_v15  ;;  %v4835_v43 = vld [vmem:[%s15497_s5 + $0x3a0] sm:$0xff]  ;;  %v9287_v39 = vpack.c.bf16 %v4844_v61, %v4836_v27  ;;  %v5708_v15 = vld [vmem:[%s15500_s8 + $0x128] sm:$0xff]  ;;  %v5706_v60 = vld [vmem:[%s15500_s8 + $0x118] sm:$0xff] }
 0x93b   :  { %9268 = vmatprep.subr.bf16.mxu0 %v9267_v62  ;;  %9300 = vmatprep.subr.bf16.mxu1 %v9299_v22  ;;  %v4837_v62 = vld [vmem:[%s15497_s5 + $0x3b0] sm:$0xff]  ;;  %v9289_v35 = vpack.c.bf16 %v4843_v14, %v4835_v43  ;;  %v5710_v27 = vld [vmem:[%s15500_s8 + $0x138] sm:$0xff] }
 0x93c   :  { %5503 = vmatprep.mubr.f32.mxu0 %v15566_v3  ;;  %5580 = vmatprep.mubr.f32.mxu1 %v15566_v3  ;;  %v4845_v22 = vld [vmem:[%s15497_s5 + $0x3f0] sm:$0xff]  ;;  %v14887_v43 = vpack.c.bf16 %v5710_v27, %v5706_v60  ;;  %v15641_v60 = vld [vmem:[#allocation16_spill] sm:$0xff] }
 0x93d   :  { %v5705_v14 = vld [vmem:[%s15500_s8 + $0x110] sm:$0xff]  ;;  %v15642_v27 = vsub.s32 0, %v15641_v60 }
 0x93e   :  { %9270 = vmatpush1.bf16.msra.mxu0 %v9269_v48  ;;  %9302 = vmatpush1.bf16.msra.mxu1 %v9301_v55  ;;  %v9321_v48 = vpack.c.bf16 %v4845_v22, %v4837_v62  ;;  %v5671_v55 = vld [vmem:[%s15500_s8] sm:$0xff]  ;;  %v5716_v62 = vld [vmem:[%s15500_s8 + $0x168] sm:$0xff]  ;;  %v5714_v22 = vld [vmem:[%s15500_s8 + $0x158] sm:$0xff] }
 0x93f   :  { %9272 = vmatprep.subr.bf16.mxu0 %v9271_v29  ;;  %9304 = vmatprep.subr.bf16.mxu1 %v9303_v44  ;;  %v5675_v29 = vld [vmem:[%s15500_s8 + $0x20] sm:$0xff]  ;;  %v5673_v44 = vld [vmem:[%s15500_s8 + $0x10] sm:$0xff] }
 0x940   :  { %v14757_v5 = vpack.c.bf16 %v5675_v29, %v5671_v55  ;;  %v14923_v55 = vpack.c.bf16 %v5718_v45, %v5714_v22  ;;  %v5713_v29 = vld [vmem:[%s15500_s8 + $0x150] sm:$0xff] }
 0x942   :  { %9274 = vmatpush1.bf16.msra.mxu0 %v9273_v42  ;;  %9306 = vmatpush1.bf16.msra.mxu1 %v9305_v18  ;;  %v14759_v42 = vpack.c.bf16 %v5677_v16, %v5673_v44  ;;  %v5679_v18 = vld [vmem:[%s15500_s8 + $0x40] sm:$0xff]  ;;  %v5717_v44 = vld [vmem:[%s15500_s8 + $0x170] sm:$0xff]  ;;  %v5720_v16 = vld [vmem:[%s15500_s8 + $0x188] sm:$0xff] }
 0x943   :  { %9276 = vmatprep.subr.bf16.mxu0 %v9275_v21  ;;  %9308 = vmatprep.subr.bf16.mxu1 %v9307_v49  ;;  %v5685_v21 = vld [vmem:[%s15500_s8 + $0x70] sm:$0xff]  ;;  %v5688_v49 = vld [vmem:[%s15500_s8 + $0x88] sm:$0xff]  ;;  %v14795_v40 = vpack.c.bf16 %v5683_v4, %v5679_v18  ;;  %v14947_v18 = vpack.c.bf16 %v5717_v44, %v5713_v29  ;;  %v5719_v4 = vld [vmem:[%s15500_s8 + $0x180] sm:$0xff] }
 0x946   :  { %9278 = vmatpush1.bf16.msra.mxu0 %v9277_v59  ;;  %9310 = vmatpush1.bf16.msra.mxu1 %v9309_v41  ;;  %v14797_v59 = vpack.c.bf16 %v5685_v21, %v5681_v36  ;;  %v5687_v41 = vld [vmem:[%s15500_s8 + $0x80] sm:$0xff]  ;;  %v14957_v21 = vpack.c.bf16 %v5724_v33, %v5720_v16 }
 0x947   :  { %9280 = vmatprep.subr.bf16.mxu0 %v9279_v56  ;;  %9312 = vmatprep.subr.bf16.mxu1 %v9311_v9  ;;  %v5689_v56 = vld [vmem:[%s15500_s8 + $0x90] sm:$0xff]  ;;  %v14835_v57 = vpack.c.bf16 %v5691_v25, %v5687_v41  ;;  %v5723_v36 = vld [vmem:[%s15500_s8 + $0x1a0] sm:$0xff]  ;;  %v5732_v41 = vld [vmem:[%s15500_s8 + $0x1e8] sm:$0xff] }
 0x948   :  { %v5693_v9 = vld [vmem:[%s15500_s8 + $0xb0] sm:$0xff]  ;;  %v5730_v25 = vld [vmem:[%s15500_s8 + $0x1d8] sm:$0xff]  ;;  %v14990_v12 = vpack.c.bf16 %v5732_v41, %v5728_v1 }
 0x949   :  { %v14837_v50 = vpack.c.bf16 %v5693_v9, %v5689_v56  ;;  %v5734_v56 = vld [vmem:[%s15500_s8 + $0x1f8] sm:$0xff]  ;;  %v14981_v9 = vpack.c.bf16 %v5723_v36, %v5719_v4 }
 0x94a   :  { %9282 = vmatpush1.bf16.msra.mxu0 %v9281_v24  ;;  %9314 = vmatpush1.bf16.msra.mxu1 %v9313_v63  ;;  %v5695_v24 = vld [vmem:[%s15500_s8 + $0xc0] sm:$0xff]  ;;  %v14992_v37 = vpack.c.bf16 %v5734_v56, %v5730_v25  ;;  %v15646_v56 = vsub.s32 4, %v15641_v60 }
 0x94b   :  { %9284 = vmatprep.subr.bf16.mxu0 %v9283_v53  ;;  %9316 = vmatprep.subr.bf16.mxu1 %v9315_v58  ;;  %v5699_v63 = vld [vmem:[%s15500_s8 + $0xe0] sm:$0xff]  ;;  %v5701_v53 = vld [vmem:[%s15500_s8 + $0xf0] sm:$0xff]  ;;  %v5704_v58 = vld [vmem:[%s15500_s8 + $0x108] sm:$0xff] }
 0x94c   :  { %v14873_v61 = vpack.c.bf16 %v5699_v63, %v5695_v24  ;;  %v14875_v17 = vpack.c.bf16 %v5701_v53, %v5697_v11  ;;  %v5731_v24 = vld [vmem:[%s15500_s8 + $0x1e0] sm:$0xff]  ;;  %v5729_v63 = vld [vmem:[%s15500_s8 + $0x1d0] sm:$0xff] }
 0x94d   :  { %v5733_v11 = vld [vmem:[%s15500_s8 + $0x1f0] sm:$0xff] }
 0x94e   :  { %9286 = vmatpush1.bf16.msra.mxu0 %v9285_v46  ;;  %9318 = vmatpush1.bf16.msra.mxu1 %v9317_v30  ;;  %v5707_v46 = vld [vmem:[%s15500_s8 + $0x120] sm:$0xff]  ;;  %v14885_v30 = vpack.c.bf16 %v5708_v15, %v5704_v58  ;;  %v15007_v58 = vpack.c.bf16 %v5733_v11, %v5729_v63  ;;  %v15648_v11 = vsub.s32 5, %v15641_v60 }
 0x94f   :  { %9288 = vmatprep.subr.bf16.mxu0 %v9287_v39  ;;  %9320 = vmatprep.subr.bf16.mxu1 %v9319_v51  ;;  %v5709_v39 = vld [vmem:[%s15500_s8 + $0x130] sm:$0xff]  ;;  %v5712_v51 = vld [vmem:[%s15500_s8 + $0x148] sm:$0xff]  ;;  %v14909_v38 = vpack.c.bf16 %v5707_v46, %v5703_v13  ;;  %v5593_v15 = vld [vmem:[%s15499_s7] sm:$0xff]  ;;  %v15643_v46 = vsub.s32 2, %v15641_v60 }
 0x950   :  { %v14911_v32 = vpack.c.bf16 %v5709_v39, %v5705_v14  ;;  %v5598_v13 = vrot.slane %v5593_v15, %v15642_v27  ;;  %v15644_v39 = vsub.s32 1, %v15641_v60  ;;  %v5618_v27 = vrot.slane %v5593_v15, %v15648_v11 }
 0x951   :  { %v5606_v14 = vrot.slane %v5593_v15, %v15643_v46 }
 0x952   :  { %9290 = vmatpush1.bf16.msra.mxu0 %v9289_v35  ;;  %9322 = vmatpush1.bf16.msra.mxu1 %v9321_v48  ;;  %v5715_v35 = vld [vmem:[%s15500_s8 + $0x160] sm:$0xff]  ;;  %v14921_v48 = vpack.c.bf16 %v5716_v62, %v5712_v51  ;;  %v5602_v51 = vrot.slane %v5593_v15, %v15644_v39  ;;  %v15645_v62 = vsub.s32 3, %v15641_v60 }
 0x953   :  { %9324 = vmatprep.subr.bf16.mxu0 %v14732_v31  ;;  %9356 = vmatprep.subr.bf16.mxu1 %v14734_v0  ;;  %v14945_v28 = vpack.c.bf16 %v5715_v35, %v5711_v23 }
 0x954   :  { %v5610_v22 = vrot.slane %v5593_v15, %v15645_v62 }
 0x955   :  { %5504 = vmatmul.mubr.f32.vlgmr.msra.gmra.mrb[44].mxu0 %v14549_v34  ;;  %5581 = vmatmul.mubr.f32.vlgmr.msra.gmra.mrb[44].mxu1 %v14549_v34  ;;  %v14807_v34 = vpack.c.bf16 %v5692_v20, %v5688_v49  ;;  %v14959_v49 = vpack.c.bf16 %v5726_v2, %v5722_v26  ;;  %v5721_v20 = vld [vmem:[%s15500_s8 + $0x190] sm:$0xff] }
 0x956   :  { %9326 = vmatpush1.bf16.msra.mxu0 %v14757_v5  ;;  %9358 = vmatpush1.bf16.msra.mxu1 %v14759_v42 }
 0x957   :  { %5509 = vmatprep.mubr.f32.mxu0 %v15566_v3  ;;  %5586 = vmatprep.mubr.f32.mxu1 %v15566_v3 }
 0x958   :  { %9328 = vmatprep.subr.bf16.mxu0 %v14778_v8  ;;  %9360 = vmatprep.subr.bf16.mxu1 %v14780_v54 }
 0x959   :  { %5510 = vmatmul.mubr.f32.gmra.mrb[46].mxu0 %v14597_v7  ;;  %5587 = vmatmul.mubr.f32.gmra.mrb[46].mxu1 %v14597_v7  ;;  %v14847_v7 = vpack.c.bf16 %v5700_v19, %v5696_v10  ;;  %v14983_v10 = vpack.c.bf16 %v5725_v52, %v5721_v20  ;;  %v5727_v19 = vld [vmem:[%s15500_s8 + $0x1c0] sm:$0xff] }
 0x95a   :  { %9330 = vmatpush1.bf16.msra.mxu0 %v14795_v40  ;;  %9362 = vmatpush1.bf16.msra.mxu1 %v14797_v59  ;;  %v15005_v53 = vpack.c.bf16 %v5731_v24, %v5727_v19  ;;  %v5614_v19 = vrot.slane %v5593_v15, %v15646_v56  ;;  %v15647_v24 = vsub.s32 6, %v15641_v60 }
 0x95b   :  { %9332 = vmatprep.subr.bf16.mxu0 %v14807_v34  ;;  %9364 = vmatprep.subr.bf16.mxu1 %v14809_v6 }
 0x95c   :  { %5799 = vmatprep.mubr.f32.mxu0 %v15566_v3  ;;  %5870 = vmatprep.mubr.f32.mxu1 %v15566_v3  ;;  %v5622_v63 = vrot.slane %v5593_v15, %v15647_v24 }
 0x95e   :  { %9334 = vmatpush1.bf16.msra.mxu0 %v14835_v57  ;;  %9366 = vmatpush1.bf16.msra.mxu1 %v14837_v50 }
 0x95f   :  { %9336 = vmatprep.subr.bf16.mxu0 %v14847_v7  ;;  %9368 = vmatprep.subr.bf16.mxu1 %v14849_v47 }
 0x962   :  { %9338 = vmatpush1.bf16.msra.mxu0 %v14873_v61  ;;  %9370 = vmatpush1.bf16.msra.mxu1 %v14875_v17 }
 0x963   :  { %9340 = vmatprep.subr.bf16.mxu0 %v14885_v30  ;;  %9372 = vmatprep.subr.bf16.mxu1 %v14887_v43 }
 0x966   :  { %9342 = vmatpush1.bf16.msra.mxu0 %v14909_v38  ;;  %9374 = vmatpush1.bf16.msra.mxu1 %v14911_v32 }
 0x967   :  { %9344 = vmatprep.subr.bf16.mxu0 %v14921_v48  ;;  %9376 = vmatprep.subr.bf16.mxu1 %v14923_v55 }
 0x96a   :  { %9346 = vmatpush1.bf16.msra.mxu0 %v14945_v28  ;;  %9378 = vmatpush1.bf16.msra.mxu1 %v14947_v18 }
 0x96b   :  { %9348 = vmatprep.subr.bf16.mxu0 %v14957_v21  ;;  %9380 = vmatprep.subr.bf16.mxu1 %v14959_v49 }
 0x96e   :  { %9350 = vmatpush1.bf16.msra.mxu0 %v14981_v9  ;;  %9382 = vmatpush1.bf16.msra.mxu1 %v14983_v10 }
 0x96f   :  { %9352 = vmatprep.subr.bf16.mxu0 %v14990_v12  ;;  %9384 = vmatprep.subr.bf16.mxu1 %v14992_v37 }
 0x972   :  { %9354 = vmatpush1.bf16.msra.mxu0 %v15005_v53  ;;  %9386 = vmatpush1.bf16.msra.mxu1 %v15007_v58 }
 0x973   :  { %9388 = vmatprep.subr.bf16.mxu0 %v14732_v31  ;;  %9420 = vmatprep.subr.bf16.mxu1 %v14734_v0 }
 0x975   :  { %5800 = vmatmul.mubr.f32.vlgmr.msra.gmra.mrb[48].mxu0 %v15566_v3  ;;  %5871 = vmatmul.mubr.f32.vlgmr.msra.gmra.mrb[48].mxu1 %v15566_v3 }
 0x976   :  { %9390 = vmatpush1.bf16.msra.mxu0 %v14757_v5  ;;  %9422 = vmatpush1.bf16.msra.mxu1 %v14759_v42 }
 0x977   :  { %9392 = vmatprep.subr.bf16.mxu0 %v14778_v8  ;;  %9424 = vmatprep.subr.bf16.mxu1 %v14780_v54 }
 0x978   :  { %5973 = vmatprep.mubr.f32.mxu0 %v15566_v3  ;;  %6044 = vmatprep.mubr.f32.mxu1 %v15566_v3 }
 0x97a   :  { %9394 = vmatpush1.bf16.msra.mxu0 %v14795_v40  ;;  %9426 = vmatpush1.bf16.msra.mxu1 %v14797_v59 }
 0x97b   :  { %9396 = vmatprep.subr.bf16.mxu0 %v14807_v34  ;;  %9428 = vmatprep.subr.bf16.mxu1 %v14809_v6 }
 0x97e   :  { %9398 = vmatpush1.bf16.msra.mxu0 %v14835_v57  ;;  %9430 = vmatpush1.bf16.msra.mxu1 %v14837_v50 }
 0x97f   :  { %9400 = vmatprep.subr.bf16.mxu0 %v14847_v7  ;;  %9432 = vmatprep.subr.bf16.mxu1 %v14849_v47 }
 0x982   :  { %9402 = vmatpush1.bf16.msra.mxu0 %v14873_v61  ;;  %9434 = vmatpush1.bf16.msra.mxu1 %v14875_v17 }
 0x983   :  { %9404 = vmatprep.subr.bf16.mxu0 %v14885_v30  ;;  %9436 = vmatprep.subr.bf16.mxu1 %v14887_v43 }
 0x986   :  { %9406 = vmatpush1.bf16.msra.mxu0 %v14909_v38  ;;  %9438 = vmatpush1.bf16.msra.mxu1 %v14911_v32 }
 0x987   :  { %9408 = vmatprep.subr.bf16.mxu0 %v14921_v48  ;;  %9440 = vmatprep.subr.bf16.mxu1 %v14923_v55 }
 0x98a   :  { %9410 = vmatpush1.bf16.msra.mxu0 %v14945_v28  ;;  %9442 = vmatpush1.bf16.msra.mxu1 %v14947_v18 }
 0x98b   :  { %9412 = vmatprep.subr.bf16.mxu0 %v14957_v21  ;;  %9444 = vmatprep.subr.bf16.mxu1 %v14959_v49 }
 0x98e   :  { %9414 = vmatpush1.bf16.msra.mxu0 %v14981_v9  ;;  %9446 = vmatpush1.bf16.msra.mxu1 %v14983_v10 }
 0x98f   :  { %9416 = vmatprep.subr.bf16.mxu0 %v14990_v12  ;;  %9448 = vmatprep.subr.bf16.mxu1 %v14992_v37 }
 0x992   :  { %9418 = vmatpush1.bf16.msra.mxu0 %v15005_v53  ;;  %9450 = vmatpush1.bf16.msra.mxu1 %v15007_v58 }
 0x993   :  { %9452 = vmatprep.subr.bf16.mxu0 %v14732_v31  ;;  %9484 = vmatprep.subr.bf16.mxu1 %v14734_v0 }
 0xa08   :  { %v5351_v45 = vpop.f32.mrb[40].mxu0  ;;  %v5428_v23 = vpop.f32.mrb[40].mxu1 }
 0xa09   :  { %v5635_v35 = vadd.f32 %v5598_v13, %v5351_v45  ;;  %v5637_v29 = vadd.f32 %v5606_v14, %v5428_v23  ;;  %v5353_v44 = vpop.f32.mrb[41].mxu0  ;;  %v5430_v16 = vpop.f32.mrb[41].mxu1 }
 0xa0a   :  { %v5636_v33 = vadd.f32 %v5602_v51, %v5353_v44  ;;  %v5638_v26 = vadd.f32 %v5610_v22, %v5430_v16 }
 0xa0b   :  { %5651 = vst [vmem:[#allocation3] sm:$0xff] %v5635_v35  ;;  %5653 = vst [vmem:[#allocation3 + $0x10] sm:$0xff] %v5637_v29 }
 0xa0c   :  { %5652 = vst [vmem:[#allocation3 + $0x8] sm:$0xff] %v5636_v33  ;;  %5654 = vst [vmem:[#allocation3 + $0x18] sm:$0xff] %v5638_v26  ;;  %v5357_v2 = vpop.f32.mrb[42].mxu0  ;;  %v5434_v4 = vpop.f32.mrb[42].mxu1 }
 0xa0d   :  { %v5643_v36 = vadd.f32 %v5598_v13, %v5357_v2  ;;  %v5645_v20 = vadd.f32 %v5606_v14, %v5434_v4  ;;  %v5359_v52 = vpop.f32.mrb[43].mxu0  ;;  %v5436_v1 = vpop.f32.mrb[43].mxu1  ;;  %v15649_v13 = vsub.s32 7, %v15641_v60 }
 0xa0e   :  { %v5644_v41 = vadd.f32 %v5602_v51, %v5359_v52  ;;  %v5646_v25 = vadd.f32 %v5610_v22, %v5436_v1 }
 0xa0f   :  { %5659 = vst [vmem:[#allocation3 + $0x40] sm:$0xff] %v5643_v36  ;;  %5661 = vst [vmem:[#allocation3 + $0x50] sm:$0xff] %v5645_v20  ;;  %v5626_v46 = vrot.slane %v5593_v15, %v15649_v13 }
 0xa10   :  { %5660 = vst [vmem:[#allocation3 + $0x48] sm:$0xff] %v5644_v41  ;;  %5662 = vst [vmem:[#allocation3 + $0x58] sm:$0xff] %v5646_v25 }
 0xa12   :  { %v5667_v26 = vld [vmem:[#allocation3] sm:$0x3]  ;;  %v5669_v25 = vld [vmem:[#allocation3 + $0x10] sm:$0x3] }
 0xa13   :  { %v5668_v4 = vld [vmem:[#allocation3 + $0x8] sm:$0x3] }
 0xa28   :  { %v5505_v14 = vpop.f32.mrb[44].mxu0  ;;  %v5582_v39 = vpop.f32.mrb[44].mxu1 }
 0xa29   :  { %v5507_v51 = vpop.f32.mrb[45].mxu0  ;;  %v5584_v62 = vpop.f32.mrb[45].mxu1 }
 0xa2c   :  { %v5511_v22 = vpop.f32.mrb[46].mxu0  ;;  %v5588_v45 = vpop.f32.mrb[46].mxu1 }
 0xa2d   :  { %v5647_v23 = vadd.f32 %v5614_v19, %v5511_v22  ;;  %v5649_v35 = vadd.f32 %v5622_v63, %v5588_v45  ;;  %v5513_v29 = vpop.f32.mrb[47].mxu0  ;;  %v5590_v44 = vpop.f32.mrb[47].mxu1  ;;  %v5670_v19 = vld [vmem:[#allocation3 + $0x18] sm:$0x3] }
 0xa2e   :  { %v5648_v16 = vadd.f32 %v5618_v27, %v5513_v29  ;;  %v5650_v33 = vadd.f32 %v5626_v46, %v5590_v44 }
 0xa2f   :  { %5663 = vst [vmem:[#allocation3 + $0x60] sm:$0xff] %v5647_v23  ;;  %5665 = vst [vmem:[#allocation3 + $0x70] sm:$0xff] %v5649_v35 }
 0xa30   :  { %5664 = vst [vmem:[#allocation3 + $0x68] sm:$0xff] %v5648_v16  ;;  %5666 = vst [vmem:[#allocation3 + $0x78] sm:$0xff] %v5650_v33 }
 0xa48   :  { %v5801_v2 = vpop.f32.mrb[48].mxu0  ;;  %v5872_v60 = vpop.f32.mrb[48].mxu1 }
 0xa49   :  { %v5877_v15 = vadd.f32 %v5801_v2, %v5667_v26  ;;  %v5803_v36 = vpop.f32.mrb[49].mxu0  ;;  %v5874_v20 = vpop.f32.mrb[49].mxu1  ;;  %v5879_v56 = vadd.f32 %v5872_v60, %v5669_v25 }
 0xa4a   :  { %v5878_v52 = vadd.f32 %v5803_v36, %v5668_v4  ;;  %v5880_v24 = vadd.f32 %v5874_v20, %v5670_v19  ;;  %v5905_v4 = vld [vmem:[#allocation3] sm:$0xc]  ;;  %v5907_v19 = vld [vmem:[#allocation3 + $0x10] sm:$0xc] }
 0xa4b   :  { %v7602_v1 = vmul.f32 -1.442695, %v5877_v15  ;;  %v7604_v63 = vmul.f32 -1.442695, %v5879_v56 }
 0xa4c   :  { %v7603_v41 = vmul.f32 -1.442695, %v5878_v52  ;;  %v5906_v52 = vld [vmem:[#allocation3 + $0x8] sm:$0xc] }
 0xa4d   :  { %10183 = vpow2.f32 %v7602_v1 }
 0xa4e   :  { %10185 = vpow2.f32 %v7603_v41 }
 0xa4f   :  { %10187 = vtanh.f32 %v5880_v24 }
 0xa50   :  { %10189 = vpow2.f32 %v7604_v63 }
 0xa57   :  { %v10184_v11 = vpop.eup %10183 }
 0xa58   :  { %v5890_v27 = vadd.f32 1.0, %v10184_v11  ;;  %v10186_v13 = vpop.eup %10185  ;;  %v5908_v11 = vld [vmem:[#allocation3 + $0x18] sm:$0xc] }
 0xa59   :  { %v5891_v46 = vadd.f32 1.0, %v10186_v13  ;;  %v10188_v14 = vpop.eup %10187 }
 0xa5a   :  { %10191 = vrcp.f32 %v5890_v27  ;;  %v10190_v39 = vpop.eup %10189 }
 0xa5b   :  { %10193 = vrcp.f32 %v5891_v46  ;;  %v5892_v45 = vadd.f32 1.0, %v10190_v39 }
 0xa5d   :  { %10195 = vrcp.f32 %v5892_v45 }
 0xa64   :  { %v10192_v51 = vpop.eup %10191 }
 0xa65   :  { %v5901_v62 = vmul.f32 %v10192_v51, %v10188_v14  ;;  %v10194_v22 = vpop.eup %10193 }
 0xa66   :  { %v5900_v23 = vmul.f32 0.0, %v10194_v22 }
 0xa67   :  { %v10196_v29 = vpop.eup %10195 }
 0xa68   :  { %v15070_v35 = vadd.f32 %v5901_v62, %v5900_v23 }
 0xa6a   :  { %10197 = vtanh.f32 %v15070_v35  ;;  %v6087_v23 = vrot.slane %v15070_v35, 6 }
 0xa74   :  { %v10198_v44 = vpop.eup %10197 }
 0xa75   :  { %v5904_v16 = vmul.f32 %v10198_v44, %v10196_v29 }
 0xa77   :  { %5974 = vmatmul.mubr.f32.vlgmr.msra.gmra.mrb[50].mxu0 %v5904_v16  ;;  %6045 = vmatmul.mubr.f32.vlgmr.msra.gmra.mrb[50].mxu1 %v5904_v16 }
 0xa78   :  { %9454 = vmatpush1.bf16.msra.mxu0 %v14757_v5  ;;  %9486 = vmatpush1.bf16.msra.mxu1 %v14759_v42 }
 0xa79   :  { %9456 = vmatprep.subr.bf16.mxu0 %v14778_v8  ;;  %9488 = vmatprep.subr.bf16.mxu1 %v14780_v54 }
 0xa7a   :  { %6165 = vmatprep.mubr.f32.mxu0 %v15566_v3  ;;  %6236 = vmatprep.mubr.f32.mxu1 %v15566_v3 }
 0xa7c   :  { %9458 = vmatpush1.bf16.msra.mxu0 %v14795_v40  ;;  %9490 = vmatpush1.bf16.msra.mxu1 %v14797_v59 }
 0xa7d   :  { %9460 = vmatprep.subr.bf16.mxu0 %v14807_v34  ;;  %9492 = vmatprep.subr.bf16.mxu1 %v14809_v6 }
 0xa80   :  { %9462 = vmatpush1.bf16.msra.mxu0 %v14835_v57  ;;  %9494 = vmatpush1.bf16.msra.mxu1 %v14837_v50 }
 0xa81   :  { %9464 = vmatprep.subr.bf16.mxu0 %v14847_v7  ;;  %9496 = vmatprep.subr.bf16.mxu1 %v14849_v47 }
 0xa84   :  { %9466 = vmatpush1.bf16.msra.mxu0 %v14873_v61  ;;  %9498 = vmatpush1.bf16.msra.mxu1 %v14875_v17 }
 0xa85   :  { %9468 = vmatprep.subr.bf16.mxu0 %v14885_v30  ;;  %9500 = vmatprep.subr.bf16.mxu1 %v14887_v43 }
 0xa88   :  { %9470 = vmatpush1.bf16.msra.mxu0 %v14909_v38  ;;  %9502 = vmatpush1.bf16.msra.mxu1 %v14911_v32 }
 0xa89   :  { %9472 = vmatprep.subr.bf16.mxu0 %v14921_v48  ;;  %9504 = vmatprep.subr.bf16.mxu1 %v14923_v55 }
 0xa8c   :  { %9474 = vmatpush1.bf16.msra.mxu0 %v14945_v28  ;;  %9506 = vmatpush1.bf16.msra.mxu1 %v14947_v18 }
 0xa8d   :  { %9476 = vmatprep.subr.bf16.mxu0 %v14957_v21  ;;  %9508 = vmatprep.subr.bf16.mxu1 %v14959_v49 }
 0xa90   :  { %9478 = vmatpush1.bf16.msra.mxu0 %v14981_v9  ;;  %9510 = vmatpush1.bf16.msra.mxu1 %v14983_v10 }
 0xa91   :  { %9480 = vmatprep.subr.bf16.mxu0 %v14990_v12  ;;  %9512 = vmatprep.subr.bf16.mxu1 %v14992_v37 }
 0xa94   :  { %9482 = vmatpush1.bf16.msra.mxu0 %v15005_v53  ;;  %9514 = vmatpush1.bf16.msra.mxu1 %v15007_v58 }
 0xa95   :  { %9516 = vmatprep.subr.bf16.mxu0 %v14732_v31  ;;  %9548 = vmatprep.subr.bf16.mxu1 %v14734_v0 }
 0xb4a   :  { %v5975_v33 = vpop.f32.mrb[50].mxu0  ;;  %v6046_v26 = vpop.f32.mrb[50].mxu1 }
 0xb4b   :  { %v6055_v2 = vrot.slane %v5975_v33, 6  ;;  %v5977_v60 = vpop.f32.mrb[51].mxu0  ;;  %v6048_v15 = vpop.f32.mrb[51].mxu1  ;;  %v6057_v56 = vrot.slane %v6046_v26, 6 }
 0xb4c   :  { %v6056_v36 = vrot.slane %v5977_v60, 6  ;;  %v6058_v24 = vrot.slane %v6048_v15, 6 }
 0xb4d   :  { %v6063_v20 = vadd.f32 %v6055_v2, %v5905_v4  ;;  %v6065_v63 = vadd.f32 %v6057_v56, %v5907_v19  ;;  %v6095_v19 = vld [vmem:[#allocation3 + $0x8] sm:$0x30] }
 0xb4e   :  { %v6064_v1 = vadd.f32 %v6056_v36, %v5906_v52  ;;  %v6066_v27 = vadd.f32 %v6058_v24, %v5908_v11 }
 0xb4f   :  { %v7605_v41 = vmul.f32 -1.442695, %v6063_v20  ;;  %v7607_v13 = vmul.f32 -1.442695, %v6065_v63 }
 0xb50   :  { %v7606_v25 = vmul.f32 -1.442695, %v6064_v1 }
 0xb51   :  { %10199 = vpow2.f32 %v7605_v41  ;;  %v6094_v41 = vld [vmem:[#allocation3] sm:$0x30] }
 0xb52   :  { %10201 = vpow2.f32 %v7606_v25 }
 0xb53   :  { %10203 = vtanh.f32 %v6066_v27 }
 0xb54   :  { %10205 = vpow2.f32 %v7607_v13  ;;  %v6096_v13 = vld [vmem:[#allocation3 + $0x10] sm:$0x30] }
 0xb5b   :  { %v10200_v46 = vpop.eup %10199 }
 0xb5c   :  { %v6076_v14 = vadd.f32 1.0, %v10200_v46  ;;  %v10202_v39 = vpop.eup %10201 }
 0xb5d   :  { %v6077_v51 = vadd.f32 1.0, %v10202_v39  ;;  %v10204_v62 = vpop.eup %10203  ;;  %v6097_v39 = vld [vmem:[#allocation3 + $0x18] sm:$0x30] }
 0xb5e   :  { %10207 = vrcp.f32 %v6076_v14  ;;  %v10206_v22 = vpop.eup %10205 }
 0xb5f   :  { %10209 = vrcp.f32 %v6077_v51  ;;  %v6078_v16 = vadd.f32 1.0, %v10206_v22 }
 0xb61   :  { %10211 = vrcp.f32 %v6078_v16 }
 0xb68   :  { %v10208_v45 = vpop.eup %10207 }
 0xb69   :  { %v6090_v29 = vmul.f32 %v10208_v45, %v10204_v62  ;;  %v10210_v44 = vpop.eup %10209 }
 0xb6a   :  { %v6089_v33 = vmul.f32 %v10210_v44, %v6087_v23 }
 0xb6b   :  { %v10212_v2 = vpop.eup %10211 }
 0xb6c   :  { %v15108_v26 = vadd.f32 %v6090_v29, %v6089_v33 }
 0xb6e   :  { %10213 = vtanh.f32 %v15108_v26 }
 0xb78   :  { %v10214_v60 = vpop.eup %10213 }
 0xb79   :  { %v6093_v15 = vmul.f32 %v10214_v60, %v10212_v2  ;;  %v6279_v2 = vrot.slane %v15108_v26, 6 }
 0xb7b   :  { %v6099_v4 = vrot.slane %v6093_v15, 2 }
 0xb7d   :  { %6166 = vmatmul.mubr.f32.vlgmr.msra.gmra.mrb[52].mxu0 %v6099_v4  ;;  %6237 = vmatmul.mubr.f32.vlgmr.msra.gmra.mrb[52].mxu1 %v6099_v4 }
 0xb7e   :  { %9518 = vmatpush1.bf16.msra.mxu0 %v14757_v5  ;;  %9550 = vmatpush1.bf16.msra.mxu1 %v14759_v42 }
 0xb7f   :  { %9520 = vmatprep.subr.bf16.mxu0 %v14778_v8  ;;  %9552 = vmatprep.subr.bf16.mxu1 %v14780_v54 }
 0xb80   :  { %6357 = vmatprep.mubr.f32.mxu0 %v15566_v3  ;;  %6428 = vmatprep.mubr.f32.mxu1 %v15566_v3 }
 0xb82   :  { %9522 = vmatpush1.bf16.msra.mxu0 %v14795_v40  ;;  %9554 = vmatpush1.bf16.msra.mxu1 %v14797_v59 }
 0xb83   :  { %9524 = vmatprep.subr.bf16.mxu0 %v14807_v34  ;;  %9556 = vmatprep.subr.bf16.mxu1 %v14809_v6 }
 0xb86   :  { %9526 = vmatpush1.bf16.msra.mxu0 %v14835_v57  ;;  %9558 = vmatpush1.bf16.msra.mxu1 %v14837_v50 }
 0xb87   :  { %9528 = vmatprep.subr.bf16.mxu0 %v14847_v7  ;;  %9560 = vmatprep.subr.bf16.mxu1 %v14849_v47 }
 0xb8a   :  { %9530 = vmatpush1.bf16.msra.mxu0 %v14873_v61  ;;  %9562 = vmatpush1.bf16.msra.mxu1 %v14875_v17 }
 0xb8b   :  { %9532 = vmatprep.subr.bf16.mxu0 %v14885_v30  ;;  %9564 = vmatprep.subr.bf16.mxu1 %v14887_v43 }
 0xb8e   :  { %9534 = vmatpush1.bf16.msra.mxu0 %v14909_v38  ;;  %9566 = vmatpush1.bf16.msra.mxu1 %v14911_v32 }
 0xb8f   :  { %9536 = vmatprep.subr.bf16.mxu0 %v14921_v48  ;;  %9568 = vmatprep.subr.bf16.mxu1 %v14923_v55 }
 0xb92   :  { %9538 = vmatpush1.bf16.msra.mxu0 %v14945_v28  ;;  %9570 = vmatpush1.bf16.msra.mxu1 %v14947_v18 }
 0xb93   :  { %9540 = vmatprep.subr.bf16.mxu0 %v14957_v21  ;;  %9572 = vmatprep.subr.bf16.mxu1 %v14959_v49 }
 0xb96   :  { %9542 = vmatpush1.bf16.msra.mxu0 %v14981_v9  ;;  %9574 = vmatpush1.bf16.msra.mxu1 %v14983_v10 }
 0xb97   :  { %9544 = vmatprep.subr.bf16.mxu0 %v14990_v12  ;;  %9576 = vmatprep.subr.bf16.mxu1 %v14992_v37 }
 0xb9a   :  { %9546 = vmatpush1.bf16.msra.mxu0 %v15005_v53  ;;  %9578 = vmatpush1.bf16.msra.mxu1 %v15007_v58 }
 0xb9b   :  { %9580 = vmatprep.subr.bf16.mxu0 %v14732_v31  ;;  %9612 = vmatprep.subr.bf16.mxu1 %v14734_v0 }
 0xc50   :  { %v6167_v35 = vpop.f32.mrb[52].mxu0  ;;  %v6238_v36 = vpop.f32.mrb[52].mxu1 }
 0xc51   :  { %v6247_v20 = vrot.slane %v6167_v35, 4  ;;  %v6169_v52 = vpop.f32.mrb[53].mxu0  ;;  %v6240_v1 = vpop.f32.mrb[53].mxu1  ;;  %v6249_v27 = vrot.slane %v6238_v36, 4 }
 0xc52   :  { %v6248_v25 = vrot.slane %v6169_v52, 4  ;;  %v6250_v46 = vrot.slane %v6240_v1, 4 }
 0xc53   :  { %v6255_v56 = vadd.f32 %v6247_v20, %v6094_v41  ;;  %v6257_v14 = vadd.f32 %v6249_v27, %v6096_v13  ;;  %v6287_v13 = vld [vmem:[#allocation3 + $0x8] sm:$0xc0] }
 0xc54   :  { %v6256_v24 = vadd.f32 %v6248_v25, %v6095_v19  ;;  %v6258_v51 = vadd.f32 %v6250_v46, %v6097_v39 }
 0xc55   :  { %v7608_v63 = vmul.f32 -1.442695, %v6255_v56  ;;  %v7610_v62 = vmul.f32 -1.442695, %v6257_v14 }
 0xc56   :  { %v7609_v11 = vmul.f32 -1.442695, %v6256_v24 }
 0xc57   :  { %10215 = vpow2.f32 %v7608_v63  ;;  %v6286_v63 = vld [vmem:[#allocation3] sm:$0xc0] }
 0xc58   :  { %10217 = vpow2.f32 %v7609_v11 }
 0xc59   :  { %10219 = vtanh.f32 %v6258_v51 }
 0xc5a   :  { %10221 = vpow2.f32 %v7610_v62  ;;  %v6288_v62 = vld [vmem:[#allocation3 + $0x10] sm:$0xc0] }
 0xc61   :  { %v10216_v22 = vpop.eup %10215 }
 0xc62   :  { %v6268_v45 = vadd.f32 1.0, %v10216_v22  ;;  %v10218_v23 = vpop.eup %10217 }
 0xc63   :  { %v6269_v29 = vadd.f32 1.0, %v10218_v23  ;;  %v10220_v44 = vpop.eup %10219  ;;  %v6289_v23 = vld [vmem:[#allocation3 + $0x18] sm:$0xc0] }
 0xc64   :  { %10223 = vrcp.f32 %v6268_v45  ;;  %v10222_v16 = vpop.eup %10221 }
 0xc65   :  { %10225 = vrcp.f32 %v6269_v29  ;;  %v6270_v4 = vadd.f32 1.0, %v10222_v16 }
 0xc67   :  { %10227 = vrcp.f32 %v6270_v4 }
 0xc6e   :  { %v10224_v33 = vpop.eup %10223 }
 0xc6f   :  { %v6282_v60 = vmul.f32 %v10224_v33, %v10220_v44  ;;  %v10226_v15 = vpop.eup %10225 }
 0xc70   :  { %v6281_v35 = vmul.f32 %v10226_v15, %v6279_v2 }
 0xc71   :  { %v10228_v20 = vpop.eup %10227 }
 0xc72   :  { %v15146_v36 = vadd.f32 %v6282_v60, %v6281_v35 }
 0xc74   :  { %10229 = vtanh.f32 %v15146_v36 }
 0xc7e   :  { %v10230_v52 = vpop.eup %10229 }
 0xc7f   :  { %v6285_v1 = vmul.f32 %v10230_v52, %v10228_v20  ;;  %v6471_v20 = vrot.slane %v15146_v36, 6  ;;  %v6478_v36 = vld [vmem:[#allocation3 + $0x40] sm:$0x3] }
 0xc81   :  { %v6291_v41 = vrot.slane %v6285_v1, 4 }
 0xc83   :  { %6358 = vmatmul.mubr.f32.vlgmr.msra.gmra.mrb[54].mxu0 %v6291_v41  ;;  %6429 = vmatmul.mubr.f32.vlgmr.msra.gmra.mrb[54].mxu1 %v6291_v41 }
 0xc84   :  { %9582 = vmatpush1.bf16.msra.mxu0 %v14757_v5  ;;  %9614 = vmatpush1.bf16.msra.mxu1 %v14759_v42 }
 0xc85   :  { %9584 = vmatprep.subr.bf16.mxu0 %v14778_v8  ;;  %9616 = vmatprep.subr.bf16.mxu1 %v14780_v54 }
 0xc86   :  { %6549 = vmatprep.mubr.f32.mxu0 %v15566_v3  ;;  %6620 = vmatprep.mubr.f32.mxu1 %v15566_v3 }
 0xc88   :  { %9586 = vmatpush1.bf16.msra.mxu0 %v14795_v40  ;;  %9618 = vmatpush1.bf16.msra.mxu1 %v14797_v59 }
 0xc89   :  { %9588 = vmatprep.subr.bf16.mxu0 %v14807_v34  ;;  %9620 = vmatprep.subr.bf16.mxu1 %v14809_v6 }
 0xc8c   :  { %9590 = vmatpush1.bf16.msra.mxu0 %v14835_v57  ;;  %9622 = vmatpush1.bf16.msra.mxu1 %v14837_v50 }
 0xc8d   :  { %9592 = vmatprep.subr.bf16.mxu0 %v14847_v7  ;;  %9624 = vmatprep.subr.bf16.mxu1 %v14849_v47 }
 0xc90   :  { %9594 = vmatpush1.bf16.msra.mxu0 %v14873_v61  ;;  %9626 = vmatpush1.bf16.msra.mxu1 %v14875_v17 }
 0xc91   :  { %9596 = vmatprep.subr.bf16.mxu0 %v14885_v30  ;;  %9628 = vmatprep.subr.bf16.mxu1 %v14887_v43 }
 0xc94   :  { %9598 = vmatpush1.bf16.msra.mxu0 %v14909_v38  ;;  %9630 = vmatpush1.bf16.msra.mxu1 %v14911_v32 }
 0xc95   :  { %9600 = vmatprep.subr.bf16.mxu0 %v14921_v48  ;;  %9632 = vmatprep.subr.bf16.mxu1 %v14923_v55 }
 0xc98   :  { %9602 = vmatpush1.bf16.msra.mxu0 %v14945_v28  ;;  %9634 = vmatpush1.bf16.msra.mxu1 %v14947_v18 }
 0xc99   :  { %9604 = vmatprep.subr.bf16.mxu0 %v14957_v21  ;;  %9636 = vmatprep.subr.bf16.mxu1 %v14959_v49 }
 0xc9c   :  { %9606 = vmatpush1.bf16.msra.mxu0 %v14981_v9  ;;  %9638 = vmatpush1.bf16.msra.mxu1 %v14983_v10 }
 0xc9d   :  { %9608 = vmatprep.subr.bf16.mxu0 %v14990_v12  ;;  %9640 = vmatprep.subr.bf16.mxu1 %v14992_v37 }
 0xca0   :  { %9610 = vmatpush1.bf16.msra.mxu0 %v15005_v53  ;;  %9642 = vmatpush1.bf16.msra.mxu1 %v15007_v58 }
 0xca1   :  { %9644 = vmatprep.subr.bf16.mxu0 %v14732_v31  ;;  %9676 = vmatprep.subr.bf16.mxu1 %v14734_v0 }
 0xd56   :  { %v6359_v26 = vpop.f32.mrb[54].mxu0  ;;  %v6430_v25 = vpop.f32.mrb[54].mxu1 }
 0xd57   :  { %v6439_v56 = vrot.slane %v6359_v26, 2  ;;  %v6361_v19 = vpop.f32.mrb[55].mxu0  ;;  %v6432_v24 = vpop.f32.mrb[55].mxu1  ;;  %v6441_v51 = vrot.slane %v6430_v25, 2 }
 0xd58   :  { %v6440_v11 = vrot.slane %v6361_v19, 2  ;;  %v6442_v22 = vrot.slane %v6432_v24, 2 }
 0xd59   :  { %v6447_v27 = vadd.f32 %v6439_v56, %v6286_v63  ;;  %v6449_v45 = vadd.f32 %v6441_v51, %v6288_v62 }
 0xd5a   :  { %v6448_v46 = vadd.f32 %v6440_v11, %v6287_v13  ;;  %v6450_v29 = vadd.f32 %v6442_v22, %v6289_v23 }
 0xd5b   :  { %v7611_v14 = vmul.f32 -1.442695, %v6447_v27  ;;  %v7613_v44 = vmul.f32 -1.442695, %v6449_v45  ;;  %v6480_v45 = vld [vmem:[#allocation3 + $0x50] sm:$0x3] }
 0xd5c   :  { %v7612_v39 = vmul.f32 -1.442695, %v6448_v46  ;;  %v6479_v46 = vld [vmem:[#allocation3 + $0x48] sm:$0x3] }
 0xd5d   :  { %10231 = vpow2.f32 %v7611_v14 }
 0xd5e   :  { %10233 = vpow2.f32 %v7612_v39 }
 0xd5f   :  { %10235 = vtanh.f32 %v6450_v29  ;;  %v6481_v29 = vld [vmem:[#allocation3 + $0x58] sm:$0x3] }
 0xd60   :  { %10237 = vpow2.f32 %v7613_v44 }
 0xd67   :  { %v10232_v16 = vpop.eup %10231 }
 0xd68   :  { %v6460_v33 = vadd.f32 1.0, %v10232_v16  ;;  %v10234_v2 = vpop.eup %10233 }
 0xd69   :  { %v6461_v60 = vadd.f32 1.0, %v10234_v2  ;;  %v10236_v15 = vpop.eup %10235 }
 0xd6a   :  { %10239 = vrcp.f32 %v6460_v33  ;;  %v10238_v4 = vpop.eup %10237 }
 0xd6b   :  { %10241 = vrcp.f32 %v6461_v60  ;;  %v6462_v41 = vadd.f32 1.0, %v10238_v4 }
 0xd6d   :  { %10243 = vrcp.f32 %v6462_v41 }
 0xd74   :  { %v10240_v35 = vpop.eup %10239 }
 0xd75   :  { %v6474_v52 = vmul.f32 %v10240_v35, %v10236_v15  ;;  %v10242_v1 = vpop.eup %10241 }
 0xd76   :  { %v6473_v26 = vmul.f32 %v10242_v1, %v6471_v20 }
 0xd77   :  { %v10244_v56 = vpop.eup %10243 }
 0xd78   :  { %v15184_v25 = vadd.f32 %v6474_v52, %v6473_v26 }
 0xd7a   :  { %10245 = vtanh.f32 %v15184_v25  ;;  %v6651_v52 = vrot.slane %v15184_v25, 6 }
 0xd84   :  { %v10246_v19 = vpop.eup %10245 }
 0xd85   :  { %v6477_v24 = vmul.f32 %v10246_v19, %v10244_v56 }
 0xd87   :  { %v6483_v63 = vrot.slane %v6477_v24, 6 }
 0xd89   :  { %6550 = vmatmul.mubr.f32.vlgmr.msra.gmra.mrb[56].mxu0 %v6483_v63  ;;  %6621 = vmatmul.mubr.f32.vlgmr.msra.gmra.mrb[56].mxu1 %v6483_v63 }
 0xd8a   :  { %9646 = vmatpush1.bf16.msra.mxu0 %v14757_v5  ;;  %9678 = vmatpush1.bf16.msra.mxu1 %v14759_v42 }
 0xd8b   :  { %9648 = vmatprep.subr.bf16.mxu0 %v14778_v8  ;;  %9680 = vmatprep.subr.bf16.mxu1 %v14780_v54 }
 0xd8c   :  { %6726 = vmatprep.mubr.f32.mxu0 %v15566_v3  ;;  %6797 = vmatprep.mubr.f32.mxu1 %v15566_v3 }
 0xd8e   :  { %9650 = vmatpush1.bf16.msra.mxu0 %v14795_v40  ;;  %9682 = vmatpush1.bf16.msra.mxu1 %v14797_v59 }
 0xd8f   :  { %9652 = vmatprep.subr.bf16.mxu0 %v14807_v34  ;;  %9684 = vmatprep.subr.bf16.mxu1 %v14809_v6 }
 0xd92   :  { %9654 = vmatpush1.bf16.msra.mxu0 %v14835_v57  ;;  %9686 = vmatpush1.bf16.msra.mxu1 %v14837_v50 }
 0xd93   :  { %9656 = vmatprep.subr.bf16.mxu0 %v14847_v7  ;;  %9688 = vmatprep.subr.bf16.mxu1 %v14849_v47 }
 0xd96   :  { %9658 = vmatpush1.bf16.msra.mxu0 %v14873_v61  ;;  %9690 = vmatpush1.bf16.msra.mxu1 %v14875_v17 }
 0xd97   :  { %9660 = vmatprep.subr.bf16.mxu0 %v14885_v30  ;;  %9692 = vmatprep.subr.bf16.mxu1 %v14887_v43 }
 0xd9a   :  { %9662 = vmatpush1.bf16.msra.mxu0 %v14909_v38  ;;  %9694 = vmatpush1.bf16.msra.mxu1 %v14911_v32 }
 0xd9b   :  { %9664 = vmatprep.subr.bf16.mxu0 %v14921_v48  ;;  %9696 = vmatprep.subr.bf16.mxu1 %v14923_v55 }
 0xd9e   :  { %9666 = vmatpush1.bf16.msra.mxu0 %v14945_v28  ;;  %9698 = vmatpush1.bf16.msra.mxu1 %v14947_v18 }
 0xd9f   :  { %9668 = vmatprep.subr.bf16.mxu0 %v14957_v21  ;;  %9700 = vmatprep.subr.bf16.mxu1 %v14959_v49 }
 0xda2   :  { %9670 = vmatpush1.bf16.msra.mxu0 %v14981_v9  ;;  %9702 = vmatpush1.bf16.msra.mxu1 %v14983_v10 }
 0xda3   :  { %9672 = vmatprep.subr.bf16.mxu0 %v14990_v12  ;;  %9704 = vmatprep.subr.bf16.mxu1 %v14992_v37 }
 0xda6   :  { %9674 = vmatpush1.bf16.msra.mxu0 %v15005_v53  ;;  %9706 = vmatpush1.bf16.msra.mxu1 %v15007_v58 }
 0xda7   :  { %9708 = vmatprep.subr.bf16.mxu0 %v14732_v31  ;;  %9740 = vmatprep.subr.bf16.mxu1 %v14734_v0 }
 0xe5c   :  { %v6551_v11 = vpop.f32.mrb[56].mxu0  ;;  %v6622_v27 = vpop.f32.mrb[56].mxu1 }
 0xe5d   :  { %v6627_v13 = vadd.f32 %v6551_v11, %v6478_v36  ;;  %v6553_v14 = vpop.f32.mrb[57].mxu0  ;;  %v6624_v39 = vpop.f32.mrb[57].mxu1  ;;  %v6629_v23 = vadd.f32 %v6622_v27, %v6480_v45 }
 0xe5e   :  { %v6628_v51 = vadd.f32 %v6553_v14, %v6479_v46  ;;  %v6630_v44 = vadd.f32 %v6624_v39, %v6481_v29  ;;  %v6658_v14 = vld [vmem:[#allocation3 + $0x40] sm:$0xc] }
 0xe5f   :  { %v7614_v62 = vmul.f32 -1.442695, %v6627_v13  ;;  %v7616_v16 = vmul.f32 -1.442695, %v6629_v23 }
 0xe60   :  { %v7615_v22 = vmul.f32 -1.442695, %v6628_v51 }
 0xe61   :  { %10247 = vpow2.f32 %v7614_v62  ;;  %v6659_v62 = vld [vmem:[#allocation3 + $0x48] sm:$0xc] }
 0xe62   :  { %10249 = vpow2.f32 %v7615_v22 }
 0xe63   :  { %10251 = vtanh.f32 %v6630_v44  ;;  %v6660_v44 = vld [vmem:[#allocation3 + $0x50] sm:$0xc] }
 0xe64   :  { %10253 = vpow2.f32 %v7616_v16 }
 0xe6b   :  { %v10248_v33 = vpop.eup %10247 }
 0xe6c   :  { %v6640_v2 = vadd.f32 1.0, %v10248_v33  ;;  %v10250_v60 = vpop.eup %10249  ;;  %v6661_v33 = vld [vmem:[#allocation3 + $0x58] sm:$0xc] }
 0xe6d   :  { %v6641_v15 = vadd.f32 1.0, %v10250_v60  ;;  %v10252_v4 = vpop.eup %10251 }
 0xe6e   :  { %10255 = vrcp.f32 %v6640_v2  ;;  %v10254_v35 = vpop.eup %10253 }
 0xe6f   :  { %10257 = vrcp.f32 %v6641_v15  ;;  %v6642_v26 = vadd.f32 1.0, %v10254_v35 }
 0xe71   :  { %10259 = vrcp.f32 %v6642_v26 }
 0xe78   :  { %v10256_v20 = vpop.eup %10255 }
 0xe79   :  { %v6654_v1 = vmul.f32 %v10256_v20, %v10252_v4  ;;  %v10258_v41 = vpop.eup %10257 }
 0xe7a   :  { %v6653_v56 = vmul.f32 %v10258_v41, %v6651_v52 }
 0xe7b   :  { %v10260_v24 = vpop.eup %10259 }
 0xe7c   :  { %v15222_v19 = vadd.f32 %v6654_v1, %v6653_v56 }
 0xe7e   :  { %10261 = vtanh.f32 %v15222_v19  ;;  %v6840_v41 = vrot.slane %v15222_v19, 6 }
 0xe88   :  { %v10262_v63 = vpop.eup %10261 }
 0xe89   :  { %v6657_v36 = vmul.f32 %v10262_v63, %v10260_v24 }
 0xe8b   :  { %6727 = vmatmul.mubr.f32.vlgmr.msra.gmra.mrb[58].mxu0 %v6657_v36  ;;  %6798 = vmatmul.mubr.f32.vlgmr.msra.gmra.mrb[58].mxu1 %v6657_v36 }
 0xe8c   :  { %9710 = vmatpush1.bf16.msra.mxu0 %v14757_v5  ;;  %9742 = vmatpush1.bf16.msra.mxu1 %v14759_v42 }
 0xe8d   :  { %9712 = vmatprep.subr.bf16.mxu0 %v14778_v8  ;;  %9744 = vmatprep.subr.bf16.mxu1 %v14780_v54 }
 0xe8e   :  { %6918 = vmatprep.mubr.f32.mxu0 %v15566_v3  ;;  %6989 = vmatprep.mubr.f32.mxu1 %v15566_v3 }
 0xe90   :  { %9714 = vmatpush1.bf16.msra.mxu0 %v14795_v40  ;;  %9746 = vmatpush1.bf16.msra.mxu1 %v14797_v59 }
 0xe91   :  { %9716 = vmatprep.subr.bf16.mxu0 %v14807_v34  ;;  %9748 = vmatprep.subr.bf16.mxu1 %v14809_v6 }
 0xe94   :  { %9718 = vmatpush1.bf16.msra.mxu0 %v14835_v57  ;;  %9750 = vmatpush1.bf16.msra.mxu1 %v14837_v50 }
 0xe95   :  { %9720 = vmatprep.subr.bf16.mxu0 %v14847_v7  ;;  %9752 = vmatprep.subr.bf16.mxu1 %v14849_v47 }
 0xe98   :  { %9722 = vmatpush1.bf16.msra.mxu0 %v14873_v61  ;;  %9754 = vmatpush1.bf16.msra.mxu1 %v14875_v17 }
 0xe99   :  { %9724 = vmatprep.subr.bf16.mxu0 %v14885_v30  ;;  %9756 = vmatprep.subr.bf16.mxu1 %v14887_v43 }
 0xe9c   :  { %9726 = vmatpush1.bf16.msra.mxu0 %v14909_v38  ;;  %9758 = vmatpush1.bf16.msra.mxu1 %v14911_v32 }
 0xe9d   :  { %9728 = vmatprep.subr.bf16.mxu0 %v14921_v48  ;;  %9760 = vmatprep.subr.bf16.mxu1 %v14923_v55 }
 0xea0   :  { %9730 = vmatpush1.bf16.msra.mxu0 %v14945_v28  ;;  %9762 = vmatpush1.bf16.msra.mxu1 %v14947_v18 }
 0xea1   :  { %9732 = vmatprep.subr.bf16.mxu0 %v14957_v21  ;;  %9764 = vmatprep.subr.bf16.mxu1 %v14959_v49 }
 0xea4   :  { %9734 = vmatpush1.bf16.msra.mxu0 %v14981_v9  ;;  %9766 = vmatpush1.bf16.msra.mxu1 %v14983_v10 }
 0xea5   :  { %9736 = vmatprep.subr.bf16.mxu0 %v14990_v12  ;;  %9768 = vmatprep.subr.bf16.mxu1 %v14992_v37 }
 0xea8   :  { %9738 = vmatpush1.bf16.msra.mxu0 %v15005_v53  ;;  %9770 = vmatpush1.bf16.msra.mxu1 %v15007_v58 }
 0xea9   :  { %9772 = vmatprep.subr.bf16.mxu0 %v14732_v31  ;;  %9804 = vmatprep.subr.bf16.mxu1 %v14734_v0 }
 0xf5e   :  { %v6728_v25 = vpop.f32.mrb[58].mxu0  ;;  %v6799_v11 = vpop.f32.mrb[58].mxu1 }
 0xf5f   :  { %v6808_v27 = vrot.slane %v6728_v25, 6  ;;  %v6730_v13 = vpop.f32.mrb[59].mxu0  ;;  %v6801_v46 = vpop.f32.mrb[59].mxu1  ;;  %v6810_v29 = vrot.slane %v6799_v11, 6 }
 0xf60   :  { %v6809_v39 = vrot.slane %v6730_v13, 6  ;;  %v6811_v16 = vrot.slane %v6801_v46, 6 }
 0xf61   :  { %v6816_v51 = vadd.f32 %v6808_v27, %v6658_v14  ;;  %v6818_v31 = vadd.f32 %v6810_v29, %v6660_v44 }
 0xf62   :  { %v6817_v22 = vadd.f32 %v6809_v39, %v6659_v62  ;;  %v6819_v0 = vadd.f32 %v6811_v16, %v6661_v33  ;;  %v7233_v16 = vld [vmem:[#allocation3 + $0x70] sm:$0xc0] }
 0xf63   :  { %v7617_v45 = vmul.f32 -1.442695, %v6816_v51  ;;  %v7619_v2 = vmul.f32 -1.442695, %v6818_v31  ;;  %v7234_v31 = vld [vmem:[#allocation3 + $0x78] sm:$0xc0] }
 0xf64   :  { %v7618_v23 = vmul.f32 -1.442695, %v6817_v22 }
 0xf65   :  { %10263 = vpow2.f32 %v7617_v45 }
 0xf66   :  { %10265 = vpow2.f32 %v7618_v23 }
 0xf67   :  { %10267 = vtanh.f32 %v6819_v0  ;;  %v7275_v0 = vld [vmem:[%s15502_s10] sm:$0xff] }
 0xf68   :  { %10269 = vpow2.f32 %v7619_v2  ;;  %v7276_v2 = vld [vmem:[%s15502_s10 + $0x8] sm:$0xff] }
 0xf6f   :  { %v10264_v60 = vpop.eup %10263 }
 0xf70   :  { %v6829_v15 = vadd.f32 1.0, %v10264_v60  ;;  %v10266_v4 = vpop.eup %10265  ;;  %v7628_v60 = vmul.f32 -1.442695, %v7233_v16  ;;  %v7272_v16 = vld [vmem:[%s15501_s9 + $0x68] sm:$0xff] }
 0xf71   :  { %v6830_v35 = vadd.f32 1.0, %v10266_v4  ;;  %v10268_v20 = vpop.eup %10267 }
 0xf72   :  { %10271 = vrcp.f32 %v6829_v15  ;;  %v10270_v52 = vpop.eup %10269 }
 0xf73   :  { %10273 = vrcp.f32 %v6830_v35  ;;  %v6831_v24 = vadd.f32 1.0, %v10270_v52  ;;  %v9836_v35 = vpack.c.bf16 %v7276_v2, %v7275_v0  ;;  %v7277_v52 = vld [vmem:[%s15502_s10 + $0x10] sm:$0xff]  ;;  %v7274_v0 = vld [vmem:[%s15501_s9 + $0x78] sm:$0xff] }
 0xf75   :  { %10275 = vrcp.f32 %v6831_v24  ;;  %v7279_v24 = vld [vmem:[%s15502_s10 + $0x20] sm:$0xff] }
 0xf7c   :  { %v10272_v1 = vpop.eup %10271 }
 0xf7d   :  { %v6843_v26 = vmul.f32 %v10272_v1, %v10268_v20  ;;  %v10274_v56 = vpop.eup %10273  ;;  %v7278_v1 = vld [vmem:[%s15502_s10 + $0x18] sm:$0xff] }
 0xf7e   :  { %v6842_v63 = vmul.f32 %v10274_v56, %v6840_v41 }
 0xf7f   :  { %v10276_v25 = vpop.eup %10275 }
 0xf80   :  { %v15260_v36 = vadd.f32 %v6843_v26, %v6842_v63  ;;  %v9839_v26 = vpack.c.bf16 %v7278_v1, %v7277_v52  ;;  %v7280_v63 = vld [vmem:[%s15502_s10 + $0x28] sm:$0xff]  ;;  %v7450_v1 = vld [vmem:[%s15504_s12 + $0x20] sm:$0xff] }
 0xf82   :  { %10277 = vtanh.f32 %v15260_v36  ;;  %v7032_v46 = vrot.slane %v15260_v36, 6 }
 0xf8c   :  { %v10278_v11 = vpop.eup %10277 }
 0xf8d   :  { %v6846_v27 = vmul.f32 %v10278_v11, %v10276_v25  ;;  %v9842_v25 = vpack.c.bf16 %v7280_v63, %v7279_v24  ;;  %v7453_v24 = vld [vmem:[%s15504_s12 + $0x38] sm:$0xff] }
 0xf8f   :  { %v6852_v13 = vrot.slane %v6846_v27, 2 }
 0xf91   :  { %6919 = vmatmul.mubr.f32.vlgmr.msra.gmra.mrb[60].mxu0 %v6852_v13  ;;  %6990 = vmatmul.mubr.f32.vlgmr.msra.gmra.mrb[60].mxu1 %v6852_v13  ;;  %v7281_v13 = vld [vmem:[%s15502_s10 + $0x30] sm:$0xff] }
 0xf92   :  { %9774 = vmatpush1.bf16.msra.mxu0 %v14757_v5  ;;  %9806 = vmatpush1.bf16.msra.mxu1 %v14759_v42  ;;  %v10352_v5 = vmov 0.0|0.0  }
 0xf93   :  { %9776 = vmatprep.subr.bf16.mxu0 %v14778_v8  ;;  %9808 = vmatprep.subr.bf16.mxu1 %v14780_v54 }
 0xf94   :  { %7110 = vmatprep.mubr.f32.mxu0 %v15566_v3  ;;  %7181 = vmatprep.mubr.f32.mxu1 %v15566_v3 }
 0xf96   :  { %9778 = vmatpush1.bf16.msra.mxu0 %v14795_v40  ;;  %9810 = vmatpush1.bf16.msra.mxu1 %v14797_v59 }
 0xf97   :  { %9780 = vmatprep.subr.bf16.mxu0 %v14807_v34  ;;  %9812 = vmatprep.subr.bf16.mxu1 %v14809_v6  ;;  %v6847_v34 = vld [vmem:[#allocation3 + $0x40] sm:$0x30] }
 0xf9a   :  { %9782 = vmatpush1.bf16.msra.mxu0 %v14835_v57  ;;  %9814 = vmatpush1.bf16.msra.mxu1 %v14837_v50  ;;  %v6848_v50 = vld [vmem:[#allocation3 + $0x48] sm:$0x30] }
 0xf9b   :  { %9784 = vmatprep.subr.bf16.mxu0 %v14847_v7  ;;  %9816 = vmatprep.subr.bf16.mxu1 %v14849_v47 }
 0xf9e   :  { %9786 = vmatpush1.bf16.msra.mxu0 %v14873_v61  ;;  %9818 = vmatpush1.bf16.msra.mxu1 %v14875_v17 }
 0xf9f   :  { %9788 = vmatprep.subr.bf16.mxu0 %v14885_v30  ;;  %9820 = vmatprep.subr.bf16.mxu1 %v14887_v43  ;;  %v6849_v30 = vld [vmem:[#allocation3 + $0x50] sm:$0x30] }
 0xfa2   :  { %9790 = vmatpush1.bf16.msra.mxu0 %v14909_v38  ;;  %9822 = vmatpush1.bf16.msra.mxu1 %v14911_v32  ;;  %v6850_v32 = vld [vmem:[#allocation3 + $0x58] sm:$0x30] }
 0xfa3   :  { %9792 = vmatprep.subr.bf16.mxu0 %v14921_v48  ;;  %9824 = vmatprep.subr.bf16.mxu1 %v14923_v55 }
 0xfa6   :  { %9794 = vmatpush1.bf16.msra.mxu0 %v14945_v28  ;;  %9826 = vmatpush1.bf16.msra.mxu1 %v14947_v18 }
 0xfa7   :  { %9796 = vmatprep.subr.bf16.mxu0 %v14957_v21  ;;  %9828 = vmatprep.subr.bf16.mxu1 %v14959_v49  ;;  %v7231_v49 = vld [vmem:[#allocation3 + $0x60] sm:$0xc0] }
 0xfaa   :  { %9798 = vmatpush1.bf16.msra.mxu0 %v14981_v9  ;;  %9830 = vmatpush1.bf16.msra.mxu1 %v14983_v10  ;;  %v7232_v10 = vld [vmem:[#allocation3 + $0x68] sm:$0xc0] }
 0xfab   :  { %9800 = vmatprep.subr.bf16.mxu0 %v14990_v12  ;;  %9832 = vmatprep.subr.bf16.mxu1 %v14992_v37  ;;  %v7626_v12 = vmul.f32 -1.442695, %v7231_v49  ;;  %v7627_v37 = vmul.f32 -1.442695, %v7232_v10  ;;  %v7260_v49 = vld [vmem:[%s15501_s9 + $0x8] sm:$0xff]  ;;  %v7261_v10 = vld [vmem:[%s15501_s9 + $0x10] sm:$0xff] }
 0xfae   :  { %9802 = vmatpush1.bf16.msra.mxu0 %v15005_v53  ;;  %9834 = vmatpush1.bf16.msra.mxu1 %v15007_v58 }
 0xfaf   :  { %9835 = vmatprep.subr.bf16.mxu0 %v10352_v5  ;;  %9859 = vmatprep.subr.bf16.mxu1 %v10352_v5 }
0x1064   :  { %v6920_v42 = vpop.f32.mrb[60].mxu0  ;;  %v6991_v8 = vpop.f32.mrb[60].mxu1 }
0x1065   :  { %v7000_v54 = vrot.slane %v6920_v42, 4  ;;  %v6922_v40 = vpop.f32.mrb[61].mxu0  ;;  %v6993_v59 = vpop.f32.mrb[61].mxu1  ;;  %v7002_v17 = vrot.slane %v6991_v8, 4  ;;  %v7282_v42 = vld [vmem:[%s15502_s10 + $0x38] sm:$0xff] }
0x1066   :  { %v7001_v6 = vrot.slane %v6922_v40, 4  ;;  %v7003_v43 = vrot.slane %v6993_v59, 4  ;;  %v7283_v59 = vld [vmem:[%s15502_s10 + $0x40] sm:$0xff] }
0x1067   :  { %v7008_v57 = vadd.f32 %v7000_v54, %v6847_v34  ;;  %v7010_v38 = vadd.f32 %v7002_v17, %v6849_v30  ;;  %v9845_v54 = vpack.c.bf16 %v7282_v42, %v7281_v13  ;;  %v7284_v34 = vld [vmem:[%s15502_s10 + $0x48] sm:$0xff]  ;;  %v7457_v13 = vld [vmem:[%s15504_s12 + $0x58] sm:$0xff] }
0x1068   :  { %v7009_v7 = vadd.f32 %v7001_v6, %v6848_v50  ;;  %v7011_v48 = vadd.f32 %v7003_v43, %v6850_v32  ;;  %v7285_v50 = vld [vmem:[%s15502_s10 + $0x50] sm:$0xff]  ;;  %v7288_v17 = vld [vmem:[%s15502_s10 + $0x68] sm:$0xff] }
0x1069   :  { %v7620_v47 = vmul.f32 -1.442695, %v7008_v57  ;;  %v7622_v55 = vmul.f32 -1.442695, %v7010_v38  ;;  %v9848_v57 = vpack.c.bf16 %v7284_v34, %v7283_v59  ;;  %v7289_v43 = vld [vmem:[%s15502_s10 + $0x70] sm:$0xff]  ;;  %v7290_v38 = vld [vmem:[%s15502_s10 + $0x78] sm:$0xff] }
0x106a   :  { %v7621_v61 = vmul.f32 -1.442695, %v7009_v7  ;;  %v7286_v7 = vld [vmem:[%s15502_s10 + $0x58] sm:$0xff] }
0x106b   :  { %10279 = vpow2.f32 %v7620_v47  ;;  %v9851_v47 = vpack.c.bf16 %v7286_v7, %v7285_v50  ;;  %v7040_v7 = vld [vmem:[#allocation3 + $0x48] sm:$0xc0] }
0x106c   :  { %10281 = vpow2.f32 %v7621_v61  ;;  %v7287_v61 = vld [vmem:[%s15502_s10 + $0x60] sm:$0xff] }
0x106d   :  { %10283 = vtanh.f32 %v7011_v48  ;;  %v9854_v30 = vpack.c.bf16 %v7288_v17, %v7287_v61 }
0x106e   :  { %10285 = vpow2.f32 %v7622_v55  ;;  %v9857_v55 = vpack.c.bf16 %v7290_v38, %v7289_v43  ;;  %v7041_v43 = vld [vmem:[#allocation3 + $0x50] sm:$0xc0] }
0x1075   :  { %v10280_v28 = vpop.eup %10279 }
0x1076   :  { %v7021_v18 = vadd.f32 1.0, %v10280_v28  ;;  %v10282_v21 = vpop.eup %10281 }
0x1077   :  { %v7022_v9 = vadd.f32 1.0, %v10282_v21  ;;  %v10284_v53 = vpop.eup %10283  ;;  %v7259_v21 = vld [vmem:[%s15501_s9] sm:$0xff] }
0x1078   :  { %10287 = vrcp.f32 %v7021_v18  ;;  %v10286_v58 = vpop.eup %10285 }
0x1079   :  { %10289 = vrcp.f32 %v7022_v9  ;;  %v7023_v51 = vadd.f32 1.0, %v10286_v58  ;;  %v9860_v9 = vpack.c.bf16 %v7260_v49, %v7259_v21 }
0x107a   :  { %10291 = vpow2.f32 %v7626_v12 }
0x107b   :  { %10293 = vpow2.f32 %v7627_v37  ;;  %v7263_v37 = vld [vmem:[%s15501_s9 + $0x20] sm:$0xff] }
0x107c   :  { %10295 = vrcp.f32 %v7023_v51  ;;  %v7268_v51 = vld [vmem:[%s15501_s9 + $0x48] sm:$0xff] }
0x1082   :  { %v10288_v19 = vpop.eup %10287 }
0x1083   :  { %v7035_v14 = vmul.f32 %v10288_v19, %v10284_v53  ;;  %v10290_v39 = vpop.eup %10289  ;;  %v7264_v53 = vld [vmem:[%s15501_s9 + $0x28] sm:$0xff]  ;;  %v7265_v19 = vld [vmem:[%s15501_s9 + $0x30] sm:$0xff] }
0x1084   :  { %v7034_v62 = vmul.f32 %v10290_v39, %v7032_v46  ;;  %v10292_v45 = vpop.eup %10291  ;;  %v9866_v58 = vpack.c.bf16 %v7264_v53, %v7263_v37  ;;  %v7266_v46 = vld [vmem:[%s15501_s9 + $0x38] sm:$0xff]  ;;  %v7267_v39 = vld [vmem:[%s15501_s9 + $0x40] sm:$0xff] }
0x1085   :  { %v10294_v23 = vpop.eup %10293  ;;  %v7244_v29 = vadd.f32 1.0, %v10292_v45  ;;  %v7269_v45 = vld [vmem:[%s15501_s9 + $0x50] sm:$0xff] }
0x1086   :  { %v15298_v22 = vadd.f32 %v7035_v14, %v7034_v62  ;;  %v7245_v44 = vadd.f32 1.0, %v10294_v23  ;;  %v10296_v33 = vpop.eup %10295  ;;  %v9869_v14 = vpack.c.bf16 %v7266_v46, %v7265_v19  ;;  %v9872_v62 = vpack.c.bf16 %v7268_v51, %v7267_v39  ;;  %v7270_v23 = vld [vmem:[%s15501_s9 + $0x58] sm:$0xff] }
0x1088   :  { %10297 = vtanh.f32 %v15298_v22  ;;  %v7224_v37 = vrot.slane %v15298_v22, 6  ;;  %v7459_v22 = vld [vmem:[%s15504_s12 + $0x68] sm:$0xff] }
0x1089   :  { %10299 = vrcp.f32 %v7244_v29  ;;  %v9875_v29 = vpack.c.bf16 %v7270_v23, %v7269_v45 }
0x108a   :  { %10301 = vrcp.f32 %v7245_v44  ;;  %v7271_v44 = vld [vmem:[%s15501_s9 + $0x60] sm:$0xff] }
0x108b   :  { %10303 = vtanh.f32 %v7234_v31  ;;  %v9878_v31 = vpack.c.bf16 %v7272_v16, %v7271_v44  ;;  %v7458_v44 = vld [vmem:[%s15504_s12 + $0x60] sm:$0xff] }
0x108c   :  { %10305 = vpow2.f32 %v7628_v60  ;;  %v7446_v60 = vld [vmem:[%s15504_s12] sm:$0xff]  ;;  %v9902_v16 = vpack.c.bf16 %v7459_v22, %v7458_v44 }
0x1092   :  { %v10298_v15 = vpop.eup %10297 }
0x1093   :  { %v7038_v4 = vmul.f32 %v10298_v15, %v10296_v33  ;;  %v10300_v41 = vpop.eup %10299  ;;  %v7273_v33 = vld [vmem:[%s15501_s9 + $0x70] sm:$0xff]  ;;  %v7447_v15 = vld [vmem:[%s15504_s12 + $0x8] sm:$0xff] }
0x1094   :  { %v10302_v56 = vpop.eup %10301  ;;  %v9881_v2 = vpack.c.bf16 %v7274_v0, %v7273_v33  ;;  %v7461_v33 = vld [vmem:[%s15504_s12 + $0x78] sm:$0xff] }
0x1095   :  { %v7044_v20 = vrot.slane %v7038_v4, 4  ;;  %v10304_v36 = vpop.eup %10303  ;;  %v7254_v11 = vmul.f32 0.0, %v10302_v56  ;;  %v7448_v4 = vld [vmem:[%s15504_s12 + $0x10] sm:$0xff] }
0x1096   :  { %v7255_v27 = vmul.f32 %v10304_v36, %v10300_v41  ;;  %v10306_v8 = vpop.eup %10305  ;;  %v7451_v41 = vld [vmem:[%s15504_s12 + $0x28] sm:$0xff]  ;;  %v7452_v56 = vld [vmem:[%s15504_s12 + $0x30] sm:$0xff]  ;;  %v7454_v36 = vld [vmem:[%s15504_s12 + $0x40] sm:$0xff] }
0x1097   :  { %7111 = vmatmul.mubr.f32.vlgmr.msra.gmra.mrb[62].mxu0 %v7044_v20  ;;  %7182 = vmatmul.mubr.f32.vlgmr.msra.gmra.mrb[62].mxu1 %v7044_v20  ;;  %v7246_v6 = vadd.f32 1.0, %v10306_v8  ;;  %v7449_v20 = vld [vmem:[%s15504_s12 + $0x18] sm:$0xff]  ;;  %v9893_v63 = vpack.c.bf16 %v7453_v24, %v7452_v56 }
0x1098   :  { %9837 = vmatpush3.bf16.msra.mxu0 %v9836_v35  ;;  %7714 = vmatprep.mubr.msk.f32.mxu0 %vm10353_vm0, %v15566_v3  ;;  %v7256_v40 = vadd.f32 %v7255_v27, %v7254_v11  ;;  %v9884_v35 = vpack.c.bf16 %v7447_v15, %v7446_v60  ;;  %v9887_v52 = vpack.c.bf16 %v7449_v20, %v7448_v4  ;;  %v7456_v27 = vld [vmem:[%s15504_s12 + $0x50] sm:$0xff]  ;;  %v7629_v60 = vld [vmem:[%s15503_s11] ss:$0 sm:$0xff] }
0x1099   :  { %9838 = vmatprep.subr.bf16.mxu0 %v10352_v5  ;;  %7749 = vmatprep.mubr.msk.f32.mxu1 %vm10353_vm0, %v15566_v3  ;;  %v9899_v42 = vpack.c.bf16 %v7457_v13, %v7456_v27 }
0x109a   :  { %10307 = vtanh.f32 %v7256_v40  ;;  %9861 = vmatpush3.bf16.msra.mxu1 %v9860_v9 }
0x109b   :  { %10309 = vrcp.f32 %v7246_v6  ;;  %9862 = vmatprep.subr.bf16.mxu1 %v10352_v5  ;;  %v7039_v6 = vld [vmem:[#allocation3 + $0x40] sm:$0xc0] }
0x109c   :  { %9840 = vmatpush3.bf16.msra.mxu0 %v9839_v26  ;;  %v9890_v26 = vpack.c.bf16 %v7451_v41, %v7450_v1 }
0x109d   :  { %9841 = vmatprep.subr.bf16.mxu0 %v10352_v5 }
0x10a0   :  { %9843 = vmatpush3.bf16.msra.mxu0 %v9842_v25  ;;  %v7455_v25 = vld [vmem:[%s15504_s12 + $0x48] sm:$0xff] }
0x10a1   :  { %9844 = vmatprep.subr.bf16.mxu0 %v10352_v5  ;;  %v9896_v11 = vpack.c.bf16 %v7455_v25, %v7454_v36 }
0x10a4   :  { %9846 = vmatpush3.bf16.msra.mxu0 %v9845_v54  ;;  %v10308_v32 = vpop.eup %10307 }
0x10a5   :  { %9847 = vmatprep.subr.bf16.mxu0 %v10352_v5  ;;  %v10310_v48 = vpop.eup %10309 }
0x10a6   :  { %v7258_v28 = vmul.f32 %v10310_v48, %v10308_v32  ;;  %v7042_v48 = vld [vmem:[#allocation3 + $0x58] sm:$0xc0] }
0x10a8   :  { %9849 = vmatpush3.bf16.msra.mxu0 %v9848_v57  ;;  %v7292_v18 = vrot.slane %v7258_v28, 6 }
0x10a9   :  { %9850 = vmatprep.subr.bf16.mxu0 %v10352_v5 }
0x10ac   :  { %9852 = vmatpush3.bf16.msra.mxu0 %v9851_v47 }
0x10ad   :  { %9853 = vmatprep.subr.bf16.mxu0 %v10352_v5 }
0x10b0   :  { %9855 = vmatpush3.bf16.msra.mxu0 %v9854_v30 }
0x10b1   :  { %9856 = vmatprep.subr.bf16.mxu0 %v10352_v5 }
0x10b4   :  { %9858 = vmatpush3.bf16.msra.mxu0 %v9857_v55 }
0x10b5   :  { %9883 = vmatprep.subr.bf16.mxu0 %v10352_v5 }
0x10b7   :  { %7715 = vmatmul.mubr.f32.vlgmr.msra.gmra.mrb[64].mxu0 %v7292_v18 }
0x10b8   :  { %7784 = vmatprep.mubr.msk.f32.mxu0 %vm10353_vm0, %v15566_v3  ;;  %v7262_v3 = vld [vmem:[%s15501_s9 + $0x18] sm:$0xff]  ;;  %9885 = vmatpush3.bf16.msra.mxu0 %v9884_v35 }
0x10b9   :  { %v9863_v12 = vpack.c.bf16 %v7262_v3, %v7261_v10  ;;  %9886 = vmatprep.subr.bf16.mxu0 %v10352_v5 }
0x10bb   :  { %9864 = vmatpush3.bf16.msra.mxu1 %v9863_v12 }
0x10bc   :  { %9865 = vmatprep.subr.bf16.mxu1 %v10352_v5  ;;  %9888 = vmatpush3.bf16.msra.mxu0 %v9887_v52 }
0x10bd   :  { %9889 = vmatprep.subr.bf16.mxu0 %v10352_v5 }
0x10bf   :  { %9867 = vmatpush3.bf16.msra.mxu1 %v9866_v58 }
0x10c0   :  { %9868 = vmatprep.subr.bf16.mxu1 %v10352_v5  ;;  %9891 = vmatpush3.bf16.msra.mxu0 %v9890_v26 }
0x10c1   :  { %9892 = vmatprep.subr.bf16.mxu0 %v10352_v5 }
0x10c3   :  { %9870 = vmatpush3.bf16.msra.mxu1 %v9869_v14 }
0x10c4   :  { %9871 = vmatprep.subr.bf16.mxu1 %v10352_v5  ;;  %9894 = vmatpush3.bf16.msra.mxu0 %v9893_v63 }
0x10c5   :  { %9895 = vmatprep.subr.bf16.mxu0 %v10352_v5 }
0x10c7   :  { %9873 = vmatpush3.bf16.msra.mxu1 %v9872_v62 }
0x10c8   :  { %9874 = vmatprep.subr.bf16.mxu1 %v10352_v5  ;;  %9897 = vmatpush3.bf16.msra.mxu0 %v9896_v11 }
0x10c9   :  { %9898 = vmatprep.subr.bf16.mxu0 %v10352_v5 }
0x10cb   :  { %9876 = vmatpush3.bf16.msra.mxu1 %v9875_v29 }
0x10cc   :  { %9877 = vmatprep.subr.bf16.mxu1 %v10352_v5  ;;  %9900 = vmatpush3.bf16.msra.mxu0 %v9899_v42 }
0x10cd   :  { %9901 = vmatprep.subr.bf16.mxu0 %v10352_v5 }
0x10cf   :  { %9879 = vmatpush3.bf16.msra.mxu1 %v9878_v31  ;;  %v7460_v31 = vld [vmem:[%s15504_s12 + $0x70] sm:$0xff]  ;;  %s10327_s12 = scalar_lea.vmem %s7547_s21, 32 }
0x10d0   :  { %9880 = vmatprep.subr.bf16.mxu1 %v10352_v5  ;;  %9903 = vmatpush3.bf16.msra.mxu0 %v9902_v16  ;;  %v9905_v0 = vpack.c.bf16 %v7461_v33, %v7460_v31  ;;  %p10328_p0 = scmp.ne.s32.totalorder %s7547_s21, %s10327_s12  ;;  %p10333_p2 = scmp.lt.s32.totalorder %s10327_s12, %s10327_s12 }
0x10d1   :  { %9904 = vmatprep.subr.bf16.mxu0 %v10352_v5  ;;  %v7630_v5 = vld [vmem:[%s15505_s13] ss:$0 sm:$0xff] }
0x10d2   :  { %p10334_p3 = por %p10333_p2, %p10332_p1 }
0x10d3   :  { %9882 = vmatpush3.bf16.msra.mxu1 %v9881_v2 }
0x10d4   :  { %9906 = vmatpush3.bf16.msra.mxu0 %v9905_v0  ;;  %p10335_p4 = pnand %p10334_p3, %p10328_p0 }
0x116a   :  { %v7112_v8 = vpop.f32.mrb[62].mxu0  ;;  %v7183_v54 = vpop.f32.mrb[62].mxu1 }
0x116b   :  { %v7192_v40 = vrot.slane %v7112_v8, 2  ;;  %v7114_v59 = vpop.f32.mrb[63].mxu0  ;;  %v7185_v34 = vpop.f32.mrb[63].mxu1  ;;  %v7194_v30 = vrot.slane %v7183_v54, 2 }
0x116c   :  { %v7193_v57 = vrot.slane %v7114_v59, 2  ;;  %v7195_v38 = vrot.slane %v7185_v34, 2 }
0x116d   :  { %v7200_v50 = vadd.f32 %v7192_v40, %v7039_v6  ;;  %v7202_v32 = vadd.f32 %v7194_v30, %v7041_v43 }
0x116e   :  { %v7201_v47 = vadd.f32 %v7193_v57, %v7040_v7  ;;  %v7203_v55 = vadd.f32 %v7195_v38, %v7042_v48 }
0x116f   :  { %v7623_v61 = vmul.f32 -1.442695, %v7200_v50  ;;  %v7625_v28 = vmul.f32 -1.442695, %v7202_v32 }
0x1170   :  { %v7624_v17 = vmul.f32 -1.442695, %v7201_v47 }
0x1171   :  { %10311 = vpow2.f32 %v7623_v61 }
0x1172   :  { %10313 = vpow2.f32 %v7624_v17 }
0x1173   :  { %10315 = vtanh.f32 %v7203_v55 }
0x1174   :  { %10317 = vpow2.f32 %v7625_v28 }
0x117b   :  { %v10312_v18 = vpop.eup %10311 }
0x117c   :  { %v7213_v21 = vadd.f32 1.0, %v10312_v18  ;;  %v10314_v49 = vpop.eup %10313 }
0x117d   :  { %v7214_v9 = vadd.f32 1.0, %v10314_v49  ;;  %v10316_v10 = vpop.eup %10315 }
0x117e   :  { %10319 = vrcp.f32 %v7213_v21  ;;  %v10318_v3 = vpop.eup %10317 }
0x117f   :  { %10321 = vrcp.f32 %v7214_v9  ;;  %v7215_v19 = vadd.f32 1.0, %v10318_v3 }
0x1181   :  { %10323 = vrcp.f32 %v7215_v19 }
0x1188   :  { %v10320_v12 = vpop.eup %10319 }
0x1189   :  { %v7227_v53 = vmul.f32 %v10320_v12, %v10316_v10  ;;  %v10322_v58 = vpop.eup %10321 }
0x118a   :  { %v7360_v46 = vpop.f32.mrb[64].mxu0  ;;  %v7226_v14 = vmul.f32 %v10322_v58, %v7224_v37 }
0x118b   :  { %v7716_v39 = vpop.f32.mrb[65].mxu0  ;;  %v10324_v62 = vpop.eup %10323 }
0x118c   :  { %v7228_v51 = vadd.f32 %v7227_v53, %v7226_v14 }
0x118e   :  { %10325 = vtanh.f32 %v7228_v51 }
0x1198   :  { %v10326_v45 = vpop.eup %10325 }
0x1199   :  { %v7230_v23 = vmul.f32 %v10326_v45, %v10324_v62 }
0x119b   :  { %v7365_v29 = vrot.slane %v7230_v23, 6 }
0x119d   :  { %7750 = vmatmul.mubr.f32.vlgmr.msra.gmra.mrb[64].mxu1 %v7365_v29 }
0x1270   :  { %v7433_v2 = vpop.f32.mrb[64].mxu1 }
0x1271   :  { %v7434_v15 = vadd.f32 %v7433_v2, %v7360_v46  ;;  %v7751_v4 = vpop.f32.mrb[65].mxu1 }
0x1273   :  { %v7444_v35 = vadd.f32 %v7629_v60, %v7434_v15 }
0x1275   :  { %v7445_v20 = vmax.f32 %v7444_v35, 0.0 }
0x1277   :  { %7785 = vmatmul.mubr.f32.vlgmr.msra.gmra.mrb[66].mxu0 %v7445_v20 }
0x134a   :  { %v7535_v52 = vpop.f32.mrb[66].mxu0 }
0x134b   :  { %v7536_v1 = vadd.f32 %v7630_v5, %v7535_v52  ;;  %v7786_v41 = vpop.f32.mrb[67].mxu0 }
0x134d   :  { %7539 = vst [vmem:[#allocation6] sm:$0x3] %v7536_v1 }
0x134e   :  { %10338 = shalt.err (!%p10335_p4)
}
0x134f   :  { %s10339_s8 = scalar_lea.hbm %s15506_s14, 32 }
0x1350   :  { %p10340_p5 = scmp.ne.s32.totalorder %s15506_s14, %s10339_s8  ;;  %p10343_p6 = scmp.lt.u32.totalorder %s10339_s8, %s15506_s14 }
0x1352   :  { %p10345_p7 = pnand %p10343_p6, %p10340_p5 }
0x1354   :  { %10348 = shalt.err (!%p10345_p7)
}
0x1355   :  { %7549 = dma.vmem_to_hbm [thread:$0]  %s7547_s21, 32, %s15506_s14, [#allocation7]  }
0x1356   :  { %10349 = dma.done.wait [#allocation7], 32  }
0x1357   :  { %10350 = vsyncadd [#allocation7], 4294967264 }
0x1358   :  { %7553 = vsyncpa [#allocation7], 1 }

</bundles_post_ra>
